<compile_context>
chip_gen: v7x
topology: tpu7x:2x2x1
jax: 0.10.0
libtpu: 0.0.40
codegen_flags: <defaults>
</compile_context>

<pallas_src>
import functools
import math

import jax
import jax.numpy as jnp
from jax.experimental import pallas as pl
from jax.experimental.pallas import tpu as pltpu

_WAV_C = 2.0 / (math.sqrt(3.0) * math.pi ** 0.25)   # mexican-hat constant
_EPS_BN = 1e-5
_EPS_LN = 1e-5
_EPS_L2 = 1e-12


def _pick_tile_rows(m, bytes_per_row, budget_bytes=128 * 1024, min_steps=4):
    """Largest row tile that (a) divides m, (b) is a multiple of 8 (or == m),
    (c) keeps the live block under budget, preferring >= min_steps grid steps
    so the BlockSpec pipeline can overlap DMA with compute."""
    cands = [t for t in range(1, m + 1) if m % t == 0 and (t % 8 == 0 or t == m)]
    fit = [t for t in cands if t * bytes_per_row <= budget_bytes] or [min(cands)]
    pref = [t for t in fit if m // t >= min_steps] or fit
    return max(pref)


# ----------------------------------------------------------------------------
# Pallas kernels
# ----------------------------------------------------------------------------
def _kan_kernel(*refs, pre, n_parts):
    # refs: x_0..x_{n-1}, [ln_g, ln_b], (bmat, toff, rmat, wt) per part,
    #       out (tM, Cout), tile_sum (1, Cout), tile_m2 (1, Cout)
    x_refs = refs[:n_parts]
    idx = n_parts
    if pre == "ln":
        ln_g_ref, ln_b_ref = refs[idx], refs[idx + 1]
        idx += 2
    part_refs = []
    for _ in range(n_parts):
        part_refs.append(refs[idx:idx + 4])
        idx += 4
    out_ref, sum_ref, m2_ref = refs[idx], refs[idx + 1], refs[idx + 2]

    tm, cout = out_ref.shape
    acc = jnp.zeros((tm, cout), jnp.float32)
    for x_ref, (bmat_ref, toff_ref, rmat_ref, wt_ref) in zip(x_refs, part_refs):
        x = x_ref[...]
        if pre == "ln":
            mu = jnp.mean(x, axis=-1, keepdims=True)
            var = jnp.mean((x - mu) ** 2, axis=-1, keepdims=True)
            x = (x - mu) * jax.lax.rsqrt(var + _EPS_LN) * ln_g_ref[...] + ln_b_ref[...]
        # Lane-dense flattened wavelet:
        #   xs[m, i*Cout+o] = (x[m,i] - trans[o,i]) / scale[o,i]
        # via one matmul against the precomputed broadcast/inv-scale matrix
        # (no in-kernel division, Cin*Cout on the 128-lane axis).
        xs = jnp.dot(x, bmat_ref[...],
                     preferred_element_type=jnp.float32) - toff_ref[...]
        x2 = xs * xs
        wav = (_WAV_C * (x2 - 1.0)) * jnp.exp(-0.5 * x2)
        # weighted reduction over Cin folded into an MXU matmul (bf16 in, f32 acc)
        acc = acc + jnp.dot(wav.astype(jnp.bfloat16), rmat_ref[...],
                            preferred_element_type=jnp.float32)
        # plain linear path
        acc = acc + jnp.dot(x.astype(jnp.bfloat16), wt_ref[...],
                            preferred_element_type=jnp.float32)

    out_ref[...] = acc
    # per-tile partial BatchNorm stats (sum + centered M2) -> combined in JAX.
    s = jnp.sum(acc, axis=0, keepdims=True)
    sum_ref[...] = s
    m2_ref[...] = jnp.sum((acc - s * (1.0 / tm)) ** 2, axis=0, keepdims=True)


def _affine_residual_kernel(res_ref, comb_ref, mul_ref, add_ref, o_ref):
    # out = residual + BN_affine(combined); fed a lane-dense (rows, 128) layout.
    o_ref[...] = res_ref[...] + comb_ref[...] * mul_ref[...] + add_ref[...]


def _conv3x3_kernel(x_ref, mul_ref, add_ref, w_ref, b_ref, o_ref, xp_ref, col_ref,
                    *, H, W, negative_slope):
    # x: (H, W, Cin) one image; mul/add: (1, Cin) fused input affine;
    # w: (9*Cin, Cout) bf16; b: (1, Cout);
    # xp: VMEM scratch (H+2, W+2, Cin); col: VMEM im2col scratch (H*W, 9*Cin)
    cin = x_ref.shape[-1]
    cout = o_ref.shape[-1]

    # Scratch persists across the sequential grid; zero the padded border once.
    @pl.when(pl.program_id(0) == 0)
    def _():
        xp_ref[...] = jnp.zeros_like(xp_ref)

    xp_ref[1:H + 1, 1:W + 1, :] = x_ref[...] * mul_ref[...] + add_ref[...]

    # Build im2col once, then a single matmul with K = 9*Cin.
    for t in range(9):
        dy, dx = t // 3, t % 3
        col_ref[:, t * cin:(t + 1) * cin] = (
            xp_ref[dy:dy + H, dx:dx + W, :].reshape(H * W, cin))

    out = jnp.dot(col_ref[...].astype(jnp.bfloat16), w_ref[...],
                  preferred_element_type=jnp.float32) + b_ref[...]
    if negative_slope is not None:
        out = jnp.where(out >= 0.0, out, negative_slope * out)
    o_ref[...] = out.reshape(H, W, cout)


def _dwconv3x3_kernel(x_ref, mul_ref, add_ref, w_ref, b_ref, o_ref, xp_ref, *, H, W):
    # depthwise 3x3, one image per grid step; fused input BN affine
    @pl.when(pl.program_id(0) == 0)
    def _():
        xp_ref[...] = jnp.zeros_like(xp_ref)

    xp_ref[1:H + 1, 1:W + 1, :] = x_ref[...] * mul_ref[...] + add_ref[...]
    acc = jnp.zeros(o_ref.shape, jnp.float32)
    for dy in range(3):
        for dx in range(3):
            acc = acc + xp_ref[dy:dy + H, dx:dx + W, :] * w_ref[dy, dx]
    o_ref[...] = acc + b_ref[...]


def _attn_kernel(qk_ref, v_ref, s_ref, m_ref, o_ref, *, dim):
    # One batch image, ALL heads at once.
    # qk: (2*dim, HW) [q rows then k rows]; v: (HW, dim);
    # s: (dim, 1) per-query-channel scale (folded into qn);
    # m: (dim, dim) block-diag head mask.
    q = qk_ref[:dim, :]
    k = qk_ref[dim:, :]
    qn = q * (s_ref[...] * jax.lax.rsqrt(
        jnp.maximum(jnp.sum(q * q, axis=-1, keepdims=True), _EPS_L2 * _EPS_L2)))
    kn = k * jax.lax.rsqrt(
        jnp.maximum(jnp.sum(k * k, axis=-1, keepdims=True), _EPS_L2 * _EPS_L2))
    attn = jax.lax.dot_general(qn, kn, (((1,), (1,)), ((), ())),
                               preferred_element_type=jnp.float32)   # (dim, dim)
    attn = attn + m_ref[...]
    attn = attn - jnp.max(attn, axis=-1, keepdims=True)
    e = jnp.exp(attn)
    p = e * pl.reciprocal(jnp.sum(e, axis=-1, keepdims=True), approx=True)
    # out[s, i] = sum_j v[s, j] * p[i, j]   -> (HW, dim)
    o_ref[...] = jax.lax.dot_general(v_ref[...], p, (((1,), (1,)), ((), ())),
                                     preferred_element_type=jnp.float32)


# ----------------------------------------------------------------------------
# Wrappers
# ----------------------------------------------------------------------------
def kan_linear(x_parts, p, pre=None, ln_gb=None):
    """Fused [LN] + mexican-hat wavelet + linear; returns (combined, bn_mul, bn_add).

    x_parts: list of (M, Cin_i) arrays (lane-concatenated logically).  The
    BatchNorm1d (training mode) affine is derived from per-tile partial stats
    and applied by the consumer kernel."""
    assert pre is None or len(x_parts) == 1
    assert len(x_parts) == len(p["parts"])
    M = x_parts[0].shape[0]
    cout = p["bn_g"].shape[1]
    cc_total = sum(xp.shape[1] for xp in x_parts) * cout
    tm = _pick_tile_rows(M, bytes_per_row=4 * cc_total)   # keep live wav block small
    nt = M // tm

    args, in_specs = [], []
    for xp in x_parts:
        ci = xp.shape[1]
        args.append(xp)
        in_specs.append(pl.BlockSpec((tm, ci), lambda i: (i, 0)))
    if pre == "ln":
        g, b = ln_gb
        ci0 = x_parts[0].shape[1]
        args += [g, b]
        in_specs += [pl.BlockSpec((1, ci0), lambda i: (0, 0)),
                     pl.BlockSpec((1, ci0), lambda i: (0, 0))]
    for pp in p["parts"]:
        for name in ("bmat", "toff", "rmat", "wt"):
            arr = pp[name]
            args.append(arr)
            in_specs.append(pl.BlockSpec(arr.shape, lambda i: (0, 0)))

    comb, tsum, tm2 = pl.pallas_call(
        functools.partial(_kan_kernel, pre=pre, n_parts=len(x_parts)),
        grid=(nt,),
        in_specs=in_specs,
        out_specs=(pl.BlockSpec((tm, cout), lambda i: (i, 0)),
                   pl.BlockSpec((None, 1, cout), lambda i: (i, 0, 0)),
                   pl.BlockSpec((None, 1, cout), lambda i: (i, 0, 0))),
        out_shape=(jax.ShapeDtypeStruct((M, cout), jnp.float32),
                   jax.ShapeDtypeStruct((nt, 1, cout), jnp.float32),
                   jax.ShapeDtypeStruct((nt, 1, cout), jnp.float32)),
        compiler_params=pltpu.CompilerParams(dimension_semantics=("parallel",)),
    )(*args)

    # Chan et al. parallel combine of per-tile (sum, centered M2) -> biased var.
    tsum = tsum.reshape(nt, cout)
    tm2 = tm2.reshape(nt, cout)
    mean = jnp.sum(tsum, axis=0, keepdims=True) / M
    tmean = tsum / tm
    m2 = (jnp.sum(tm2, axis=0, keepdims=True)
          + tm * jnp.sum((tmean - mean) ** 2, axis=0, keepdims=True))
    var = m2 / M
    mul = p["bn_g"] * jax.lax.rsqrt(var + _EPS_BN)
    add = p["bn_b"] - mean * mul
    # TODO(synk): BatchNorm1d running_mean/running_var buffer updates (training
    # side effect) are not reproduced; forward output matches training mode.
    return comb, mul, add


def _bn_residual_call(res, comb, mul, add):
    R, L = comb.shape
    tr = _pick_tile_rows(R, bytes_per_row=12 * L, budget_bytes=1 << 20)
    return pl.pallas_call(
        _affine_residual_kernel,
        grid=(R // tr,),
        in_specs=[pl.BlockSpec((tr, L), lambda i: (i, 0)),
                  pl.BlockSpec((tr, L), lambda i: (i, 0)),
                  pl.BlockSpec((1, L), lambda i: (0, 0)),
                  pl.BlockSpec((1, L), lambda i: (0, 0))],
        out_specs=pl.BlockSpec((tr, L), lambda i: (i, 0)),
        out_shape=jax.ShapeDtypeStruct((R, L), jnp.float32),
        compiler_params=pltpu.CompilerParams(dimension_semantics=("parallel",)),
    )(res, comb, mul, add)


def bn_residual(res, comb, mul, add):
    """out = res + comb*mul + add.  Reshaped wrapper-side to a lane-dense
    (M*C/128, 128) layout when C divides 128 (unmasked vst)."""
    M, C = comb.shape
    if C < 128 and 128 % C == 0 and (M * C) % 128 == 0:
        rep = 128 // C
        rows = (M * C) // 128
        out = _bn_residual_call(res.reshape(rows, 128), comb.reshape(rows, 128),
                                jnp.tile(mul, (1, rep)), jnp.tile(add, (1, rep)))
        return out.reshape(M, C)
    return _bn_residual_call(res, comb, mul, add)


def conv3x3(x_nhwc, p, mul=None, add=None, negative_slope=None):
    """Dense 3x3 conv (padding=1), per-image grid, im2col + single bf16 matmul,
    optional fused input affine and LeakyReLU epilogue."""
    N, H, W, cin = x_nhwc.shape
    cout = p["w"].shape[-1]
    if mul is None:
        mul = jnp.ones((1, cin), jnp.float32)
        add = jnp.zeros((1, cin), jnp.float32)
    # TODO(synk): for production H/W, tile over H row-strips with a 1-row halo
    # instead of one image per step (v7x 64 MiB VMEM + >=4 grid steps).
    return pl.pallas_call(
        functools.partial(_conv3x3_kernel, H=H, W=W,
                          negative_slope=negative_slope),
        grid=(N,),
        in_specs=[pl.BlockSpec((None, H, W, cin), lambda n: (n, 0, 0, 0)),
                  pl.BlockSpec((1, cin), lambda n: (0, 0)),
                  pl.BlockSpec((1, cin), lambda n: (0, 0)),
                  pl.BlockSpec((9 * cin, cout), lambda n: (0, 0)),
                  pl.BlockSpec((1, cout), lambda n: (0, 0))],
        out_specs=pl.BlockSpec((None, H, W, cout), lambda n: (n, 0, 0, 0)),
        out_shape=jax.ShapeDtypeStruct((N, H, W, cout), jnp.float32),
        scratch_shapes=[pltpu.VMEM((H + 2, W + 2, cin), jnp.float32),
                        pltpu.VMEM((H * W, 9 * cin), jnp.float32)],
        # "arbitrary": scratch border zeroed once at step 0 and reused.
        compiler_params=pltpu.CompilerParams(dimension_semantics=("arbitrary",)),
    )(x_nhwc, mul, add, p["w"], p["b"])


def dwconv3x3(x_nhwc, mul, add, p):
    """Depthwise 3x3 conv (groups=C, padding=1) with fused input BN affine."""
    N, H, W, C = x_nhwc.shape
    return pl.pallas_call(
        functools.partial(_dwconv3x3_kernel, H=H, W=W),
        grid=(N,),
        in_specs=[pl.BlockSpec((None, H, W, C), lambda n: (n, 0, 0, 0)),
                  pl.BlockSpec((1, C), lambda n: (0, 0)),
                  pl.BlockSpec((1, C), lambda n: (0, 0)),
                  pl.BlockSpec((3, 3, 1, C), lambda n: (0, 0, 0, 0)),
                  pl.BlockSpec((1, C), lambda n: (0, 0))],
        out_specs=pl.BlockSpec((None, H, W, C), lambda n: (n, 0, 0, 0)),
        out_shape=jax.ShapeDtypeStruct((N, H, W, C), jnp.float32),
        scratch_shapes=[pltpu.VMEM((H + 2, W + 2, C), jnp.float32)],
        compiler_params=pltpu.CompilerParams(dimension_semantics=("arbitrary",)),
    )(x_nhwc, mul, add, p["w"], p["b"])


def channel_attention(qk_t, v_flat, scale_col, mask):
    """qk_t: (B, 2*dim, HW); v_flat: (B, HW, dim) -> (B, HW, dim)."""
    B, c2, hw = qk_t.shape
    dim = c2 // 2
    return pl.pallas_call(
        functools.partial(_attn_kernel, dim=dim),
        grid=(B,),
        in_specs=[pl.BlockSpec((None, c2, hw), lambda b: (b, 0, 0)),
                  pl.BlockSpec((None, hw, dim), lambda b: (b, 0, 0)),
                  pl.BlockSpec((dim, 1), lambda b: (0, 0)),
                  pl.BlockSpec((dim, dim), lambda b: (0, 0))],
        out_specs=pl.BlockSpec((None, hw, dim), lambda b: (b, 0, 0)),
        out_shape=jax.ShapeDtypeStruct((B, hw, dim), jnp.float32),
        compiler_params=pltpu.CompilerParams(dimension_semantics=("parallel",)),
    )(qk_t, v_flat, scale_col, mask)


# ----------------------------------------------------------------------------
# Model forward
# ----------------------------------------------------------------------------
def transformer_block(x_flat, tp, b, h, w):
    m, c = x_flat.shape

    # --- attention branch: LN1 fused into qkv KAN; its BN fused into dwconv ---
    qkv_comb, qkv_mul, qkv_add = kan_linear(
        [x_flat], tp["qkv_kan"], pre="ln", ln_gb=(tp["ln1_g"], tp["ln1_b"]))
    qkv_dw = dwconv3x3(qkv_comb.reshape(b, h, w, 3 * c), qkv_mul, qkv_add,
                       tp["qkv_dw"])                                 # (b,h,w,3c)
    qkv_flat = qkv_dw.reshape(b, h * w, 3 * c)
    # TODO(synk): qk transpose + v slice remain XLA-side glue; slicing in-kernel
    # would need a transposed-LHS matmul form Mosaic may reject.
    qk_t = jnp.transpose(qkv_flat[:, :, :2 * c], (0, 2, 1))          # (b, 2c, hw)
    v_flat = qkv_flat[:, :, 2 * c:]                                  # (b, hw, c)
    attn_out = channel_attention(qk_t, v_flat,
                                 tp["attn_scale_col"], tp["attn_mask"])

    proj_comb, proj_mul, proj_add = kan_linear(
        [attn_out.reshape(m, c)], tp["proj_kan"])
    x1 = bn_residual(x_flat, proj_comb, proj_mul, proj_add)          # x + attn(LN(x))

    # --- FFN branch: LN2 fused into ffn_kan1; its BN fused into dwconv ---
    f_comb, f_mul, f_add = kan_linear(
        [x1], tp["ffn_kan1"], pre="ln", ln_gb=(tp["ln2_g"], tp["ln2_b"]))
    hidden = f_comb.shape[1]
    f_dw = dwconv3x3(f_comb.reshape(b, h, w, hidden), f_mul, f_add, tp["ffn_dw"])
    # TODO(synk): exact-erf GELU (nn.GELU default) kept in plain-JAX glue —
    # Mosaic erf lowering inside a Pallas kernel is not guaranteed.
    f_act = jax.nn.gelu(f_dw, approximate=False).reshape(m, hidden)
    g_comb, g_mul, g_add = kan_linear([f_act], tp["ffn_kan2"])
    return bn_residual(x1, g_comb, g_mul, g_add)                     # (m, c)


def kan_conv_transformer(x_nchw, params):
    b, c, h, w = x_nchw.shape
    x = jnp.transpose(x_nchw, (0, 2, 3, 1)).astype(jnp.float32)      # NHWC
    m = b * h * w
    x_flat = x.reshape(m, c)

    conv_out = conv3x3(x, params["conv"])                            # (b,h,w,c)
    trans_out = transformer_block(x_flat, params["transformer"], b, h, w)

    # concat-free reduce: conv and transformer branches are two kernel inputs.
    r_comb, r_mul, r_add = kan_linear(
        [conv_out.reshape(m, c), trans_out], params["reduce"])
    out = conv3x3(r_comb.reshape(b, h, w, c), params["out_conv"],
                  mul=r_mul, add=r_add, negative_slope=0.2)
    return jnp.transpose(out, (0, 3, 1, 2))                          # NCHW


# ----------------------------------------------------------------------------
# Deterministic parameter construction (kernel-friendly layouts, hoisted)
# ----------------------------------------------------------------------------
def make_kan_linear_params(key, cin, cout, split=None):
    k = jax.random.split(key, 6)
    bound = 1.0 / math.sqrt(cin)
    scale = 1.0 + 0.1 * jax.random.uniform(k[0], (cout, cin), jnp.float32)
    translation = 0.1 * jax.random.normal(k[1], (cout, cin), jnp.float32)
    wavw = jax.random.uniform(k[2], (cout, cin), jnp.float32,
                              minval=-bound, maxval=bound)
    weight = jax.random.uniform(k[3], (cout, cin), jnp.float32,
                                minval=-bound, maxval=bound)
    bn_g = (1.0 + 0.05 * jax.random.normal(k[4], (cout,), jnp.float32)).reshape(1, cout)
    bn_b = (0.05 * jax.random.normal(k[5], (cout,), jnp.float32)).reshape(1, cout)
    if split is None:
        split = [cin]
    parts, off = [], 0
    eye_o = jnp.eye(cout, dtype=jnp.float32)
    for ci in split:
        sc = scale[:, off:off + ci]
        tr = translation[:, off:off + ci]
        ww = wavw[:, off:off + ci]
        wt = weight[:, off:off + ci]
        inv_s = 1.0 / sc                                   # (cout, ci)
        eye_i = jnp.eye(ci, dtype=jnp.float32)
        # bmat[i, i*cout+o] = 1/scale[o,i]    (broadcast + inv-scale as a matmul)
        bmat = (eye_i[:, :, None] * inv_s.T[None, :, :]).reshape(ci, ci * cout)
        # toff[0, i*cout+o] = trans[o,i]/scale[o,i]
        toff = (tr * inv_s).T.reshape(1, ci * cout)
        # rmat[i*cout+o, o'] = wavelet_weights[o,i] * delta(o,o')
        rmat = (ww.T[:, :, None] * eye_o[None, :, :]).reshape(ci * cout, cout)
        parts.append(dict(
            bmat=bmat,
            toff=toff,
            rmat=rmat.astype(jnp.bfloat16),
            wt=jnp.transpose(wt).astype(jnp.bfloat16),     # (ci, cout)
        ))
        off += ci
    return dict(parts=parts, bn_g=bn_g, bn_b=bn_b)


def make_conv_params(key, cin, cout):
    k1, k2 = jax.random.split(key)
    bound = 1.0 / math.sqrt(cin * 9)
    w = jax.random.uniform(k1, (3, 3, cin, cout), jnp.float32,
                           minval=-bound, maxval=bound)
    return dict(
        w=w.reshape(9 * cin, cout).astype(jnp.bfloat16),   # im2col layout, bf16 MXU
        b=jax.random.uniform(k2, (1, cout), jnp.float32,
                             minval=-bound, maxval=bound),
    )


def make_dwconv_params(key, c):
    k1, k2 = jax.random.split(key)
    bound = 1.0 / 3.0
    return dict(
        w=jax.random.uniform(k1, (3, 3, 1, c), jnp.float32,
                             minval=-bound, maxval=bound),
        b=jax.random.uniform(k2, (1, c), jnp.float32,
                             minval=-bound, maxval=bound),
    )


def make_params(key, dim, heads, ffn_expansion):
    ks = jax.random.split(key, 14)
    hidden = dim * ffn_expansion
    cph = dim // heads
    attn_scale = 1.0 + 0.05 * jax.random.normal(ks[3], (heads,), jnp.float32)
    head_id = jnp.arange(dim, dtype=jnp.int32) // cph
    return dict(
        conv=make_conv_params(ks[0], dim, dim),
        transformer=dict(
            ln1_g=(1.0 + 0.05 * jax.random.normal(ks[1], (dim,), jnp.float32)).reshape(1, dim),
            ln1_b=(0.05 * jax.random.normal(ks[2], (dim,), jnp.float32)).reshape(1, dim),
            attn_scale_col=jnp.repeat(attn_scale, cph).reshape(dim, 1),
            attn_mask=jnp.where(head_id[:, None] == head_id[None, :],
                                0.0, -1e30).astype(jnp.float32),
            qkv_kan=make_kan_linear_params(ks[4], dim, dim * 3),
            qkv_dw=make_dwconv_params(ks[5], dim * 3),
            proj_kan=make_kan_linear_params(ks[6], dim, dim),
            ln2_g=(1.0 + 0.05 * jax.random.normal(ks[7], (dim,), jnp.float32)).reshape(1, dim),
            ln2_b=(0.05 * jax.random.normal(ks[8], (dim,), jnp.float32)).reshape(1, dim),
            ffn_kan1=make_kan_linear_params(ks[9], dim, hidden),
            ffn_dw=make_dwconv_params(ks[10], hidden),
            ffn_kan2=make_kan_linear_params(ks[11], hidden, dim),
        ),
        reduce=make_kan_linear_params(ks[12], dim * 2, dim, split=[dim, dim]),
        out_conv=make_conv_params(ks[13], dim, dim),
    )


# ----------------------------------------------------------------------------
if __name__ == "__main__":
    dim, heads, ffn_expansion = 16, 8, 2
    batch, hsp, wsp = 2, 8, 8

    key = jax.random.PRNGKey(0)
    kx, kp = jax.random.split(key)
    x = jax.random.normal(kx, (batch, dim, hsp, wsp), jnp.float32)   # NCHW
    params = make_params(kp, dim, heads, ffn_expansion)

    fwd = jax.jit(kan_conv_transformer)
    out = fwd(x, params)
    jax.block_until_ready(out)

    assert out.shape == (batch, dim, hsp, wsp), out.shape
    assert bool(jnp.all(jnp.isfinite(out)))
    print("KERNEL_OK")
</pallas_src>

<mosaic_0001>
module attributes {stable_mosaic.version = 11 : i64} {
  func.func @_kan_kernel(%arg0: i32, %arg1: memref<32x16xf32, #tpu.memory_space<vmem>>, %arg2: memref<1x16xf32, #tpu.memory_space<vmem>>, %arg3: memref<1x16xf32, #tpu.memory_space<vmem>>, %arg4: memref<16x768xf32, #tpu.memory_space<vmem>>, %arg5: memref<1x768xf32, #tpu.memory_space<vmem>>, %arg6: memref<768x48xbf16, #tpu.memory_space<vmem>>, %arg7: memref<16x48xbf16, #tpu.memory_space<vmem>>, %arg8: memref<32x48xf32, #tpu.memory_space<vmem>>, %arg9: memref<1x1x48xf32, #tpu.memory_space<vmem>>, %arg10: memref<1x1x48xf32, #tpu.memory_space<vmem>>) attributes {dimension_semantics = [#tpu.dimension_semantics<parallel>], iteration_bounds = array<i64: 4>, scalar_prefetch = 0 : i64, scratch_operands = 0 : i64, tpu.core_type = #tpu.core_type<tc>, window_params = [{transform_indices = @transform_0, window_bounds = array<i64: 32, 16>}, {pipeline_mode = #tpu.pipeline_mode<synchronous>, transform_indices = @transform_1, window_bounds = array<i64: 1, 16>}, {pipeline_mode = #tpu.pipeline_mode<synchronous>, transform_indices = @transform_2, window_bounds = array<i64: 1, 16>}, {pipeline_mode = #tpu.pipeline_mode<synchronous>, transform_indices = @transform_3, window_bounds = array<i64: 16, 768>}, {pipeline_mode = #tpu.pipeline_mode<synchronous>, transform_indices = @transform_4, window_bounds = array<i64: 1, 768>}, {pipeline_mode = #tpu.pipeline_mode<synchronous>, transform_indices = @transform_5, window_bounds = array<i64: 768, 48>}, {pipeline_mode = #tpu.pipeline_mode<synchronous>, transform_indices = @transform_6, window_bounds = array<i64: 16, 48>}, {transform_indices = @transform_7, window_bounds = array<i64: 32, 48>}, {transform_indices = @transform_8, window_bounds = array<i64: 1, 1, 48>}, {transform_indices = @transform_9, window_bounds = array<i64: 1, 1, 48>}]} {
    %cst = arith.constant 0.000000e+00 : f32
    %0 = vector.broadcast %cst : f32 to vector<32x48xf32>
    %c0 = arith.constant 0 : index
    %c0_0 = arith.constant 0 : index
    %1 = vector.load %arg1[%c0, %c0_0] : memref<32x16xf32, #tpu.memory_space<vmem>>, vector<32x16xf32>
    %cst_1 = arith.constant dense<0.000000e+00> : vector<32xf32>
    %2 = vector.multi_reduction <add>, %1, %cst_1 [1] : vector<32x16xf32> to vector<32xf32>
    %3 = vector.shape_cast %2 : vector<32xf32> to vector<32x1xf32>
    %cst_2 = arith.constant 1.600000e+01 : f32
    %4 = vector.broadcast %cst_2 : f32 to vector<32x1xf32>
    %5 = arith.divf %3, %4 : vector<32x1xf32>
    %6 = vector.broadcast %5 : vector<32x1xf32> to vector<32x16xf32>
    %7 = arith.subf %1, %6 : vector<32x16xf32>
    %8 = arith.mulf %7, %7 : vector<32x16xf32>
    %cst_3 = arith.constant dense<0.000000e+00> : vector<32xf32>
    %9 = vector.multi_reduction <add>, %8, %cst_3 [1] : vector<32x16xf32> to vector<32xf32>
    %10 = vector.shape_cast %9 : vector<32xf32> to vector<32x1xf32>
    %cst_4 = arith.constant 1.600000e+01 : f32
    %11 = vector.broadcast %cst_4 : f32 to vector<32x1xf32>
    %12 = arith.divf %10, %11 : vector<32x1xf32>
    %13 = vector.broadcast %5 : vector<32x1xf32> to vector<32x16xf32>
    %14 = arith.subf %1, %13 : vector<32x16xf32>
    %cst_5 = arith.constant 9.99999974E-6 : f32
    %15 = vector.broadcast %cst_5 : f32 to vector<32x1xf32>
    %16 = arith.addf %12, %15 : vector<32x1xf32>
    %17 = math.rsqrt %16 : vector<32x1xf32>
    %18 = vector.broadcast %17 : vector<32x1xf32> to vector<32x16xf32>
    %19 = arith.mulf %14, %18 : vector<32x16xf32>
    %c0_6 = arith.constant 0 : index
    %c0_7 = arith.constant 0 : index
    %20 = vector.load %arg2[%c0_6, %c0_7] : memref<1x16xf32, #tpu.memory_space<vmem>>, vector<1x16xf32>
    %21 = vector.broadcast %20 : vector<1x16xf32> to vector<32x16xf32>
    %22 = arith.mulf %19, %21 : vector<32x16xf32>
    %c0_8 = arith.constant 0 : index
    %c0_9 = arith.constant 0 : index
    %23 = vector.load %arg3[%c0_8, %c0_9] : memref<1x16xf32, #tpu.memory_space<vmem>>, vector<1x16xf32>
    %24 = vector.broadcast %23 : vector<1x16xf32> to vector<32x16xf32>
    %25 = arith.addf %22, %24 : vector<32x16xf32>
    %c0_10 = arith.constant 0 : index
    %c0_11 = arith.constant 0 : index
    %26 = vector.load %arg4[%c0_10, %c0_11] : memref<16x768xf32, #tpu.memory_space<vmem>>, vector<16x768xf32>
    %cst_12 = arith.constant dense<0.000000e+00> : vector<32x768xf32>
    %27 = tpu.matmul %25, %26, %cst_12 {dimension_numbers = #tpu.dot_dimension_numbers<[1], [0], [0], [1], [0, 0, 1, 1], [], []>} : vector<32x16xf32>, vector<16x768xf32>, vector<32x768xf32> -> vector<32x768xf32>
    %c0_13 = arith.constant 0 : index
    %c0_14 = arith.constant 0 : index
    %28 = vector.load %arg5[%c0_13, %c0_14] : memref<1x768xf32, #tpu.memory_space<vmem>>, vector<1x768xf32>
    %29 = vector.broadcast %28 : vector<1x768xf32> to vector<32x768xf32>
    %30 = arith.subf %27, %29 : vector<32x768xf32>
    %31 = arith.mulf %30, %30 : vector<32x768xf32>
    %cst_15 = arith.constant 1.000000e+00 : f32
    %32 = vector.broadcast %cst_15 : f32 to vector<32x768xf32>
    %33 = arith.subf %31, %32 : vector<32x768xf32>
    %cst_16 = arith.constant 0.867325068 : f32
    %34 = vector.broadcast %cst_16 : f32 to vector<32x768xf32>
    %35 = arith.mulf %34, %33 : vector<32x768xf32>
    %cst_17 = arith.constant -5.000000e-01 : f32
    %36 = vector.broadcast %cst_17 : f32 to vector<32x768xf32>
    %37 = arith.mulf %36, %31 : vector<32x768xf32>
    %38 = math.exp %37 : vector<32x768xf32>
    %39 = arith.mulf %35, %38 : vector<32x768xf32>
    %40 = arith.truncf %39 : vector<32x768xf32> to vector<32x768xbf16>
    %c0_18 = arith.constant 0 : index
    %c0_19 = arith.constant 0 : index
    %41 = vector.load %arg6[%c0_18, %c0_19] : memref<768x48xbf16, #tpu.memory_space<vmem>>, vector<768x48xbf16>
    %cst_20 = arith.constant dense<0.000000e+00> : vector<32x48xf32>
    %42 = tpu.matmul %40, %41, %cst_20 {dimension_numbers = #tpu.dot_dimension_numbers<[1], [0], [0], [1], [0, 0, 1, 1], [], []>} : vector<32x768xbf16>, vector<768x48xbf16>, vector<32x48xf32> -> vector<32x48xf32>
    %43 = arith.addf %0, %42 : vector<32x48xf32>
    %44 = arith.truncf %25 : vector<32x16xf32> to vector<32x16xbf16>
    %c0_21 = arith.constant 0 : index
    %c0_22 = arith.constant 0 : index
    %45 = vector.load %arg7[%c0_21, %c0_22] : memref<16x48xbf16, #tpu.memory_space<vmem>>, vector<16x48xbf16>
    %cst_23 = arith.constant dense<0.000000e+00> : vector<32x48xf32>
    %46 = tpu.matmul %44, %45, %cst_23 {dimension_numbers = #tpu.dot_dimension_numbers<[1], [0], [0], [1], [0, 0, 1, 1], [], []>} : vector<32x16xbf16>, vector<16x48xbf16>, vector<32x48xf32> -> vector<32x48xf32>
    %47 = arith.addf %43, %46 : vector<32x48xf32>
    %c0_24 = arith.constant 0 : index
    %c0_25 = arith.constant 0 : index
    %48 = vector.load %arg8[%c0_24, %c0_25] : memref<32x48xf32, #tpu.memory_space<vmem>>, vector<32x48xf32>
    tpu.vector_store %arg8[%c0_24, %c0_25], %47 {strides = array<i32>} : memref<32x48xf32, #tpu.memory_space<vmem>>, vector<32x48xf32>,
    %cst_26 = arith.constant dense<0.000000e+00> : vector<48xf32>
    %49 = vector.multi_reduction <add>, %47, %cst_26 [0] : vector<32x48xf32> to vector<48xf32>
    %50 = vector.shape_cast %49 : vector<48xf32> to vector<1x48xf32>
    %c0_27 = arith.constant 0 : index
    %c0_28 = arith.constant 0 : index
    %c0_29 = arith.constant 0 : index
    %51 = vector.load %arg9[%c0_27, %c0_28, %c0_29] : memref<1x1x48xf32, #tpu.memory_space<vmem>>, vector<1x1x48xf32>
    %52 = vector.shape_cast %51 : vector<1x1x48xf32> to vector<1x48xf32>
    %53 = vector.shape_cast %50 : vector<1x48xf32> to vector<1x1x48xf32>
    tpu.vector_store %arg9[%c0_27, %c0_28, %c0_29], %53 {strides = array<i32>} : memref<1x1x48xf32, #tpu.memory_space<vmem>>, vector<1x1x48xf32>,
    %cst_30 = arith.constant 3.125000e-02 : f32
    %54 = vector.broadcast %cst_30 : f32 to vector<1x48xf32>
    %55 = arith.mulf %50, %54 : vector<1x48xf32>
    %56 = vector.broadcast %55 : vector<1x48xf32> to vector<32x48xf32>
    %57 = arith.subf %47, %56 : vector<32x48xf32>
    %58 = arith.mulf %57, %57 : vector<32x48xf32>
    %cst_31 = arith.constant dense<0.000000e+00> : vector<48xf32>
    %59 = vector.multi_reduction <add>, %58, %cst_31 [0] : vector<32x48xf32> to vector<48xf32>
    %60 = vector.shape_cast %59 : vector<48xf32> to vector<1x48xf32>
    %c0_32 = arith.constant 0 : index
    %c0_33 = arith.constant 0 : index
    %c0_34 = arith.constant 0 : index
    %61 = vector.load %arg10[%c0_32, %c0_33, %c0_34] : memref<1x1x48xf32, #tpu.memory_space<vmem>>, vector<1x1x48xf32>
    %62 = vector.shape_cast %61 : vector<1x1x48xf32> to vector<1x48xf32>
    %63 = vector.shape_cast %60 : vector<1x48xf32> to vector<1x1x48xf32>
    tpu.vector_store %arg10[%c0_32, %c0_33, %c0_34], %63 {strides = array<i32>} : memref<1x1x48xf32, #tpu.memory_space<vmem>>, vector<1x1x48xf32>,
    return
  }
  func.func @transform_0(%arg0: i32) -> (i32, i32) {
    %c0_i32 = arith.constant 0 : i32
    %c0_i32_0 = arith.constant 0 : i32
    return %arg0, %c0_i32 : i32, i32
  }
  func.func @transform_1(%arg0: i32) -> (i32, i32) {
    %c0_i32 = arith.constant 0 : i32
    %c0_i32_0 = arith.constant 0 : i32
    %c0_i32_1 = arith.constant 0 : i32
    return %c0_i32, %c0_i32_0 : i32, i32
  }
  func.func @transform_2(%arg0: i32) -> (i32, i32) {
    %c0_i32 = arith.constant 0 : i32
    %c0_i32_0 = arith.constant 0 : i32
    %c0_i32_1 = arith.constant 0 : i32
    return %c0_i32, %c0_i32_0 : i32, i32
  }
  func.func @transform_3(%arg0: i32) -> (i32, i32) {
    %c0_i32 = arith.constant 0 : i32
    %c0_i32_0 = arith.constant 0 : i32
    %c0_i32_1 = arith.constant 0 : i32
    return %c0_i32, %c0_i32_0 : i32, i32
  }
  func.func @transform_4(%arg0: i32) -> (i32, i32) {
    %c0_i32 = arith.constant 0 : i32
    %c0_i32_0 = arith.constant 0 : i32
    %c0_i32_1 = arith.constant 0 : i32
    return %c0_i32, %c0_i32_0 : i32, i32
  }
  func.func @transform_5(%arg0: i32) -> (i32, i32) {
    %c0_i32 = arith.constant 0 : i32
    %c0_i32_0 = arith.constant 0 : i32
    %c0_i32_1 = arith.constant 0 : i32
    return %c0_i32, %c0_i32_0 : i32, i32
  }
  func.func @transform_6(%arg0: i32) -> (i32, i32) {
    %c0_i32 = arith.constant 0 : i32
    %c0_i32_0 = arith.constant 0 : i32
    %c0_i32_1 = arith.constant 0 : i32
    return %c0_i32, %c0_i32_0 : i32, i32
  }
  func.func @transform_7(%arg0: i32) -> (i32, i32) {
    %c0_i32 = arith.constant 0 : i32
    %c0_i32_0 = arith.constant 0 : i32
    return %arg0, %c0_i32 : i32, i32
  }
  func.func @transform_8(%arg0: i32) -> (i32, i32, i32) {
    %c0_i32 = arith.constant 0 : i32
    %c0_i32_0 = arith.constant 0 : i32
    %c0_i32_1 = arith.constant 0 : i32
    return %arg0, %c0_i32, %c0_i32_0 : i32, i32, i32
  }
  func.func @transform_9(%arg0: i32) -> (i32, i32, i32) {
    %c0_i32 = arith.constant 0 : i32
    %c0_i32_0 = arith.constant 0 : i32
    %c0_i32_1 = arith.constant 0 : i32
    return %arg0, %c0_i32, %c0_i32_0 : i32, i32, i32
  }
}

module attributes {stable_mosaic.version = 11 : i64} {
  func.func @_dwconv3x3_kernel(%arg0: i32, %arg1: memref<1x8x8x48xf32, #tpu.memory_space<vmem>>, %arg2: memref<1x48xf32, #tpu.memory_space<vmem>>, %arg3: memref<1x48xf32, #tpu.memory_space<vmem>>, %arg4: memref<3x3x1x48xf32, #tpu.memory_space<vmem>>, %arg5: memref<1x48xf32, #tpu.memory_space<vmem>>, %arg6: memref<1x8x8x48xf32, #tpu.memory_space<vmem>>, %arg7: memref<10x10x48xf32, #tpu.memory_space<vmem>>) attributes {dimension_semantics = [#tpu.dimension_semantics<arbitrary>], iteration_bounds = array<i64: 2>, scalar_prefetch = 0 : i64, scratch_operands = 1 : i64, tpu.core_type = #tpu.core_type<tc>, window_params = [{transform_indices = @transform_0, window_bounds = array<i64: 1, 8, 8, 48>}, {pipeline_mode = #tpu.pipeline_mode<synchronous>, transform_indices = @transform_1, window_bounds = array<i64: 1, 48>}, {pipeline_mode = #tpu.pipeline_mode<synchronous>, transform_indices = @transform_2, window_bounds = array<i64: 1, 48>}, {pipeline_mode = #tpu.pipeline_mode<synchronous>, transform_indices = @transform_3, window_bounds = array<i64: 3, 3, 1, 48>}, {pipeline_mode = #tpu.pipeline_mode<synchronous>, transform_indices = @transform_4, window_bounds = array<i64: 1, 48>}, {transform_indices = @transform_5, window_bounds = array<i64: 1, 8, 8, 48>}]} {
    %c0_i32 = arith.constant 0 : i32
    %0 = arith.cmpi eq, %arg0, %c0_i32 : i32
    %1 = arith.extui %0 : i1 to i32
    %c0_i32_0 = arith.constant 0 : i32
    %2 = arith.cmpi ne, %1, %c0_i32_0 : i32
    scf.if %2 {
      %cst_78 = arith.constant 0.000000e+00 : f32
      %85 = vector.broadcast %cst_78 : f32 to vector<10x10x48xf32>
      %c0_79 = arith.constant 0 : index
      %c0_80 = arith.constant 0 : index
      %c0_81 = arith.constant 0 : index
      %86 = vector.load %arg7[%c0_79, %c0_80, %c0_81] : memref<10x10x48xf32, #tpu.memory_space<vmem>>, vector<10x10x48xf32>
      tpu.vector_store %arg7[%c0_79, %c0_80, %c0_81], %85 {strides = array<i32>} : memref<10x10x48xf32, #tpu.memory_space<vmem>>, vector<10x10x48xf32>,
    } else {
    }
    %c0 = arith.constant 0 : index
    %c0_1 = arith.constant 0 : index
    %c0_2 = arith.constant 0 : index
    %c0_3 = arith.constant 0 : index
    %3 = vector.load %arg1[%c0, %c0_1, %c0_2, %c0_3] : memref<1x8x8x48xf32, #tpu.memory_space<vmem>>, vector<1x8x8x48xf32>
    %4 = vector.shape_cast %3 : vector<1x8x8x48xf32> to vector<8x8x48xf32>
    %c0_4 = arith.constant 0 : index
    %c0_5 = arith.constant 0 : index
    %5 = vector.load %arg2[%c0_4, %c0_5] : memref<1x48xf32, #tpu.memory_space<vmem>>, vector<1x48xf32>
    %6 = vector.shape_cast %5 : vector<1x48xf32> to vector<1x1x48xf32>
    %7 = vector.broadcast %6 : vector<1x1x48xf32> to vector<8x8x48xf32>
    %8 = arith.mulf %4, %7 : vector<8x8x48xf32>
    %c0_6 = arith.constant 0 : index
    %c0_7 = arith.constant 0 : index
    %9 = vector.load %arg3[%c0_6, %c0_7] : memref<1x48xf32, #tpu.memory_space<vmem>>, vector<1x48xf32>
    %10 = vector.shape_cast %9 : vector<1x48xf32> to vector<1x1x48xf32>
    %11 = vector.broadcast %10 : vector<1x1x48xf32> to vector<8x8x48xf32>
    %12 = arith.addf %8, %11 : vector<8x8x48xf32>
    %c1 = arith.constant 1 : index
    %c1_8 = arith.constant 1 : index
    %c0_9 = arith.constant 0 : index
    %13 = vector.load %arg7[%c1, %c1_8, %c0_9] : memref<10x10x48xf32, #tpu.memory_space<vmem>>, vector<8x8x48xf32>
    tpu.vector_store %arg7[%c1, %c1_8, %c0_9], %12 {strides = array<i32>} : memref<10x10x48xf32, #tpu.memory_space<vmem>>, vector<8x8x48xf32>,
    %cst = arith.constant 0.000000e+00 : f32
    %14 = vector.broadcast %cst : f32 to vector<8x8x48xf32>
    %c0_10 = arith.constant 0 : index
    %c0_11 = arith.constant 0 : index
    %c0_12 = arith.constant 0 : index
    %15 = vector.load %arg7[%c0_10, %c0_11, %c0_12] : memref<10x10x48xf32, #tpu.memory_space<vmem>>, vector<8x8x48xf32>
    %c0_13 = arith.constant 0 : index
    %c0_14 = arith.constant 0 : index
    %c0_15 = arith.constant 0 : index
    %c0_16 = arith.constant 0 : index
    %16 = vector.load %arg4[%c0_13, %c0_14, %c0_15, %c0_16] : memref<3x3x1x48xf32, #tpu.memory_space<vmem>>, vector<1x1x1x48xf32>
    %17 = vector.shape_cast %16 : vector<1x1x1x48xf32> to vector<1x48xf32>
    %18 = vector.shape_cast %17 : vector<1x48xf32> to vector<1x1x48xf32>
    %19 = vector.broadcast %18 : vector<1x1x48xf32> to vector<8x8x48xf32>
    %20 = arith.mulf %15, %19 : vector<8x8x48xf32>
    %21 = arith.addf %14, %20 : vector<8x8x48xf32>
    %c0_17 = arith.constant 0 : index
    %c1_18 = arith.constant 1 : index
    %c0_19 = arith.constant 0 : index
    %22 = vector.load %arg7[%c0_17, %c1_18, %c0_19] : memref<10x10x48xf32, #tpu.memory_space<vmem>>, vector<8x8x48xf32>
    %c0_20 = arith.constant 0 : index
    %c1_21 = arith.constant 1 : index
    %c0_22 = arith.constant 0 : index
    %c0_23 = arith.constant 0 : index
    %23 = vector.load %arg4[%c0_20, %c1_21, %c0_22, %c0_23] : memref<3x3x1x48xf32, #tpu.memory_space<vmem>>, vector<1x1x1x48xf32>
    %24 = vector.shape_cast %23 : vector<1x1x1x48xf32> to vector<1x48xf32>
    %25 = vector.shape_cast %24 : vector<1x48xf32> to vector<1x1x48xf32>
    %26 = vector.broadcast %25 : vector<1x1x48xf32> to vector<8x8x48xf32>
    %27 = arith.mulf %22, %26 : vector<8x8x48xf32>
    %28 = arith.addf %21, %27 : vector<8x8x48xf32>
    %c0_24 = arith.constant 0 : index
    %c2 = arith.constant 2 : index
    %c0_25 = arith.constant 0 : index
    %29 = vector.load %arg7[%c0_24, %c2, %c0_25] : memref<10x10x48xf32, #tpu.memory_space<vmem>>, vector<8x8x48xf32>
    %c0_26 = arith.constant 0 : index
    %c2_27 = arith.constant 2 : index
    %c0_28 = arith.constant 0 : index
    %c0_29 = arith.constant 0 : index
    %30 = vector.load %arg4[%c0_26, %c2_27, %c0_28, %c0_29] : memref<3x3x1x48xf32, #tpu.memory_space<vmem>>, vector<1x1x1x48xf32>
    %31 = vector.shape_cast %30 : vector<1x1x1x48xf32> to vector<1x48xf32>
    %32 = vector.shape_cast %31 : vector<1x48xf32> to vector<1x1x48xf32>
    %33 = vector.broadcast %32 : vector<1x1x48xf32> to vector<8x8x48xf32>
    %34 = arith.mulf %29, %33 : vector<8x8x48xf32>
    %35 = arith.addf %28, %34 : vector<8x8x48xf32>
    %c1_30 = arith.constant 1 : index
    %c0_31 = arith.constant 0 : index
    %c0_32 = arith.constant 0 : index
    %36 = vector.load %arg7[%c1_30, %c0_31, %c0_32] : memref<10x10x48xf32, #tpu.memory_space<vmem>>, vector<8x8x48xf32>
    %c1_33 = arith.constant 1 : index
    %c0_34 = arith.constant 0 : index
    %c0_35 = arith.constant 0 : index
    %c0_36 = arith.constant 0 : index
    %37 = vector.load %arg4[%c1_33, %c0_34, %c0_35, %c0_36] : memref<3x3x1x48xf32, #tpu.memory_space<vmem>>, vector<1x1x1x48xf32>
    %38 = vector.shape_cast %37 : vector<1x1x1x48xf32> to vector<1x48xf32>
    %39 = vector.shape_cast %38 : vector<1x48xf32> to vector<1x1x48xf32>
    %40 = vector.broadcast %39 : vector<1x1x48xf32> to vector<8x8x48xf32>
    %41 = arith.mulf %36, %40 : vector<8x8x48xf32>
    %42 = arith.addf %35, %41 : vector<8x8x48xf32>
    %c1_37 = arith.constant 1 : index
    %c1_38 = arith.constant 1 : index
    %c0_39 = arith.constant 0 : index
    %43 = vector.load %arg7[%c1_37, %c1_38, %c0_39] : memref<10x10x48xf32, #tpu.memory_space<vmem>>, vector<8x8x48xf32>
    %c1_40 = arith.constant 1 : index
    %c1_41 = arith.constant 1 : index
    %c0_42 = arith.constant 0 : index
    %c0_43 = arith.constant 0 : index
    %44 = vector.load %arg4[%c1_40, %c1_41, %c0_42, %c0_43] : memref<3x3x1x48xf32, #tpu.memory_space<vmem>>, vector<1x1x1x48xf32>
    %45 = vector.shape_cast %44 : vector<1x1x1x48xf32> to vector<1x48xf32>
    %46 = vector.shape_cast %45 : vector<1x48xf32> to vector<1x1x48xf32>
    %47 = vector.broadcast %46 : vector<1x1x48xf32> to vector<8x8x48xf32>
    %48 = arith.mulf %43, %47 : vector<8x8x48xf32>
    %49 = arith.addf %42, %48 : vector<8x8x48xf32>
    %c1_44 = arith.constant 1 : index
    %c2_45 = arith.constant 2 : index
    %c0_46 = arith.constant 0 : index
    %50 = vector.load %arg7[%c1_44, %c2_45, %c0_46] : memref<10x10x48xf32, #tpu.memory_space<vmem>>, vector<8x8x48xf32>
    %c1_47 = arith.constant 1 : index
    %c2_48 = arith.constant 2 : index
    %c0_49 = arith.constant 0 : index
    %c0_50 = arith.constant 0 : index
    %51 = vector.load %arg4[%c1_47, %c2_48, %c0_49, %c0_50] : memref<3x3x1x48xf32, #tpu.memory_space<vmem>>, vector<1x1x1x48xf32>
    %52 = vector.shape_cast %51 : vector<1x1x1x48xf32> to vector<1x48xf32>
    %53 = vector.shape_cast %52 : vector<1x48xf32> to vector<1x1x48xf32>
    %54 = vector.broadcast %53 : vector<1x1x48xf32> to vector<8x8x48xf32>
    %55 = arith.mulf %50, %54 : vector<8x8x48xf32>
    %56 = arith.addf %49, %55 : vector<8x8x48xf32>
    %c2_51 = arith.constant 2 : index
    %c0_52 = arith.constant 0 : index
    %c0_53 = arith.constant 0 : index
    %57 = vector.load %arg7[%c2_51, %c0_52, %c0_53] : memref<10x10x48xf32, #tpu.memory_space<vmem>>, vector<8x8x48xf32>
    %c2_54 = arith.constant 2 : index
    %c0_55 = arith.constant 0 : index
    %c0_56 = arith.constant 0 : index
    %c0_57 = arith.constant 0 : index
    %58 = vector.load %arg4[%c2_54, %c0_55, %c0_56, %c0_57] : memref<3x3x1x48xf32, #tpu.memory_space<vmem>>, vector<1x1x1x48xf32>
    %59 = vector.shape_cast %58 : vector<1x1x1x48xf32> to vector<1x48xf32>
    %60 = vector.shape_cast %59 : vector<1x48xf32> to vector<1x1x48xf32>
    %61 = vector.broadcast %60 : vector<1x1x48xf32> to vector<8x8x48xf32>
    %62 = arith.mulf %57, %61 : vector<8x8x48xf32>
    %63 = arith.addf %56, %62 : vector<8x8x48xf32>
    %c2_58 = arith.constant 2 : index
    %c1_59 = arith.constant 1 : index
    %c0_60 = arith.constant 0 : index
    %64 = vector.load %arg7[%c2_58, %c1_59, %c0_60] : memref<10x10x48xf32, #tpu.memory_space<vmem>>, vector<8x8x48xf32>
    %c2_61 = arith.constant 2 : index
    %c1_62 = arith.constant 1 : index
    %c0_63 = arith.constant 0 : index
    %c0_64 = arith.constant 0 : index
    %65 = vector.load %arg4[%c2_61, %c1_62, %c0_63, %c0_64] : memref<3x3x1x48xf32, #tpu.memory_space<vmem>>, vector<1x1x1x48xf32>
    %66 = vector.shape_cast %65 : vector<1x1x1x48xf32> to vector<1x48xf32>
    %67 = vector.shape_cast %66 : vector<1x48xf32> to vector<1x1x48xf32>
    %68 = vector.broadcast %67 : vector<1x1x48xf32> to vector<8x8x48xf32>
    %69 = arith.mulf %64, %68 : vector<8x8x48xf32>
    %70 = arith.addf %63, %69 : vector<8x8x48xf32>
    %c2_65 = arith.constant 2 : index
    %c2_66 = arith.constant 2 : index
    %c0_67 = arith.constant 0 : index
    %71 = vector.load %arg7[%c2_65, %c2_66, %c0_67] : memref<10x10x48xf32, #tpu.memory_space<vmem>>, vector<8x8x48xf32>
    %c2_68 = arith.constant 2 : index
    %c2_69 = arith.constant 2 : index
    %c0_70 = arith.constant 0 : index
    %c0_71 = arith.constant 0 : index
    %72 = vector.load %arg4[%c2_68, %c2_69, %c0_70, %c0_71] : memref<3x3x1x48xf32, #tpu.memory_space<vmem>>, vector<1x1x1x48xf32>
    %73 = vector.shape_cast %72 : vector<1x1x1x48xf32> to vector<1x48xf32>
    %74 = vector.shape_cast %73 : vector<1x48xf32> to vector<1x1x48xf32>
    %75 = vector.broadcast %74 : vector<1x1x48xf32> to vector<8x8x48xf32>
    %76 = arith.mulf %71, %75 : vector<8x8x48xf32>
    %77 = arith.addf %70, %76 : vector<8x8x48xf32>
    %c0_72 = arith.constant 0 : index
    %c0_73 = arith.constant 0 : index
    %78 = vector.load %arg5[%c0_72, %c0_73] : memref<1x48xf32, #tpu.memory_space<vmem>>, vector<1x48xf32>
    %79 = vector.shape_cast %78 : vector<1x48xf32> to vector<1x1x48xf32>
    %80 = vector.broadcast %79 : vector<1x1x48xf32> to vector<8x8x48xf32>
    %81 = arith.addf %77, %80 : vector<8x8x48xf32>
    %c0_74 = arith.constant 0 : index
    %c0_75 = arith.constant 0 : index
    %c0_76 = arith.constant 0 : index
    %c0_77 = arith.constant 0 : index
    %82 = vector.load %arg6[%c0_74, %c0_75, %c0_76, %c0_77] : memref<1x8x8x48xf32, #tpu.memory_space<vmem>>, vector<1x8x8x48xf32>
    %83 = vector.shape_cast %82 : vector<1x8x8x48xf32> to vector<8x8x48xf32>
    %84 = vector.shape_cast %81 : vector<8x8x48xf32> to vector<1x8x8x48xf32>
    tpu.vector_store %arg6[%c0_74, %c0_75, %c0_76, %c0_77], %84 {strides = array<i32>} : memref<1x8x8x48xf32, #tpu.memory_space<vmem>>, vector<1x8x8x48xf32>,
    return
  }
  func.func @transform_0(%arg0: i32) -> (i32, i32, i32, i32) {
    %c0_i32 = arith.constant 0 : i32
    %c0_i32_0 = arith.constant 0 : i32
    %c0_i32_1 = arith.constant 0 : i32
    %c0_i32_2 = arith.constant 0 : i32
    return %arg0, %c0_i32, %c0_i32_0, %c0_i32_1 : i32, i32, i32, i32
  }
  func.func @transform_1(%arg0: i32) -> (i32, i32) {
    %c0_i32 = arith.constant 0 : i32
    %c0_i32_0 = arith.constant 0 : i32
    %c0_i32_1 = arith.constant 0 : i32
    return %c0_i32, %c0_i32_0 : i32, i32
  }
  func.func @transform_2(%arg0: i32) -> (i32, i32) {
    %c0_i32 = arith.constant 0 : i32
    %c0_i32_0 = arith.constant 0 : i32
    %c0_i32_1 = arith.constant 0 : i32
    return %c0_i32, %c0_i32_0 : i32, i32
  }
  func.func @transform_3(%arg0: i32) -> (i32, i32, i32, i32) {
    %c0_i32 = arith.constant 0 : i32
    %c0_i32_0 = arith.constant 0 : i32
    %c0_i32_1 = arith.constant 0 : i32
    %c0_i32_2 = arith.constant 0 : i32
    %c0_i32_3 = arith.constant 0 : i32
    return %c0_i32, %c0_i32_0, %c0_i32_1, %c0_i32_2 : i32, i32, i32, i32
  }
  func.func @transform_4(%arg0: i32) -> (i32, i32) {
    %c0_i32 = arith.constant 0 : i32
    %c0_i32_0 = arith.constant 0 : i32
    %c0_i32_1 = arith.constant 0 : i32
    return %c0_i32, %c0_i32_0 : i32, i32
  }
  func.func @transform_5(%arg0: i32) -> (i32, i32, i32, i32) {
    %c0_i32 = arith.constant 0 : i32
    %c0_i32_0 = arith.constant 0 : i32
    %c0_i32_1 = arith.constant 0 : i32
    %c0_i32_2 = arith.constant 0 : i32
    return %arg0, %c0_i32, %c0_i32_0, %c0_i32_1 : i32, i32, i32, i32
  }
}

module attributes {stable_mosaic.version = 11 : i64} {
  func.func @_attn_kernel(%arg0: i32, %arg1: memref<1x32x64xf32, #tpu.memory_space<vmem>>, %arg2: memref<1x64x16xf32, #tpu.memory_space<vmem>>, %arg3: memref<16x1xf32, #tpu.memory_space<vmem>>, %arg4: memref<16x16xf32, #tpu.memory_space<vmem>>, %arg5: memref<1x64x16xf32, #tpu.memory_space<vmem>>) attributes {dimension_semantics = [#tpu.dimension_semantics<parallel>], iteration_bounds = array<i64: 2>, scalar_prefetch = 0 : i64, scratch_operands = 0 : i64, tpu.core_type = #tpu.core_type<tc>, window_params = [{transform_indices = @transform_0, window_bounds = array<i64: 1, 32, 64>}, {transform_indices = @transform_1, window_bounds = array<i64: 1, 64, 16>}, {pipeline_mode = #tpu.pipeline_mode<synchronous>, transform_indices = @transform_2, window_bounds = array<i64: 16, 1>}, {pipeline_mode = #tpu.pipeline_mode<synchronous>, transform_indices = @transform_3, window_bounds = array<i64: 16, 16>}, {transform_indices = @transform_4, window_bounds = array<i64: 1, 64, 16>}]} {
    %c0 = arith.constant 0 : index
    %c0_0 = arith.constant 0 : index
    %c0_1 = arith.constant 0 : index
    %0 = vector.load %arg1[%c0, %c0_0, %c0_1] : memref<1x32x64xf32, #tpu.memory_space<vmem>>, vector<1x16x64xf32>
    %1 = vector.shape_cast %0 : vector<1x16x64xf32> to vector<16x64xf32>
    %c0_2 = arith.constant 0 : index
    %c16 = arith.constant 16 : index
    %c0_3 = arith.constant 0 : index
    %2 = vector.load %arg1[%c0_2, %c16, %c0_3] : memref<1x32x64xf32, #tpu.memory_space<vmem>>, vector<1x16x64xf32>
    %3 = vector.shape_cast %2 : vector<1x16x64xf32> to vector<16x64xf32>
    %c0_4 = arith.constant 0 : index
    %c0_5 = arith.constant 0 : index
    %4 = vector.load %arg3[%c0_4, %c0_5] : memref<16x1xf32, #tpu.memory_space<vmem>>, vector<16x1xf32>
    %5 = arith.mulf %1, %1 : vector<16x64xf32>
    %cst = arith.constant dense<0.000000e+00> : vector<16xf32>
    %6 = vector.multi_reduction <add>, %5, %cst [1] : vector<16x64xf32> to vector<16xf32>
    %7 = vector.shape_cast %6 : vector<16xf32> to vector<16x1xf32>
    %cst_6 = arith.constant 1.000000e-24 : f32
    %8 = vector.broadcast %cst_6 : f32 to vector<16x1xf32>
    %9 = arith.maximumf %7, %8 : vector<16x1xf32>
    %10 = math.rsqrt %9 : vector<16x1xf32>
    %11 = arith.mulf %4, %10 : vector<16x1xf32>
    %12 = vector.broadcast %11 : vector<16x1xf32> to vector<16x64xf32>
    %13 = arith.mulf %1, %12 : vector<16x64xf32>
    %14 = arith.mulf %3, %3 : vector<16x64xf32>
    %cst_7 = arith.constant dense<0.000000e+00> : vector<16xf32>
    %15 = vector.multi_reduction <add>, %14, %cst_7 [1] : vector<16x64xf32> to vector<16xf32>
    %16 = vector.shape_cast %15 : vector<16xf32> to vector<16x1xf32>
    %cst_8 = arith.constant 1.000000e-24 : f32
    %17 = vector.broadcast %cst_8 : f32 to vector<16x1xf32>
    %18 = arith.maximumf %16, %17 : vector<16x1xf32>
    %19 = math.rsqrt %18 : vector<16x1xf32>
    %20 = vector.broadcast %19 : vector<16x1xf32> to vector<16x64xf32>
    %21 = arith.mulf %3, %20 : vector<16x64xf32>
    %cst_9 = arith.constant dense<0.000000e+00> : vector<16x16xf32>
    %22 = tpu.matmul %13, %21, %cst_9 {dimension_numbers = #tpu.dot_dimension_numbers<[1], [1], [0], [0], [0, 0, 1, 0], [], []>} : vector<16x64xf32>, vector<16x64xf32>, vector<16x16xf32> -> vector<16x16xf32>
    %c0_10 = arith.constant 0 : index
    %c0_11 = arith.constant 0 : index
    %23 = vector.load %arg4[%c0_10, %c0_11] : memref<16x16xf32, #tpu.memory_space<vmem>>, vector<16x16xf32>
    %24 = arith.addf %22, %23 : vector<16x16xf32>
    %cst_12 = arith.constant dense<0xFF800000> : vector<16xf32>
    %25 = vector.multi_reduction <maximumf>, %24, %cst_12 [1] : vector<16x16xf32> to vector<16xf32>
    %26 = vector.shape_cast %25 : vector<16xf32> to vector<16x1xf32>
    %27 = vector.broadcast %26 : vector<16x1xf32> to vector<16x16xf32>
    %28 = arith.subf %24, %27 : vector<16x16xf32>
    %29 = math.exp %28 : vector<16x16xf32>
    %cst_13 = arith.constant dense<0.000000e+00> : vector<16xf32>
    %30 = vector.multi_reduction <add>, %29, %cst_13 [1] : vector<16x16xf32> to vector<16xf32>
    %31 = vector.shape_cast %30 : vector<16xf32> to vector<16x1xf32>
    %32 = tpu.reciprocal %31 {approx = true} : vector<16x1xf32> -> vector<16x1xf32>
    %33 = vector.broadcast %32 : vector<16x1xf32> to vector<16x16xf32>
    %34 = arith.mulf %29, %33 : vector<16x16xf32>
    %c0_14 = arith.constant 0 : index
    %c0_15 = arith.constant 0 : index
    %c0_16 = arith.constant 0 : index
    %35 = vector.load %arg2[%c0_14, %c0_15, %c0_16] : memref<1x64x16xf32, #tpu.memory_space<vmem>>, vector<1x64x16xf32>
    %36 = vector.shape_cast %35 : vector<1x64x16xf32> to vector<64x16xf32>
    %cst_17 = arith.constant dense<0.000000e+00> : vector<64x16xf32>
    %37 = tpu.matmul %36, %34, %cst_17 {dimension_numbers = #tpu.dot_dimension_numbers<[1], [1], [0], [0], [0, 0, 1, 0], [], []>} : vector<64x16xf32>, vector<16x16xf32>, vector<64x16xf32> -> vector<64x16xf32>
    %c0_18 = arith.constant 0 : index
    %c0_19 = arith.constant 0 : index
    %c0_20 = arith.constant 0 : index
    %38 = vector.load %arg5[%c0_18, %c0_19, %c0_20] : memref<1x64x16xf32, #tpu.memory_space<vmem>>, vector<1x64x16xf32>
    %39 = vector.shape_cast %38 : vector<1x64x16xf32> to vector<64x16xf32>
    %40 = vector.shape_cast %37 : vector<64x16xf32> to vector<1x64x16xf32>
    tpu.vector_store %arg5[%c0_18, %c0_19, %c0_20], %40 {strides = array<i32>} : memref<1x64x16xf32, #tpu.memory_space<vmem>>, vector<1x64x16xf32>,
    return
  }
  func.func @transform_0(%arg0: i32) -> (i32, i32, i32) {
    %c0_i32 = arith.constant 0 : i32
    %c0_i32_0 = arith.constant 0 : i32
    %c0_i32_1 = arith.constant 0 : i32
    return %arg0, %c0_i32, %c0_i32_0 : i32, i32, i32
  }
  func.func @transform_1(%arg0: i32) -> (i32, i32, i32) {
    %c0_i32 = arith.constant 0 : i32
    %c0_i32_0 = arith.constant 0 : i32
    %c0_i32_1 = arith.constant 0 : i32
    return %arg0, %c0_i32, %c0_i32_0 : i32, i32, i32
  }
  func.func @transform_2(%arg0: i32) -> (i32, i32) {
    %c0_i32 = arith.constant 0 : i32
    %c0_i32_0 = arith.constant 0 : i32
    %c0_i32_1 = arith.constant 0 : i32
    return %c0_i32, %c0_i32_0 : i32, i32
  }
  func.func @transform_3(%arg0: i32) -> (i32, i32) {
    %c0_i32 = arith.constant 0 : i32
    %c0_i32_0 = arith.constant 0 : i32
    %c0_i32_1 = arith.constant 0 : i32
    return %c0_i32, %c0_i32_0 : i32, i32
  }
  func.func @transform_4(%arg0: i32) -> (i32, i32, i32) {
    %c0_i32 = arith.constant 0 : i32
    %c0_i32_0 = arith.constant 0 : i32
    %c0_i32_1 = arith.constant 0 : i32
    return %arg0, %c0_i32, %c0_i32_0 : i32, i32, i32
  }
}

module attributes {stable_mosaic.version = 11 : i64} {
  func.func @_kan_kernel(%arg0: i32, %arg1: memref<32x16xf32, #tpu.memory_space<vmem>>, %arg2: memref<16x256xf32, #tpu.memory_space<vmem>>, %arg3: memref<1x256xf32, #tpu.memory_space<vmem>>, %arg4: memref<256x16xbf16, #tpu.memory_space<vmem>>, %arg5: memref<16x16xbf16, #tpu.memory_space<vmem>>, %arg6: memref<32x16xf32, #tpu.memory_space<vmem>>, %arg7: memref<1x1x16xf32, #tpu.memory_space<vmem>>, %arg8: memref<1x1x16xf32, #tpu.memory_space<vmem>>) attributes {dimension_semantics = [#tpu.dimension_semantics<parallel>], iteration_bounds = array<i64: 4>, scalar_prefetch = 0 : i64, scratch_operands = 0 : i64, tpu.core_type = #tpu.core_type<tc>, window_params = [{transform_indices = @transform_0, window_bounds = array<i64: 32, 16>}, {pipeline_mode = #tpu.pipeline_mode<synchronous>, transform_indices = @transform_1, window_bounds = array<i64: 16, 256>}, {pipeline_mode = #tpu.pipeline_mode<synchronous>, transform_indices = @transform_2, window_bounds = array<i64: 1, 256>}, {pipeline_mode = #tpu.pipeline_mode<synchronous>, transform_indices = @transform_3, window_bounds = array<i64: 256, 16>}, {pipeline_mode = #tpu.pipeline_mode<synchronous>, transform_indices = @transform_4, window_bounds = array<i64: 16, 16>}, {transform_indices = @transform_5, window_bounds = array<i64: 32, 16>}, {transform_indices = @transform_6, window_bounds = array<i64: 1, 1, 16>}, {transform_indices = @transform_7, window_bounds = array<i64: 1, 1, 16>}]} {
    %cst = arith.constant 0.000000e+00 : f32
    %0 = vector.broadcast %cst : f32 to vector<32x16xf32>
    %c0 = arith.constant 0 : index
    %c0_0 = arith.constant 0 : index
    %1 = vector.load %arg1[%c0, %c0_0] : memref<32x16xf32, #tpu.memory_space<vmem>>, vector<32x16xf32>
    %c0_1 = arith.constant 0 : index
    %c0_2 = arith.constant 0 : index
    %2 = vector.load %arg2[%c0_1, %c0_2] : memref<16x256xf32, #tpu.memory_space<vmem>>, vector<16x256xf32>
    %cst_3 = arith.constant dense<0.000000e+00> : vector<32x256xf32>
    %3 = tpu.matmul %1, %2, %cst_3 {dimension_numbers = #tpu.dot_dimension_numbers<[1], [0], [0], [1], [0, 0, 1, 1], [], []>} : vector<32x16xf32>, vector<16x256xf32>, vector<32x256xf32> -> vector<32x256xf32>
    %c0_4 = arith.constant 0 : index
    %c0_5 = arith.constant 0 : index
    %4 = vector.load %arg3[%c0_4, %c0_5] : memref<1x256xf32, #tpu.memory_space<vmem>>, vector<1x256xf32>
    %5 = vector.broadcast %4 : vector<1x256xf32> to vector<32x256xf32>
    %6 = arith.subf %3, %5 : vector<32x256xf32>
    %7 = arith.mulf %6, %6 : vector<32x256xf32>
    %cst_6 = arith.constant 1.000000e+00 : f32
    %8 = vector.broadcast %cst_6 : f32 to vector<32x256xf32>
    %9 = arith.subf %7, %8 : vector<32x256xf32>
    %cst_7 = arith.constant 0.867325068 : f32
    %10 = vector.broadcast %cst_7 : f32 to vector<32x256xf32>
    %11 = arith.mulf %10, %9 : vector<32x256xf32>
    %cst_8 = arith.constant -5.000000e-01 : f32
    %12 = vector.broadcast %cst_8 : f32 to vector<32x256xf32>
    %13 = arith.mulf %12, %7 : vector<32x256xf32>
    %14 = math.exp %13 : vector<32x256xf32>
    %15 = arith.mulf %11, %14 : vector<32x256xf32>
    %16 = arith.truncf %15 : vector<32x256xf32> to vector<32x256xbf16>
    %c0_9 = arith.constant 0 : index
    %c0_10 = arith.constant 0 : index
    %17 = vector.load %arg4[%c0_9, %c0_10] : memref<256x16xbf16, #tpu.memory_space<vmem>>, vector<256x16xbf16>
    %cst_11 = arith.constant dense<0.000000e+00> : vector<32x16xf32>
    %18 = tpu.matmul %16, %17, %cst_11 {dimension_numbers = #tpu.dot_dimension_numbers<[1], [0], [0], [1], [0, 0, 1, 1], [], []>} : vector<32x256xbf16>, vector<256x16xbf16>, vector<32x16xf32> -> vector<32x16xf32>
    %19 = arith.addf %0, %18 : vector<32x16xf32>
    %20 = arith.truncf %1 : vector<32x16xf32> to vector<32x16xbf16>
    %c0_12 = arith.constant 0 : index
    %c0_13 = arith.constant 0 : index
    %21 = vector.load %arg5[%c0_12, %c0_13] : memref<16x16xbf16, #tpu.memory_space<vmem>>, vector<16x16xbf16>
    %cst_14 = arith.constant dense<0.000000e+00> : vector<32x16xf32>
    %22 = tpu.matmul %20, %21, %cst_14 {dimension_numbers = #tpu.dot_dimension_numbers<[1], [0], [0], [1], [0, 0, 1, 1], [], []>} : vector<32x16xbf16>, vector<16x16xbf16>, vector<32x16xf32> -> vector<32x16xf32>
    %23 = arith.addf %19, %22 : vector<32x16xf32>
    %c0_15 = arith.constant 0 : index
    %c0_16 = arith.constant 0 : index
    %24 = vector.load %arg6[%c0_15, %c0_16] : memref<32x16xf32, #tpu.memory_space<vmem>>, vector<32x16xf32>
    tpu.vector_store %arg6[%c0_15, %c0_16], %23 {strides = array<i32>} : memref<32x16xf32, #tpu.memory_space<vmem>>, vector<32x16xf32>,
    %cst_17 = arith.constant dense<0.000000e+00> : vector<16xf32>
    %25 = vector.multi_reduction <add>, %23, %cst_17 [0] : vector<32x16xf32> to vector<16xf32>
    %26 = vector.shape_cast %25 : vector<16xf32> to vector<1x16xf32>
    %c0_18 = arith.constant 0 : index
    %c0_19 = arith.constant 0 : index
    %c0_20 = arith.constant 0 : index
    %27 = vector.load %arg7[%c0_18, %c0_19, %c0_20] : memref<1x1x16xf32, #tpu.memory_space<vmem>>, vector<1x1x16xf32>
    %28 = vector.shape_cast %27 : vector<1x1x16xf32> to vector<1x16xf32>
    %29 = vector.shape_cast %26 : vector<1x16xf32> to vector<1x1x16xf32>
    tpu.vector_store %arg7[%c0_18, %c0_19, %c0_20], %29 {strides = array<i32>} : memref<1x1x16xf32, #tpu.memory_space<vmem>>, vector<1x1x16xf32>,
    %cst_21 = arith.constant 3.125000e-02 : f32
    %30 = vector.broadcast %cst_21 : f32 to vector<1x16xf32>
    %31 = arith.mulf %26, %30 : vector<1x16xf32>
    %32 = vector.broadcast %31 : vector<1x16xf32> to vector<32x16xf32>
    %33 = arith.subf %23, %32 : vector<32x16xf32>
    %34 = arith.mulf %33, %33 : vector<32x16xf32>
    %cst_22 = arith.constant dense<0.000000e+00> : vector<16xf32>
    %35 = vector.multi_reduction <add>, %34, %cst_22 [0] : vector<32x16xf32> to vector<16xf32>
    %36 = vector.shape_cast %35 : vector<16xf32> to vector<1x16xf32>
    %c0_23 = arith.constant 0 : index
    %c0_24 = arith.constant 0 : index
    %c0_25 = arith.constant 0 : index
    %37 = vector.load %arg8[%c0_23, %c0_24, %c0_25] : memref<1x1x16xf32, #tpu.memory_space<vmem>>, vector<1x1x16xf32>
    %38 = vector.shape_cast %37 : vector<1x1x16xf32> to vector<1x16xf32>
    %39 = vector.shape_cast %36 : vector<1x16xf32> to vector<1x1x16xf32>
    tpu.vector_store %arg8[%c0_23, %c0_24, %c0_25], %39 {strides = array<i32>} : memref<1x1x16xf32, #tpu.memory_space<vmem>>, vector<1x1x16xf32>,
    return
  }
  func.func @transform_0(%arg0: i32) -> (i32, i32) {
    %c0_i32 = arith.constant 0 : i32
    %c0_i32_0 = arith.constant 0 : i32
    return %arg0, %c0_i32 : i32, i32
  }
  func.func @transform_1(%arg0: i32) -> (i32, i32) {
    %c0_i32 = arith.constant 0 : i32
    %c0_i32_0 = arith.constant 0 : i32
    %c0_i32_1 = arith.constant 0 : i32
    return %c0_i32, %c0_i32_0 : i32, i32
  }
  func.func @transform_2(%arg0: i32) -> (i32, i32) {
    %c0_i32 = arith.constant 0 : i32
    %c0_i32_0 = arith.constant 0 : i32
    %c0_i32_1 = arith.constant 0 : i32
    return %c0_i32, %c0_i32_0 : i32, i32
  }
  func.func @transform_3(%arg0: i32) -> (i32, i32) {
    %c0_i32 = arith.constant 0 : i32
    %c0_i32_0 = arith.constant 0 : i32
    %c0_i32_1 = arith.constant 0 : i32
    return %c0_i32, %c0_i32_0 : i32, i32
  }
  func.func @transform_4(%arg0: i32) -> (i32, i32) {
    %c0_i32 = arith.constant 0 : i32
    %c0_i32_0 = arith.constant 0 : i32
    %c0_i32_1 = arith.constant 0 : i32
    return %c0_i32, %c0_i32_0 : i32, i32
  }
  func.func @transform_5(%arg0: i32) -> (i32, i32) {
    %c0_i32 = arith.constant 0 : i32
    %c0_i32_0 = arith.constant 0 : i32
    return %arg0, %c0_i32 : i32, i32
  }
  func.func @transform_6(%arg0: i32) -> (i32, i32, i32) {
    %c0_i32 = arith.constant 0 : i32
    %c0_i32_0 = arith.constant 0 : i32
    %c0_i32_1 = arith.constant 0 : i32
    return %arg0, %c0_i32, %c0_i32_0 : i32, i32, i32
  }
  func.func @transform_7(%arg0: i32) -> (i32, i32, i32) {
    %c0_i32 = arith.constant 0 : i32
    %c0_i32_0 = arith.constant 0 : i32
    %c0_i32_1 = arith.constant 0 : i32
    return %arg0, %c0_i32, %c0_i32_0 : i32, i32, i32
  }
}

module attributes {stable_mosaic.version = 11 : i64} {
  func.func @_affine_residual_kernel(%arg0: i32, %arg1: memref<16x128xf32, #tpu.memory_space<vmem>>, %arg2: memref<16x128xf32, #tpu.memory_space<vmem>>, %arg3: memref<1x128xf32, #tpu.memory_space<vmem>>, %arg4: memref<1x128xf32, #tpu.memory_space<vmem>>, %arg5: memref<16x128xf32, #tpu.memory_space<vmem>>) attributes {dimension_semantics = [#tpu.dimension_semantics<parallel>], iteration_bounds = array<i64: 1>, scalar_prefetch = 0 : i64, scratch_operands = 0 : i64, tpu.core_type = #tpu.core_type<tc>, window_params = [{transform_indices = @transform_0, window_bounds = array<i64: 16, 128>}, {transform_indices = @transform_1, window_bounds = array<i64: 16, 128>}, {pipeline_mode = #tpu.pipeline_mode<synchronous>, transform_indices = @transform_2, window_bounds = array<i64: 1, 128>}, {pipeline_mode = #tpu.pipeline_mode<synchronous>, transform_indices = @transform_3, window_bounds = array<i64: 1, 128>}, {transform_indices = @transform_4, window_bounds = array<i64: 16, 128>}]} {
    %c0 = arith.constant 0 : index
    %c0_0 = arith.constant 0 : index
    %0 = vector.load %arg1[%c0, %c0_0] : memref<16x128xf32, #tpu.memory_space<vmem>>, vector<16x128xf32>
    %c0_1 = arith.constant 0 : index
    %c0_2 = arith.constant 0 : index
    %1 = vector.load %arg2[%c0_1, %c0_2] : memref<16x128xf32, #tpu.memory_space<vmem>>, vector<16x128xf32>
    %c0_3 = arith.constant 0 : index
    %c0_4 = arith.constant 0 : index
    %2 = vector.load %arg3[%c0_3, %c0_4] : memref<1x128xf32, #tpu.memory_space<vmem>>, vector<1x128xf32>
    %3 = vector.broadcast %2 : vector<1x128xf32> to vector<16x128xf32>
    %4 = arith.mulf %1, %3 : vector<16x128xf32>
    %5 = arith.addf %0, %4 : vector<16x128xf32>
    %c0_5 = arith.constant 0 : index
    %c0_6 = arith.constant 0 : index
    %6 = vector.load %arg4[%c0_5, %c0_6] : memref<1x128xf32, #tpu.memory_space<vmem>>, vector<1x128xf32>
    %7 = vector.broadcast %6 : vector<1x128xf32> to vector<16x128xf32>
    %8 = arith.addf %5, %7 : vector<16x128xf32>
    %c0_7 = arith.constant 0 : index
    %c0_8 = arith.constant 0 : index
    %9 = vector.load %arg5[%c0_7, %c0_8] : memref<16x128xf32, #tpu.memory_space<vmem>>, vector<16x128xf32>
    tpu.vector_store %arg5[%c0_7, %c0_8], %8 {strides = array<i32>} : memref<16x128xf32, #tpu.memory_space<vmem>>, vector<16x128xf32>,
    return
  }
  func.func @transform_0(%arg0: i32) -> (i32, i32) {
    %c0_i32 = arith.constant 0 : i32
    %c0_i32_0 = arith.constant 0 : i32
    return %arg0, %c0_i32 : i32, i32
  }
  func.func @transform_1(%arg0: i32) -> (i32, i32) {
    %c0_i32 = arith.constant 0 : i32
    %c0_i32_0 = arith.constant 0 : i32
    return %arg0, %c0_i32 : i32, i32
  }
  func.func @transform_2(%arg0: i32) -> (i32, i32) {
    %c0_i32 = arith.constant 0 : i32
    %c0_i32_0 = arith.constant 0 : i32
    %c0_i32_1 = arith.constant 0 : i32
    return %c0_i32, %c0_i32_0 : i32, i32
  }
  func.func @transform_3(%arg0: i32) -> (i32, i32) {
    %c0_i32 = arith.constant 0 : i32
    %c0_i32_0 = arith.constant 0 : i32
    %c0_i32_1 = arith.constant 0 : i32
    return %c0_i32, %c0_i32_0 : i32, i32
  }
  func.func @transform_4(%arg0: i32) -> (i32, i32) {
    %c0_i32 = arith.constant 0 : i32
    %c0_i32_0 = arith.constant 0 : i32
    return %arg0, %c0_i32 : i32, i32
  }
}

module attributes {stable_mosaic.version = 11 : i64} {
  func.func @_kan_kernel(%arg0: i32, %arg1: memref<32x16xf32, #tpu.memory_space<vmem>>, %arg2: memref<1x16xf32, #tpu.memory_space<vmem>>, %arg3: memref<1x16xf32, #tpu.memory_space<vmem>>, %arg4: memref<16x512xf32, #tpu.memory_space<vmem>>, %arg5: memref<1x512xf32, #tpu.memory_space<vmem>>, %arg6: memref<512x32xbf16, #tpu.memory_space<vmem>>, %arg7: memref<16x32xbf16, #tpu.memory_space<vmem>>, %arg8: memref<32x32xf32, #tpu.memory_space<vmem>>, %arg9: memref<1x1x32xf32, #tpu.memory_space<vmem>>, %arg10: memref<1x1x32xf32, #tpu.memory_space<vmem>>) attributes {dimension_semantics = [#tpu.dimension_semantics<parallel>], iteration_bounds = array<i64: 4>, scalar_prefetch = 0 : i64, scratch_operands = 0 : i64, tpu.core_type = #tpu.core_type<tc>, window_params = [{transform_indices = @transform_0, window_bounds = array<i64: 32, 16>}, {pipeline_mode = #tpu.pipeline_mode<synchronous>, transform_indices = @transform_1, window_bounds = array<i64: 1, 16>}, {pipeline_mode = #tpu.pipeline_mode<synchronous>, transform_indices = @transform_2, window_bounds = array<i64: 1, 16>}, {pipeline_mode = #tpu.pipeline_mode<synchronous>, transform_indices = @transform_3, window_bounds = array<i64: 16, 512>}, {pipeline_mode = #tpu.pipeline_mode<synchronous>, transform_indices = @transform_4, window_bounds = array<i64: 1, 512>}, {pipeline_mode = #tpu.pipeline_mode<synchronous>, transform_indices = @transform_5, window_bounds = array<i64: 512, 32>}, {pipeline_mode = #tpu.pipeline_mode<synchronous>, transform_indices = @transform_6, window_bounds = array<i64: 16, 32>}, {transform_indices = @transform_7, window_bounds = array<i64: 32, 32>}, {transform_indices = @transform_8, window_bounds = array<i64: 1, 1, 32>}, {transform_indices = @transform_9, window_bounds = array<i64: 1, 1, 32>}]} {
    %cst = arith.constant 0.000000e+00 : f32
    %0 = vector.broadcast %cst : f32 to vector<32x32xf32>
    %c0 = arith.constant 0 : index
    %c0_0 = arith.constant 0 : index
    %1 = vector.load %arg1[%c0, %c0_0] : memref<32x16xf32, #tpu.memory_space<vmem>>, vector<32x16xf32>
    %cst_1 = arith.constant dense<0.000000e+00> : vector<32xf32>
    %2 = vector.multi_reduction <add>, %1, %cst_1 [1] : vector<32x16xf32> to vector<32xf32>
    %3 = vector.shape_cast %2 : vector<32xf32> to vector<32x1xf32>
    %cst_2 = arith.constant 1.600000e+01 : f32
    %4 = vector.broadcast %cst_2 : f32 to vector<32x1xf32>
    %5 = arith.divf %3, %4 : vector<32x1xf32>
    %6 = vector.broadcast %5 : vector<32x1xf32> to vector<32x16xf32>
    %7 = arith.subf %1, %6 : vector<32x16xf32>
    %8 = arith.mulf %7, %7 : vector<32x16xf32>
    %cst_3 = arith.constant dense<0.000000e+00> : vector<32xf32>
    %9 = vector.multi_reduction <add>, %8, %cst_3 [1] : vector<32x16xf32> to vector<32xf32>
    %10 = vector.shape_cast %9 : vector<32xf32> to vector<32x1xf32>
    %cst_4 = arith.constant 1.600000e+01 : f32
    %11 = vector.broadcast %cst_4 : f32 to vector<32x1xf32>
    %12 = arith.divf %10, %11 : vector<32x1xf32>
    %13 = vector.broadcast %5 : vector<32x1xf32> to vector<32x16xf32>
    %14 = arith.subf %1, %13 : vector<32x16xf32>
    %cst_5 = arith.constant 9.99999974E-6 : f32
    %15 = vector.broadcast %cst_5 : f32 to vector<32x1xf32>
    %16 = arith.addf %12, %15 : vector<32x1xf32>
    %17 = math.rsqrt %16 : vector<32x1xf32>
    %18 = vector.broadcast %17 : vector<32x1xf32> to vector<32x16xf32>
    %19 = arith.mulf %14, %18 : vector<32x16xf32>
    %c0_6 = arith.constant 0 : index
    %c0_7 = arith.constant 0 : index
    %20 = vector.load %arg2[%c0_6, %c0_7] : memref<1x16xf32, #tpu.memory_space<vmem>>, vector<1x16xf32>
    %21 = vector.broadcast %20 : vector<1x16xf32> to vector<32x16xf32>
    %22 = arith.mulf %19, %21 : vector<32x16xf32>
    %c0_8 = arith.constant 0 : index
    %c0_9 = arith.constant 0 : index
    %23 = vector.load %arg3[%c0_8, %c0_9] : memref<1x16xf32, #tpu.memory_space<vmem>>, vector<1x16xf32>
    %24 = vector.broadcast %23 : vector<1x16xf32> to vector<32x16xf32>
    %25 = arith.addf %22, %24 : vector<32x16xf32>
    %c0_10 = arith.constant 0 : index
    %c0_11 = arith.constant 0 : index
    %26 = vector.load %arg4[%c0_10, %c0_11] : memref<16x512xf32, #tpu.memory_space<vmem>>, vector<16x512xf32>
    %cst_12 = arith.constant dense<0.000000e+00> : vector<32x512xf32>
    %27 = tpu.matmul %25, %26, %cst_12 {dimension_numbers = #tpu.dot_dimension_numbers<[1], [0], [0], [1], [0, 0, 1, 1], [], []>} : vector<32x16xf32>, vector<16x512xf32>, vector<32x512xf32> -> vector<32x512xf32>
    %c0_13 = arith.constant 0 : index
    %c0_14 = arith.constant 0 : index
    %28 = vector.load %arg5[%c0_13, %c0_14] : memref<1x512xf32, #tpu.memory_space<vmem>>, vector<1x512xf32>
    %29 = vector.broadcast %28 : vector<1x512xf32> to vector<32x512xf32>
    %30 = arith.subf %27, %29 : vector<32x512xf32>
    %31 = arith.mulf %30, %30 : vector<32x512xf32>
    %cst_15 = arith.constant 1.000000e+00 : f32
    %32 = vector.broadcast %cst_15 : f32 to vector<32x512xf32>
    %33 = arith.subf %31, %32 : vector<32x512xf32>
    %cst_16 = arith.constant 0.867325068 : f32
    %34 = vector.broadcast %cst_16 : f32 to vector<32x512xf32>
    %35 = arith.mulf %34, %33 : vector<32x512xf32>
    %cst_17 = arith.constant -5.000000e-01 : f32
    %36 = vector.broadcast %cst_17 : f32 to vector<32x512xf32>
    %37 = arith.mulf %36, %31 : vector<32x512xf32>
    %38 = math.exp %37 : vector<32x512xf32>
    %39 = arith.mulf %35, %38 : vector<32x512xf32>
    %40 = arith.truncf %39 : vector<32x512xf32> to vector<32x512xbf16>
    %c0_18 = arith.constant 0 : index
    %c0_19 = arith.constant 0 : index
    %41 = vector.load %arg6[%c0_18, %c0_19] : memref<512x32xbf16, #tpu.memory_space<vmem>>, vector<512x32xbf16>
    %cst_20 = arith.constant dense<0.000000e+00> : vector<32x32xf32>
    %42 = tpu.matmul %40, %41, %cst_20 {dimension_numbers = #tpu.dot_dimension_numbers<[1], [0], [0], [1], [0, 0, 1, 1], [], []>} : vector<32x512xbf16>, vector<512x32xbf16>, vector<32x32xf32> -> vector<32x32xf32>
    %43 = arith.addf %0, %42 : vector<32x32xf32>
    %44 = arith.truncf %25 : vector<32x16xf32> to vector<32x16xbf16>
    %c0_21 = arith.constant 0 : index
    %c0_22 = arith.constant 0 : index
    %45 = vector.load %arg7[%c0_21, %c0_22] : memref<16x32xbf16, #tpu.memory_space<vmem>>, vector<16x32xbf16>
    %cst_23 = arith.constant dense<0.000000e+00> : vector<32x32xf32>
    %46 = tpu.matmul %44, %45, %cst_23 {dimension_numbers = #tpu.dot_dimension_numbers<[1], [0], [0], [1], [0, 0, 1, 1], [], []>} : vector<32x16xbf16>, vector<16x32xbf16>, vector<32x32xf32> -> vector<32x32xf32>
    %47 = arith.addf %43, %46 : vector<32x32xf32>
    %c0_24 = arith.constant 0 : index
    %c0_25 = arith.constant 0 : index
    %48 = vector.load %arg8[%c0_24, %c0_25] : memref<32x32xf32, #tpu.memory_space<vmem>>, vector<32x32xf32>
    tpu.vector_store %arg8[%c0_24, %c0_25], %47 {strides = array<i32>} : memref<32x32xf32, #tpu.memory_space<vmem>>, vector<32x32xf32>,
    %cst_26 = arith.constant dense<0.000000e+00> : vector<32xf32>
    %49 = vector.multi_reduction <add>, %47, %cst_26 [0] : vector<32x32xf32> to vector<32xf32>
    %50 = vector.shape_cast %49 : vector<32xf32> to vector<1x32xf32>
    %c0_27 = arith.constant 0 : index
    %c0_28 = arith.constant 0 : index
    %c0_29 = arith.constant 0 : index
    %51 = vector.load %arg9[%c0_27, %c0_28, %c0_29] : memref<1x1x32xf32, #tpu.memory_space<vmem>>, vector<1x1x32xf32>
    %52 = vector.shape_cast %51 : vector<1x1x32xf32> to vector<1x32xf32>
    %53 = vector.shape_cast %50 : vector<1x32xf32> to vector<1x1x32xf32>
    tpu.vector_store %arg9[%c0_27, %c0_28, %c0_29], %53 {strides = array<i32>} : memref<1x1x32xf32, #tpu.memory_space<vmem>>, vector<1x1x32xf32>,
    %cst_30 = arith.constant 3.125000e-02 : f32
    %54 = vector.broadcast %cst_30 : f32 to vector<1x32xf32>
    %55 = arith.mulf %50, %54 : vector<1x32xf32>
    %56 = vector.broadcast %55 : vector<1x32xf32> to vector<32x32xf32>
    %57 = arith.subf %47, %56 : vector<32x32xf32>
    %58 = arith.mulf %57, %57 : vector<32x32xf32>
    %cst_31 = arith.constant dense<0.000000e+00> : vector<32xf32>
    %59 = vector.multi_reduction <add>, %58, %cst_31 [0] : vector<32x32xf32> to vector<32xf32>
    %60 = vector.shape_cast %59 : vector<32xf32> to vector<1x32xf32>
    %c0_32 = arith.constant 0 : index
    %c0_33 = arith.constant 0 : index
    %c0_34 = arith.constant 0 : index
    %61 = vector.load %arg10[%c0_32, %c0_33, %c0_34] : memref<1x1x32xf32, #tpu.memory_space<vmem>>, vector<1x1x32xf32>
    %62 = vector.shape_cast %61 : vector<1x1x32xf32> to vector<1x32xf32>
    %63 = vector.shape_cast %60 : vector<1x32xf32> to vector<1x1x32xf32>
    tpu.vector_store %arg10[%c0_32, %c0_33, %c0_34], %63 {strides = array<i32>} : memref<1x1x32xf32, #tpu.memory_space<vmem>>, vector<1x1x32xf32>,
    return
  }
  func.func @transform_0(%arg0: i32) -> (i32, i32) {
    %c0_i32 = arith.constant 0 : i32
    %c0_i32_0 = arith.constant 0 : i32
    return %arg0, %c0_i32 : i32, i32
  }
  func.func @transform_1(%arg0: i32) -> (i32, i32) {
    %c0_i32 = arith.constant 0 : i32
    %c0_i32_0 = arith.constant 0 : i32
    %c0_i32_1 = arith.constant 0 : i32
    return %c0_i32, %c0_i32_0 : i32, i32
  }
  func.func @transform_2(%arg0: i32) -> (i32, i32) {
    %c0_i32 = arith.constant 0 : i32
    %c0_i32_0 = arith.constant 0 : i32
    %c0_i32_1 = arith.constant 0 : i32
    return %c0_i32, %c0_i32_0 : i32, i32
  }
  func.func @transform_3(%arg0: i32) -> (i32, i32) {
    %c0_i32 = arith.constant 0 : i32
    %c0_i32_0 = arith.constant 0 : i32
    %c0_i32_1 = arith.constant 0 : i32
    return %c0_i32, %c0_i32_0 : i32, i32
  }
  func.func @transform_4(%arg0: i32) -> (i32, i32) {
    %c0_i32 = arith.constant 0 : i32
    %c0_i32_0 = arith.constant 0 : i32
    %c0_i32_1 = arith.constant 0 : i32
    return %c0_i32, %c0_i32_0 : i32, i32
  }
  func.func @transform_5(%arg0: i32) -> (i32, i32) {
    %c0_i32 = arith.constant 0 : i32
    %c0_i32_0 = arith.constant 0 : i32
    %c0_i32_1 = arith.constant 0 : i32
    return %c0_i32, %c0_i32_0 : i32, i32
  }
  func.func @transform_6(%arg0: i32) -> (i32, i32) {
    %c0_i32 = arith.constant 0 : i32
    %c0_i32_0 = arith.constant 0 : i32
    %c0_i32_1 = arith.constant 0 : i32
    return %c0_i32, %c0_i32_0 : i32, i32
  }
  func.func @transform_7(%arg0: i32) -> (i32, i32) {
    %c0_i32 = arith.constant 0 : i32
    %c0_i32_0 = arith.constant 0 : i32
    return %arg0, %c0_i32 : i32, i32
  }
  func.func @transform_8(%arg0: i32) -> (i32, i32, i32) {
    %c0_i32 = arith.constant 0 : i32
    %c0_i32_0 = arith.constant 0 : i32
    %c0_i32_1 = arith.constant 0 : i32
    return %arg0, %c0_i32, %c0_i32_0 : i32, i32, i32
  }
  func.func @transform_9(%arg0: i32) -> (i32, i32, i32) {
    %c0_i32 = arith.constant 0 : i32
    %c0_i32_0 = arith.constant 0 : i32
    %c0_i32_1 = arith.constant 0 : i32
    return %arg0, %c0_i32, %c0_i32_0 : i32, i32, i32
  }
}

module attributes {stable_mosaic.version = 11 : i64} {
  func.func @_dwconv3x3_kernel(%arg0: i32, %arg1: memref<1x8x8x32xf32, #tpu.memory_space<vmem>>, %arg2: memref<1x32xf32, #tpu.memory_space<vmem>>, %arg3: memref<1x32xf32, #tpu.memory_space<vmem>>, %arg4: memref<3x3x1x32xf32, #tpu.memory_space<vmem>>, %arg5: memref<1x32xf32, #tpu.memory_space<vmem>>, %arg6: memref<1x8x8x32xf32, #tpu.memory_space<vmem>>, %arg7: memref<10x10x32xf32, #tpu.memory_space<vmem>>) attributes {dimension_semantics = [#tpu.dimension_semantics<arbitrary>], iteration_bounds = array<i64: 2>, scalar_prefetch = 0 : i64, scratch_operands = 1 : i64, tpu.core_type = #tpu.core_type<tc>, window_params = [{transform_indices = @transform_0, window_bounds = array<i64: 1, 8, 8, 32>}, {pipeline_mode = #tpu.pipeline_mode<synchronous>, transform_indices = @transform_1, window_bounds = array<i64: 1, 32>}, {pipeline_mode = #tpu.pipeline_mode<synchronous>, transform_indices = @transform_2, window_bounds = array<i64: 1, 32>}, {pipeline_mode = #tpu.pipeline_mode<synchronous>, transform_indices = @transform_3, window_bounds = array<i64: 3, 3, 1, 32>}, {pipeline_mode = #tpu.pipeline_mode<synchronous>, transform_indices = @transform_4, window_bounds = array<i64: 1, 32>}, {transform_indices = @transform_5, window_bounds = array<i64: 1, 8, 8, 32>}]} {
    %c0_i32 = arith.constant 0 : i32
    %0 = arith.cmpi eq, %arg0, %c0_i32 : i32
    %1 = arith.extui %0 : i1 to i32
    %c0_i32_0 = arith.constant 0 : i32
    %2 = arith.cmpi ne, %1, %c0_i32_0 : i32
    scf.if %2 {
      %cst_78 = arith.constant 0.000000e+00 : f32
      %85 = vector.broadcast %cst_78 : f32 to vector<10x10x32xf32>
      %c0_79 = arith.constant 0 : index
      %c0_80 = arith.constant 0 : index
      %c0_81 = arith.constant 0 : index
      %86 = vector.load %arg7[%c0_79, %c0_80, %c0_81] : memref<10x10x32xf32, #tpu.memory_space<vmem>>, vector<10x10x32xf32>
      tpu.vector_store %arg7[%c0_79, %c0_80, %c0_81], %85 {strides = array<i32>} : memref<10x10x32xf32, #tpu.memory_space<vmem>>, vector<10x10x32xf32>,
    } else {
    }
    %c0 = arith.constant 0 : index
    %c0_1 = arith.constant 0 : index
    %c0_2 = arith.constant 0 : index
    %c0_3 = arith.constant 0 : index
    %3 = vector.load %arg1[%c0, %c0_1, %c0_2, %c0_3] : memref<1x8x8x32xf32, #tpu.memory_space<vmem>>, vector<1x8x8x32xf32>
    %4 = vector.shape_cast %3 : vector<1x8x8x32xf32> to vector<8x8x32xf32>
    %c0_4 = arith.constant 0 : index
    %c0_5 = arith.constant 0 : index
    %5 = vector.load %arg2[%c0_4, %c0_5] : memref<1x32xf32, #tpu.memory_space<vmem>>, vector<1x32xf32>
    %6 = vector.shape_cast %5 : vector<1x32xf32> to vector<1x1x32xf32>
    %7 = vector.broadcast %6 : vector<1x1x32xf32> to vector<8x8x32xf32>
    %8 = arith.mulf %4, %7 : vector<8x8x32xf32>
    %c0_6 = arith.constant 0 : index
    %c0_7 = arith.constant 0 : index
    %9 = vector.load %arg3[%c0_6, %c0_7] : memref<1x32xf32, #tpu.memory_space<vmem>>, vector<1x32xf32>
    %10 = vector.shape_cast %9 : vector<1x32xf32> to vector<1x1x32xf32>
    %11 = vector.broadcast %10 : vector<1x1x32xf32> to vector<8x8x32xf32>
    %12 = arith.addf %8, %11 : vector<8x8x32xf32>
    %c1 = arith.constant 1 : index
    %c1_8 = arith.constant 1 : index
    %c0_9 = arith.constant 0 : index
    %13 = vector.load %arg7[%c1, %c1_8, %c0_9] : memref<10x10x32xf32, #tpu.memory_space<vmem>>, vector<8x8x32xf32>
    tpu.vector_store %arg7[%c1, %c1_8, %c0_9], %12 {strides = array<i32>} : memref<10x10x32xf32, #tpu.memory_space<vmem>>, vector<8x8x32xf32>,
    %cst = arith.constant 0.000000e+00 : f32
    %14 = vector.broadcast %cst : f32 to vector<8x8x32xf32>
    %c0_10 = arith.constant 0 : index
    %c0_11 = arith.constant 0 : index
    %c0_12 = arith.constant 0 : index
    %15 = vector.load %arg7[%c0_10, %c0_11, %c0_12] : memref<10x10x32xf32, #tpu.memory_space<vmem>>, vector<8x8x32xf32>
    %c0_13 = arith.constant 0 : index
    %c0_14 = arith.constant 0 : index
    %c0_15 = arith.constant 0 : index
    %c0_16 = arith.constant 0 : index
    %16 = vector.load %arg4[%c0_13, %c0_14, %c0_15, %c0_16] : memref<3x3x1x32xf32, #tpu.memory_space<vmem>>, vector<1x1x1x32xf32>
    %17 = vector.shape_cast %16 : vector<1x1x1x32xf32> to vector<1x32xf32>
    %18 = vector.shape_cast %17 : vector<1x32xf32> to vector<1x1x32xf32>
    %19 = vector.broadcast %18 : vector<1x1x32xf32> to vector<8x8x32xf32>
    %20 = arith.mulf %15, %19 : vector<8x8x32xf32>
    %21 = arith.addf %14, %20 : vector<8x8x32xf32>
    %c0_17 = arith.constant 0 : index
    %c1_18 = arith.constant 1 : index
    %c0_19 = arith.constant 0 : index
    %22 = vector.load %arg7[%c0_17, %c1_18, %c0_19] : memref<10x10x32xf32, #tpu.memory_space<vmem>>, vector<8x8x32xf32>
    %c0_20 = arith.constant 0 : index
    %c1_21 = arith.constant 1 : index
    %c0_22 = arith.constant 0 : index
    %c0_23 = arith.constant 0 : index
    %23 = vector.load %arg4[%c0_20, %c1_21, %c0_22, %c0_23] : memref<3x3x1x32xf32, #tpu.memory_space<vmem>>, vector<1x1x1x32xf32>
    %24 = vector.shape_cast %23 : vector<1x1x1x32xf32> to vector<1x32xf32>
    %25 = vector.shape_cast %24 : vector<1x32xf32> to vector<1x1x32xf32>
    %26 = vector.broadcast %25 : vector<1x1x32xf32> to vector<8x8x32xf32>
    %27 = arith.mulf %22, %26 : vector<8x8x32xf32>
    %28 = arith.addf %21, %27 : vector<8x8x32xf32>
    %c0_24 = arith.constant 0 : index
    %c2 = arith.constant 2 : index
    %c0_25 = arith.constant 0 : index
    %29 = vector.load %arg7[%c0_24, %c2, %c0_25] : memref<10x10x32xf32, #tpu.memory_space<vmem>>, vector<8x8x32xf32>
    %c0_26 = arith.constant 0 : index
    %c2_27 = arith.constant 2 : index
    %c0_28 = arith.constant 0 : index
    %c0_29 = arith.constant 0 : index
    %30 = vector.load %arg4[%c0_26, %c2_27, %c0_28, %c0_29] : memref<3x3x1x32xf32, #tpu.memory_space<vmem>>, vector<1x1x1x32xf32>
    %31 = vector.shape_cast %30 : vector<1x1x1x32xf32> to vector<1x32xf32>
    %32 = vector.shape_cast %31 : vector<1x32xf32> to vector<1x1x32xf32>
    %33 = vector.broadcast %32 : vector<1x1x32xf32> to vector<8x8x32xf32>
    %34 = arith.mulf %29, %33 : vector<8x8x32xf32>
    %35 = arith.addf %28, %34 : vector<8x8x32xf32>
    %c1_30 = arith.constant 1 : index
    %c0_31 = arith.constant 0 : index
    %c0_32 = arith.constant 0 : index
    %36 = vector.load %arg7[%c1_30, %c0_31, %c0_32] : memref<10x10x32xf32, #tpu.memory_space<vmem>>, vector<8x8x32xf32>
    %c1_33 = arith.constant 1 : index
    %c0_34 = arith.constant 0 : index
    %c0_35 = arith.constant 0 : index
    %c0_36 = arith.constant 0 : index
    %37 = vector.load %arg4[%c1_33, %c0_34, %c0_35, %c0_36] : memref<3x3x1x32xf32, #tpu.memory_space<vmem>>, vector<1x1x1x32xf32>
    %38 = vector.shape_cast %37 : vector<1x1x1x32xf32> to vector<1x32xf32>
    %39 = vector.shape_cast %38 : vector<1x32xf32> to vector<1x1x32xf32>
    %40 = vector.broadcast %39 : vector<1x1x32xf32> to vector<8x8x32xf32>
    %41 = arith.mulf %36, %40 : vector<8x8x32xf32>
    %42 = arith.addf %35, %41 : vector<8x8x32xf32>
    %c1_37 = arith.constant 1 : index
    %c1_38 = arith.constant 1 : index
    %c0_39 = arith.constant 0 : index
    %43 = vector.load %arg7[%c1_37, %c1_38, %c0_39] : memref<10x10x32xf32, #tpu.memory_space<vmem>>, vector<8x8x32xf32>
    %c1_40 = arith.constant 1 : index
    %c1_41 = arith.constant 1 : index
    %c0_42 = arith.constant 0 : index
    %c0_43 = arith.constant 0 : index
    %44 = vector.load %arg4[%c1_40, %c1_41, %c0_42, %c0_43] : memref<3x3x1x32xf32, #tpu.memory_space<vmem>>, vector<1x1x1x32xf32>
    %45 = vector.shape_cast %44 : vector<1x1x1x32xf32> to vector<1x32xf32>
    %46 = vector.shape_cast %45 : vector<1x32xf32> to vector<1x1x32xf32>
    %47 = vector.broadcast %46 : vector<1x1x32xf32> to vector<8x8x32xf32>
    %48 = arith.mulf %43, %47 : vector<8x8x32xf32>
    %49 = arith.addf %42, %48 : vector<8x8x32xf32>
    %c1_44 = arith.constant 1 : index
    %c2_45 = arith.constant 2 : index
    %c0_46 = arith.constant 0 : index
    %50 = vector.load %arg7[%c1_44, %c2_45, %c0_46] : memref<10x10x32xf32, #tpu.memory_space<vmem>>, vector<8x8x32xf32>
    %c1_47 = arith.constant 1 : index
    %c2_48 = arith.constant 2 : index
    %c0_49 = arith.constant 0 : index
    %c0_50 = arith.constant 0 : index
    %51 = vector.load %arg4[%c1_47, %c2_48, %c0_49, %c0_50] : memref<3x3x1x32xf32, #tpu.memory_space<vmem>>, vector<1x1x1x32xf32>
    %52 = vector.shape_cast %51 : vector<1x1x1x32xf32> to vector<1x32xf32>
    %53 = vector.shape_cast %52 : vector<1x32xf32> to vector<1x1x32xf32>
    %54 = vector.broadcast %53 : vector<1x1x32xf32> to vector<8x8x32xf32>
    %55 = arith.mulf %50, %54 : vector<8x8x32xf32>
    %56 = arith.addf %49, %55 : vector<8x8x32xf32>
    %c2_51 = arith.constant 2 : index
    %c0_52 = arith.constant 0 : index
    %c0_53 = arith.constant 0 : index
    %57 = vector.load %arg7[%c2_51, %c0_52, %c0_53] : memref<10x10x32xf32, #tpu.memory_space<vmem>>, vector<8x8x32xf32>
    %c2_54 = arith.constant 2 : index
    %c0_55 = arith.constant 0 : index
    %c0_56 = arith.constant 0 : index
    %c0_57 = arith.constant 0 : index
    %58 = vector.load %arg4[%c2_54, %c0_55, %c0_56, %c0_57] : memref<3x3x1x32xf32, #tpu.memory_space<vmem>>, vector<1x1x1x32xf32>
    %59 = vector.shape_cast %58 : vector<1x1x1x32xf32> to vector<1x32xf32>
    %60 = vector.shape_cast %59 : vector<1x32xf32> to vector<1x1x32xf32>
    %61 = vector.broadcast %60 : vector<1x1x32xf32> to vector<8x8x32xf32>
    %62 = arith.mulf %57, %61 : vector<8x8x32xf32>
    %63 = arith.addf %56, %62 : vector<8x8x32xf32>
    %c2_58 = arith.constant 2 : index
    %c1_59 = arith.constant 1 : index
    %c0_60 = arith.constant 0 : index
    %64 = vector.load %arg7[%c2_58, %c1_59, %c0_60] : memref<10x10x32xf32, #tpu.memory_space<vmem>>, vector<8x8x32xf32>
    %c2_61 = arith.constant 2 : index
    %c1_62 = arith.constant 1 : index
    %c0_63 = arith.constant 0 : index
    %c0_64 = arith.constant 0 : index
    %65 = vector.load %arg4[%c2_61, %c1_62, %c0_63, %c0_64] : memref<3x3x1x32xf32, #tpu.memory_space<vmem>>, vector<1x1x1x32xf32>
    %66 = vector.shape_cast %65 : vector<1x1x1x32xf32> to vector<1x32xf32>
    %67 = vector.shape_cast %66 : vector<1x32xf32> to vector<1x1x32xf32>
    %68 = vector.broadcast %67 : vector<1x1x32xf32> to vector<8x8x32xf32>
    %69 = arith.mulf %64, %68 : vector<8x8x32xf32>
    %70 = arith.addf %63, %69 : vector<8x8x32xf32>
    %c2_65 = arith.constant 2 : index
    %c2_66 = arith.constant 2 : index
    %c0_67 = arith.constant 0 : index
    %71 = vector.load %arg7[%c2_65, %c2_66, %c0_67] : memref<10x10x32xf32, #tpu.memory_space<vmem>>, vector<8x8x32xf32>
    %c2_68 = arith.constant 2 : index
    %c2_69 = arith.constant 2 : index
    %c0_70 = arith.constant 0 : index
    %c0_71 = arith.constant 0 : index
    %72 = vector.load %arg4[%c2_68, %c2_69, %c0_70, %c0_71] : memref<3x3x1x32xf32, #tpu.memory_space<vmem>>, vector<1x1x1x32xf32>
    %73 = vector.shape_cast %72 : vector<1x1x1x32xf32> to vector<1x32xf32>
    %74 = vector.shape_cast %73 : vector<1x32xf32> to vector<1x1x32xf32>
    %75 = vector.broadcast %74 : vector<1x1x32xf32> to vector<8x8x32xf32>
    %76 = arith.mulf %71, %75 : vector<8x8x32xf32>
    %77 = arith.addf %70, %76 : vector<8x8x32xf32>
    %c0_72 = arith.constant 0 : index
    %c0_73 = arith.constant 0 : index
    %78 = vector.load %arg5[%c0_72, %c0_73] : memref<1x32xf32, #tpu.memory_space<vmem>>, vector<1x32xf32>
    %79 = vector.shape_cast %78 : vector<1x32xf32> to vector<1x1x32xf32>
    %80 = vector.broadcast %79 : vector<1x1x32xf32> to vector<8x8x32xf32>
    %81 = arith.addf %77, %80 : vector<8x8x32xf32>
    %c0_74 = arith.constant 0 : index
    %c0_75 = arith.constant 0 : index
    %c0_76 = arith.constant 0 : index
    %c0_77 = arith.constant 0 : index
    %82 = vector.load %arg6[%c0_74, %c0_75, %c0_76, %c0_77] : memref<1x8x8x32xf32, #tpu.memory_space<vmem>>, vector<1x8x8x32xf32>
    %83 = vector.shape_cast %82 : vector<1x8x8x32xf32> to vector<8x8x32xf32>
    %84 = vector.shape_cast %81 : vector<8x8x32xf32> to vector<1x8x8x32xf32>
    tpu.vector_store %arg6[%c0_74, %c0_75, %c0_76, %c0_77], %84 {strides = array<i32>} : memref<1x8x8x32xf32, #tpu.memory_space<vmem>>, vector<1x8x8x32xf32>,
    return
  }
  func.func @transform_0(%arg0: i32) -> (i32, i32, i32, i32) {
    %c0_i32 = arith.constant 0 : i32
    %c0_i32_0 = arith.constant 0 : i32
    %c0_i32_1 = arith.constant 0 : i32
    %c0_i32_2 = arith.constant 0 : i32
    return %arg0, %c0_i32, %c0_i32_0, %c0_i32_1 : i32, i32, i32, i32
  }
  func.func @transform_1(%arg0: i32) -> (i32, i32) {
    %c0_i32 = arith.constant 0 : i32
    %c0_i32_0 = arith.constant 0 : i32
    %c0_i32_1 = arith.constant 0 : i32
    return %c0_i32, %c0_i32_0 : i32, i32
  }
  func.func @transform_2(%arg0: i32) -> (i32, i32) {
    %c0_i32 = arith.constant 0 : i32
    %c0_i32_0 = arith.constant 0 : i32
    %c0_i32_1 = arith.constant 0 : i32
    return %c0_i32, %c0_i32_0 : i32, i32
  }
  func.func @transform_3(%arg0: i32) -> (i32, i32, i32, i32) {
    %c0_i32 = arith.constant 0 : i32
    %c0_i32_0 = arith.constant 0 : i32
    %c0_i32_1 = arith.constant 0 : i32
    %c0_i32_2 = arith.constant 0 : i32
    %c0_i32_3 = arith.constant 0 : i32
    return %c0_i32, %c0_i32_0, %c0_i32_1, %c0_i32_2 : i32, i32, i32, i32
  }
  func.func @transform_4(%arg0: i32) -> (i32, i32) {
    %c0_i32 = arith.constant 0 : i32
    %c0_i32_0 = arith.constant 0 : i32
    %c0_i32_1 = arith.constant 0 : i32
    return %c0_i32, %c0_i32_0 : i32, i32
  }
  func.func @transform_5(%arg0: i32) -> (i32, i32, i32, i32) {
    %c0_i32 = arith.constant 0 : i32
    %c0_i32_0 = arith.constant 0 : i32
    %c0_i32_1 = arith.constant 0 : i32
    %c0_i32_2 = arith.constant 0 : i32
    return %arg0, %c0_i32, %c0_i32_0, %c0_i32_1 : i32, i32, i32, i32
  }
}

module attributes {stable_mosaic.version = 11 : i64} {
  func.func @_kan_kernel(%arg0: i32, %arg1: memref<32x32xf32, #tpu.memory_space<vmem>>, %arg2: memref<32x512xf32, #tpu.memory_space<vmem>>, %arg3: memref<1x512xf32, #tpu.memory_space<vmem>>, %arg4: memref<512x16xbf16, #tpu.memory_space<vmem>>, %arg5: memref<32x16xbf16, #tpu.memory_space<vmem>>, %arg6: memref<32x16xf32, #tpu.memory_space<vmem>>, %arg7: memref<1x1x16xf32, #tpu.memory_space<vmem>>, %arg8: memref<1x1x16xf32, #tpu.memory_space<vmem>>) attributes {dimension_semantics = [#tpu.dimension_semantics<parallel>], iteration_bounds = array<i64: 4>, scalar_prefetch = 0 : i64, scratch_operands = 0 : i64, tpu.core_type = #tpu.core_type<tc>, window_params = [{transform_indices = @transform_0, window_bounds = array<i64: 32, 32>}, {pipeline_mode = #tpu.pipeline_mode<synchronous>, transform_indices = @transform_1, window_bounds = array<i64: 32, 512>}, {pipeline_mode = #tpu.pipeline_mode<synchronous>, transform_indices = @transform_2, window_bounds = array<i64: 1, 512>}, {pipeline_mode = #tpu.pipeline_mode<synchronous>, transform_indices = @transform_3, window_bounds = array<i64: 512, 16>}, {pipeline_mode = #tpu.pipeline_mode<synchronous>, transform_indices = @transform_4, window_bounds = array<i64: 32, 16>}, {transform_indices = @transform_5, window_bounds = array<i64: 32, 16>}, {transform_indices = @transform_6, window_bounds = array<i64: 1, 1, 16>}, {transform_indices = @transform_7, window_bounds = array<i64: 1, 1, 16>}]} {
    %cst = arith.constant 0.000000e+00 : f32
    %0 = vector.broadcast %cst : f32 to vector<32x16xf32>
    %c0 = arith.constant 0 : index
    %c0_0 = arith.constant 0 : index
    %1 = vector.load %arg1[%c0, %c0_0] : memref<32x32xf32, #tpu.memory_space<vmem>>, vector<32x32xf32>
    %c0_1 = arith.constant 0 : index
    %c0_2 = arith.constant 0 : index
    %2 = vector.load %arg2[%c0_1, %c0_2] : memref<32x512xf32, #tpu.memory_space<vmem>>, vector<32x512xf32>
    %cst_3 = arith.constant dense<0.000000e+00> : vector<32x512xf32>
    %3 = tpu.matmul %1, %2, %cst_3 {dimension_numbers = #tpu.dot_dimension_numbers<[1], [0], [0], [1], [0, 0, 1, 1], [], []>} : vector<32x32xf32>, vector<32x512xf32>, vector<32x512xf32> -> vector<32x512xf32>
    %c0_4 = arith.constant 0 : index
    %c0_5 = arith.constant 0 : index
    %4 = vector.load %arg3[%c0_4, %c0_5] : memref<1x512xf32, #tpu.memory_space<vmem>>, vector<1x512xf32>
    %5 = vector.broadcast %4 : vector<1x512xf32> to vector<32x512xf32>
    %6 = arith.subf %3, %5 : vector<32x512xf32>
    %7 = arith.mulf %6, %6 : vector<32x512xf32>
    %cst_6 = arith.constant 1.000000e+00 : f32
    %8 = vector.broadcast %cst_6 : f32 to vector<32x512xf32>
    %9 = arith.subf %7, %8 : vector<32x512xf32>
    %cst_7 = arith.constant 0.867325068 : f32
    %10 = vector.broadcast %cst_7 : f32 to vector<32x512xf32>
    %11 = arith.mulf %10, %9 : vector<32x512xf32>
    %cst_8 = arith.constant -5.000000e-01 : f32
    %12 = vector.broadcast %cst_8 : f32 to vector<32x512xf32>
    %13 = arith.mulf %12, %7 : vector<32x512xf32>
    %14 = math.exp %13 : vector<32x512xf32>
    %15 = arith.mulf %11, %14 : vector<32x512xf32>
    %16 = arith.truncf %15 : vector<32x512xf32> to vector<32x512xbf16>
    %c0_9 = arith.constant 0 : index
    %c0_10 = arith.constant 0 : index
    %17 = vector.load %arg4[%c0_9, %c0_10] : memref<512x16xbf16, #tpu.memory_space<vmem>>, vector<512x16xbf16>
    %cst_11 = arith.constant dense<0.000000e+00> : vector<32x16xf32>
    %18 = tpu.matmul %16, %17, %cst_11 {dimension_numbers = #tpu.dot_dimension_numbers<[1], [0], [0], [1], [0, 0, 1, 1], [], []>} : vector<32x512xbf16>, vector<512x16xbf16>, vector<32x16xf32> -> vector<32x16xf32>
    %19 = arith.addf %0, %18 : vector<32x16xf32>
    %20 = arith.truncf %1 : vector<32x32xf32> to vector<32x32xbf16>
    %c0_12 = arith.constant 0 : index
    %c0_13 = arith.constant 0 : index
    %21 = vector.load %arg5[%c0_12, %c0_13] : memref<32x16xbf16, #tpu.memory_space<vmem>>, vector<32x16xbf16>
    %cst_14 = arith.constant dense<0.000000e+00> : vector<32x16xf32>
    %22 = tpu.matmul %20, %21, %cst_14 {dimension_numbers = #tpu.dot_dimension_numbers<[1], [0], [0], [1], [0, 0, 1, 1], [], []>} : vector<32x32xbf16>, vector<32x16xbf16>, vector<32x16xf32> -> vector<32x16xf32>
    %23 = arith.addf %19, %22 : vector<32x16xf32>
    %c0_15 = arith.constant 0 : index
    %c0_16 = arith.constant 0 : index
    %24 = vector.load %arg6[%c0_15, %c0_16] : memref<32x16xf32, #tpu.memory_space<vmem>>, vector<32x16xf32>
    tpu.vector_store %arg6[%c0_15, %c0_16], %23 {strides = array<i32>} : memref<32x16xf32, #tpu.memory_space<vmem>>, vector<32x16xf32>,
    %cst_17 = arith.constant dense<0.000000e+00> : vector<16xf32>
    %25 = vector.multi_reduction <add>, %23, %cst_17 [0] : vector<32x16xf32> to vector<16xf32>
    %26 = vector.shape_cast %25 : vector<16xf32> to vector<1x16xf32>
    %c0_18 = arith.constant 0 : index
    %c0_19 = arith.constant 0 : index
    %c0_20 = arith.constant 0 : index
    %27 = vector.load %arg7[%c0_18, %c0_19, %c0_20] : memref<1x1x16xf32, #tpu.memory_space<vmem>>, vector<1x1x16xf32>
    %28 = vector.shape_cast %27 : vector<1x1x16xf32> to vector<1x16xf32>
    %29 = vector.shape_cast %26 : vector<1x16xf32> to vector<1x1x16xf32>
    tpu.vector_store %arg7[%c0_18, %c0_19, %c0_20], %29 {strides = array<i32>} : memref<1x1x16xf32, #tpu.memory_space<vmem>>, vector<1x1x16xf32>,
    %cst_21 = arith.constant 3.125000e-02 : f32
    %30 = vector.broadcast %cst_21 : f32 to vector<1x16xf32>
    %31 = arith.mulf %26, %30 : vector<1x16xf32>
    %32 = vector.broadcast %31 : vector<1x16xf32> to vector<32x16xf32>
    %33 = arith.subf %23, %32 : vector<32x16xf32>
    %34 = arith.mulf %33, %33 : vector<32x16xf32>
    %cst_22 = arith.constant dense<0.000000e+00> : vector<16xf32>
    %35 = vector.multi_reduction <add>, %34, %cst_22 [0] : vector<32x16xf32> to vector<16xf32>
    %36 = vector.shape_cast %35 : vector<16xf32> to vector<1x16xf32>
    %c0_23 = arith.constant 0 : index
    %c0_24 = arith.constant 0 : index
    %c0_25 = arith.constant 0 : index
    %37 = vector.load %arg8[%c0_23, %c0_24, %c0_25] : memref<1x1x16xf32, #tpu.memory_space<vmem>>, vector<1x1x16xf32>
    %38 = vector.shape_cast %37 : vector<1x1x16xf32> to vector<1x16xf32>
    %39 = vector.shape_cast %36 : vector<1x16xf32> to vector<1x1x16xf32>
    tpu.vector_store %arg8[%c0_23, %c0_24, %c0_25], %39 {strides = array<i32>} : memref<1x1x16xf32, #tpu.memory_space<vmem>>, vector<1x1x16xf32>,
    return
  }
  func.func @transform_0(%arg0: i32) -> (i32, i32) {
    %c0_i32 = arith.constant 0 : i32
    %c0_i32_0 = arith.constant 0 : i32
    return %arg0, %c0_i32 : i32, i32
  }
  func.func @transform_1(%arg0: i32) -> (i32, i32) {
    %c0_i32 = arith.constant 0 : i32
    %c0_i32_0 = arith.constant 0 : i32
    %c0_i32_1 = arith.constant 0 : i32
    return %c0_i32, %c0_i32_0 : i32, i32
  }
  func.func @transform_2(%arg0: i32) -> (i32, i32) {
    %c0_i32 = arith.constant 0 : i32
    %c0_i32_0 = arith.constant 0 : i32
    %c0_i32_1 = arith.constant 0 : i32
    return %c0_i32, %c0_i32_0 : i32, i32
  }
  func.func @transform_3(%arg0: i32) -> (i32, i32) {
    %c0_i32 = arith.constant 0 : i32
    %c0_i32_0 = arith.constant 0 : i32
    %c0_i32_1 = arith.constant 0 : i32
    return %c0_i32, %c0_i32_0 : i32, i32
  }
  func.func @transform_4(%arg0: i32) -> (i32, i32) {
    %c0_i32 = arith.constant 0 : i32
    %c0_i32_0 = arith.constant 0 : i32
    %c0_i32_1 = arith.constant 0 : i32
    return %c0_i32, %c0_i32_0 : i32, i32
  }
  func.func @transform_5(%arg0: i32) -> (i32, i32) {
    %c0_i32 = arith.constant 0 : i32
    %c0_i32_0 = arith.constant 0 : i32
    return %arg0, %c0_i32 : i32, i32
  }
  func.func @transform_6(%arg0: i32) -> (i32, i32, i32) {
    %c0_i32 = arith.constant 0 : i32
    %c0_i32_0 = arith.constant 0 : i32
    %c0_i32_1 = arith.constant 0 : i32
    return %arg0, %c0_i32, %c0_i32_0 : i32, i32, i32
  }
  func.func @transform_7(%arg0: i32) -> (i32, i32, i32) {
    %c0_i32 = arith.constant 0 : i32
    %c0_i32_0 = arith.constant 0 : i32
    %c0_i32_1 = arith.constant 0 : i32
    return %arg0, %c0_i32, %c0_i32_0 : i32, i32, i32
  }
}

module attributes {stable_mosaic.version = 11 : i64} {
  func.func @_conv3x3_kernel(%arg0: i32, %arg1: memref<1x8x8x16xf32, #tpu.memory_space<vmem>>, %arg2: memref<1x16xf32, #tpu.memory_space<vmem>>, %arg3: memref<1x16xf32, #tpu.memory_space<vmem>>, %arg4: memref<144x16xbf16, #tpu.memory_space<vmem>>, %arg5: memref<1x16xf32, #tpu.memory_space<vmem>>, %arg6: memref<1x8x8x16xf32, #tpu.memory_space<vmem>>, %arg7: memref<10x10x16xf32, #tpu.memory_space<vmem>>, %arg8: memref<64x144xf32, #tpu.memory_space<vmem>>) attributes {dimension_semantics = [#tpu.dimension_semantics<arbitrary>], iteration_bounds = array<i64: 2>, scalar_prefetch = 0 : i64, scratch_operands = 2 : i64, tpu.core_type = #tpu.core_type<tc>, window_params = [{transform_indices = @transform_0, window_bounds = array<i64: 1, 8, 8, 16>}, {pipeline_mode = #tpu.pipeline_mode<synchronous>, transform_indices = @transform_1, window_bounds = array<i64: 1, 16>}, {pipeline_mode = #tpu.pipeline_mode<synchronous>, transform_indices = @transform_2, window_bounds = array<i64: 1, 16>}, {pipeline_mode = #tpu.pipeline_mode<synchronous>, transform_indices = @transform_3, window_bounds = array<i64: 144, 16>}, {pipeline_mode = #tpu.pipeline_mode<synchronous>, transform_indices = @transform_4, window_bounds = array<i64: 1, 16>}, {transform_indices = @transform_5, window_bounds = array<i64: 1, 8, 8, 16>}]} {
    %c0_i32 = arith.constant 0 : i32
    %0 = arith.cmpi eq, %arg0, %c0_i32 : i32
    %1 = arith.extui %0 : i1 to i32
    %c0_i32_0 = arith.constant 0 : i32
    %2 = arith.cmpi ne, %1, %c0_i32_0 : i32
    scf.if %2 {
      %cst_56 = arith.constant 0.000000e+00 : f32
      %52 = vector.broadcast %cst_56 : f32 to vector<10x10x16xf32>
      %c0_57 = arith.constant 0 : index
      %c0_58 = arith.constant 0 : index
      %c0_59 = arith.constant 0 : index
      %53 = vector.load %arg7[%c0_57, %c0_58, %c0_59] : memref<10x10x16xf32, #tpu.memory_space<vmem>>, vector<10x10x16xf32>
      tpu.vector_store %arg7[%c0_57, %c0_58, %c0_59], %52 {strides = array<i32>} : memref<10x10x16xf32, #tpu.memory_space<vmem>>, vector<10x10x16xf32>,
    } else {
    }
    %c0 = arith.constant 0 : index
    %c0_1 = arith.constant 0 : index
    %c0_2 = arith.constant 0 : index
    %c0_3 = arith.constant 0 : index
    %3 = vector.load %arg1[%c0, %c0_1, %c0_2, %c0_3] : memref<1x8x8x16xf32, #tpu.memory_space<vmem>>, vector<1x8x8x16xf32>
    %4 = vector.shape_cast %3 : vector<1x8x8x16xf32> to vector<8x8x16xf32>
    %c0_4 = arith.constant 0 : index
    %c0_5 = arith.constant 0 : index
    %5 = vector.load %arg2[%c0_4, %c0_5] : memref<1x16xf32, #tpu.memory_space<vmem>>, vector<1x16xf32>
    %6 = vector.shape_cast %5 : vector<1x16xf32> to vector<1x1x16xf32>
    %7 = vector.broadcast %6 : vector<1x1x16xf32> to vector<8x8x16xf32>
    %8 = arith.mulf %4, %7 : vector<8x8x16xf32>
    %c0_6 = arith.constant 0 : index
    %c0_7 = arith.constant 0 : index
    %9 = vector.load %arg3[%c0_6, %c0_7] : memref<1x16xf32, #tpu.memory_space<vmem>>, vector<1x16xf32>
    %10 = vector.shape_cast %9 : vector<1x16xf32> to vector<1x1x16xf32>
    %11 = vector.broadcast %10 : vector<1x1x16xf32> to vector<8x8x16xf32>
    %12 = arith.addf %8, %11 : vector<8x8x16xf32>
    %c1 = arith.constant 1 : index
    %c1_8 = arith.constant 1 : index
    %c0_9 = arith.constant 0 : index
    %13 = vector.load %arg7[%c1, %c1_8, %c0_9] : memref<10x10x16xf32, #tpu.memory_space<vmem>>, vector<8x8x16xf32>
    tpu.vector_store %arg7[%c1, %c1_8, %c0_9], %12 {strides = array<i32>} : memref<10x10x16xf32, #tpu.memory_space<vmem>>, vector<8x8x16xf32>,
    %c0_10 = arith.constant 0 : index
    %c0_11 = arith.constant 0 : index
    %c0_12 = arith.constant 0 : index
    %14 = vector.load %arg7[%c0_10, %c0_11, %c0_12] : memref<10x10x16xf32, #tpu.memory_space<vmem>>, vector<8x8x16xf32>
    %15 = vector.shape_cast %14 : vector<8x8x16xf32> to vector<64x16xf32>
    %c0_13 = arith.constant 0 : index
    %c0_14 = arith.constant 0 : index
    %16 = vector.load %arg8[%c0_13, %c0_14] : memref<64x144xf32, #tpu.memory_space<vmem>>, vector<64x16xf32>
    tpu.vector_store %arg8[%c0_13, %c0_14], %15 {strides = array<i32>} : memref<64x144xf32, #tpu.memory_space<vmem>>, vector<64x16xf32>,
    %c0_15 = arith.constant 0 : index
    %c1_16 = arith.constant 1 : index
    %c0_17 = arith.constant 0 : index
    %17 = vector.load %arg7[%c0_15, %c1_16, %c0_17] : memref<10x10x16xf32, #tpu.memory_space<vmem>>, vector<8x8x16xf32>
    %18 = vector.shape_cast %17 : vector<8x8x16xf32> to vector<64x16xf32>
    %c0_18 = arith.constant 0 : index
    %c16 = arith.constant 16 : index
    %19 = vector.load %arg8[%c0_18, %c16] : memref<64x144xf32, #tpu.memory_space<vmem>>, vector<64x16xf32>
    tpu.vector_store %arg8[%c0_18, %c16], %18 {strides = array<i32>} : memref<64x144xf32, #tpu.memory_space<vmem>>, vector<64x16xf32>,
    %c0_19 = arith.constant 0 : index
    %c2 = arith.constant 2 : index
    %c0_20 = arith.constant 0 : index
    %20 = vector.load %arg7[%c0_19, %c2, %c0_20] : memref<10x10x16xf32, #tpu.memory_space<vmem>>, vector<8x8x16xf32>
    %21 = vector.shape_cast %20 : vector<8x8x16xf32> to vector<64x16xf32>
    %c0_21 = arith.constant 0 : index
    %c32 = arith.constant 32 : index
    %22 = vector.load %arg8[%c0_21, %c32] : memref<64x144xf32, #tpu.memory_space<vmem>>, vector<64x16xf32>
    tpu.vector_store %arg8[%c0_21, %c32], %21 {strides = array<i32>} : memref<64x144xf32, #tpu.memory_space<vmem>>, vector<64x16xf32>,
    %c1_22 = arith.constant 1 : index
    %c0_23 = arith.constant 0 : index
    %c0_24 = arith.constant 0 : index
    %23 = vector.load %arg7[%c1_22, %c0_23, %c0_24] : memref<10x10x16xf32, #tpu.memory_space<vmem>>, vector<8x8x16xf32>
    %24 = vector.shape_cast %23 : vector<8x8x16xf32> to vector<64x16xf32>
    %c0_25 = arith.constant 0 : index
    %c48 = arith.constant 48 : index
    %25 = vector.load %arg8[%c0_25, %c48] : memref<64x144xf32, #tpu.memory_space<vmem>>, vector<64x16xf32>
    tpu.vector_store %arg8[%c0_25, %c48], %24 {strides = array<i32>} : memref<64x144xf32, #tpu.memory_space<vmem>>, vector<64x16xf32>,
    %c1_26 = arith.constant 1 : index
    %c1_27 = arith.constant 1 : index
    %c0_28 = arith.constant 0 : index
    %26 = vector.load %arg7[%c1_26, %c1_27, %c0_28] : memref<10x10x16xf32, #tpu.memory_space<vmem>>, vector<8x8x16xf32>
    %27 = vector.shape_cast %26 : vector<8x8x16xf32> to vector<64x16xf32>
    %c0_29 = arith.constant 0 : index
    %c64 = arith.constant 64 : index
    %28 = vector.load %arg8[%c0_29, %c64] : memref<64x144xf32, #tpu.memory_space<vmem>>, vector<64x16xf32>
    tpu.vector_store %arg8[%c0_29, %c64], %27 {strides = array<i32>} : memref<64x144xf32, #tpu.memory_space<vmem>>, vector<64x16xf32>,
    %c1_30 = arith.constant 1 : index
    %c2_31 = arith.constant 2 : index
    %c0_32 = arith.constant 0 : index
    %29 = vector.load %arg7[%c1_30, %c2_31, %c0_32] : memref<10x10x16xf32, #tpu.memory_space<vmem>>, vector<8x8x16xf32>
    %30 = vector.shape_cast %29 : vector<8x8x16xf32> to vector<64x16xf32>
    %c0_33 = arith.constant 0 : index
    %c80 = arith.constant 80 : index
    %31 = vector.load %arg8[%c0_33, %c80] : memref<64x144xf32, #tpu.memory_space<vmem>>, vector<64x16xf32>
    tpu.vector_store %arg8[%c0_33, %c80], %30 {strides = array<i32>} : memref<64x144xf32, #tpu.memory_space<vmem>>, vector<64x16xf32>,
    %c2_34 = arith.constant 2 : index
    %c0_35 = arith.constant 0 : index
    %c0_36 = arith.constant 0 : index
    %32 = vector.load %arg7[%c2_34, %c0_35, %c0_36] : memref<10x10x16xf32, #tpu.memory_space<vmem>>, vector<8x8x16xf32>
    %33 = vector.shape_cast %32 : vector<8x8x16xf32> to vector<64x16xf32>
    %c0_37 = arith.constant 0 : index
    %c96 = arith.constant 96 : index
    %34 = vector.load %arg8[%c0_37, %c96] : memref<64x144xf32, #tpu.memory_space<vmem>>, vector<64x16xf32>
    tpu.vector_store %arg8[%c0_37, %c96], %33 {strides = array<i32>} : memref<64x144xf32, #tpu.memory_space<vmem>>, vector<64x16xf32>,
    %c2_38 = arith.constant 2 : index
    %c1_39 = arith.constant 1 : index
    %c0_40 = arith.constant 0 : index
    %35 = vector.load %arg7[%c2_38, %c1_39, %c0_40] : memref<10x10x16xf32, #tpu.memory_space<vmem>>, vector<8x8x16xf32>
    %36 = vector.shape_cast %35 : vector<8x8x16xf32> to vector<64x16xf32>
    %c0_41 = arith.constant 0 : index
    %c112 = arith.constant 112 : index
    %37 = vector.load %arg8[%c0_41, %c112] : memref<64x144xf32, #tpu.memory_space<vmem>>, vector<64x16xf32>
    tpu.vector_store %arg8[%c0_41, %c112], %36 {strides = array<i32>} : memref<64x144xf32, #tpu.memory_space<vmem>>, vector<64x16xf32>,
    %c2_42 = arith.constant 2 : index
    %c2_43 = arith.constant 2 : index
    %c0_44 = arith.constant 0 : index
    %38 = vector.load %arg7[%c2_42, %c2_43, %c0_44] : memref<10x10x16xf32, #tpu.memory_space<vmem>>, vector<8x8x16xf32>
    %39 = vector.shape_cast %38 : vector<8x8x16xf32> to vector<64x16xf32>
    %c0_45 = arith.constant 0 : index
    %c128 = arith.constant 128 : index
    %40 = vector.load %arg8[%c0_45, %c128] : memref<64x144xf32, #tpu.memory_space<vmem>>, vector<64x16xf32>
    tpu.vector_store %arg8[%c0_45, %c128], %39 {strides = array<i32>} : memref<64x144xf32, #tpu.memory_space<vmem>>, vector<64x16xf32>,
    %c0_46 = arith.constant 0 : index
    %c0_47 = arith.constant 0 : index
    %41 = vector.load %arg8[%c0_46, %c0_47] : memref<64x144xf32, #tpu.memory_space<vmem>>, vector<64x144xf32>
    %42 = arith.truncf %41 : vector<64x144xf32> to vector<64x144xbf16>
    %c0_48 = arith.constant 0 : index
    %c0_49 = arith.constant 0 : index
    %43 = vector.load %arg4[%c0_48, %c0_49] : memref<144x16xbf16, #tpu.memory_space<vmem>>, vector<144x16xbf16>
    %cst = arith.constant dense<0.000000e+00> : vector<64x16xf32>
    %44 = tpu.matmul %42, %43, %cst {dimension_numbers = #tpu.dot_dimension_numbers<[1], [0], [0], [1], [0, 0, 1, 1], [], []>} : vector<64x144xbf16>, vector<144x16xbf16>, vector<64x16xf32> -> vector<64x16xf32>
    %c0_50 = arith.constant 0 : index
    %c0_51 = arith.constant 0 : index
    %45 = vector.load %arg5[%c0_50, %c0_51] : memref<1x16xf32, #tpu.memory_space<vmem>>, vector<1x16xf32>
    %46 = vector.broadcast %45 : vector<1x16xf32> to vector<64x16xf32>
    %47 = arith.addf %44, %46 : vector<64x16xf32>
    %48 = vector.shape_cast %47 : vector<64x16xf32> to vector<8x8x16xf32>
    %c0_52 = arith.constant 0 : index
    %c0_53 = arith.constant 0 : index
    %c0_54 = arith.constant 0 : index
    %c0_55 = arith.constant 0 : index
    %49 = vector.load %arg6[%c0_52, %c0_53, %c0_54, %c0_55] : memref<1x8x8x16xf32, #tpu.memory_space<vmem>>, vector<1x8x8x16xf32>
    %50 = vector.shape_cast %49 : vector<1x8x8x16xf32> to vector<8x8x16xf32>
    %51 = vector.shape_cast %48 : vector<8x8x16xf32> to vector<1x8x8x16xf32>
    tpu.vector_store %arg6[%c0_52, %c0_53, %c0_54, %c0_55], %51 {strides = array<i32>} : memref<1x8x8x16xf32, #tpu.memory_space<vmem>>, vector<1x8x8x16xf32>,
    return
  }
  func.func @transform_0(%arg0: i32) -> (i32, i32, i32, i32) {
    %c0_i32 = arith.constant 0 : i32
    %c0_i32_0 = arith.constant 0 : i32
    %c0_i32_1 = arith.constant 0 : i32
    %c0_i32_2 = arith.constant 0 : i32
    return %arg0, %c0_i32, %c0_i32_0, %c0_i32_1 : i32, i32, i32, i32
  }
  func.func @transform_1(%arg0: i32) -> (i32, i32) {
    %c0_i32 = arith.constant 0 : i32
    %c0_i32_0 = arith.constant 0 : i32
    %c0_i32_1 = arith.constant 0 : i32
    return %c0_i32, %c0_i32_0 : i32, i32
  }
  func.func @transform_2(%arg0: i32) -> (i32, i32) {
    %c0_i32 = arith.constant 0 : i32
    %c0_i32_0 = arith.constant 0 : i32
    %c0_i32_1 = arith.constant 0 : i32
    return %c0_i32, %c0_i32_0 : i32, i32
  }
  func.func @transform_3(%arg0: i32) -> (i32, i32) {
    %c0_i32 = arith.constant 0 : i32
    %c0_i32_0 = arith.constant 0 : i32
    %c0_i32_1 = arith.constant 0 : i32
    return %c0_i32, %c0_i32_0 : i32, i32
  }
  func.func @transform_4(%arg0: i32) -> (i32, i32) {
    %c0_i32 = arith.constant 0 : i32
    %c0_i32_0 = arith.constant 0 : i32
    %c0_i32_1 = arith.constant 0 : i32
    return %c0_i32, %c0_i32_0 : i32, i32
  }
  func.func @transform_5(%arg0: i32) -> (i32, i32, i32, i32) {
    %c0_i32 = arith.constant 0 : i32
    %c0_i32_0 = arith.constant 0 : i32
    %c0_i32_1 = arith.constant 0 : i32
    %c0_i32_2 = arith.constant 0 : i32
    return %arg0, %c0_i32, %c0_i32_0, %c0_i32_1 : i32, i32, i32, i32
  }
}

module attributes {stable_mosaic.version = 11 : i64} {
  func.func @_kan_kernel(%arg0: i32, %arg1: memref<32x16xf32, #tpu.memory_space<vmem>>, %arg2: memref<32x16xf32, #tpu.memory_space<vmem>>, %arg3: memref<16x256xf32, #tpu.memory_space<vmem>>, %arg4: memref<1x256xf32, #tpu.memory_space<vmem>>, %arg5: memref<256x16xbf16, #tpu.memory_space<vmem>>, %arg6: memref<16x16xbf16, #tpu.memory_space<vmem>>, %arg7: memref<16x256xf32, #tpu.memory_space<vmem>>, %arg8: memref<1x256xf32, #tpu.memory_space<vmem>>, %arg9: memref<256x16xbf16, #tpu.memory_space<vmem>>, %arg10: memref<16x16xbf16, #tpu.memory_space<vmem>>, %arg11: memref<32x16xf32, #tpu.memory_space<vmem>>, %arg12: memref<1x1x16xf32, #tpu.memory_space<vmem>>, %arg13: memref<1x1x16xf32, #tpu.memory_space<vmem>>) attributes {dimension_semantics = [#tpu.dimension_semantics<parallel>], iteration_bounds = array<i64: 4>, scalar_prefetch = 0 : i64, scratch_operands = 0 : i64, tpu.core_type = #tpu.core_type<tc>, window_params = [{transform_indices = @transform_0, window_bounds = array<i64: 32, 16>}, {transform_indices = @transform_1, window_bounds = array<i64: 32, 16>}, {pipeline_mode = #tpu.pipeline_mode<synchronous>, transform_indices = @transform_2, window_bounds = array<i64: 16, 256>}, {pipeline_mode = #tpu.pipeline_mode<synchronous>, transform_indices = @transform_3, window_bounds = array<i64: 1, 256>}, {pipeline_mode = #tpu.pipeline_mode<synchronous>, transform_indices = @transform_4, window_bounds = array<i64: 256, 16>}, {pipeline_mode = #tpu.pipeline_mode<synchronous>, transform_indices = @transform_5, window_bounds = array<i64: 16, 16>}, {pipeline_mode = #tpu.pipeline_mode<synchronous>, transform_indices = @transform_6, window_bounds = array<i64: 16, 256>}, {pipeline_mode = #tpu.pipeline_mode<synchronous>, transform_indices = @transform_7, window_bounds = array<i64: 1, 256>}, {pipeline_mode = #tpu.pipeline_mode<synchronous>, transform_indices = @transform_8, window_bounds = array<i64: 256, 16>}, {pipeline_mode = #tpu.pipeline_mode<synchronous>, transform_indices = @transform_9, window_bounds = array<i64: 16, 16>}, {transform_indices = @transform_10, window_bounds = array<i64: 32, 16>}, {transform_indices = @transform_11, window_bounds = array<i64: 1, 1, 16>}, {transform_indices = @transform_12, window_bounds = array<i64: 1, 1, 16>}]} {
    %cst = arith.constant 0.000000e+00 : f32
    %0 = vector.broadcast %cst : f32 to vector<32x16xf32>
    %c0 = arith.constant 0 : index
    %c0_0 = arith.constant 0 : index
    %1 = vector.load %arg1[%c0, %c0_0] : memref<32x16xf32, #tpu.memory_space<vmem>>, vector<32x16xf32>
    %c0_1 = arith.constant 0 : index
    %c0_2 = arith.constant 0 : index
    %2 = vector.load %arg3[%c0_1, %c0_2] : memref<16x256xf32, #tpu.memory_space<vmem>>, vector<16x256xf32>
    %cst_3 = arith.constant dense<0.000000e+00> : vector<32x256xf32>
    %3 = tpu.matmul %1, %2, %cst_3 {dimension_numbers = #tpu.dot_dimension_numbers<[1], [0], [0], [1], [0, 0, 1, 1], [], []>} : vector<32x16xf32>, vector<16x256xf32>, vector<32x256xf32> -> vector<32x256xf32>
    %c0_4 = arith.constant 0 : index
    %c0_5 = arith.constant 0 : index
    %4 = vector.load %arg4[%c0_4, %c0_5] : memref<1x256xf32, #tpu.memory_space<vmem>>, vector<1x256xf32>
    %5 = vector.broadcast %4 : vector<1x256xf32> to vector<32x256xf32>
    %6 = arith.subf %3, %5 : vector<32x256xf32>
    %7 = arith.mulf %6, %6 : vector<32x256xf32>
    %cst_6 = arith.constant 1.000000e+00 : f32
    %8 = vector.broadcast %cst_6 : f32 to vector<32x256xf32>
    %9 = arith.subf %7, %8 : vector<32x256xf32>
    %cst_7 = arith.constant 0.867325068 : f32
    %10 = vector.broadcast %cst_7 : f32 to vector<32x256xf32>
    %11 = arith.mulf %10, %9 : vector<32x256xf32>
    %cst_8 = arith.constant -5.000000e-01 : f32
    %12 = vector.broadcast %cst_8 : f32 to vector<32x256xf32>
    %13 = arith.mulf %12, %7 : vector<32x256xf32>
    %14 = math.exp %13 : vector<32x256xf32>
    %15 = arith.mulf %11, %14 : vector<32x256xf32>
    %16 = arith.truncf %15 : vector<32x256xf32> to vector<32x256xbf16>
    %c0_9 = arith.constant 0 : index
    %c0_10 = arith.constant 0 : index
    %17 = vector.load %arg5[%c0_9, %c0_10] : memref<256x16xbf16, #tpu.memory_space<vmem>>, vector<256x16xbf16>
    %cst_11 = arith.constant dense<0.000000e+00> : vector<32x16xf32>
    %18 = tpu.matmul %16, %17, %cst_11 {dimension_numbers = #tpu.dot_dimension_numbers<[1], [0], [0], [1], [0, 0, 1, 1], [], []>} : vector<32x256xbf16>, vector<256x16xbf16>, vector<32x16xf32> -> vector<32x16xf32>
    %19 = arith.addf %0, %18 : vector<32x16xf32>
    %20 = arith.truncf %1 : vector<32x16xf32> to vector<32x16xbf16>
    %c0_12 = arith.constant 0 : index
    %c0_13 = arith.constant 0 : index
    %21 = vector.load %arg6[%c0_12, %c0_13] : memref<16x16xbf16, #tpu.memory_space<vmem>>, vector<16x16xbf16>
    %cst_14 = arith.constant dense<0.000000e+00> : vector<32x16xf32>
    %22 = tpu.matmul %20, %21, %cst_14 {dimension_numbers = #tpu.dot_dimension_numbers<[1], [0], [0], [1], [0, 0, 1, 1], [], []>} : vector<32x16xbf16>, vector<16x16xbf16>, vector<32x16xf32> -> vector<32x16xf32>
    %23 = arith.addf %19, %22 : vector<32x16xf32>
    %c0_15 = arith.constant 0 : index
    %c0_16 = arith.constant 0 : index
    %24 = vector.load %arg2[%c0_15, %c0_16] : memref<32x16xf32, #tpu.memory_space<vmem>>, vector<32x16xf32>
    %c0_17 = arith.constant 0 : index
    %c0_18 = arith.constant 0 : index
    %25 = vector.load %arg7[%c0_17, %c0_18] : memref<16x256xf32, #tpu.memory_space<vmem>>, vector<16x256xf32>
    %cst_19 = arith.constant dense<0.000000e+00> : vector<32x256xf32>
    %26 = tpu.matmul %24, %25, %cst_19 {dimension_numbers = #tpu.dot_dimension_numbers<[1], [0], [0], [1], [0, 0, 1, 1], [], []>} : vector<32x16xf32>, vector<16x256xf32>, vector<32x256xf32> -> vector<32x256xf32>
    %c0_20 = arith.constant 0 : index
    %c0_21 = arith.constant 0 : index
    %27 = vector.load %arg8[%c0_20, %c0_21] : memref<1x256xf32, #tpu.memory_space<vmem>>, vector<1x256xf32>
    %28 = vector.broadcast %27 : vector<1x256xf32> to vector<32x256xf32>
    %29 = arith.subf %26, %28 : vector<32x256xf32>
    %30 = arith.mulf %29, %29 : vector<32x256xf32>
    %cst_22 = arith.constant 1.000000e+00 : f32
    %31 = vector.broadcast %cst_22 : f32 to vector<32x256xf32>
    %32 = arith.subf %30, %31 : vector<32x256xf32>
    %cst_23 = arith.constant 0.867325068 : f32
    %33 = vector.broadcast %cst_23 : f32 to vector<32x256xf32>
    %34 = arith.mulf %33, %32 : vector<32x256xf32>
    %cst_24 = arith.constant -5.000000e-01 : f32
    %35 = vector.broadcast %cst_24 : f32 to vector<32x256xf32>
    %36 = arith.mulf %35, %30 : vector<32x256xf32>
    %37 = math.exp %36 : vector<32x256xf32>
    %38 = arith.mulf %34, %37 : vector<32x256xf32>
    %39 = arith.truncf %38 : vector<32x256xf32> to vector<32x256xbf16>
    %c0_25 = arith.constant 0 : index
    %c0_26 = arith.constant 0 : index
    %40 = vector.load %arg9[%c0_25, %c0_26] : memref<256x16xbf16, #tpu.memory_space<vmem>>, vector<256x16xbf16>
    %cst_27 = arith.constant dense<0.000000e+00> : vector<32x16xf32>
    %41 = tpu.matmul %39, %40, %cst_27 {dimension_numbers = #tpu.dot_dimension_numbers<[1], [0], [0], [1], [0, 0, 1, 1], [], []>} : vector<32x256xbf16>, vector<256x16xbf16>, vector<32x16xf32> -> vector<32x16xf32>
    %42 = arith.addf %23, %41 : vector<32x16xf32>
    %43 = arith.truncf %24 : vector<32x16xf32> to vector<32x16xbf16>
    %c0_28 = arith.constant 0 : index
    %c0_29 = arith.constant 0 : index
    %44 = vector.load %arg10[%c0_28, %c0_29] : memref<16x16xbf16, #tpu.memory_space<vmem>>, vector<16x16xbf16>
    %cst_30 = arith.constant dense<0.000000e+00> : vector<32x16xf32>
    %45 = tpu.matmul %43, %44, %cst_30 {dimension_numbers = #tpu.dot_dimension_numbers<[1], [0], [0], [1], [0, 0, 1, 1], [], []>} : vector<32x16xbf16>, vector<16x16xbf16>, vector<32x16xf32> -> vector<32x16xf32>
    %46 = arith.addf %42, %45 : vector<32x16xf32>
    %c0_31 = arith.constant 0 : index
    %c0_32 = arith.constant 0 : index
    %47 = vector.load %arg11[%c0_31, %c0_32] : memref<32x16xf32, #tpu.memory_space<vmem>>, vector<32x16xf32>
    tpu.vector_store %arg11[%c0_31, %c0_32], %46 {strides = array<i32>} : memref<32x16xf32, #tpu.memory_space<vmem>>, vector<32x16xf32>,
    %cst_33 = arith.constant dense<0.000000e+00> : vector<16xf32>
    %48 = vector.multi_reduction <add>, %46, %cst_33 [0] : vector<32x16xf32> to vector<16xf32>
    %49 = vector.shape_cast %48 : vector<16xf32> to vector<1x16xf32>
    %c0_34 = arith.constant 0 : index
    %c0_35 = arith.constant 0 : index
    %c0_36 = arith.constant 0 : index
    %50 = vector.load %arg12[%c0_34, %c0_35, %c0_36] : memref<1x1x16xf32, #tpu.memory_space<vmem>>, vector<1x1x16xf32>
    %51 = vector.shape_cast %50 : vector<1x1x16xf32> to vector<1x16xf32>
    %52 = vector.shape_cast %49 : vector<1x16xf32> to vector<1x1x16xf32>
    tpu.vector_store %arg12[%c0_34, %c0_35, %c0_36], %52 {strides = array<i32>} : memref<1x1x16xf32, #tpu.memory_space<vmem>>, vector<1x1x16xf32>,
    %cst_37 = arith.constant 3.125000e-02 : f32
    %53 = vector.broadcast %cst_37 : f32 to vector<1x16xf32>
    %54 = arith.mulf %49, %53 : vector<1x16xf32>
    %55 = vector.broadcast %54 : vector<1x16xf32> to vector<32x16xf32>
    %56 = arith.subf %46, %55 : vector<32x16xf32>
    %57 = arith.mulf %56, %56 : vector<32x16xf32>
    %cst_38 = arith.constant dense<0.000000e+00> : vector<16xf32>
    %58 = vector.multi_reduction <add>, %57, %cst_38 [0] : vector<32x16xf32> to vector<16xf32>
    %59 = vector.shape_cast %58 : vector<16xf32> to vector<1x16xf32>
    %c0_39 = arith.constant 0 : index
    %c0_40 = arith.constant 0 : index
    %c0_41 = arith.constant 0 : index
    %60 = vector.load %arg13[%c0_39, %c0_40, %c0_41] : memref<1x1x16xf32, #tpu.memory_space<vmem>>, vector<1x1x16xf32>
    %61 = vector.shape_cast %60 : vector<1x1x16xf32> to vector<1x16xf32>
    %62 = vector.shape_cast %59 : vector<1x16xf32> to vector<1x1x16xf32>
    tpu.vector_store %arg13[%c0_39, %c0_40, %c0_41], %62 {strides = array<i32>} : memref<1x1x16xf32, #tpu.memory_space<vmem>>, vector<1x1x16xf32>,
    return
  }
  func.func @transform_0(%arg0: i32) -> (i32, i32) {
    %c0_i32 = arith.constant 0 : i32
    %c0_i32_0 = arith.constant 0 : i32
    return %arg0, %c0_i32 : i32, i32
  }
  func.func @transform_1(%arg0: i32) -> (i32, i32) {
    %c0_i32 = arith.constant 0 : i32
    %c0_i32_0 = arith.constant 0 : i32
    return %arg0, %c0_i32 : i32, i32
  }
  func.func @transform_2(%arg0: i32) -> (i32, i32) {
    %c0_i32 = arith.constant 0 : i32
    %c0_i32_0 = arith.constant 0 : i32
    %c0_i32_1 = arith.constant 0 : i32
    return %c0_i32, %c0_i32_0 : i32, i32
  }
  func.func @transform_3(%arg0: i32) -> (i32, i32) {
    %c0_i32 = arith.constant 0 : i32
    %c0_i32_0 = arith.constant 0 : i32
    %c0_i32_1 = arith.constant 0 : i32
    return %c0_i32, %c0_i32_0 : i32, i32
  }
  func.func @transform_4(%arg0: i32) -> (i32, i32) {
    %c0_i32 = arith.constant 0 : i32
    %c0_i32_0 = arith.constant 0 : i32
    %c0_i32_1 = arith.constant 0 : i32
    return %c0_i32, %c0_i32_0 : i32, i32
  }
  func.func @transform_5(%arg0: i32) -> (i32, i32) {
    %c0_i32 = arith.constant 0 : i32
    %c0_i32_0 = arith.constant 0 : i32
    %c0_i32_1 = arith.constant 0 : i32
    return %c0_i32, %c0_i32_0 : i32, i32
  }
  func.func @transform_6(%arg0: i32) -> (i32, i32) {
    %c0_i32 = arith.constant 0 : i32
    %c0_i32_0 = arith.constant 0 : i32
    %c0_i32_1 = arith.constant 0 : i32
    return %c0_i32, %c0_i32_0 : i32, i32
  }
  func.func @transform_7(%arg0: i32) -> (i32, i32) {
    %c0_i32 = arith.constant 0 : i32
    %c0_i32_0 = arith.constant 0 : i32
    %c0_i32_1 = arith.constant 0 : i32
    return %c0_i32, %c0_i32_0 : i32, i32
  }
  func.func @transform_8(%arg0: i32) -> (i32, i32) {
    %c0_i32 = arith.constant 0 : i32
    %c0_i32_0 = arith.constant 0 : i32
    %c0_i32_1 = arith.constant 0 : i32
    return %c0_i32, %c0_i32_0 : i32, i32
  }
  func.func @transform_9(%arg0: i32) -> (i32, i32) {
    %c0_i32 = arith.constant 0 : i32
    %c0_i32_0 = arith.constant 0 : i32
    %c0_i32_1 = arith.constant 0 : i32
    return %c0_i32, %c0_i32_0 : i32, i32
  }
  func.func @transform_10(%arg0: i32) -> (i32, i32) {
    %c0_i32 = arith.constant 0 : i32
    %c0_i32_0 = arith.constant 0 : i32
    return %arg0, %c0_i32 : i32, i32
  }
  func.func @transform_11(%arg0: i32) -> (i32, i32, i32) {
    %c0_i32 = arith.constant 0 : i32
    %c0_i32_0 = arith.constant 0 : i32
    %c0_i32_1 = arith.constant 0 : i32
    return %arg0, %c0_i32, %c0_i32_0 : i32, i32, i32
  }
  func.func @transform_12(%arg0: i32) -> (i32, i32, i32) {
    %c0_i32 = arith.constant 0 : i32
    %c0_i32_0 = arith.constant 0 : i32
    %c0_i32_1 = arith.constant 0 : i32
    return %arg0, %c0_i32, %c0_i32_0 : i32, i32, i32
  }
}

module attributes {stable_mosaic.version = 11 : i64} {
  func.func @_conv3x3_kernel(%arg0: i32, %arg1: memref<1x8x8x16xf32, #tpu.memory_space<vmem>>, %arg2: memref<1x16xf32, #tpu.memory_space<vmem>>, %arg3: memref<1x16xf32, #tpu.memory_space<vmem>>, %arg4: memref<144x16xbf16, #tpu.memory_space<vmem>>, %arg5: memref<1x16xf32, #tpu.memory_space<vmem>>, %arg6: memref<1x8x8x16xf32, #tpu.memory_space<vmem>>, %arg7: memref<10x10x16xf32, #tpu.memory_space<vmem>>, %arg8: memref<64x144xf32, #tpu.memory_space<vmem>>) attributes {dimension_semantics = [#tpu.dimension_semantics<arbitrary>], iteration_bounds = array<i64: 2>, scalar_prefetch = 0 : i64, scratch_operands = 2 : i64, tpu.core_type = #tpu.core_type<tc>, window_params = [{transform_indices = @transform_0, window_bounds = array<i64: 1, 8, 8, 16>}, {pipeline_mode = #tpu.pipeline_mode<synchronous>, transform_indices = @transform_1, window_bounds = array<i64: 1, 16>}, {pipeline_mode = #tpu.pipeline_mode<synchronous>, transform_indices = @transform_2, window_bounds = array<i64: 1, 16>}, {pipeline_mode = #tpu.pipeline_mode<synchronous>, transform_indices = @transform_3, window_bounds = array<i64: 144, 16>}, {pipeline_mode = #tpu.pipeline_mode<synchronous>, transform_indices = @transform_4, window_bounds = array<i64: 1, 16>}, {transform_indices = @transform_5, window_bounds = array<i64: 1, 8, 8, 16>}]} {
    %c0_i32 = arith.constant 0 : i32
    %0 = arith.cmpi eq, %arg0, %c0_i32 : i32
    %1 = arith.extui %0 : i1 to i32
    %c0_i32_0 = arith.constant 0 : i32
    %2 = arith.cmpi ne, %1, %c0_i32_0 : i32
    scf.if %2 {
      %cst_58 = arith.constant 0.000000e+00 : f32
      %57 = vector.broadcast %cst_58 : f32 to vector<10x10x16xf32>
      %c0_59 = arith.constant 0 : index
      %c0_60 = arith.constant 0 : index
      %c0_61 = arith.constant 0 : index
      %58 = vector.load %arg7[%c0_59, %c0_60, %c0_61] : memref<10x10x16xf32, #tpu.memory_space<vmem>>, vector<10x10x16xf32>
      tpu.vector_store %arg7[%c0_59, %c0_60, %c0_61], %57 {strides = array<i32>} : memref<10x10x16xf32, #tpu.memory_space<vmem>>, vector<10x10x16xf32>,
    } else {
    }
    %c0 = arith.constant 0 : index
    %c0_1 = arith.constant 0 : index
    %c0_2 = arith.constant 0 : index
    %c0_3 = arith.constant 0 : index
    %3 = vector.load %arg1[%c0, %c0_1, %c0_2, %c0_3] : memref<1x8x8x16xf32, #tpu.memory_space<vmem>>, vector<1x8x8x16xf32>
    %4 = vector.shape_cast %3 : vector<1x8x8x16xf32> to vector<8x8x16xf32>
    %c0_4 = arith.constant 0 : index
    %c0_5 = arith.constant 0 : index
    %5 = vector.load %arg2[%c0_4, %c0_5] : memref<1x16xf32, #tpu.memory_space<vmem>>, vector<1x16xf32>
    %6 = vector.shape_cast %5 : vector<1x16xf32> to vector<1x1x16xf32>
    %7 = vector.broadcast %6 : vector<1x1x16xf32> to vector<8x8x16xf32>
    %8 = arith.mulf %4, %7 : vector<8x8x16xf32>
    %c0_6 = arith.constant 0 : index
    %c0_7 = arith.constant 0 : index
    %9 = vector.load %arg3[%c0_6, %c0_7] : memref<1x16xf32, #tpu.memory_space<vmem>>, vector<1x16xf32>
    %10 = vector.shape_cast %9 : vector<1x16xf32> to vector<1x1x16xf32>
    %11 = vector.broadcast %10 : vector<1x1x16xf32> to vector<8x8x16xf32>
    %12 = arith.addf %8, %11 : vector<8x8x16xf32>
    %c1 = arith.constant 1 : index
    %c1_8 = arith.constant 1 : index
    %c0_9 = arith.constant 0 : index
    %13 = vector.load %arg7[%c1, %c1_8, %c0_9] : memref<10x10x16xf32, #tpu.memory_space<vmem>>, vector<8x8x16xf32>
    tpu.vector_store %arg7[%c1, %c1_8, %c0_9], %12 {strides = array<i32>} : memref<10x10x16xf32, #tpu.memory_space<vmem>>, vector<8x8x16xf32>,
    %c0_10 = arith.constant 0 : index
    %c0_11 = arith.constant 0 : index
    %c0_12 = arith.constant 0 : index
    %14 = vector.load %arg7[%c0_10, %c0_11, %c0_12] : memref<10x10x16xf32, #tpu.memory_space<vmem>>, vector<8x8x16xf32>
    %15 = vector.shape_cast %14 : vector<8x8x16xf32> to vector<64x16xf32>
    %c0_13 = arith.constant 0 : index
    %c0_14 = arith.constant 0 : index
    %16 = vector.load %arg8[%c0_13, %c0_14] : memref<64x144xf32, #tpu.memory_space<vmem>>, vector<64x16xf32>
    tpu.vector_store %arg8[%c0_13, %c0_14], %15 {strides = array<i32>} : memref<64x144xf32, #tpu.memory_space<vmem>>, vector<64x16xf32>,
    %c0_15 = arith.constant 0 : index
    %c1_16 = arith.constant 1 : index
    %c0_17 = arith.constant 0 : index
    %17 = vector.load %arg7[%c0_15, %c1_16, %c0_17] : memref<10x10x16xf32, #tpu.memory_space<vmem>>, vector<8x8x16xf32>
    %18 = vector.shape_cast %17 : vector<8x8x16xf32> to vector<64x16xf32>
    %c0_18 = arith.constant 0 : index
    %c16 = arith.constant 16 : index
    %19 = vector.load %arg8[%c0_18, %c16] : memref<64x144xf32, #tpu.memory_space<vmem>>, vector<64x16xf32>
    tpu.vector_store %arg8[%c0_18, %c16], %18 {strides = array<i32>} : memref<64x144xf32, #tpu.memory_space<vmem>>, vector<64x16xf32>,
    %c0_19 = arith.constant 0 : index
    %c2 = arith.constant 2 : index
    %c0_20 = arith.constant 0 : index
    %20 = vector.load %arg7[%c0_19, %c2, %c0_20] : memref<10x10x16xf32, #tpu.memory_space<vmem>>, vector<8x8x16xf32>
    %21 = vector.shape_cast %20 : vector<8x8x16xf32> to vector<64x16xf32>
    %c0_21 = arith.constant 0 : index
    %c32 = arith.constant 32 : index
    %22 = vector.load %arg8[%c0_21, %c32] : memref<64x144xf32, #tpu.memory_space<vmem>>, vector<64x16xf32>
    tpu.vector_store %arg8[%c0_21, %c32], %21 {strides = array<i32>} : memref<64x144xf32, #tpu.memory_space<vmem>>, vector<64x16xf32>,
    %c1_22 = arith.constant 1 : index
    %c0_23 = arith.constant 0 : index
    %c0_24 = arith.constant 0 : index
    %23 = vector.load %arg7[%c1_22, %c0_23, %c0_24] : memref<10x10x16xf32, #tpu.memory_space<vmem>>, vector<8x8x16xf32>
    %24 = vector.shape_cast %23 : vector<8x8x16xf32> to vector<64x16xf32>
    %c0_25 = arith.constant 0 : index
    %c48 = arith.constant 48 : index
    %25 = vector.load %arg8[%c0_25, %c48] : memref<64x144xf32, #tpu.memory_space<vmem>>, vector<64x16xf32>
    tpu.vector_store %arg8[%c0_25, %c48], %24 {strides = array<i32>} : memref<64x144xf32, #tpu.memory_space<vmem>>, vector<64x16xf32>,
    %c1_26 = arith.constant 1 : index
    %c1_27 = arith.constant 1 : index
    %c0_28 = arith.constant 0 : index
    %26 = vector.load %arg7[%c1_26, %c1_27, %c0_28] : memref<10x10x16xf32, #tpu.memory_space<vmem>>, vector<8x8x16xf32>
    %27 = vector.shape_cast %26 : vector<8x8x16xf32> to vector<64x16xf32>
    %c0_29 = arith.constant 0 : index
    %c64 = arith.constant 64 : index
    %28 = vector.load %arg8[%c0_29, %c64] : memref<64x144xf32, #tpu.memory_space<vmem>>, vector<64x16xf32>
    tpu.vector_store %arg8[%c0_29, %c64], %27 {strides = array<i32>} : memref<64x144xf32, #tpu.memory_space<vmem>>, vector<64x16xf32>,
    %c1_30 = arith.constant 1 : index
    %c2_31 = arith.constant 2 : index
    %c0_32 = arith.constant 0 : index
    %29 = vector.load %arg7[%c1_30, %c2_31, %c0_32] : memref<10x10x16xf32, #tpu.memory_space<vmem>>, vector<8x8x16xf32>
    %30 = vector.shape_cast %29 : vector<8x8x16xf32> to vector<64x16xf32>
    %c0_33 = arith.constant 0 : index
    %c80 = arith.constant 80 : index
    %31 = vector.load %arg8[%c0_33, %c80] : memref<64x144xf32, #tpu.memory_space<vmem>>, vector<64x16xf32>
    tpu.vector_store %arg8[%c0_33, %c80], %30 {strides = array<i32>} : memref<64x144xf32, #tpu.memory_space<vmem>>, vector<64x16xf32>,
    %c2_34 = arith.constant 2 : index
    %c0_35 = arith.constant 0 : index
    %c0_36 = arith.constant 0 : index
    %32 = vector.load %arg7[%c2_34, %c0_35, %c0_36] : memref<10x10x16xf32, #tpu.memory_space<vmem>>, vector<8x8x16xf32>
    %33 = vector.shape_cast %32 : vector<8x8x16xf32> to vector<64x16xf32>
    %c0_37 = arith.constant 0 : index
    %c96 = arith.constant 96 : index
    %34 = vector.load %arg8[%c0_37, %c96] : memref<64x144xf32, #tpu.memory_space<vmem>>, vector<64x16xf32>
    tpu.vector_store %arg8[%c0_37, %c96], %33 {strides = array<i32>} : memref<64x144xf32, #tpu.memory_space<vmem>>, vector<64x16xf32>,
    %c2_38 = arith.constant 2 : index
    %c1_39 = arith.constant 1 : index
    %c0_40 = arith.constant 0 : index
    %35 = vector.load %arg7[%c2_38, %c1_39, %c0_40] : memref<10x10x16xf32, #tpu.memory_space<vmem>>, vector<8x8x16xf32>
    %36 = vector.shape_cast %35 : vector<8x8x16xf32> to vector<64x16xf32>
    %c0_41 = arith.constant 0 : index
    %c112 = arith.constant 112 : index
    %37 = vector.load %arg8[%c0_41, %c112] : memref<64x144xf32, #tpu.memory_space<vmem>>, vector<64x16xf32>
    tpu.vector_store %arg8[%c0_41, %c112], %36 {strides = array<i32>} : memref<64x144xf32, #tpu.memory_space<vmem>>, vector<64x16xf32>,
    %c2_42 = arith.constant 2 : index
    %c2_43 = arith.constant 2 : index
    %c0_44 = arith.constant 0 : index
    %38 = vector.load %arg7[%c2_42, %c2_43, %c0_44] : memref<10x10x16xf32, #tpu.memory_space<vmem>>, vector<8x8x16xf32>
    %39 = vector.shape_cast %38 : vector<8x8x16xf32> to vector<64x16xf32>
    %c0_45 = arith.constant 0 : index
    %c128 = arith.constant 128 : index
    %40 = vector.load %arg8[%c0_45, %c128] : memref<64x144xf32, #tpu.memory_space<vmem>>, vector<64x16xf32>
    tpu.vector_store %arg8[%c0_45, %c128], %39 {strides = array<i32>} : memref<64x144xf32, #tpu.memory_space<vmem>>, vector<64x16xf32>,
    %c0_46 = arith.constant 0 : index
    %c0_47 = arith.constant 0 : index
    %41 = vector.load %arg8[%c0_46, %c0_47] : memref<64x144xf32, #tpu.memory_space<vmem>>, vector<64x144xf32>
    %42 = arith.truncf %41 : vector<64x144xf32> to vector<64x144xbf16>
    %c0_48 = arith.constant 0 : index
    %c0_49 = arith.constant 0 : index
    %43 = vector.load %arg4[%c0_48, %c0_49] : memref<144x16xbf16, #tpu.memory_space<vmem>>, vector<144x16xbf16>
    %cst = arith.constant dense<0.000000e+00> : vector<64x16xf32>
    %44 = tpu.matmul %42, %43, %cst {dimension_numbers = #tpu.dot_dimension_numbers<[1], [0], [0], [1], [0, 0, 1, 1], [], []>} : vector<64x144xbf16>, vector<144x16xbf16>, vector<64x16xf32> -> vector<64x16xf32>
    %c0_50 = arith.constant 0 : index
    %c0_51 = arith.constant 0 : index
    %45 = vector.load %arg5[%c0_50, %c0_51] : memref<1x16xf32, #tpu.memory_space<vmem>>, vector<1x16xf32>
    %46 = vector.broadcast %45 : vector<1x16xf32> to vector<64x16xf32>
    %47 = arith.addf %44, %46 : vector<64x16xf32>
    %cst_52 = arith.constant 0.000000e+00 : f32
    %48 = vector.broadcast %cst_52 : f32 to vector<64x16xf32>
    %49 = arith.cmpf oge, %47, %48 : vector<64x16xf32>
    %cst_53 = arith.constant 2.000000e-01 : f32
    %50 = vector.broadcast %cst_53 : f32 to vector<64x16xf32>
    %51 = arith.mulf %50, %47 : vector<64x16xf32>
    %52 = arith.select %49, %47, %51 : vector<64x16xi1>, vector<64x16xf32>
    %53 = vector.shape_cast %52 : vector<64x16xf32> to vector<8x8x16xf32>
    %c0_54 = arith.constant 0 : index
    %c0_55 = arith.constant 0 : index
    %c0_56 = arith.constant 0 : index
    %c0_57 = arith.constant 0 : index
    %54 = vector.load %arg6[%c0_54, %c0_55, %c0_56, %c0_57] : memref<1x8x8x16xf32, #tpu.memory_space<vmem>>, vector<1x8x8x16xf32>
    %55 = vector.shape_cast %54 : vector<1x8x8x16xf32> to vector<8x8x16xf32>
    %56 = vector.shape_cast %53 : vector<8x8x16xf32> to vector<1x8x8x16xf32>
    tpu.vector_store %arg6[%c0_54, %c0_55, %c0_56, %c0_57], %56 {strides = array<i32>} : memref<1x8x8x16xf32, #tpu.memory_space<vmem>>, vector<1x8x8x16xf32>,
    return
  }
  func.func @transform_0(%arg0: i32) -> (i32, i32, i32, i32) {
    %c0_i32 = arith.constant 0 : i32
    %c0_i32_0 = arith.constant 0 : i32
    %c0_i32_1 = arith.constant 0 : i32
    %c0_i32_2 = arith.constant 0 : i32
    return %arg0, %c0_i32, %c0_i32_0, %c0_i32_1 : i32, i32, i32, i32
  }
  func.func @transform_1(%arg0: i32) -> (i32, i32) {
    %c0_i32 = arith.constant 0 : i32
    %c0_i32_0 = arith.constant 0 : i32
    %c0_i32_1 = arith.constant 0 : i32
    return %c0_i32, %c0_i32_0 : i32, i32
  }
  func.func @transform_2(%arg0: i32) -> (i32, i32) {
    %c0_i32 = arith.constant 0 : i32
    %c0_i32_0 = arith.constant 0 : i32
    %c0_i32_1 = arith.constant 0 : i32
    return %c0_i32, %c0_i32_0 : i32, i32
  }
  func.func @transform_3(%arg0: i32) -> (i32, i32) {
    %c0_i32 = arith.constant 0 : i32
    %c0_i32_0 = arith.constant 0 : i32
    %c0_i32_1 = arith.constant 0 : i32
    return %c0_i32, %c0_i32_0 : i32, i32
  }
  func.func @transform_4(%arg0: i32) -> (i32, i32) {
    %c0_i32 = arith.constant 0 : i32
    %c0_i32_0 = arith.constant 0 : i32
    %c0_i32_1 = arith.constant 0 : i32
    return %c0_i32, %c0_i32_0 : i32, i32
  }
  func.func @transform_5(%arg0: i32) -> (i32, i32, i32, i32) {
    %c0_i32 = arith.constant 0 : i32
    %c0_i32_0 = arith.constant 0 : i32
    %c0_i32_1 = arith.constant 0 : i32
    %c0_i32_2 = arith.constant 0 : i32
    return %arg0, %c0_i32, %c0_i32_0, %c0_i32_1 : i32, i32, i32, i32
  }
}

</mosaic_0001>

<bundles_post_ra>
// kernel: kan_conv_transformer.14
= control target key start
LH: loop header
LB: loop body
LE: loop exit
PB: predicated region body
PF: predicated region fallthrough
CT: control target
= control target key end

     0   :  { %s747_s18 = smov 0   ;;  %s946_s0 = inlined_call_operand.vmem [shape: f32[2,8,8,48], index: 0, kind: input, shape index: {}]   ;;  %s947_s1 = inlined_call_operand.vmem [shape: f32[1,48], index: 1, kind: input, shape index: {}]   ;;  %s948_s2 = inlined_call_operand.vmem [shape: f32[1,48], index: 2, kind: input, shape index: {}]   ;;  %s949_s3 = inlined_call_operand.vmem [shape: f32[3,3,1,48], index: 3, kind: input, shape index: {}]   ;;  %s950_s4 = inlined_call_operand.vmem [shape: f32[1,48], index: 4, kind: input, shape index: {}]   ;;  %s951_s5 = inlined_call_operand.vmem [shape: f32[2,8,8,48], index: 5, kind: output, shape index: {}]  }
   0x1 LB: > { %s665_s19 = sadd.s32 4294967295, %s714_s18   ;;  %p669_p0 = scmp.ge.s32.totalorder %s714_s18, 1  ;;  %s714_s18 = sphi %s747_s18, %s15_s18  }
   0x2   : > { %p187_p1 = scmp.lt.s32.totalorder %s714_s18, 3 }
   0x4   : > { %p188_p2 = pnand %p669_p0, %p187_p1 }
   0x5   : > { %p215_p3 = scmp.lt.s32.totalorder (!%p188_p2), %s665_s19, 1  ;;  %p674_p4 = scmp.ne.s32.totalorder (!%p188_p2), %s665_s19, 0 }
   0x6   : > { %191 = sbr.rel (%p188_p2) target bundleno = 85 (0x55), region = 40 }
   0xd   : > { %s216_s20 = scalar_select %p215_p3, %s665_s19, 1 }
   0xe   : > { %228 = sbr.rel (%p674_p4) target bundleno = 25 (0x19), region = 44  ;;  %vm229_vm0 = vcmask (!%p674_p4), 392192   ;;  %vm231_vm1 = vcmask (!%p674_p4), 386048   ;;  %v716_v0 = vmov (!%p674_p4), 0.0  }
   0xf   : > { %s697_s21 = sshll.u32 %s216_s20, 6  ;;  %230 = vst.msk [vmem:[#allocation2] sm:$0xff] (!%p674_p4), %vm229_vm0, %v716_v0  ;;  %233 = vst.msk [vmem:[#allocation2 + $0x10] sm:$0xff] (!%p674_p4), %vm229_vm0, %v716_v0 }
  0x10   : > { %s758_s24 = scalar_lea.vmem %s946_s0, %s697_s21  ;;  %s763_s27 = scalar_lea.vmem %s951_s5, %s697_s21  ;;  %235 = vst.msk [vmem:[#allocation2 + $0x20] sm:$0xff] (!%p674_p4), %vm229_vm0, %v716_v0  ;;  %237 = vst.msk [vmem:[#allocation2 + $0x30] sm:$0xff] (!%p674_p4), %vm229_vm0, %v716_v0 }
  0x11   : > { %239 = vst.msk [vmem:[#allocation2 + $0x40] sm:$0xff] (!%p674_p4), %vm229_vm0, %v716_v0  ;;  %241 = vst.msk [vmem:[#allocation2 + $0x50] sm:$0xff] (!%p674_p4), %vm229_vm0, %v716_v0 }
  0x12   : > { %243 = vst.msk [vmem:[#allocation2 + $0x60] sm:$0xff] (!%p674_p4), %vm229_vm0, %v716_v0  ;;  %245 = vst.msk [vmem:[#allocation2 + $0x70] sm:$0xff] (!%p674_p4), %vm229_vm0, %v716_v0 }
  0x13   : > { %247 = vst.msk [vmem:[#allocation2 + $0x80] sm:$0xff] (!%p674_p4), %vm229_vm0, %v716_v0  ;;  %249 = vst.msk [vmem:[#allocation2 + $0x90] sm:$0xff] (!%p674_p4), %vm229_vm0, %v716_v0 }
  0x14   : > { %232 = vst.msk [vmem:[#allocation2 + $0x8] sm:$0x3] (!%p674_p4), %vm231_vm1, %v716_v0  ;;  %234 = vst.msk [vmem:[#allocation2 + $0x18] sm:$0x3] (!%p674_p4), %vm231_vm1, %v716_v0 }
  0x15   : > { %236 = vst.msk [vmem:[#allocation2 + $0x28] sm:$0x3] %vm231_vm1, %v716_v0  ;;  %238 = vst.msk [vmem:[#allocation2 + $0x38] sm:$0x3] %vm231_vm1, %v716_v0 }
  0x16   : > { %240 = vst.msk [vmem:[#allocation2 + $0x48] sm:$0x3] %vm231_vm1, %v716_v0  ;;  %242 = vst.msk [vmem:[#allocation2 + $0x58] sm:$0x3] %vm231_vm1, %v716_v0 }
  0x17   : > { %244 = vst.msk [vmem:[#allocation2 + $0x68] sm:$0x3] %vm231_vm1, %v716_v0  ;;  %246 = vst.msk [vmem:[#allocation2 + $0x78] sm:$0x3] %vm231_vm1, %v716_v0 }
  0x18   : > { %248 = vst.msk [vmem:[#allocation2 + $0x88] sm:$0x3] %vm231_vm1, %v716_v0  ;;  %250 = vst.msk [vmem:[#allocation2 + $0x98] sm:$0x3] %vm231_vm1, %v716_v0 }
  0x19 PF: > { %v251_v1 = vld [vmem:[%s758_s24] sm:$0xff]  ;;  %v252_v5 = vld [vmem:[%s758_s24 + $0x8] sm:$0xff]  ;;  %v253_v6 = vld [vmem:[%s758_s24 + $0x10] sm:$0xff]  ;;  %vm290_vm2 = vcmask 392192  }
  0x1a   : > { %v675_v2 = vld [vmem:[%s947_s1] ss:$0 sm:$0xff]  ;;  %v254_v7 = vld [vmem:[%s758_s24 + $0x18] sm:$0xff]  ;;  %v256_v12 = vld [vmem:[%s758_s24 + $0x28] sm:$0xff] }
  0x1b   : > { %v676_v3 = vld [vmem:[%s948_s2] ss:$0 sm:$0xff]  ;;  %v266_v4 = vmul.f32 %v675_v2, %v251_v1  ;;  %v267_v8 = vmul.f32 %v675_v2, %v252_v5  ;;  %v268_v9 = vmul.f32 %v675_v2, %v253_v6  ;;  %v269_v10 = vmul.f32 %v675_v2, %v254_v7  ;;  %v257_v13 = vld [vmem:[%s758_s24 + $0x30] sm:$0xff]  ;;  %v258_v18 = vld [vmem:[%s758_s24 + $0x38] sm:$0xff] }
  0x1c   : > { %v255_v11 = vld [vmem:[%s758_s24 + $0x20] sm:$0xff]  ;;  %v271_v16 = vmul.f32 %v675_v2, %v256_v12  ;;  %v272_v17 = vmul.f32 %v675_v2, %v257_v13  ;;  %v273_v24 = vmul.f32 %v675_v2, %v258_v18  ;;  %v847_v54 = vld [vmem:[%s949_s3 + $0x8] ss:$0 sm:$0xff] }
  0x1d   : > { %v281_v14 = vadd.f32 %v676_v3, %v266_v4  ;;  %v270_v15 = vmul.f32 %v675_v2, %v255_v11  ;;  %v299_v19 = vld [vmem:[#allocation2] sm:$0xff]  ;;  %v282_v21 = vadd.f32 %v676_v3, %v267_v8  ;;  %v283_v22 = vadd.f32 %v676_v3, %v268_v9 }
  0x1e   : > { %v792_v20 = vld [vmem:[%s949_s3] ss:$0 sm:$0xff]  ;;  %v284_v23 = vadd.f32 %v676_v3, %v269_v10  ;;  %v797_v26 = vld [vmem:[%s949_s3 + $0x1] ss:$0 sm:$0xff]  ;;  %v286_v29 = vadd.f32 %v676_v3, %v271_v16  ;;  %v287_v30 = vadd.f32 %v676_v3, %v272_v17  ;;  %v804_v32 = vld [vmem:[%s949_s3 + $0x2] ss:$0 sm:$0xff]  ;;  %v288_v33 = vadd.f32 %v676_v3, %v273_v24 }
  0x1f   : > { %v330_v25 = vld [vmem:[#allocation2 + $0x1] sm:$0xff]  ;;  %291 = vst.msk [vmem:[#allocation2 + $0x11] sm:$0xff] %vm290_vm2, %v281_v14  ;;  %v285_v28 = vadd.f32 %v676_v3, %v270_v15  ;;  %v314_v31 = vmul.f32 %v792_v20, %v299_v19  ;;  %292 = vst.msk [vmem:[#allocation2 + $0x21] sm:$0xff] %vm290_vm2, %v282_v21 }
  0x20   : > { %v362_v27 = vld [vmem:[#allocation2 + $0x2] sm:$0xff]  ;;  %293 = vst.msk [vmem:[#allocation2 + $0x31] sm:$0xff] %vm290_vm2, %v283_v22  ;;  %294 = vst.msk [vmem:[#allocation2 + $0x41] sm:$0xff] %vm290_vm2, %v284_v23  ;;  %v346_v34 = vmul.f32 %v797_v26, %v330_v25 }
  0x21   : > { %295 = vst.msk [vmem:[#allocation2 + $0x51] sm:$0xff] %vm290_vm2, %v285_v28  ;;  %296 = vst.msk [vmem:[#allocation2 + $0x61] sm:$0xff] %vm290_vm2, %v286_v29  ;;  %v378_v35 = vmul.f32 %v804_v32, %v362_v27  ;;  %v818_v37 = vld [vmem:[%s949_s3 + $0x3] ss:$0 sm:$0xff]  ;;  %v823_v39 = vld [vmem:[%s949_s3 + $0x4] ss:$0 sm:$0xff] }
  0x22   : > { %297 = vst.msk [vmem:[#allocation2 + $0x71] sm:$0xff] %vm290_vm2, %v287_v30  ;;  %298 = vst.msk [vmem:[#allocation2 + $0x81] sm:$0xff] %vm290_vm2, %v288_v33  ;;  %v354_v36 = vadd.f32 %v346_v34, %v314_v31  ;;  %v828_v42 = vld [vmem:[%s949_s3 + $0x5] ss:$0 sm:$0xff]  ;;  %v834_v46 = vld [vmem:[%s949_s3 + $0x6] ss:$0 sm:$0xff] }
  0x23   : > { %v840_v49 = vld [vmem:[%s949_s3 + $0x7] ss:$0 sm:$0xff]  ;;  %v872_v31 = vld [vmem:[%s950_s4] ss:$0 sm:$0xff] }
  0x24   : > { %v386_v38 = vadd.f32 %v378_v35, %v354_v36 }
  0x26   : > { %v394_v40 = vld [vmem:[#allocation2 + $0x10] sm:$0xff]  ;;  %v491_v45 = vld [vmem:[#allocation2 + $0x20] sm:$0xff] }
  0x27   : > { %v426_v41 = vld [vmem:[#allocation2 + $0x11] sm:$0xff]  ;;  %v410_v43 = vmul.f32 %v818_v37, %v394_v40  ;;  %v315_v47 = vmul.f32 %v792_v20, %v394_v40  ;;  %v523_v48 = vld [vmem:[#allocation2 + $0x21] sm:$0xff]  ;;  %v507_v56 = vmul.f32 %v834_v46, %v491_v45  ;;  %v316_v63 = vmul.f32 %v792_v20, %v491_v45 }
  0x28   : > { %v458_v44 = vld [vmem:[#allocation2 + $0x12] sm:$0xff]  ;;  %v347_v50 = vmul.f32 %v797_v26, %v426_v41  ;;  %v442_v52 = vmul.f32 %v823_v39, %v426_v41  ;;  %v555_v53 = vld [vmem:[#allocation2 + $0x22] sm:$0xff]  ;;  %v539_v60 = vmul.f32 %v840_v49, %v523_v48  ;;  %v348_v0 = vmul.f32 %v797_v26, %v523_v48 }
  0x29   : > { %v418_v51 = vadd.f32 %v410_v43, %v386_v38  ;;  %v474_v55 = vmul.f32 %v828_v42, %v458_v44  ;;  %v379_v58 = vmul.f32 %v804_v32, %v458_v44  ;;  %v492_v61 = vld [vmem:[#allocation2 + $0x30] sm:$0xff]  ;;  %v571_v1 = vmul.f32 %v847_v54, %v555_v53  ;;  %v493_v17 = vld [vmem:[#allocation2 + $0x40] sm:$0xff] }
  0x2a   : > { %v355_v57 = vadd.f32 %v347_v50, %v315_v47  ;;  %v524_v62 = vld [vmem:[#allocation2 + $0x31] sm:$0xff]  ;;  %v411_v3 = vmul.f32 %v818_v37, %v491_v45  ;;  %v443_v4 = vmul.f32 %v823_v39, %v523_v48  ;;  %v475_v6 = vmul.f32 %v828_v42, %v555_v53  ;;  %v525_v24 = vld [vmem:[#allocation2 + $0x41] sm:$0xff] }
  0x2b   : > { %v450_v59 = vadd.f32 %v442_v52, %v418_v51  ;;  %v556_v7 = vld [vmem:[#allocation2 + $0x32] sm:$0xff]  ;;  %v356_v8 = vadd.f32 %v348_v0, %v316_v63  ;;  %v380_v9 = vmul.f32 %v804_v32, %v555_v53  ;;  %v508_v11 = vmul.f32 %v834_v46, %v492_v61  ;;  %v557_v28 = vld [vmem:[#allocation2 + $0x42] sm:$0xff] }
  0x2c   : > { %v387_v2 = vadd.f32 %v379_v58, %v355_v57  ;;  %v540_v12 = vmul.f32 %v840_v49, %v524_v62  ;;  %v317_v13 = vmul.f32 %v792_v20, %v492_v61  ;;  %v412_v16 = vmul.f32 %v818_v37, %v492_v61  ;;  %v494_v43 = vld [vmem:[#allocation2 + $0x50] sm:$0xff] }
  0x2d   : > { %v482_v5 = vadd.f32 %v474_v55, %v450_v59  ;;  %v388_v15 = vadd.f32 %v380_v9, %v356_v8  ;;  %v349_v18 = vmul.f32 %v797_v26, %v524_v62  ;;  %v572_v21 = vmul.f32 %v847_v54, %v556_v7  ;;  %v526_v55 = vld [vmem:[#allocation2 + $0x51] sm:$0xff] }
  0x2e   : > { %v419_v10 = vadd.f32 %v411_v3, %v387_v2  ;;  %v444_v22 = vmul.f32 %v823_v39, %v524_v62  ;;  %v476_v23 = vmul.f32 %v828_v42, %v556_v7  ;;  %v381_v30 = vmul.f32 %v804_v32, %v556_v7  ;;  %v558_v63 = vld [vmem:[#allocation2 + $0x52] sm:$0xff] }
  0x2f   : > { %v515_v14 = vadd.f32 %v507_v56, %v482_v5  ;;  %v420_v27 = vadd.f32 %v412_v16, %v388_v15  ;;  %v357_v29 = vadd.f32 %v349_v18, %v317_v13  ;;  %v509_v34 = vmul.f32 %v834_v46, %v493_v17  ;;  %v527_v13 = vld [vmem:[#allocation2 + $0x61] sm:$0xff] }
  0x30   : > { %v451_v19 = vadd.f32 %v443_v4, %v419_v10  ;;  %v413_v35 = vmul.f32 %v818_v37, %v493_v17  ;;  %v318_v36 = vmul.f32 %v792_v20, %v493_v17  ;;  %v350_v44 = vmul.f32 %v797_v26, %v525_v24  ;;  %v495_v10 = vld [vmem:[#allocation2 + $0x60] sm:$0xff] }
  0x31   : > { %v547_v25 = vadd.f32 %v539_v60, %v515_v14  ;;  %v452_v40 = vadd.f32 %v444_v22, %v420_v27  ;;  %v389_v41 = vadd.f32 %v381_v30, %v357_v29  ;;  %v541_v47 = vmul.f32 %v840_v49, %v525_v24  ;;  %v559_v22 = vld [vmem:[#allocation2 + $0x62] sm:$0xff]  ;;  %v496_v30 = vld [vmem:[#allocation2 + $0x70] sm:$0xff] }
  0x32   : > { %v483_v33 = vadd.f32 %v475_v6, %v451_v19  ;;  %v445_v48 = vmul.f32 %v823_v39, %v525_v24  ;;  %v382_v50 = vmul.f32 %v804_v32, %v557_v28  ;;  %v358_v56 = vadd.f32 %v350_v44, %v318_v36 }
  0x33   : > { %v579_v38 = vadd.f32 %v571_v1, %v547_v25  ;;  %v484_v52 = vadd.f32 %v476_v23, %v452_v40  ;;  %v421_v53 = vadd.f32 %v413_v35, %v389_v41  ;;  %v573_v58 = vmul.f32 %v847_v54, %v557_v28  ;;  %v528_v41 = vld [vmem:[#allocation2 + $0x71] sm:$0xff] }
  0x34   : > { %v516_v45 = vadd.f32 %v508_v11, %v483_v33  ;;  %v477_v59 = vmul.f32 %v828_v42, %v557_v28  ;;  %v510_v60 = vmul.f32 %v834_v46, %v494_v43  ;;  %v390_v0 = vadd.f32 %v382_v50, %v358_v56  ;;  %v497_v56 = vld [vmem:[#allocation2 + $0x80] sm:$0xff] }
  0x35   : > { %v594_v51 = vadd.f32 %v872_v31, %v579_v38  ;;  %v517_v61 = vadd.f32 %v509_v34, %v484_v52  ;;  %v453_v62 = vadd.f32 %v445_v48, %v421_v53  ;;  %v414_v1 = vmul.f32 %v818_v37, %v494_v43  ;;  %v560_v53 = vld [vmem:[#allocation2 + $0x72] sm:$0xff] }
  0x36   : > { %v548_v57 = vadd.f32 %v540_v12, %v516_v45  ;;  %v542_v3 = vmul.f32 %v840_v49, %v526_v55  ;;  %v319_v4 = vmul.f32 %v792_v20, %v494_v43  ;;  %v351_v5 = vmul.f32 %v797_v26, %v526_v55 }
  0x37   : > { %602 = vst.msk [vmem:[%s763_s27] sm:$0xff] %vm290_vm2, %v594_v51  ;;  %v549_v6 = vadd.f32 %v541_v47, %v517_v61  ;;  %v485_v7 = vadd.f32 %v477_v59, %v453_v62  ;;  %v422_v8 = vadd.f32 %v414_v1, %v390_v0  ;;  %v446_v9 = vmul.f32 %v823_v39, %v526_v55 }
  0x38   : > { %v580_v2 = vadd.f32 %v572_v21, %v548_v57  ;;  %v574_v12 = vmul.f32 %v847_v54, %v558_v63  ;;  %v359_v14 = vadd.f32 %v351_v5, %v319_v4  ;;  %v383_v15 = vmul.f32 %v804_v32, %v558_v63 }
  0x39   : > { %v581_v16 = vadd.f32 %v573_v58, %v549_v6  ;;  %v518_v17 = vadd.f32 %v510_v60, %v485_v7  ;;  %v454_v18 = vadd.f32 %v446_v9, %v422_v8  ;;  %v478_v19 = vmul.f32 %v828_v42, %v558_v63  ;;  %v529_v6 = vld [vmem:[#allocation2 + $0x81] sm:$0xff] }
  0x3a   : > { %v595_v11 = vadd.f32 %v872_v31, %v580_v2  ;;  %v511_v21 = vmul.f32 %v834_v46, %v495_v10  ;;  %v391_v23 = vadd.f32 %v383_v15, %v359_v14  ;;  %v415_v24 = vmul.f32 %v818_v37, %v495_v10 }
  0x3b   : > { %v320_v25 = vmul.f32 %v792_v20, %v495_v10  ;;  %v596_v27 = vadd.f32 %v872_v31, %v581_v16  ;;  %v550_v28 = vadd.f32 %v542_v3, %v518_v17  ;;  %v486_v29 = vadd.f32 %v478_v19, %v454_v18  ;;  %v530_v17 = vld [vmem:[#allocation2 + $0x91] sm:$0xff] }
  0x3c   : > { %603 = vst.msk [vmem:[%s763_s27 + $0x8] sm:$0xff] %vm290_vm2, %v595_v11  ;;  %v352_v33 = vmul.f32 %v797_v26, %v527_v13  ;;  %v543_v34 = vmul.f32 %v840_v49, %v527_v13  ;;  %v423_v35 = vadd.f32 %v415_v24, %v391_v23  ;;  %v447_v36 = vmul.f32 %v823_v39, %v527_v13 }
  0x3d   : > { %604 = vst.msk [vmem:[%s763_s27 + $0x10] sm:$0xff] %vm290_vm2, %v596_v27  ;;  %v582_v38 = vadd.f32 %v574_v12, %v550_v28  ;;  %v519_v40 = vadd.f32 %v511_v21, %v486_v29  ;;  %v384_v44 = vmul.f32 %v804_v32, %v559_v22  ;;  %v575_v45 = vmul.f32 %v847_v54, %v559_v22  ;;  %v561_v12 = vld [vmem:[#allocation2 + $0x82] sm:$0xff] }
  0x3e   : > { %v360_v43 = vadd.f32 %v352_v33, %v320_v25  ;;  %v455_v47 = vadd.f32 %v447_v36, %v423_v35  ;;  %v479_v48 = vmul.f32 %v828_v42, %v559_v22  ;;  %v416_v50 = vmul.f32 %v818_v37, %v496_v30  ;;  %v562_v25 = vld [vmem:[#allocation2 + $0x92] sm:$0xff] }
  0x3f   : > { %v597_v51 = vadd.f32 %v872_v31, %v582_v38  ;;  %v551_v52 = vadd.f32 %v543_v34, %v519_v40  ;;  %v321_v57 = vmul.f32 %v792_v20, %v496_v30  ;;  %v512_v59 = vmul.f32 %v834_v46, %v496_v30 }
  0x40   : > { %v392_v55 = vadd.f32 %v384_v44, %v360_v43  ;;  %v487_v58 = vadd.f32 %v479_v48, %v455_v47  ;;  %v353_v60 = vmul.f32 %v797_v26, %v528_v41  ;;  %v544_v62 = vmul.f32 %v840_v49, %v528_v41 }
  0x41   : > { %605 = vst.msk [vmem:[%s763_s27 + $0x18] sm:$0xff] %vm290_vm2, %v597_v51  ;;  %v583_v61 = vadd.f32 %v575_v45, %v551_v52  ;;  %v448_v0 = vmul.f32 %v823_v39, %v528_v41  ;;  %v385_v3 = vmul.f32 %v804_v32, %v560_v53  ;;  %v417_v20 = vmul.f32 %v818_v37, %v497_v56  ;;  %v498_v32 = vld [vmem:[#allocation2 + $0x90] sm:$0xff] }
  0x42   : > { %v424_v63 = vadd.f32 %v416_v50, %v392_v55  ;;  %v520_v1 = vadd.f32 %v512_v59, %v487_v58  ;;  %v361_v2 = vadd.f32 %v353_v60, %v321_v57  ;;  %v480_v26 = vmul.f32 %v828_v42, %v560_v53 }
  0x43   : > { %v598_v4 = vadd.f32 %v872_v31, %v583_v61  ;;  %v576_v8 = vmul.f32 %v847_v54, %v560_v53  ;;  %v513_v11 = vmul.f32 %v834_v46, %v497_v56  ;;  %v449_v14 = vmul.f32 %v823_v39, %v529_v6 }
  0x44   : > { %v456_v5 = vadd.f32 %v448_v0, %v424_v63  ;;  %v552_v7 = vadd.f32 %v544_v62, %v520_v1  ;;  %v393_v9 = vadd.f32 %v385_v3, %v361_v2  ;;  %v545_v16 = vmul.f32 %v840_v49, %v529_v6 }
  0x45   : > { %606 = vst.msk [vmem:[%s763_s27 + $0x20] sm:$0xff] %vm290_vm2, %v598_v4  ;;  %v481_v21 = vmul.f32 %v828_v42, %v561_v12  ;;  %v514_v22 = vmul.f32 %v834_v46, %v498_v32  ;;  %v577_v24 = vmul.f32 %v847_v54, %v561_v12  ;;  %v546_v27 = vmul.f32 %v840_v49, %v530_v17 }
  0x46   : > { %v488_v10 = vadd.f32 %v480_v26, %v456_v5  ;;  %v584_v13 = vadd.f32 %v576_v8, %v552_v7  ;;  %v425_v37 = vadd.f32 %v417_v20, %v393_v9  ;;  %v578_v30 = vmul.f32 %v847_v54, %v562_v25 }
  0x48   : > { %v521_v15 = vadd.f32 %v513_v11, %v488_v10  ;;  %v599_v18 = vadd.f32 %v872_v31, %v584_v13  ;;  %v457_v19 = vadd.f32 %v449_v14, %v425_v37 }
  0x4a   : > { %v553_v23 = vadd.f32 %v545_v16, %v521_v15  ;;  %607 = vst.msk [vmem:[%s763_s27 + $0x28] sm:$0xff] %vm290_vm2, %v599_v18  ;;  %v489_v39 = vadd.f32 %v481_v21, %v457_v19 }
  0x4c   : > { %v585_v28 = vadd.f32 %v577_v24, %v553_v23  ;;  %v522_v29 = vadd.f32 %v514_v22, %v489_v39 }
  0x4e   : > { %v600_v33 = vadd.f32 %v872_v31, %v585_v28  ;;  %v554_v34 = vadd.f32 %v546_v27, %v522_v29 }
  0x50   : > { %608 = vst.msk [vmem:[%s763_s27 + $0x30] sm:$0xff] %vm290_vm2, %v600_v33  ;;  %v586_v42 = vadd.f32 %v578_v30, %v554_v34 }
  0x52   : > { %v601_v46 = vadd.f32 %v872_v31, %v586_v42 }
  0x54   : > { %609 = vst.msk [vmem:[%s763_s27 + $0x38] sm:$0xff] %vm290_vm2, %v601_v46 }
  0x55 PF: > { %s15_s18 = sadd.s32 1, %s714_s18  }
  0x56   : > { %p12_p5 = scmp.ge.s32.totalorder %s15_s18, 4  }
  0x58   :  { %14 = sbr.rel (!%p12_p5) target bundleno = 1 (0x1), region = 84 }

// kernel: kan_conv_transformer.15
= control target key start
LH: loop header
LB: loop body
LE: loop exit
PB: predicated region body
PF: predicated region fallthrough
CT: control target
= control target key end

     0   :  { %s737_s15 = smov 0   ;;  %s807_s0 = inlined_call_operand.vmem [shape: f32[2,32,64], index: 0, kind: input, shape index: {}]   ;;  %s808_s1 = inlined_call_operand.vmem [shape: f32[2,64,16], index: 1, kind: input, shape index: {}]   ;;  %s809_s2 = inlined_call_operand.vmem [shape: f32[16,1], index: 2, kind: input, shape index: {}]   ;;  %s810_s3 = inlined_call_operand.vmem [shape: f32[16,16], index: 3, kind: input, shape index: {}]   ;;  %s811_s4 = inlined_call_operand.vmem [shape: f32[2,64,16], index: 4, kind: output, shape index: {}]  }
   0x1 LB: > { %s595_s16 = sadd.s32 4294967295, %s709_s15   ;;  %p599_p0 = scmp.ge.s32.totalorder %s709_s15, 1  ;;  %s709_s15 = sphi %s737_s15, %s14_s15  }
   0x2   : > { %p172_p1 = scmp.lt.s32.totalorder %s709_s15, 3 }
   0x4   : > { %p173_p2 = pnand %p599_p0, %p172_p1 }
   0x5   : > { %p203_p3 = scmp.lt.s32.totalorder (!%p173_p2), %s595_s16, 1  ;;  %vm226_vm0 = vcmask (!%p173_p2), 523264   ;;  %v711_v12 = vmov (!%p173_p2), 0   ;;  %v222_v21 = vld [vmem:[%s809_s2] sm:$0xff] (!%p173_p2)  ;;  %v223_v25 = vld [vmem:[%s809_s2 + $0x8] sm:$0xff] (!%p173_p2)  ;;  %vm354_vm2 = vcmask (!%p173_p2), 130048  }
   0x6   : > { %176 = sbr.rel (%p173_p2) target bundleno = 1076 (0x434), region = 36  ;;  %685 = vset.pattern.permute.xlu0 (!%p173_p2), %v711_v12  ;;  %686 = vset.pattern.permute.xlu1 (!%p173_p2), %v711_v12  ;;  %vm663_vm1 = vmpackc.low (!%p173_p2), %vm226_vm0, %vm226_vm0  ;;  %v266_v36 = vld [vmem:[%s810_s3 + $0x8] sm:$0xff] (!%p173_p2)  ;;  %v265_v37 = vld [vmem:[%s810_s3] sm:$0xff] (!%p173_p2) }
   0x7   : > { %vm669_vm3 = vmpackc.low (!%p173_p2), %vm354_vm2, %vm354_vm2 }
   0xd   : > { %s813_s16 = smov (!%p203_p3, %s595_s16), 1 }
   0xe   : > { %s622_s17 = sshll.u32 %s813_s16, 5  ;;  %s623_s29 = sshll.u32 %s813_s16, 6 }
   0xf   : > { %s207_s20 = scalar_lea.vmem %s807_s0, %s622_s17  ;;  %s212_s6 = scalar_lea.vmem %s808_s1, %s623_s29 }
  0x10   : > { %v218_v0 = vld [vmem:[%s207_s20] sm:$0xff]  ;;  %v219_v1 = vld [vmem:[%s207_s20 + $0x8] sm:$0xff]  ;;  %v220_v2 = vld [vmem:[%s207_s20 + $0x10] sm:$0xff]  ;;  %s217_s9 = scalar_lea.vmem %s811_s4, %s623_s29 }
  0x11   : > { %v224_v3 = vmul.f32 %v218_v0, %v218_v0  ;;  %v225_v4 = vmul.f32 %v219_v1, %v219_v1  ;;  %v251_v5 = vmul.f32 %v220_v2, %v220_v2  ;;  %v221_v6 = vld [vmem:[%s207_s20 + $0x18] sm:$0xff]  ;;  %v379_v54 = vld [vmem:[%s212_s6 + $0x10] sm:$0xff]  ;;  %v377_v55 = vld [vmem:[%s212_s6] sm:$0xff] }
  0x12   : > { %v252_v7 = vmul.f32 %v221_v6, %v221_v6  ;;  %653 = vmatprep.mubr.msk.f32.mxu1 %vm354_vm2, %v379_v54  ;;  %v380_v63 = vld [vmem:[%s212_s6 + $0x18] sm:$0xff] }
  0x13   : > { %v227_v8 = vsel %vm226_vm0, %v224_v3, 0.0  ;;  %v253_v9 = vsel %vm226_vm0, %v251_v5, 0.0  ;;  %v230_v10 = vsel %vm226_vm0, %v225_v4, 0.0  ;;  %v383_v3 = vld [vmem:[%s212_s6 + $0x30] sm:$0xff]  ;;  %v384_v4 = vld [vmem:[%s212_s6 + $0x38] sm:$0xff] }
  0x14   : > { %228 = vadd.xlane.f32.xlu0 %v227_v8  ;;  %254 = vadd.xlane.f32.xlu1 %v253_v9  ;;  %v256_v11 = vsel %vm226_vm0, %v252_v7, 0.0 }
  0x18   : > { %231 = vadd.xlane.f32.xlu0 %v230_v10  ;;  %257 = vadd.xlane.f32.xlu1 %v256_v11 }
  0xa1   : > { %v229_v13 = vpop.xlane.xlu0 %228  ;;  %v255_v14 = vpop.xlane.xlu1 %254 }
  0xa2   : > { %v233_v15 = vmax.f32 %v229_v13, 1e-24  ;;  %v259_v16 = vmax.f32 %v255_v14, 1e-24 }
  0xa4   : > { %687 = vrsqrt.f32 %v233_v15 }
  0xa5   : > { %v232_v17 = vpop.xlane.xlu0 %231  ;;  %689 = vrsqrt.f32 %v259_v16  ;;  %v258_v18 = vpop.xlane.xlu1 %257 }
  0xa6   : > { %v234_v19 = vmax.f32 %v232_v17, 1e-24  ;;  %v260_v20 = vmax.f32 %v258_v18, 1e-24 }
  0xa8   : > { %691 = vrsqrt.f32 %v234_v19 }
  0xa9   : > { %693 = vrsqrt.f32 %v260_v20 }
  0xae   : > { %v688_v22 = vpop.eup %687 }
  0xaf   : > { %v690_v23 = vpop.eup %689  ;;  %v237_v24 = vmul.f32 %v688_v22, %v222_v21 }
  0xb0   : > { %v263_v27 = vmul.f32 %v690_v23, %v220_v2  ;;  %v382_v2 = vld [vmem:[%s212_s6 + $0x28] sm:$0xff] }
  0xb1   : > { %241 = vperm.xlu0 %685, %v237_v24  }
  0xb2   : > { %v692_v26 = vpop.eup %691 }
  0xb3   : > { %v694_v28 = vpop.eup %693  ;;  %v238_v29 = vmul.f32 %v692_v26, %v223_v25 }
  0xb4   : > { %v264_v30 = vmul.f32 %v694_v28, %v221_v6 }
  0xb5   : > { %246 = vperm.xlu1 %686, %v238_v29  }
  0xb6   : > { %v662_v31 = vpack.c.bf16 %v264_v30, %v263_v27 }
  0xb8   : > { %664 = vmatprep.subr.msk.bf16.mxu0 %vm663_vm1, %v662_v31 }
  0xb9   : > { %667 = vmatpush3.bf16.xpose.msk.msra.mxu0 %vm663_vm1, %v662_v31 }
 0x130   : > { %v242_v32 = vpop.permute.xlu0 %241 }
 0x131   : > { %v249_v33 = vmul.f32 %v242_v32, %v218_v0  ;;  %v378_v0 = vld [vmem:[%s212_s6 + $0x8] sm:$0xff] }
 0x133   : > { %643 = vmatprep.mubr.msk.f32.mxu0 %vm226_vm0, %v249_v33 }
 0x134   : > { %v247_v34 = vpop.permute.xlu1 %246 }
 0x135   : > { %v250_v35 = vmul.f32 %v247_v34, %v219_v1  ;;  %v381_v1 = vld [vmem:[%s212_s6 + $0x20] sm:$0xff] }
 0x137   : > { %644 = vmatmul.mubr.msk.f32.vlgmr.msra.gmra.mrb[0].mxu0 %vm226_vm0, %v250_v35 }
 0x138   : > { %650 = vmatprep.mubr.msk.f32.mxu0 %vm354_vm2, %v377_v55 }
 0x20a   : > { %v645_v38 = vpop.f32.mrb[0].mxu0 }
 0x20b   : > { %v351_v39 = vadd.f32 %v645_v38, %v266_v36  ;;  %v345_v40 = vpop.f32.mrb[1].mxu0 }
 0x20c   : > { %v346_v41 = vadd.f32 %v345_v40, %v265_v37 }
 0x20d   : > { %v358_v42 = vsel %vm354_vm2, %v351_v39, -inf }
 0x20e   : > { %359 = vmax.xlane.f32.xlu0 %v358_v42  ;;  %v355_v43 = vsel %vm354_vm2, %v346_v41, -inf }
 0x20f   : > { %356 = vmax.xlane.f32.xlu1 %v355_v43 }
 0x29b   : > { %v360_v44 = vpop.xlane.xlu0 %359 }
 0x29c   : > { %v362_v45 = vsub.f32 %v351_v39, %v360_v44  ;;  %v357_v46 = vpop.xlane.xlu1 %356 }
 0x29d   : > { %v361_v47 = vsub.f32 %v346_v41, %v357_v46 }
 0x29e   : > { %v365_v48 = vmul.f32 1.442695, %v362_v45 }
 0x29f   : > { %v363_v49 = vmul.f32 1.442695, %v361_v47 }
 0x2a1   : > { %695 = vpow2.f32 %v363_v49 }
 0x2a2   : > { %697 = vpow2.f32 %v365_v48 }
 0x2ab   : > { %v696_v50 = vpop.eup %695 }
 0x2ac   : > { %v367_v51 = vsel %vm354_vm2, %v696_v50, 0.0  ;;  %v698_v52 = vpop.eup %697 }
 0x2ad   : > { %368 = vadd.xlane.f32.xlu1 %v367_v51  ;;  %v370_v53 = vsel %vm354_vm2, %v698_v52, 0.0 }
 0x2b1   : > { %371 = vadd.xlane.f32.xlu1 %v370_v53 }
 0x33a   : > { %v369_v56 = vpop.xlane.xlu1 %368 }
 0x33b   : > { %699 = vrcp.f32 %v369_v56 }
 0x33e   : > { %v372_v57 = vpop.xlane.xlu1 %371 }
 0x33f   : > { %701 = vrcp.f32 %v372_v57 }
 0x345   : > { %v700_v58 = vpop.eup %699 }
 0x346   : > { %v375_v60 = vmul.f32 %v700_v58, %v696_v50 }
 0x349   : > { %v702_v59 = vpop.eup %701 }
 0x34a   : > { %v376_v61 = vmul.f32 %v702_v59, %v698_v52 }
 0x34c   : > { %v668_v62 = vpack.c.bf16 %v376_v61, %v375_v60 }
 0x34e   : > { %670 = vmatprep.subr.msk.bf16.mxu0 %vm669_vm3, %v668_v62  ;;  %674 = vmatprep.subr.msk.bf16.mxu1 %vm669_vm3, %v668_v62 }
 0x34f   : > { %673 = vmatpush3.bf16.xpose.msk.msra.mxu0 %vm669_vm3, %v668_v62  ;;  %675 = vmatpush3.bf16.xpose.msk.msra.mxu1 %vm669_vm3, %v668_v62 }
 0x356   : > { %654 = vmatmul.mubr.msk.f32.vlgmr.msra.gmra.mrb[0].mxu1 %vm354_vm2, %v380_v63  ;;  %651 = vmatmul.mubr.msk.f32.vlgmr.msra.gmra.mrb[2].mxu0 %vm354_vm2, %v378_v0 }
 0x357   : > { %656 = vmatprep.mubr.msk.f32.mxu1 %vm354_vm2, %v381_v1 }
 0x35a   : > { %657 = vmatmul.mubr.msk.f32.gmra.mrb[2].mxu1 %vm354_vm2, %v382_v2 }
 0x35b   : > { %659 = vmatprep.mubr.msk.f32.mxu1 %vm354_vm2, %v383_v3 }
 0x35e   : > { %660 = vmatmul.mubr.msk.f32.gmra.mrb[4].mxu1 %vm354_vm2, %v384_v4 }
 0x429   : > { %v655_v5 = vpop.f32.mrb[0].mxu1  ;;  %v652_v6 = vpop.f32.mrb[2].mxu0 }
 0x42a   : > { %523 = vst.msk [vmem:[%s217_s9 + $0x18] sm:$0xff] %vm354_vm2, %v655_v5  ;;  %v491_v7 = vpop.f32.mrb[1].mxu1  ;;  %521 = vst.msk [vmem:[%s217_s9 + $0x8] sm:$0xff] %vm354_vm2, %v652_v6  ;;  %v481_v8 = vpop.f32.mrb[3].mxu0 }
 0x42b   : > { %522 = vst.msk [vmem:[%s217_s9 + $0x10] sm:$0xff] %vm354_vm2, %v491_v7  ;;  %520 = vst.msk [vmem:[%s217_s9] sm:$0xff] %vm354_vm2, %v481_v8 }
 0x42d   : > { %v658_v9 = vpop.f32.mrb[2].mxu1 }
 0x42e   : > { %525 = vst.msk [vmem:[%s217_s9 + $0x28] sm:$0xff] %vm354_vm2, %v658_v9  ;;  %v501_v10 = vpop.f32.mrb[3].mxu1 }
 0x42f   : > { %524 = vst.msk [vmem:[%s217_s9 + $0x20] sm:$0xff] %vm354_vm2, %v501_v10 }
 0x431   : > { %v661_v11 = vpop.f32.mrb[4].mxu1 }
 0x432   : > { %527 = vst.msk [vmem:[%s217_s9 + $0x38] sm:$0xff] %vm354_vm2, %v661_v11  ;;  %v511_v12 = vpop.f32.mrb[5].mxu1 }
 0x433   : > { %526 = vst.msk [vmem:[%s217_s9 + $0x30] sm:$0xff] %vm354_vm2, %v511_v12 }
 0x434 PF: > { %s14_s15 = sadd.s32 1, %s709_s15  }
 0x435   : > { %p11_p4 = scmp.ge.s32.totalorder %s14_s15, 4  }
 0x437   :  { %13 = sbr.rel (!%p11_p4) target bundleno = 1 (0x1), region = 69 }

// kernel: kan_conv_transformer.13
= control target key start
LH: loop header
LB: loop body
LE: loop exit
PB: predicated region body
PF: predicated region fallthrough
CT: control target
= control target key end

     0   :  { %s2084_s30 = smov 0   ;;  %s2525_s0 = inlined_call_operand.vmem [shape: f32[128,16], index: 0, kind: input, shape index: {}]   ;;  %s2526_s1 = inlined_call_operand.vmem [shape: f32[1,16], index: 1, kind: input, shape index: {}]   ;;  %s2527_s2 = inlined_call_operand.vmem [shape: f32[1,16], index: 2, kind: input, shape index: {}]   ;;  %s2528_s3 = inlined_call_operand.vmem [shape: f32[16,768], index: 3, kind: input, shape index: {}]   ;;  %s2529_s4 = inlined_call_operand.vmem [shape: f32[1,768], index: 4, kind: input, shape index: {}]   ;;  %s2530_s5 = inlined_call_operand.vmem [shape: bf16[768,48], index: 5, kind: input, shape index: {}]   ;;  %s2531_s6 = inlined_call_operand.vmem [shape: bf16[16,48], index: 6, kind: input, shape index: {}]   ;;  %s2532_s7 = inlined_call_operand.vmem [shape: f32[128,48], index: 7, kind: output, shape index: {0}]   ;;  %s2533_s8 = inlined_call_operand.vmem [shape: f32[4,1,48], index: 8, kind: output, shape index: {1}]   ;;  %s2534_s9 = inlined_call_operand.vmem [shape: f32[4,1,48], index: 9, kind: output, shape index: {2}]  }
   0x1 LB: > { %s2090_s10 = sadd.s32 4294967295, %s2031_s30   ;;  %p1710_p0 = scmp.ge.s32.totalorder %s2031_s30, 1  ;;  %s2031_s30 = sphi %s2084_s30, %s20_s30  }
   0x2   : > { %p293_p1 = scmp.lt.s32.totalorder %s2031_s30, 5 }
   0x4   : > { %p294_p2 = pnand %p1710_p0, %p293_p1 }
   0x5   : > { %s1711_s11 = sshll.u32 (!%p294_p2), %s2090_s10, 2  ;;  %vm358_vm0 = vcmask (!%p294_p2), 130048   ;;  %v435_v28 = vld [vmem:[%s2528_s3 + $0x8] sm:$0xff] (!%p294_p2)  ;;  %v441_v29 = vld [vmem:[%s2528_s3 + $0x38] sm:$0xff] (!%p294_p2)  ;;  %v434_v33 = vld [vmem:[%s2528_s3] sm:$0xff] (!%p294_p2)  ;;  %v2033_v35 = vmov (!%p294_p2), 0.0  }
   0x6   : > { %297 = sbr.rel (%p294_p2) target bundleno = 887 (0x377), region = 48  ;;  %p336_p3 = scmp.lt.s32.totalorder (!%p294_p2), %s1711_s11, 15  ;;  %v439_v30 = vld [vmem:[%s2528_s3 + $0x28] sm:$0xff] (!%p294_p2)  ;;  %v1899_v31 = vpack.c.bf16 (!%p294_p2), %v441_v29, %v435_v28  ;;  %v445_v32 = vld [vmem:[%s2528_s3 + $0x58] sm:$0xff] (!%p294_p2)  ;;  %v440_v34 = vld [vmem:[%s2528_s3 + $0x30] sm:$0xff] (!%p294_p2)  ;;  %522 = vmatprep.mubr.f32.mxu1 (!%p294_p2), %v2033_v35  ;;  %700 = vmatprep.mubr.f32.mxu0 (!%p294_p2), %v2033_v35  ;;  %vm1557_vm1 = vcmask (!%p294_p2), 392192  }
   0x7   : > { %v1907_v36 = vpack.c.bf16 (!%p294_p2), %v445_v32, %v439_v30  ;;  %v1901_v37 = vpack.c.bf16 (!%p294_p2), %v440_v34, %v434_v33  ;;  %v438_v38 = vld [vmem:[%s2528_s3 + $0x20] sm:$0xff] (!%p294_p2)  ;;  %v444_v39 = vld [vmem:[%s2528_s3 + $0x50] sm:$0xff] (!%p294_p2)  ;;  %v437_v41 = vld [vmem:[%s2528_s3 + $0x18] sm:$0xff] (!%p294_p2)  ;;  %p347_p4 = scmp.lt.s32.totalorder (!%p294_p2), %s2090_s10, 3  ;;  %vm1575_vm2 = vcmask (!%p294_p2), 385024  }
   0x8   : > { %1900 = vmatprep.subr.bf16.mxu1 (!%p294_p2), %v1899_v31  ;;  %v1909_v40 = vpack.c.bf16 (!%p294_p2), %v444_v39, %v438_v38  ;;  %v443_v42 = vld [vmem:[%s2528_s3 + $0x48] sm:$0xff] (!%p294_p2)  ;;  %v1921_v44 = vld [vmem:[%s2530_s5 + $0x40] sm:$0xff] (!%p294_p2)   ;;  %v436_v61 = vld [vmem:[%s2528_s3 + $0x10] sm:$0xff] (!%p294_p2) }
   0x9   : > { %1908 = vmatprep.subr.bf16.mxu0 (!%p294_p2), %v1907_v36  ;;  %1902 = vmatpush1.bf16.msra.mxu1 (!%p294_p2), %v1901_v37  ;;  %v1903_v43 = vpack.c.bf16 (!%p294_p2), %v443_v42, %v437_v41  ;;  %v1715_v58 = vld [vmem:[%s2526_s1] ss:$0 sm:$0xff] (!%p294_p2)  ;;  %v1933_v28 = vld [vmem:[%s2530_s5 + $0x68] sm:$0xff] (!%p294_p2)   ;;  %v1937_v32 = vld [vmem:[%s2530_s5 + $0x70] sm:$0xff] (!%p294_p2)  }
   0xa   : > { %1910 = vmatpush1.bf16.msra.mxu0 (!%p294_p2), %v1909_v40  ;;  %v1716_v60 = vld [vmem:[%s2527_s2] ss:$0 sm:$0xff] (!%p294_p2)  ;;  %v1934_v29 = vld [vmem:[%s2530_s5 + $0x28] sm:$0xff] (!%p294_p2)   ;;  %v1938_v33 = vld [vmem:[%s2530_s5 + $0x30] sm:$0xff] (!%p294_p2)  }
   0xb   : > { %1904 = vmatprep.subr.bf16.mxu1 (!%p294_p2), %v1903_v43  ;;  %1809 = vmatprep.subr.bf16.mxu0 (!%p294_p2), %v1921_v44  ;;  %v442_v62 = vld [vmem:[%s2528_s3 + $0x40] sm:$0xff] (!%p294_p2)  ;;  %v1935_v30 = vld [vmem:[%s2530_s5 + $0xc8] sm:$0xff] (!%p294_p2)   ;;  %v1939_v34 = vld [vmem:[%s2530_s5 + $0xd0] sm:$0xff] (!%p294_p2)  }
   0xc   : > { %v1936_v31 = vld [vmem:[%s2530_s5 + $0x88] sm:$0xff] (!%p294_p2)   ;;  %v1941_v36 = vld [vmem:[%s2530_s5 + $0x78] sm:$0xff] (!%p294_p2)   ;;  %v1945_v40 = vld [vmem:[%s2530_s5 + $0x140] sm:$0xff] (!%p294_p2)  }
   0xd   : > { %s2536_s11 = smov (!%p336_p3, %s1711_s11), 15  ;;  %v1942_v37 = vld [vmem:[%s2530_s5 + $0x38] sm:$0xff]   ;;  %v1946_v41 = vld [vmem:[%s2530_s5 + $0xe0] sm:$0xff]   ;;  %v1950_v43 = vld [vmem:[%s2530_s5 + $0xe8] sm:$0xff]   ;;  %s2538_s10 = smov (!%p347_p4, %s2090_s10), 3 }
   0xe   : > { %s1712_s12 = sshll.u32 %s2536_s11, 3  ;;  %v1943_v38 = vld [vmem:[%s2530_s5 + $0xd8] sm:$0xff]   ;;  %v1948_v42 = vld [vmem:[%s2530_s5 + $0xa0] sm:$0xff]   ;;  %v1952_v44 = vld [vmem:[%s2530_s5 + $0xa8] sm:$0xff]   ;;  %s349_s28 = scalar_lea.vmem %s2533_s8, %s2538_s10 }
   0xf   : > { %s339_s15 = scalar_lea.vmem %s2525_s0, %s1712_s12  ;;  %v1944_v39 = vld [vmem:[%s2530_s5 + $0x98] sm:$0xff]   ;;  %s345_s27 = scalar_lea.vmem %s2532_s7, %s1712_s12 }
  0x10   : > { %v354_v0 = vld [vmem:[%s339_s15] sm:$0xff]  ;;  %v356_v1 = vld [vmem:[%s339_s15 + $0x10] sm:$0xff]  ;;  %v355_v2 = vld [vmem:[%s339_s15 + $0x8] sm:$0xff]  ;;  %s352_s14 = scalar_lea.vmem %s2534_s9, %s2538_s10 }
  0x11   : > { %v359_v3 = vsel %vm358_vm0, %v354_v0, 0.0  ;;  %v365_v4 = vsel %vm358_vm0, %v356_v1, 0.0  ;;  %v357_v5 = vld [vmem:[%s339_s15 + $0x18] sm:$0xff]  ;;  %v362_v6 = vsel %vm358_vm0, %v355_v2, 0.0 }
  0x12   : > { %360 = vadd.xlane.f32.xlu0 %v359_v3  ;;  %366 = vadd.xlane.f32.xlu1 %v365_v4  ;;  %v368_v7 = vsel %vm358_vm0, %v357_v5, 0.0  ;;  %v1905_v4 = vpack.c.bf16 %v442_v62, %v436_v61 }
  0x16   : > { %363 = vadd.xlane.f32.xlu0 %v362_v6  ;;  %369 = vadd.xlane.f32.xlu1 %v368_v7  ;;  %v1920_v7 = vld [vmem:[%s2531_s6] sm:$0xff]  }
  0x9f   : > { %v361_v8 = vpop.xlane.xlu0 %360  ;;  %v367_v9 = vpop.xlane.xlu1 %366 }
  0xa0   : > { %v372_v10 = vmul.f32 0.0625, %v361_v8  ;;  %v374_v11 = vmul.f32 0.0625, %v367_v9 }
  0xa2   : > { %v2107_v12 = vsub.f32 %v354_v0, %v372_v10  ;;  %v2109_v13 = vsub.f32 %v356_v1, %v374_v11 }
  0xa3   : > { %v364_v14 = vpop.xlane.xlu0 %363  ;;  %v370_v15 = vpop.xlane.xlu1 %369 }
  0xa4   : > { %v373_v16 = vmul.f32 0.0625, %v364_v14  ;;  %v375_v17 = vmul.f32 0.0625, %v370_v15  ;;  %v380_v18 = vmul.f32 %v2107_v12, %v2107_v12  ;;  %v382_v19 = vmul.f32 %v2109_v13, %v2109_v13 }
  0xa6   : > { %v2115_v20 = vsub.f32 %v355_v2, %v373_v16  ;;  %v2117_v21 = vsub.f32 %v357_v5, %v375_v17  ;;  %v384_v22 = vsel %vm358_vm0, %v380_v18, 0.0  ;;  %v390_v23 = vsel %vm358_vm0, %v382_v19, 0.0  ;;  %v1922_v5 = vld [vmem:[%s2530_s5] sm:$0xff]   ;;  %v1923_v18 = vld [vmem:[%s2530_s5 + $0x48] sm:$0xff]  }
  0xa7   : > { %385 = vadd.xlane.f32.xlu0 %v384_v22  ;;  %v1924_v19 = vld [vmem:[%s2530_s5 + $0x8] sm:$0xff]   ;;  %v1927_v22 = vld [vmem:[%s2530_s5 + $0x58] sm:$0xff]  }
  0xa8   : > { %v381_v24 = vmul.f32 %v2115_v20, %v2115_v20  ;;  %v383_v25 = vmul.f32 %v2117_v21, %v2117_v21 }
  0xaa   : > { %v387_v26 = vsel %vm358_vm0, %v381_v24, 0.0  ;;  %v393_v27 = vsel %vm358_vm0, %v383_v25, 0.0  ;;  %v1929_v24 = vld [vmem:[%s2530_s5 + $0x60] sm:$0xff]  }
  0xab   : > { %391 = vadd.xlane.f32.xlu0 %v390_v23  ;;  %388 = vadd.xlane.f32.xlu1 %v387_v26  ;;  %v1928_v23 = vld [vmem:[%s2530_s5 + $0x18] sm:$0xff]   ;;  %v1930_v25 = vld [vmem:[%s2530_s5 + $0x20] sm:$0xff]  }
  0xac   : > { %v1931_v26 = vld [vmem:[%s2530_s5 + $0xc0] sm:$0xff]  }
  0xaf   : > { %394 = vadd.xlane.f32.xlu1 %v393_v27  ;;  %v1932_v27 = vld [vmem:[%s2530_s5 + $0x80] sm:$0xff]  }
 0x134   : > { %v386_v45 = vpop.xlane.xlu0 %385 }
 0x135   : > { %v396_v46 = vmul.f32 0.0625, %v386_v45  ;;  %v1954_v45 = vld [vmem:[%s2530_s5 + $0xf0] sm:$0xff]  }
 0x137   : > { %v400_v47 = vadd.f32 1e-05, %v396_v46  ;;  %v1956_v46 = vld [vmem:[%s2530_s5 + $0xb0] sm:$0xff]  }
 0x138   : > { %v389_v48 = vpop.xlane.xlu1 %388  ;;  %v392_v49 = vpop.xlane.xlu0 %391 }
 0x139   : > { %1969 = vrsqrt.f32 %v400_v47  ;;  %v397_v50 = vmul.f32 0.0625, %v389_v48  ;;  %v398_v51 = vmul.f32 0.0625, %v392_v49  ;;  %v1958_v47 = vld [vmem:[%s2530_s5 + $0xf8] sm:$0xff]   ;;  %v727_v49 = vlaneseq }
 0x13a   : > { %v1960_v48 = vld [vmem:[%s2530_s5 + $0xb8] sm:$0xff]  }
 0x13b   : > { %v401_v52 = vadd.f32 1e-05, %v397_v50  ;;  %v402_v53 = vadd.f32 1e-05, %v398_v51  ;;  %v2301_v50 = vshrl.u32 %v727_v49, 7 }
 0x13c   : > { %v395_v54 = vpop.xlane.xlu1 %394 }
 0x13d   : > { %1971 = vrsqrt.f32 %v401_v52  ;;  %v399_v55 = vmul.f32 0.0625, %v395_v54  ;;  %v729_v51 = vsub.s32 0, %v2301_v50  ;;  %v745_v52 = vsub.s32 4, %v2301_v50 }
 0x13e   : > { %1973 = vrsqrt.f32 %v402_v53  ;;  %v725_v53 = vld [vmem:[%s2529_s4] sm:$0x3f]  ;;  %v733_v54 = vsub.s32 1, %v2301_v50 }
 0x13f   : > { %v403_v56 = vadd.f32 1e-05, %v399_v55  ;;  %v749_v55 = vsub.s32 5, %v2301_v50 }
 0x141   : > { %1975 = vrsqrt.f32 %v403_v56  ;;  %v2310_v56 = vrot.slane %v725_v53, %v729_v51  ;;  %v2316_v61 = vrot.slane %v725_v53, %v749_v55 }
 0x143   : > { %v1970_v57 = vpop.eup %1969 }
 0x144   : > { %v408_v59 = vmul.f32 %v1970_v57, %v2107_v12  ;;  %v2312_v57 = vrot.slane %v725_v53, %v745_v52 }
 0x146   : > { %v419_v63 = vmul.f32 %v1715_v58, %v408_v59 }
 0x147   : > { %v1972_v0 = vpop.eup %1971 }
 0x148   : > { %v1974_v1 = vpop.eup %1973  ;;  %v430_v2 = vadd.f32 %v1716_v60, %v419_v63  ;;  %v409_v3 = vmul.f32 %v1972_v0, %v2115_v20  ;;  %v1925_v20 = vld [vmem:[%s2530_s5 + $0x50] sm:$0xff]  }
 0x149   : > { %v410_v6 = vmul.f32 %v1974_v1, %v2109_v13 }
 0x14a   : > { %1717 = vmatmul.mubr.msk.f32.vlgmr.msra.gmra.mrb[0].mxu1 %vm358_vm0, %v430_v2  ;;  %1725 = vmatmul.mubr.msk.f32.vlgmr.msra.gmra.mrb[0].mxu0 %vm358_vm0, %v430_v2  ;;  %v420_v8 = vmul.f32 %v1715_v58, %v409_v3 }
 0x14b   : > { %v1976_v9 = vpop.eup %1975  ;;  %528 = vmatprep.mubr.f32.mxu1 %v2033_v35  ;;  %706 = vmatprep.mubr.f32.mxu0 %v2033_v35  ;;  %v421_v11 = vmul.f32 %v1715_v58, %v410_v6 }
 0x14c   : > { %v431_v10 = vadd.f32 %v1716_v60, %v420_v8  ;;  %v411_v12 = vmul.f32 %v1976_v9, %v2117_v21  ;;  %1906 = vmatpush1.bf16.msra.mxu1 %v1905_v4  ;;  %1810 = vmatpush3.bf16.msra.mxu0 %v1922_v5  ;;  %v1926_v21 = vld [vmem:[%s2530_s5 + $0x10] sm:$0xff]  }
 0x14d   : > { %1893 = vmatprep.subr.bf16.mxu1 %v1920_v7  ;;  %v432_v13 = vadd.f32 %v1716_v60, %v421_v11  ;;  %1811 = vmatprep.subr.bf16.mxu0 %v1923_v18 }
 0x14e   : > { %1718 = vmatmul.mubr.msk.f32.gmra.mrb[2].mxu1 %vm358_vm0, %v431_v10  ;;  %1726 = vmatmul.mubr.msk.f32.gmra.mrb[2].mxu0 %vm358_vm0, %v431_v10  ;;  %v422_v14 = vmul.f32 %v1715_v58, %v411_v12  ;;  %v1057_v16 = vpack.c.bf16 %v431_v10, %v430_v2  ;;  %v2314_v58 = vrot.slane %v725_v53, %v733_v54 }
 0x14f   : > { %534 = vmatprep.mubr.f32.mxu1 %v2033_v35  ;;  %712 = vmatprep.mubr.f32.mxu0 %v2033_v35 }
 0x150   : > { %v433_v15 = vadd.f32 %v1716_v60, %v422_v14  ;;  %1812 = vmatpush3.bf16.msra.mxu0 %v1924_v19 }
 0x151   : > { %1813 = vmatprep.subr.bf16.mxu0 %v1925_v20 }
 0x152   : > { %1719 = vmatmul.mubr.msk.f32.gmra.mrb[4].mxu1 %vm358_vm0, %v432_v13  ;;  %1727 = vmatmul.mubr.msk.f32.gmra.mrb[4].mxu0 %vm358_vm0, %v432_v13  ;;  %v1058_v17 = vpack.c.bf16 %v433_v15, %v432_v13 }
 0x153   : > { %540 = vmatprep.mubr.f32.mxu1 %v2033_v35  ;;  %718 = vmatprep.mubr.f32.mxu0 %v2033_v35 }
 0x154   : > { %1814 = vmatpush3.bf16.msra.mxu0 %v1926_v21 }
 0x155   : > { %1815 = vmatprep.subr.bf16.mxu0 %v1927_v22  ;;  %v737_v22 = vsub.s32 2, %v2301_v50 }
 0x156   : > { %1720 = vmatmul.mubr.msk.f32.gmra.mrb[6].mxu1 %vm358_vm0, %v433_v15  ;;  %1728 = vmatmul.mubr.msk.f32.gmra.mrb[6].mxu0 %vm358_vm0, %v433_v15 }
 0x157   : > { %611 = vmatprep.mubr.f32.mxu1 %v2033_v35 }
 0x158   : > { %1816 = vmatpush3.bf16.msra.mxu0 %v1928_v23  ;;  %v741_v23 = vsub.s32 3, %v2301_v50 }
 0x159   : > { %1817 = vmatprep.subr.bf16.mxu0 %v1929_v24 }
 0x15a   : > { %1721 = vmatmul.mubr.msk.f32.vlgmr.msra.gmra.mrb[8].mxu1 %vm358_vm0, %v430_v2 }
 0x15b   : > { %617 = vmatprep.mubr.f32.mxu1 %v2033_v35  ;;  %1894 = vmatpush3.bf16.msra.mxu1 %v1920_v7 }
 0x15c   : > { %1818 = vmatpush3.bf16.msra.mxu0 %v1930_v25  ;;  %1837 = vmatprep.subr.bf16.mxu1 %v1931_v26 }
 0x15d   : > { %1819 = vmatprep.subr.bf16.mxu0 %v1933_v28 }
 0x15e   : > { %1722 = vmatmul.mubr.msk.f32.gmra.mrb[10].mxu1 %vm358_vm0, %v431_v10 }
 0x15f   : > { %623 = vmatprep.mubr.f32.mxu1 %v2033_v35 }
 0x160   : > { %1820 = vmatpush3.bf16.msra.mxu0 %v1934_v29 }
 0x161   : > { %1821 = vmatprep.subr.bf16.mxu0 %v1937_v32 }
 0x162   : > { %1723 = vmatmul.mubr.msk.f32.gmra.mrb[12].mxu1 %vm358_vm0, %v432_v13 }
 0x163   : > { %629 = vmatprep.mubr.f32.mxu1 %v2033_v35  ;;  %v1940_v35 = vld [vmem:[%s2530_s5 + $0x90] sm:$0xff]  }
 0x164   : > { %1822 = vmatpush3.bf16.msra.mxu0 %v1938_v33 }
 0x165   : > { %1823 = vmatprep.subr.bf16.mxu0 %v1941_v36 }
 0x166   : > { %1724 = vmatmul.mubr.msk.f32.gmra.mrb[14].mxu1 %vm358_vm0, %v433_v15 }
 0x167   : > { %1895 = vmatprep.mubr.msk.bf16.mxu1 %vm358_vm0, %v1057_v16 }
 0x168   : > { %1824 = vmatpush3.bf16.msra.mxu0 %v1942_v37 }
 0x169   : > { %1865 = vmatprep.subr.bf16.mxu0 %v1945_v40 }
 0x16a   : > { %1896 = vmatmul.mubr.msk.bf16.vlgmr.msra.gmra.mrb[16].mxu1 %vm358_vm0, %v1058_v17 }
 0x16b   : > { %1838 = vmatpush3.bf16.msra.mxu1 %v1932_v27 }
 0x16c   : > { %1839 = vmatprep.subr.bf16.mxu1 %v1935_v30 }
 0x16f   : > { %1840 = vmatpush3.bf16.msra.mxu1 %v1936_v31 }
 0x170   : > { %1841 = vmatprep.subr.bf16.mxu1 %v1939_v34 }
 0x173   : > { %1842 = vmatpush3.bf16.msra.mxu1 %v1940_v35 }
 0x174   : > { %1843 = vmatprep.subr.bf16.mxu1 %v1943_v38 }
 0x177   : > { %1844 = vmatpush3.bf16.msra.mxu1 %v1944_v39 }
 0x178   : > { %1845 = vmatprep.subr.bf16.mxu1 %v1946_v41 }
 0x17b   : > { %1846 = vmatpush3.bf16.msra.mxu1 %v1948_v42 }
 0x17c   : > { %1847 = vmatprep.subr.bf16.mxu1 %v1950_v43 }
 0x17f   : > { %1848 = vmatpush3.bf16.msra.mxu1 %v1952_v44 }
 0x180   : > { %1849 = vmatprep.subr.bf16.mxu1 %v1954_v45  ;;  %v2333_v45 = vrot.slane %v725_v53, %v737_v22 }
 0x183   : > { %1850 = vmatpush3.bf16.msra.mxu1 %v1956_v46  ;;  %v2335_v46 = vrot.slane %v725_v53, %v741_v23 }
 0x184   : > { %1851 = vmatprep.subr.bf16.mxu1 %v1958_v47 }
 0x187   : > { %1852 = vmatpush3.bf16.msra.mxu1 %v1960_v48 }
 0x21d   : > { %v524_v59 = vpop.f32.mrb[0].mxu1  ;;  %v702_v60 = vpop.f32.mrb[0].mxu0 }
 0x21e   : > { %v757_v62 = vsub.f32 %v524_v59, %v2310_v56  ;;  %v761_v63 = vsub.f32 %v702_v60, %v2312_v57  ;;  %v526_v0 = vpop.f32.mrb[1].mxu1  ;;  %v704_v1 = vpop.f32.mrb[1].mxu0 }
 0x21f   : > { %v758_v2 = vsub.f32 %v526_v0, %v2314_v58  ;;  %v762_v6 = vsub.f32 %v704_v1, %v2316_v61 }
 0x220   : > { %v781_v3 = vmul.f32 %v757_v62, %v757_v62  ;;  %v785_v4 = vmul.f32 %v761_v63, %v761_v63 }
 0x221   : > { %v782_v5 = vmul.f32 %v758_v2, %v758_v2  ;;  %v530_v7 = vpop.f32.mrb[2].mxu1  ;;  %v708_v8 = vpop.f32.mrb[2].mxu0  ;;  %v786_v16 = vmul.f32 %v762_v6, %v762_v6 }
 0x222   : > { %v853_v9 = vmul.f32 -0.5, %v781_v3  ;;  %v857_v10 = vmul.f32 -0.5, %v785_v4  ;;  %v532_v11 = vpop.f32.mrb[3].mxu1  ;;  %v710_v12 = vpop.f32.mrb[3].mxu0  ;;  %v763_v15 = vsub.f32 %v530_v7, %v2310_v56  ;;  %v767_v17 = vsub.f32 %v708_v8, %v2312_v57 }
 0x223   : > { %v854_v13 = vmul.f32 -0.5, %v782_v5  ;;  %v764_v26 = vsub.f32 %v532_v11, %v2314_v58  ;;  %v768_v27 = vsub.f32 %v710_v12, %v2316_v61  ;;  %v1729_v30 = vadd.f32 -1.0, %v781_v3 }
 0x224   : > { %v877_v14 = vmul.f32 1.442695, %v853_v9  ;;  %v885_v18 = vmul.f32 1.442695, %v857_v10  ;;  %v787_v19 = vmul.f32 %v763_v15, %v763_v15  ;;  %v791_v25 = vmul.f32 %v767_v17, %v767_v17 }
 0x225   : > { %v536_v20 = vpop.f32.mrb[4].mxu1  ;;  %v714_v21 = vpop.f32.mrb[4].mxu0  ;;  %v879_v24 = vmul.f32 1.442695, %v854_v13  ;;  %v1733_v33 = vadd.f32 -1.0, %v785_v4  ;;  %v858_v34 = vmul.f32 -0.5, %v786_v16  ;;  %v788_v36 = vmul.f32 %v764_v26, %v764_v26 }
 0x226   : > { %v538_v28 = vpop.f32.mrb[5].mxu1  ;;  %v716_v29 = vpop.f32.mrb[5].mxu0  ;;  %1977 = vpow2.f32 %v877_v14  ;;  %v859_v31 = vmul.f32 -0.5, %v787_v19  ;;  %v769_v32 = vsub.f32 %v536_v20, %v2310_v56  ;;  %v863_v35 = vmul.f32 -0.5, %v791_v25 }
 0x227   : > { %1979 = vpow2.f32 %v885_v18  ;;  %v792_v40 = vmul.f32 %v768_v27, %v768_v27  ;;  %v1730_v47 = vadd.f32 -1.0, %v782_v5  ;;  %v1734_v48 = vadd.f32 -1.0, %v786_v16 }
 0x228   : > { %v889_v39 = vmul.f32 1.442695, %v859_v31  ;;  %v793_v41 = vmul.f32 %v769_v32, %v769_v32  ;;  %1981 = vpow2.f32 %v879_v24  ;;  %v897_v44 = vmul.f32 1.442695, %v863_v35 }
 0x229   : > { %v542_v37 = vpop.f32.mrb[6].mxu1  ;;  %v720_v38 = vpop.f32.mrb[6].mxu0  ;;  %v860_v49 = vmul.f32 -0.5, %v788_v36  ;;  %v829_v50 = vmul.f32 0.86732507, %v1729_v30  ;;  %v864_v52 = vmul.f32 -0.5, %v792_v40  ;;  %v773_v62 = vsub.f32 %v714_v21, %v2312_v57 }
 0x22a   : > { %v2329_v42 = vpop.f32.mrb[7].mxu1  ;;  %v2331_v43 = vpop.f32.mrb[7].mxu0  ;;  %1983 = vpow2.f32 %v889_v39  ;;  %v833_v51 = vmul.f32 0.86732507, %v1733_v33  ;;  %v887_v55 = vmul.f32 1.442695, %v858_v34  ;;  %v770_v53 = vsub.f32 %v538_v28, %v2314_v58 }
 0x22b   : > { %1985 = vpow2.f32 %v897_v44  ;;  %v1735_v59 = vadd.f32 -1.0, %v787_v19  ;;  %v865_v60 = vmul.f32 -0.5, %v793_v41  ;;  %v1739_v63 = vadd.f32 -1.0, %v791_v25 }
 0x22c   : > { %v1736_v0 = vadd.f32 -1.0, %v788_v36  ;;  %v774_v1 = vsub.f32 %v716_v29, %v2316_v61  ;;  %v891_v3 = vmul.f32 1.442695, %v860_v49  ;;  %v1740_v4 = vadd.f32 -1.0, %v792_v40 }
 0x22d   : > { %v2337_v54 = vpop.f32.mrb[8].mxu1  ;;  %v1741_v5 = vadd.f32 -1.0, %v793_v41  ;;  %v775_v6 = vsub.f32 %v542_v37, %v2310_v56  ;;  %v830_v7 = vmul.f32 0.86732507, %v1730_v47  ;;  %v899_v8 = vmul.f32 1.442695, %v864_v52 }
 0x22e   : > { %v615_v2 = vpop.f32.mrb[9].mxu1  ;;  %v797_v9 = vmul.f32 %v773_v62, %v773_v62  ;;  %v779_v10 = vsub.f32 %v720_v38, %v2312_v57  ;;  %v2344_v13 = vmul.f32 0.86732507, %v1734_v48  ;;  %v901_v14 = vmul.f32 1.442695, %v865_v60 }
 0x22f   : > { %v794_v15 = vmul.f32 %v770_v53, %v770_v53  ;;  %v799_v16 = vmul.f32 %v775_v6, %v775_v6  ;;  %1987 = vpow2.f32 %v887_v55  ;;  %v835_v18 = vmul.f32 0.86732507, %v1735_v59 }
 0x230   : > { %v1978_v12 = vpop.eup %1977  ;;  %v839_v19 = vmul.f32 0.86732507, %v1739_v63  ;;  %v798_v20 = vmul.f32 %v774_v1, %v774_v1  ;;  %v2348_v56 = vmul.f32 0.86732507, %v1736_v0  ;;  %1989 = vpow2.f32 %v891_v3 }
 0x231   : > { %v619_v11 = vpop.f32.mrb[10].mxu1  ;;  %v1980_v21 = vpop.eup %1979  ;;  %v2350_v22 = vmul.f32 0.86732507, %v1740_v4  ;;  %v2352_v57 = vmul.f32 0.86732507, %v1741_v5  ;;  %v2354_v24 = vmul.f32 %v1978_v12, %v829_v50  ;;  %1991 = vpow2.f32 %v899_v8 }
 0x232   : > { %v2346_v17 = vpop.f32.mrb[11].mxu1  ;;  %v1982_v23 = vpop.eup %1981  ;;  %v869_v25 = vmul.f32 -0.5, %v797_v9  ;;  %v803_v26 = vmul.f32 %v779_v10, %v779_v10  ;;  %1993 = vpow2.f32 %v901_v14  ;;  %v1745_v28 = vadd.f32 -1.0, %v797_v9 }
 0x233   : > { %v866_v29 = vmul.f32 -0.5, %v794_v15  ;;  %v871_v30 = vmul.f32 -0.5, %v799_v16  ;;  %v2358_v33 = vmul.f32 %v1980_v21, %v833_v51  ;;  %v870_v35 = vmul.f32 -0.5, %v798_v20 }
 0x234   : > { %v1984_v27 = vpop.eup %1983  ;;  %v875_v36 = vmul.f32 -0.5, %v803_v26  ;;  %v2362_v38 = vmul.f32 %v1982_v23, %v830_v7  ;;  %v1742_v40 = vadd.f32 -1.0, %v794_v15  ;;  %v909_v47 = vmul.f32 1.442695, %v869_v25 }
 0x235   : > { %v2356_v31 = vpop.f32.mrb[12].mxu1  ;;  %v1986_v32 = vpop.eup %1985  ;;  %v2360_v34 = vmul.f32 %v1984_v27, %v835_v18  ;;  %v913_v41 = vmul.f32 1.442695, %v871_v30  ;;  %v1746_v48 = vadd.f32 -1.0, %v798_v20  ;;  %v776_v49 = vsub.f32 %v2329_v42, %v2314_v58 }
 0x236   : > { %v627_v37 = vpop.f32.mrb[13].mxu1  ;;  %v2364_v39 = vmul.f32 %v1986_v32, %v839_v19  ;;  %v2372_v52 = vmul.f32 0.86732507, %v1745_v28  ;;  %v903_v55 = vmul.f32 1.442695, %v866_v29  ;;  %v780_v59 = vsub.f32 %v2331_v43, %v2316_v61 }
 0x237   : > { %v949_v44 = vpack.c.bf16 %v2360_v34, %v2354_v24  ;;  %v911_v62 = vmul.f32 1.442695, %v870_v35  ;;  %v921_v63 = vmul.f32 1.442695, %v875_v36  ;;  %v800_v0 = vmul.f32 %v776_v49, %v776_v49  ;;  %v1953_v24 = vld [vmem:[%s2530_s5 + $0x150] sm:$0xff]  }
 0x238   : > { %v953_v51 = vpack.c.bf16 %v2364_v39, %v2358_v33  ;;  %v759_v53 = vsub.f32 %v2337_v54, %v2333_v45  ;;  %1995 = vpow2.f32 %v913_v41  ;;  %v804_v1 = vmul.f32 %v780_v59, %v780_v59 }
 0x239   : > { %v631_v50 = vpop.f32.mrb[14].mxu1  ;;  %v760_v58 = vsub.f32 %v615_v2, %v2335_v46  ;;  %v765_v42 = vsub.f32 %v619_v11, %v2333_v45  ;;  %v1988_v3 = vpop.eup %1987  ;;  %1997 = vpow2.f32 %v909_v47  ;;  %v1747_v4 = vadd.f32 -1.0, %v799_v16 }
 0x23a   : > { %v633_v60 = vpop.f32.mrb[15].mxu1  ;;  %v872_v5 = vmul.f32 -0.5, %v800_v0  ;;  %v783_v6 = vmul.f32 %v759_v53, %v759_v53  ;;  %v1990_v61 = vpop.eup %1989  ;;  %1999 = vpow2.f32 %v903_v55  ;;  %v1751_v43 = vadd.f32 -1.0, %v803_v26 }
 0x23b   : > { %v876_v8 = vmul.f32 -0.5, %v804_v1  ;;  %v784_v9 = vmul.f32 %v760_v58, %v760_v58  ;;  %v1992_v54 = vpop.eup %1991  ;;  %2001 = vpow2.f32 %v921_v63  ;;  %v789_v14 = vmul.f32 %v765_v42, %v765_v42 }
 0x23c   : > { %v915_v12 = vmul.f32 1.442695, %v872_v5  ;;  %v855_v2 = vmul.f32 -0.5, %v783_v6  ;;  %v1994_v11 = vpop.eup %1993  ;;  %2003 = vpow2.f32 %v911_v62  ;;  %v766_v18 = vsub.f32 %v2346_v17, %v2335_v46 }
 0x23d   : > { %v2380_v7 = vpop.f32.mrb[16].mxu1  ;;  %v923_v15 = vmul.f32 1.442695, %v876_v8  ;;  %v856_v16 = vmul.f32 -0.5, %v784_v9  ;;  %v2387_v19 = vmul.f32 %v1988_v3, %v2344_v13  ;;  %v842_v20 = vmul.f32 0.86732507, %v1742_v40 }
 0x23e   : > { %v2382_v10 = vpop.f32.mrb[17].mxu1  ;;  %2005 = vpow2.f32 %v915_v12  ;;  %v881_v21 = vmul.f32 1.442695, %v855_v2  ;;  %v846_v25 = vmul.f32 0.86732507, %v1746_v48  ;;  %v1748_v27 = vadd.f32 -1.0, %v800_v0 }
 0x23f   : > { %v2389_v23 = vpop.f32.mrb[18].mxu1  ;;  %v847_v26 = vmul.f32 0.86732507, %v1747_v4  ;;  %2007 = vpow2.f32 %v923_v15  ;;  %v932_v29 = vmul.f32 %v1990_v61, %v2348_v56  ;;  %v2395_v30 = vmul.f32 %v1992_v54, %v2350_v22  ;;  %v1947_v12 = vld [vmem:[%s2530_s5 + $0x100] sm:$0xff]  }
 0x240   : > { %v2391_v28 = vpop.f32.mrb[19].mxu1  ;;  %v851_v17 = vmul.f32 0.86732507, %v1751_v43  ;;  %v861_v32 = vmul.f32 -0.5, %v789_v14  ;;  %v883_v13 = vmul.f32 1.442695, %v856_v16  ;;  %v790_v35 = vmul.f32 %v766_v18, %v766_v18 }
 0x241   : > { %v771_v36 = vsub.f32 %v2356_v31, %v2333_v45  ;;  %v772_v40 = vsub.f32 %v627_v37, %v2335_v46  ;;  %v1752_v41 = vadd.f32 -1.0, %v804_v1  ;;  %2009 = vpow2.f32 %v881_v21 }
 0x242   : > { %v893_v47 = vmul.f32 1.442695, %v861_v32  ;;  %v777_v48 = vsub.f32 %v631_v50, %v2333_v45  ;;  %v1996_v49 = vpop.eup %1995  ;;  %v2402_v56 = vmul.f32 %v1994_v11, %v2352_v57  ;;  %v848_v22 = vmul.f32 0.86732507, %v1748_v27 }
 0x243   : > { %v862_v55 = vmul.f32 -0.5, %v790_v35  ;;  %v2404_v59 = vmul.f32 %v771_v36, %v771_v36  ;;  %v1998_v62 = vpop.eup %1997  ;;  %v2406_v63 = vmul.f32 %v772_v40, %v772_v40  ;;  %v778_v37 = vsub.f32 %v633_v60, %v2335_v46 }
 0x244   : > { %2011 = vpow2.f32 %v893_v47  ;;  %v801_v31 = vmul.f32 %v777_v48, %v777_v48  ;;  %v2000_v0 = vpop.eup %1999  ;;  %v1731_v53 = vadd.f32 -1.0, %v783_v6  ;;  %v2410_v57 = vmul.f32 %v1996_v49, %v847_v26 }
 0x245   : > { %2013 = vpow2.f32 %v883_v13  ;;  %v895_v1 = vmul.f32 1.442695, %v862_v55  ;;  %v867_v45 = vmul.f32 -0.5, %v2404_v59  ;;  %v2002_v50 = vpop.eup %2001  ;;  %v852_v58 = vmul.f32 0.86732507, %v1752_v41 }
 0x246   : > { %v868_v42 = vmul.f32 -0.5, %v2406_v63  ;;  %v873_v3 = vmul.f32 -0.5, %v801_v31  ;;  %v2004_v4 = vpop.eup %2003  ;;  %v1732_v5 = vadd.f32 -1.0, %v784_v9  ;;  %v802_v43 = vmul.f32 %v778_v37, %v778_v37  ;;  %v1949_v9 = vld [vmem:[%s2530_s5 + $0x148] sm:$0xff]  }
 0x247   : > { %2015 = vpow2.f32 %v895_v1  ;;  %v905_v61 = vmul.f32 1.442695, %v867_v45  ;;  %v938_v46 = vmul.f32 %v2000_v0, %v842_v20  ;;  %v1737_v60 = vadd.f32 -1.0, %v789_v14 }
 0x248   : > { %v2006_v8 = vpop.eup %2005  ;;  %v907_v6 = vmul.f32 1.442695, %v868_v42  ;;  %v950_v54 = vpack.c.bf16 %v932_v29, %v2362_v38  ;;  %v2417_v11 = vmul.f32 %v2002_v50, %v851_v17  ;;  %v917_v16 = vmul.f32 1.442695, %v873_v3  ;;  %v1951_v17 = vld [vmem:[%s2530_s5 + $0x108] sm:$0xff]  }
 0x249   : > { %v2008_v2 = vpop.eup %2007  ;;  %v944_v15 = vmul.f32 %v2006_v8, %v848_v22  ;;  %2017 = vpow2.f32 %v905_v61  ;;  %v2422_v18 = vmul.f32 %v2004_v4, %v846_v25  ;;  %v874_v20 = vmul.f32 -0.5, %v802_v43  ;;  %v1957_v22 = vld [vmem:[%s2530_s5 + $0x158] sm:$0xff]  }
 0x24a   : > { %v2424_v14 = vmul.f32 %v2008_v2, %v852_v58  ;;  %1442 = vmatprep.mubr.bf16.mxu0 %v950_v54  ;;  %v955_v38 = vpack.c.bf16 %v2410_v57, %v2402_v56  ;;  %v2429_v21 = vmul.f32 %v1998_v62, %v2372_v52  ;;  %v1738_v26 = vadd.f32 -1.0, %v790_v35  ;;  %v1961_v58 = vld [vmem:[%s2530_s5 + $0x160] sm:$0xff]   ;;  %v1965_v2 = vld [vmem:[%s2530_s5 + $0x170] sm:$0xff]  }
 0x24b   : > { %2019 = vpow2.f32 %v917_v16  ;;  %1443 = vmatmul.mubr.bf16.vlgmr.msra.gmra.mrb[8].mxu0 %v949_v44  ;;  %v956_v27 = vpack.c.bf16 %v944_v15, %v938_v46  ;;  %v2010_v29 = vpop.eup %2009  ;;  %v919_v25 = vmul.f32 1.442695, %v874_v20  ;;  %v954_v32 = vpack.c.bf16 %v2395_v30, %v2387_v19  ;;  %v1955_v19 = vld [vmem:[%s2530_s5 + $0x110] sm:$0xff]   ;;  %v1967_v15 = vld [vmem:[%s2530_s5 + $0x178] sm:$0xff]  }
 0x24c   : > { %2021 = vpow2.f32 %v907_v6  ;;  %1866 = vmatpush3.bf16.msra.mxu0 %v1947_v12  ;;  %v960_v52 = vpack.c.bf16 %v2424_v14, %v2422_v18  ;;  %v831_v13 = vmul.f32 0.86732507, %v1731_v53  ;;  %v837_v35 = vmul.f32 0.86732507, %v1737_v60  ;;  %v1963_v6 = vld [vmem:[%s2530_s5 + $0x168] sm:$0xff]   ;;  %v1968_v16 = vld [vmem:[%s2530_s5 + $0x138] sm:$0xff]  }
 0x24d   : > { %1867 = vmatprep.subr.bf16.mxu0 %v1949_v9  ;;  %1450 = vmatprep.mubr.bf16.mxu0 %v956_v27  ;;  %v959_v34 = vpack.c.bf16 %v2417_v11, %v2429_v21  ;;  %2023 = vpow2.f32 %v919_v25  ;;  %v832_v30 = vmul.f32 0.86732507, %v1732_v5  ;;  %v838_v47 = vmul.f32 0.86732507, %v1738_v26  ;;  %v1964_v12 = vld [vmem:[%s2530_s5 + $0x128] sm:$0xff]   ;;  %v1966_v11 = vld [vmem:[%s2530_s5 + $0x130] sm:$0xff]  }
 0x24e   : > { %v2012_v44 = vpop.eup %2011  ;;  %v927_v40 = vmul.f32 %v2010_v29, %v831_v13  ;;  %v1743_v48 = vadd.f32 -1.0, %v2404_v59  ;;  %v1749_v49 = vadd.f32 -1.0, %v801_v31  ;;  %v1744_v53 = vadd.f32 -1.0, %v2406_v63  ;;  %v1959_v59 = vld [vmem:[%s2530_s5 + $0x118] sm:$0xff]  }
 0x24f   : > { %v2014_v36 = vpop.eup %2013  ;;  %v933_v41 = vmul.f32 %v2012_v44, %v837_v35  ;;  %v1750_v1 = vadd.f32 -1.0, %v802_v43  ;;  %v1962_v43 = vld [vmem:[%s2530_s5 + $0x120] sm:$0xff]  }
 0x250   : > { %1868 = vmatpush3.bf16.msra.mxu0 %v1951_v17  ;;  %v928_v62 = vmul.f32 %v2014_v36, %v832_v30  ;;  %v843_v45 = vmul.f32 0.86732507, %v1743_v48  ;;  %v849_v50 = vmul.f32 0.86732507, %v1749_v49  ;;  %v844_v4 = vmul.f32 0.86732507, %v1744_v53 }
 0x251   : > { %v2016_v56 = vpop.eup %2015  ;;  %1869 = vmatprep.subr.bf16.mxu0 %v1953_v24  ;;  %v951_v55 = vpack.c.bf16 %v933_v41, %v927_v40  ;;  %v850_v5 = vmul.f32 0.86732507, %v1750_v1 }
 0x252   : > { %v934_v37 = vmul.f32 %v2016_v56, %v838_v47 }
 0x253   : > { %v2018_v0 = vpop.eup %2017  ;;  %1451 = vmatmul.mubr.bf16.gmra.mrb[12].mxu0 %v955_v38 }
 0x254   : > { %1870 = vmatpush3.bf16.msra.mxu0 %v1955_v19  ;;  %1540 = vmatprep.mubr.bf16.mxu0 %v954_v32  ;;  %v952_v31 = vpack.c.bf16 %v934_v37, %v928_v62  ;;  %v939_v3 = vmul.f32 %v2018_v0, %v843_v45 }
 0x255   : > { %v2020_v57 = vpop.eup %2019  ;;  %1871 = vmatprep.subr.bf16.mxu0 %v1957_v22 }
 0x256   : > { %v2022_v42 = vpop.eup %2021  ;;  %v945_v63 = vmul.f32 %v2020_v57, %v849_v50  ;;  %1491 = vmatprep.mubr.bf16.mxu1 %v952_v31 }
 0x257   : > { %1492 = vmatmul.mubr.bf16.vlgmr.msra.gmra.mrb[20].mxu1 %v951_v55  ;;  %v2024_v61 = vpop.eup %2023  ;;  %v940_v46 = vmul.f32 %v2022_v42, %v844_v4 }
 0x258   : > { %1872 = vmatpush3.bf16.msra.mxu0 %v1959_v59  ;;  %v957_v8 = vpack.c.bf16 %v945_v63, %v939_v3  ;;  %v946_v60 = vmul.f32 %v2024_v61, %v850_v5 }
 0x259   : > { %1873 = vmatprep.subr.bf16.mxu0 %v1961_v58 }
 0x25a   : > { %v958_v54 = vpack.c.bf16 %v946_v60, %v940_v46 }
 0x25c   : > { %1874 = vmatpush3.bf16.msra.mxu0 %v1962_v43  ;;  %1499 = vmatprep.mubr.bf16.mxu1 %v958_v54 }
 0x25d   : > { %1875 = vmatprep.subr.bf16.mxu0 %v1963_v6 }
 0x25f   : > { %1500 = vmatmul.mubr.bf16.gmra.mrb[24].mxu1 %v957_v8 }
 0x260   : > { %1876 = vmatpush3.bf16.msra.mxu0 %v1964_v12 }
 0x261   : > { %1877 = vmatprep.subr.bf16.mxu0 %v1965_v2 }
 0x264   : > { %1878 = vmatpush3.bf16.msra.mxu0 %v1966_v11 }
 0x265   : > { %1879 = vmatprep.subr.bf16.mxu0 %v1967_v15 }
 0x268   : > { %1880 = vmatpush3.bf16.msra.mxu0 %v1968_v16 }
 0x26b   : > { %1541 = vmatmul.mubr.bf16.vlgmr.msra.gmra.mrb[16].mxu0 %v953_v51 }
 0x26c   : > { %1548 = vmatprep.mubr.bf16.mxu0 %v960_v52 }
 0x273   : > { %1549 = vmatmul.mubr.bf16.gmra.mrb[20].mxu0 %v959_v34 }
 0x31e   : > { %v1825_v9 = vpop.f32.mrb[8].mxu0 }
 0x31f   : > { %v1826_v20 = vpop.f32.mrb[9].mxu0 }
 0x320   : > { %v1827_v38 = vadd.f32 %v1826_v20, %v1825_v9  ;;  %v1828_v21 = vpop.f32.mrb[10].mxu0 }
 0x321   : > { %v1829_v26 = vpop.f32.mrb[11].mxu0 }
 0x322   : > { %v1445_v27 = vadd.f32 %v1827_v38, %v2382_v10  ;;  %v1830_v29 = vadd.f32 %v1829_v26, %v1828_v21 }
 0x324   : > { %v1448_v25 = vadd.f32 %v1830_v29, %v2391_v28 }
 0x326   : > { %v1831_v17 = vpop.f32.mrb[12].mxu0 }
 0x327   : > { %v1832_v32 = vpop.f32.mrb[13].mxu0 }
 0x328   : > { %v1833_v13 = vadd.f32 %v1832_v32, %v1831_v17  ;;  %v1834_v33 = vpop.f32.mrb[14].mxu0 }
 0x329   : > { %v1835_v39 = vpop.f32.mrb[15].mxu0 }
 0x32a   : > { %v1453_v51 = vadd.f32 %v2380_v7, %v1833_v13  ;;  %v1836_v18 = vadd.f32 %v1835_v39, %v1834_v33  ;;  %v1853_v14 = vpop.f32.mrb[20].mxu1 }
 0x32b   : > { %v1854_v52 = vpop.f32.mrb[21].mxu1 }
 0x32c   : > { %v1456_v35 = vadd.f32 %v2389_v23, %v1836_v18  ;;  %v1855_v24 = vadd.f32 %v1854_v52, %v1853_v14  ;;  %v1856_v34 = vpop.f32.mrb[22].mxu1 }
 0x32d   : > { %v1857_v44 = vpop.f32.mrb[23].mxu1 }
 0x32e   : > { %v1494_v10 = vadd.f32 %v1855_v24, %v1445_v27  ;;  %v1858_v36 = vadd.f32 %v1857_v44, %v1856_v34 }
 0x330   : > { %v1497_v40 = vadd.f32 %v1858_v36, %v1448_v25 }
 0x332   : > { %v1859_v28 = vpop.f32.mrb[24].mxu1 }
 0x333   : > { %v1860_v41 = vpop.f32.mrb[25].mxu1 }
 0x334   : > { %v1861_v19 = vadd.f32 %v1860_v41, %v1859_v28  ;;  %v1862_v30 = vpop.f32.mrb[26].mxu1 }
 0x335   : > { %v1863_v47 = vpop.f32.mrb[27].mxu1 }
 0x336   : > { %v1502_v48 = vadd.f32 %v1861_v19, %v1453_v51  ;;  %v1864_v49 = vadd.f32 %v1863_v47, %v1862_v30 }
 0x338   : > { %v1505_v7 = vadd.f32 %v1864_v49, %v1456_v35 }
 0x33e   : > { %v1881_v56 = vpop.f32.mrb[16].mxu0 }
 0x33f   : > { %v1882_v22 = vpop.f32.mrb[17].mxu0 }
 0x340   : > { %v1883_v55 = vadd.f32 %v1882_v22, %v1881_v56  ;;  %v1884_v62 = vpop.f32.mrb[18].mxu0 }
 0x341   : > { %v1885_v23 = vpop.f32.mrb[19].mxu0 }
 0x342   : > { %v1543_v37 = vadd.f32 %v1883_v55, %v1494_v10  ;;  %v1886_v0 = vadd.f32 %v1885_v23, %v1884_v62 }
 0x344   : > { %1558 = vst.msk [vmem:[%s345_s27] sm:$0xff] %vm1557_vm1, %v1543_v37  ;;  %v1546_v53 = vadd.f32 %v1886_v0, %v1497_v40  ;;  %v1562_v1 = vsel %vm1557_vm1, %v1543_v37, 0.0 }
 0x346   : > { %1559 = vst.msk [vmem:[%s345_s27 + $0x8] sm:$0xff] %vm1557_vm1, %v1546_v53  ;;  %v1563_v45 = vsel %vm1557_vm1, %v1546_v53, 0.0  ;;  %v1887_v50 = vpop.f32.mrb[20].mxu0 }
 0x347   : > { %v1564_v59 = vadd.f32 %v1563_v45, %v1562_v1  ;;  %v1888_v31 = vpop.f32.mrb[21].mxu0 }
 0x348   : > { %v1889_v57 = vadd.f32 %v1888_v31, %v1887_v50  ;;  %v1890_v58 = vpop.f32.mrb[22].mxu0 }
 0x349   : > { %v1891_v42 = vpop.f32.mrb[23].mxu0 }
 0x34a   : > { %v1551_v3 = vadd.f32 %v1889_v57, %v1502_v48  ;;  %v1892_v63 = vadd.f32 %v1891_v42, %v1890_v58 }
 0x34c   : > { %1560 = vst.msk [vmem:[%s345_s27 + $0x10] sm:$0xff] %vm1557_vm1, %v1551_v3  ;;  %v1565_v4 = vsel %vm1557_vm1, %v1551_v3, 0.0  ;;  %v1554_v5 = vadd.f32 %v1892_v63, %v1505_v7 }
 0x34d   : > { %v1566_v61 = vadd.f32 %v1565_v4, %v1564_v59 }
 0x34e   : > { %1561 = vst.msk [vmem:[%s345_s27 + $0x18] sm:$0xff] %vm1557_vm1, %v1554_v5  ;;  %v1567_v43 = vsel %vm1557_vm1, %v1554_v5, 0.0 }
 0x34f   : > { %v1568_v8 = vadd.f32 %v1567_v43, %v1566_v61 }
 0x351   : > { %v1569_v46 = vrot.slane %v1568_v8, 4 }
 0x353   : > { %v1570_v60 = vadd.f32 %v1569_v46, %v1568_v8 }
 0x355   : > { %v1571_v6 = vrot.slane %v1570_v60, 2 }
 0x357   : > { %v1572_v54 = vadd.f32 %v1571_v6, %v1570_v60 }
 0x359   : > { %v1573_v12 = vrot.slane %v1572_v54, 1 }
 0x35b   : > { %v1574_v2 = vadd.f32 %v1573_v12, %v1572_v54 }
 0x35d   : > { %1576 = vst.msk [vmem:[%s349_s28] sm:$0x1] %vm1575_vm2, %v1574_v2  ;;  %v1577_v11 = vmul.f32 0.03125, %v1574_v2 }
 0x35f   : > { %v1578_v15 = vsub.f32 %v1543_v37, %v1577_v11  ;;  %v1579_v16 = vsub.f32 %v1546_v53, %v1577_v11  ;;  %v1580_v9 = vsub.f32 %v1551_v3, %v1577_v11  ;;  %v1581_v20 = vsub.f32 %v1554_v5, %v1577_v11 }
 0x361   : > { %v1582_v38 = vmul.f32 %v1578_v15, %v1578_v15  ;;  %v1583_v21 = vmul.f32 %v1579_v16, %v1579_v16  ;;  %v1584_v26 = vmul.f32 %v1580_v9, %v1580_v9  ;;  %v1585_v27 = vmul.f32 %v1581_v20, %v1581_v20 }
 0x363   : > { %v1586_v29 = vsel %vm1557_vm1, %v1582_v38, 0.0  ;;  %v1587_v25 = vsel %vm1557_vm1, %v1583_v21, 0.0  ;;  %v1589_v32 = vsel %vm1557_vm1, %v1584_v26, 0.0  ;;  %v1591_v33 = vsel %vm1557_vm1, %v1585_v27, 0.0 }
 0x364   : > { %v1588_v17 = vadd.f32 %v1587_v25, %v1586_v29 }
 0x366   : > { %v1590_v13 = vadd.f32 %v1589_v32, %v1588_v17 }
 0x368   : > { %v1592_v39 = vadd.f32 %v1591_v33, %v1590_v13 }
 0x36a   : > { %v1593_v51 = vrot.slane %v1592_v39, 4 }
 0x36c   : > { %v1594_v18 = vadd.f32 %v1593_v51, %v1592_v39 }
 0x36e   : > { %v1595_v14 = vrot.slane %v1594_v18, 2 }
 0x370   : > { %v1596_v52 = vadd.f32 %v1595_v14, %v1594_v18 }
 0x372   : > { %v1597_v35 = vrot.slane %v1596_v52, 1 }
 0x374   : > { %v1598_v24 = vadd.f32 %v1597_v35, %v1596_v52 }
 0x376   : > { %1599 = vst.msk [vmem:[%s352_s14] sm:$0x1] %vm1575_vm2, %v1598_v24 }
 0x377 PF: > { %s20_s30 = sadd.s32 1, %s2031_s30  }
 0x378   : > { %p17_p5 = scmp.ge.s32.totalorder %s20_s30, 6  }
 0x37a   :  { %19 = sbr.rel (!%p17_p5) target bundleno = 1 (0x1), region = 102 }

// kernel: kan_conv_transformer.16
= control target key start
LH: loop header
LB: loop body
LE: loop exit
PB: predicated region body
PF: predicated region fallthrough
CT: control target
= control target key end

     0   :  { %s1070_s24 = smov 0   ;;  %s1195_s0 = inlined_call_operand.vmem [shape: f32[128,16], index: 0, kind: input, shape index: {}]   ;;  %s1196_s1 = inlined_call_operand.vmem [shape: f32[16,256], index: 1, kind: input, shape index: {}]   ;;  %s1197_s2 = inlined_call_operand.vmem [shape: f32[1,256], index: 2, kind: input, shape index: {}]   ;;  %s1198_s3 = inlined_call_operand.vmem [shape: bf16[256,16], index: 3, kind: input, shape index: {}]   ;;  %s1199_s4 = inlined_call_operand.vmem [shape: bf16[16,16], index: 4, kind: input, shape index: {}]   ;;  %s1200_s5 = inlined_call_operand.vmem [shape: f32[128,16], index: 5, kind: output, shape index: {0}]   ;;  %s1201_s6 = inlined_call_operand.vmem [shape: f32[4,1,16], index: 6, kind: output, shape index: {1}]   ;;  %s1202_s7 = inlined_call_operand.vmem [shape: f32[4,1,16], index: 7, kind: output, shape index: {2}]  }
   0x1 LB: > { %s1076_s25 = sadd.s32 4294967295, %s1027_s24   ;;  %p884_p0 = scmp.ge.s32.totalorder %s1027_s24, 1  ;;  %s1027_s24 = sphi %s1070_s24, %s18_s24  }
   0x2   : > { %p243_p1 = scmp.lt.s32.totalorder %s1027_s24, 5 }
   0x4   : > { %p244_p2 = pnand %p884_p0, %p243_p1 }
   0x5   : > { %v305_v0 = vld [vmem:[%s1196_s1 + $0x8] sm:$0xff] (!%p244_p2)  ;;  %v307_v1 = vld [vmem:[%s1196_s1 + $0x18] sm:$0xff] (!%p244_p2)  ;;  %v304_v2 = vld [vmem:[%s1196_s1] sm:$0xff] (!%p244_p2)  ;;  %s885_s9 = sshll.u32 (!%p244_p2), %s1076_s25, 2  ;;  %v1029_v5 = vmov (!%p244_p2), 0.0   ;;  %vm308_vm0 = vcmask (!%p244_p2), 130048   ;;  %v412_v30 = vlaneseq (!%p244_p2) }
   0x6   : > { %247 = sbr.rel (%p244_p2) target bundleno = 526 (0x20e), region = 40  ;;  %v959_v3 = vpack.c.bf16 (!%p244_p2), %v307_v1, %v305_v0  ;;  %v306_v4 = vld [vmem:[%s1196_s1 + $0x10] sm:$0xff] (!%p244_p2)  ;;  %385 = vmatprep.mubr.f32.mxu0 (!%p244_p2), %v1029_v5  ;;  %p282_p3 = scmp.lt.s32.totalorder (!%p244_p2), %s885_s9, 15  ;;  %v988_v7 = vld [vmem:[%s1198_s3 + $0x40] sm:$0xff] (!%p244_p2)   ;;  %v991_v15 = vld [vmem:[%s1198_s3 + $0x48] sm:$0xff] (!%p244_p2)   ;;  %vm749_vm1 = vcmask (!%p244_p2), 122880  }
   0x7   : > { %v961_v6 = vpack.c.bf16 (!%p244_p2), %v306_v4, %v304_v2  ;;  %v989_v8 = vld [vmem:[%s1198_s3] sm:$0xff] (!%p244_p2)   ;;  %v992_v17 = vld [vmem:[%s1198_s3 + $0x8] sm:$0xff] (!%p244_p2)   ;;  %v993_v18 = vld [vmem:[%s1198_s3 + $0x50] sm:$0xff] (!%p244_p2)   ;;  %v413_v31 = vshrl.u32 (!%p244_p2), %v412_v30, 7  ;;  %p293_p4 = scmp.lt.s32.totalorder (!%p244_p2), %s1076_s25, 3 }
   0x8   : > { %960 = vmatprep.subr.bf16.mxu0 (!%p244_p2), %v959_v3  ;;  %v990_v14 = vld [vmem:[%s1199_s4] sm:$0xff] (!%p244_p2)   ;;  %v994_v19 = vld [vmem:[%s1198_s3 + $0x10] sm:$0xff] (!%p244_p2)   ;;  %v995_v20 = vld [vmem:[%s1198_s3 + $0x58] sm:$0xff] (!%p244_p2)  }
   0x9   : > { %962 = vmatpush1.bf16.msra.mxu0 (!%p244_p2), %v961_v6  ;;  %953 = vmatprep.subr.bf16.mxu1 (!%p244_p2), %v990_v14  ;;  %v996_v21 = vld [vmem:[%s1198_s3 + $0x18] sm:$0xff] (!%p244_p2)   ;;  %v997_v22 = vld [vmem:[%s1198_s3 + $0x60] sm:$0xff] (!%p244_p2)   ;;  %v999_v24 = vld [vmem:[%s1198_s3 + $0x68] sm:$0xff] (!%p244_p2)   ;;  %v414_v32 = vsub.s32 (!%p244_p2), 0, %v413_v31  ;;  %v418_v34 = vsub.s32 (!%p244_p2), 1, %v413_v31 }
   0xa   : > { %925 = vmatprep.subr.bf16.mxu0 (!%p244_p2), %v988_v7  ;;  %954 = vmatpush3.bf16.msra.mxu1 (!%p244_p2), %v990_v14  ;;  %v998_v23 = vld [vmem:[%s1198_s3 + $0x20] sm:$0xff] (!%p244_p2)   ;;  %v1000_v25 = vld [vmem:[%s1198_s3 + $0x28] sm:$0xff] (!%p244_p2)   ;;  %v1001_v26 = vld [vmem:[%s1198_s3 + $0x70] sm:$0xff] (!%p244_p2)  }
   0xb   : > { %963 = vmatprep.subr.bf16.mxu1 (!%p244_p2), %v988_v7  ;;  %v1002_v27 = vld [vmem:[%s1198_s3 + $0x30] sm:$0xff] (!%p244_p2)   ;;  %v1003_v28 = vld [vmem:[%s1198_s3 + $0x78] sm:$0xff] (!%p244_p2)   ;;  %v410_v33 = vld [vmem:[%s1197_s2] sm:$0x3] (!%p244_p2) }
   0xc   : > { %v1004_v29 = vld [vmem:[%s1198_s3 + $0x38] sm:$0xff] (!%p244_p2)   ;;  %v415_v35 = vrot.slane (!%p244_p2), %v410_v33, %v414_v32  ;;  %v419_v36 = vrot.slane (!%p244_p2), %v410_v33, %v418_v34 }
   0xd   : > { %s1204_s9 = smov (!%p282_p3, %s885_s9), 15  ;;  %s1206_s25 = smov (!%p293_p4, %s1076_s25), 3 }
   0xe   : > { %s886_s14 = sshll.u32 %s1204_s9, 3  ;;  %s295_s17 = scalar_lea.vmem %s1201_s6, %s1206_s25 }
   0xf   : > { %s285_s19 = scalar_lea.vmem %s1195_s0, %s886_s14  ;;  %s291_s16 = scalar_lea.vmem %s1200_s5, %s886_s14 }
  0x10   : > { %v300_v9 = vld [vmem:[%s285_s19] sm:$0xff]  ;;  %v301_v10 = vld [vmem:[%s285_s19 + $0x8] sm:$0xff]  ;;  %v302_v11 = vld [vmem:[%s285_s19 + $0x10] sm:$0xff]  ;;  %s298_s20 = scalar_lea.vmem %s1202_s7, %s1206_s25 }
  0x11   : > { %889 = vmatmul.mubr.msk.f32.vlgmr.msra.gmra.mrb[0].mxu0 %vm308_vm0, %v300_v9  ;;  %v303_v12 = vld [vmem:[%s285_s19 + $0x18] sm:$0xff]  ;;  %v522_v16 = vpack.c.bf16 %v301_v10, %v300_v9 }
  0x12   : > { %391 = vmatprep.mubr.f32.mxu0 %v1029_v5  ;;  %v523_v13 = vpack.c.bf16 %v303_v12, %v302_v11  ;;  %926 = vmatpush3.bf16.msra.mxu0 %v989_v8 }
  0x13   : > { %927 = vmatprep.subr.bf16.mxu0 %v991_v15  ;;  %955 = vmatprep.mubr.msk.bf16.mxu1 %vm308_vm0, %v522_v16 }
  0x14   : > { %956 = vmatmul.mubr.msk.bf16.vlgmr.msra.gmra.mrb[0].mxu1 %vm308_vm0, %v523_v13 }
  0x15   : > { %890 = vmatmul.mubr.msk.f32.gmra.mrb[2].mxu0 %vm308_vm0, %v301_v10  ;;  %971 = vmatpush3.bf16.msra.mxu1 %v989_v8 }
  0x16   : > { %397 = vmatprep.mubr.f32.mxu0 %v1029_v5  ;;  %928 = vmatpush3.bf16.msra.mxu0 %v992_v17 }
  0x17   : > { %929 = vmatprep.subr.bf16.mxu0 %v993_v18  ;;  %964 = vmatprep.subr.bf16.mxu1 %v991_v15 }
  0x19   : > { %891 = vmatmul.mubr.msk.f32.gmra.mrb[4].mxu0 %vm308_vm0, %v302_v11  ;;  %972 = vmatpush3.bf16.msra.mxu1 %v992_v17 }
  0x1a   : > { %403 = vmatprep.mubr.f32.mxu0 %v1029_v5  ;;  %930 = vmatpush3.bf16.msra.mxu0 %v994_v19 }
  0x1b   : > { %931 = vmatprep.subr.bf16.mxu0 %v995_v20  ;;  %965 = vmatprep.subr.bf16.mxu1 %v993_v18 }
  0x1d   : > { %892 = vmatmul.mubr.msk.f32.gmra.mrb[6].mxu0 %vm308_vm0, %v303_v12  ;;  %973 = vmatpush3.bf16.msra.mxu1 %v994_v19 }
  0x1e   : > { %932 = vmatpush3.bf16.msra.mxu0 %v996_v21  ;;  %966 = vmatprep.subr.bf16.mxu1 %v995_v20 }
  0x1f   : > { %933 = vmatprep.subr.bf16.mxu0 %v997_v22 }
  0x21   : > { %974 = vmatpush3.bf16.msra.mxu1 %v996_v21 }
  0x22   : > { %934 = vmatpush3.bf16.msra.mxu0 %v998_v23  ;;  %967 = vmatprep.subr.bf16.mxu1 %v997_v22 }
  0x23   : > { %935 = vmatprep.subr.bf16.mxu0 %v999_v24 }
  0x25   : > { %975 = vmatpush3.bf16.msra.mxu1 %v998_v23 }
  0x26   : > { %936 = vmatpush3.bf16.msra.mxu0 %v1000_v25  ;;  %968 = vmatprep.subr.bf16.mxu1 %v999_v24 }
  0x27   : > { %937 = vmatprep.subr.bf16.mxu0 %v1001_v26 }
  0x29   : > { %976 = vmatpush3.bf16.msra.mxu1 %v1000_v25 }
  0x2a   : > { %938 = vmatpush3.bf16.msra.mxu0 %v1002_v27  ;;  %969 = vmatprep.subr.bf16.mxu1 %v1001_v26 }
  0x2b   : > { %939 = vmatprep.subr.bf16.mxu0 %v1003_v28 }
  0x2d   : > { %977 = vmatpush3.bf16.msra.mxu1 %v1002_v27 }
  0x2e   : > { %940 = vmatpush3.bf16.msra.mxu0 %v1004_v29  ;;  %970 = vmatprep.subr.bf16.mxu1 %v1003_v28 }
  0x31   : > { %978 = vmatpush3.bf16.msra.mxu1 %v1004_v29 }
  0xe4   : > { %v387_v37 = vpop.f32.mrb[0].mxu0 }
  0xe5   : > { %v422_v38 = vsub.f32 %v387_v37, %v415_v35  ;;  %v389_v39 = vpop.f32.mrb[1].mxu0 }
  0xe6   : > { %v423_v40 = vsub.f32 %v389_v39, %v419_v36 }
  0xe7   : > { %v430_v41 = vmul.f32 %v422_v38, %v422_v38 }
  0xe8   : > { %v431_v42 = vmul.f32 %v423_v40, %v423_v40  ;;  %v393_v43 = vpop.f32.mrb[2].mxu0 }
  0xe9   : > { %v454_v44 = vmul.f32 -0.5, %v430_v41  ;;  %v424_v45 = vsub.f32 %v393_v43, %v415_v35  ;;  %v395_v46 = vpop.f32.mrb[3].mxu0  ;;  %v893_v10 = vadd.f32 -1.0, %v430_v41 }
  0xea   : > { %v455_v47 = vmul.f32 -0.5, %v431_v42  ;;  %v425_v48 = vsub.f32 %v395_v46, %v419_v36  ;;  %v894_v13 = vadd.f32 -1.0, %v431_v42 }
  0xeb   : > { %v462_v49 = vmul.f32 1.442695, %v454_v44  ;;  %v432_v50 = vmul.f32 %v424_v45, %v424_v45  ;;  %v446_v19 = vmul.f32 0.86732507, %v893_v10 }
  0xec   : > { %v464_v51 = vmul.f32 1.442695, %v455_v47  ;;  %v433_v52 = vmul.f32 %v425_v48, %v425_v48  ;;  %v399_v53 = vpop.f32.mrb[4].mxu0  ;;  %v447_v22 = vmul.f32 0.86732507, %v894_v13 }
  0xed   : > { %v456_v54 = vmul.f32 -0.5, %v432_v50  ;;  %v426_v55 = vsub.f32 %v399_v53, %v415_v35  ;;  %v401_v56 = vpop.f32.mrb[5].mxu0  ;;  %1005 = vpow2.f32 %v462_v49  ;;  %v895_v11 = vadd.f32 -1.0, %v432_v50  ;;  %v957_v49 = vpop.f32.mrb[0].mxu1 }
  0xee   : > { %v457_v57 = vmul.f32 -0.5, %v433_v52  ;;  %v427_v58 = vsub.f32 %v401_v56, %v419_v36  ;;  %1007 = vpow2.f32 %v464_v51  ;;  %v896_v14 = vadd.f32 -1.0, %v433_v52  ;;  %v572_v50 = vpop.f32.mrb[1].mxu1 }
  0xef   : > { %v466_v59 = vmul.f32 1.442695, %v456_v54  ;;  %v434_v60 = vmul.f32 %v426_v55, %v426_v55  ;;  %v448_v20 = vmul.f32 0.86732507, %v895_v11  ;;  %v958_v51 = vpop.f32.mrb[2].mxu1 }
  0xf0   : > { %v468_v61 = vmul.f32 1.442695, %v457_v57  ;;  %v435_v62 = vmul.f32 %v427_v58, %v427_v58  ;;  %v405_v63 = vpop.f32.mrb[6].mxu0  ;;  %v449_v23 = vmul.f32 0.86732507, %v896_v14  ;;  %v575_v52 = vpop.f32.mrb[3].mxu1 }
  0xf1   : > { %1009 = vpow2.f32 %v466_v59  ;;  %v458_v0 = vmul.f32 -0.5, %v434_v60  ;;  %v428_v1 = vsub.f32 %v405_v63, %v415_v35  ;;  %v407_v2 = vpop.f32.mrb[7].mxu0  ;;  %v897_v30 = vadd.f32 -1.0, %v434_v60 }
  0xf2   : > { %1011 = vpow2.f32 %v468_v61  ;;  %v459_v3 = vmul.f32 -0.5, %v435_v62  ;;  %v429_v4 = vsub.f32 %v407_v2, %v419_v36  ;;  %v898_v32 = vadd.f32 -1.0, %v435_v62 }
  0xf3   : > { %v470_v5 = vmul.f32 1.442695, %v458_v0  ;;  %v436_v6 = vmul.f32 %v428_v1, %v428_v1  ;;  %v450_v37 = vmul.f32 0.86732507, %v897_v30 }
  0xf4   : > { %v472_v7 = vmul.f32 1.442695, %v459_v3  ;;  %v437_v8 = vmul.f32 %v429_v4, %v429_v4  ;;  %v451_v40 = vmul.f32 0.86732507, %v898_v32 }
  0xf5   : > { %v460_v9 = vmul.f32 -0.5, %v436_v6  ;;  %1013 = vpow2.f32 %v470_v5  ;;  %v899_v31 = vadd.f32 -1.0, %v436_v6 }
  0xf6   : > { %v461_v12 = vmul.f32 -0.5, %v437_v8  ;;  %1015 = vpow2.f32 %v472_v7  ;;  %v900_v33 = vadd.f32 -1.0, %v437_v8 }
  0xf7   : > { %v474_v15 = vmul.f32 1.442695, %v460_v9  ;;  %v1006_v17 = vpop.eup %1005  ;;  %v452_v38 = vmul.f32 0.86732507, %v899_v31 }
  0xf8   : > { %v476_v16 = vmul.f32 1.442695, %v461_v12  ;;  %v1008_v18 = vpop.eup %1007  ;;  %v478_v25 = vmul.f32 %v1006_v17, %v446_v19  ;;  %v453_v41 = vmul.f32 0.86732507, %v900_v33 }
  0xf9   : > { %1017 = vpow2.f32 %v474_v15  ;;  %v479_v27 = vmul.f32 %v1008_v18, %v447_v22 }
  0xfa   : > { %1019 = vpow2.f32 %v476_v16 }
  0xfb   : > { %v1010_v21 = vpop.eup %1009 }
  0xfc   : > { %v1012_v24 = vpop.eup %1011  ;;  %v480_v26 = vmul.f32 %v1010_v21, %v448_v20 }
  0xfd   : > { %v481_v28 = vmul.f32 %v1012_v24, %v449_v23 }
  0xfe   : > { %v486_v29 = vpack.c.bf16 %v480_v26, %v478_v25 }
  0xff   : > { %v487_v34 = vpack.c.bf16 %v481_v28, %v479_v27  ;;  %v1014_v35 = vpop.eup %1013 }
 0x100   : > { %v1016_v36 = vpop.eup %1015  ;;  %v482_v43 = vmul.f32 %v1014_v35, %v450_v37 }
 0x101   : > { %715 = vmatprep.mubr.bf16.mxu0 %v487_v34  ;;  %v483_v45 = vmul.f32 %v1016_v36, %v451_v40 }
 0x102   : > { %716 = vmatmul.mubr.bf16.vlgmr.msra.gmra.mrb[8].mxu0 %v486_v29 }
 0x103   : > { %v1018_v39 = vpop.eup %1017 }
 0x104   : > { %v1020_v42 = vpop.eup %1019  ;;  %v484_v44 = vmul.f32 %v1018_v39, %v452_v38 }
 0x105   : > { %v485_v46 = vmul.f32 %v1020_v42, %v453_v41 }
 0x106   : > { %v488_v47 = vpack.c.bf16 %v484_v44, %v482_v43 }
 0x107   : > { %v489_v48 = vpack.c.bf16 %v485_v46, %v483_v45 }
 0x109   : > { %723 = vmatprep.mubr.bf16.mxu1 %v489_v48 }
 0x10a   : > { %724 = vmatmul.mubr.bf16.vlgmr.msra.gmra.mrb[4].mxu1 %v488_v47 }
 0x1d5   : > { %v941_v53 = vpop.f32.mrb[8].mxu0 }
 0x1d6   : > { %v942_v54 = vpop.f32.mrb[9].mxu0 }
 0x1d7   : > { %v943_v55 = vadd.f32 %v942_v54, %v941_v53  ;;  %v944_v56 = vpop.f32.mrb[10].mxu0 }
 0x1d8   : > { %v945_v57 = vpop.f32.mrb[11].mxu0 }
 0x1d9   : > { %v718_v58 = vadd.f32 %v943_v55, %v572_v50  ;;  %v946_v59 = vadd.f32 %v945_v57, %v944_v56 }
 0x1db   : > { %732 = vst.msk [vmem:[%s291_s16] sm:$0xff] %vm308_vm0, %v718_v58  ;;  %v721_v60 = vadd.f32 %v946_v59, %v575_v52  ;;  %v736_v61 = vsel %vm308_vm0, %v718_v58, 0.0 }
 0x1dd   : > { %733 = vst.msk [vmem:[%s291_s16 + $0x8] sm:$0xff] %vm308_vm0, %v721_v60  ;;  %v737_v62 = vsel %vm308_vm0, %v721_v60, 0.0  ;;  %v947_v63 = vpop.f32.mrb[4].mxu1 }
 0x1de   : > { %v738_v0 = vadd.f32 %v737_v62, %v736_v61  ;;  %v948_v1 = vpop.f32.mrb[5].mxu1 }
 0x1df   : > { %v949_v2 = vadd.f32 %v948_v1, %v947_v63  ;;  %v950_v3 = vpop.f32.mrb[6].mxu1 }
 0x1e0   : > { %v951_v4 = vpop.f32.mrb[7].mxu1 }
 0x1e1   : > { %v726_v5 = vadd.f32 %v957_v49, %v949_v2  ;;  %v952_v6 = vadd.f32 %v951_v4, %v950_v3 }
 0x1e3   : > { %734 = vst.msk [vmem:[%s291_s16 + $0x10] sm:$0xff] %vm308_vm0, %v726_v5  ;;  %v739_v7 = vsel %vm308_vm0, %v726_v5, 0.0  ;;  %v729_v8 = vadd.f32 %v958_v51, %v952_v6 }
 0x1e4   : > { %v740_v9 = vadd.f32 %v739_v7, %v738_v0 }
 0x1e5   : > { %735 = vst.msk [vmem:[%s291_s16 + $0x18] sm:$0xff] %vm308_vm0, %v729_v8  ;;  %v741_v10 = vsel %vm308_vm0, %v729_v8, 0.0 }
 0x1e6   : > { %v742_v11 = vadd.f32 %v741_v10, %v740_v9 }
 0x1e8   : > { %v743_v12 = vrot.slane %v742_v11, 4 }
 0x1ea   : > { %v744_v13 = vadd.f32 %v743_v12, %v742_v11 }
 0x1ec   : > { %v745_v14 = vrot.slane %v744_v13, 2 }
 0x1ee   : > { %v746_v15 = vadd.f32 %v745_v14, %v744_v13 }
 0x1f0   : > { %v747_v16 = vrot.slane %v746_v15, 1 }
 0x1f2   : > { %v748_v17 = vadd.f32 %v747_v16, %v746_v15 }
 0x1f4   : > { %750 = vst.msk [vmem:[%s295_s17] sm:$0x1] %vm749_vm1, %v748_v17  ;;  %v751_v18 = vmul.f32 0.03125, %v748_v17 }
 0x1f6   : > { %v752_v19 = vsub.f32 %v718_v58, %v751_v18  ;;  %v753_v20 = vsub.f32 %v721_v60, %v751_v18  ;;  %v754_v21 = vsub.f32 %v726_v5, %v751_v18  ;;  %v755_v22 = vsub.f32 %v729_v8, %v751_v18 }
 0x1f8   : > { %v756_v23 = vmul.f32 %v752_v19, %v752_v19  ;;  %v757_v24 = vmul.f32 %v753_v20, %v753_v20  ;;  %v758_v25 = vmul.f32 %v754_v21, %v754_v21  ;;  %v759_v26 = vmul.f32 %v755_v22, %v755_v22 }
 0x1fa   : > { %v760_v27 = vsel %vm308_vm0, %v756_v23, 0.0  ;;  %v761_v28 = vsel %vm308_vm0, %v757_v24, 0.0  ;;  %v763_v30 = vsel %vm308_vm0, %v758_v25, 0.0  ;;  %v765_v32 = vsel %vm308_vm0, %v759_v26, 0.0 }
 0x1fb   : > { %v762_v29 = vadd.f32 %v761_v28, %v760_v27 }
 0x1fd   : > { %v764_v31 = vadd.f32 %v763_v30, %v762_v29 }
 0x1ff   : > { %v766_v33 = vadd.f32 %v765_v32, %v764_v31 }
 0x201   : > { %v767_v34 = vrot.slane %v766_v33, 4 }
 0x203   : > { %v768_v35 = vadd.f32 %v767_v34, %v766_v33 }
 0x205   : > { %v769_v36 = vrot.slane %v768_v35, 2 }
 0x207   : > { %v770_v37 = vadd.f32 %v769_v36, %v768_v35 }
 0x209   : > { %v771_v38 = vrot.slane %v770_v37, 1 }
 0x20b   : > { %v772_v39 = vadd.f32 %v771_v38, %v770_v37 }
 0x20d   : > { %773 = vst.msk [vmem:[%s298_s20] sm:$0x1] %vm749_vm1, %v772_v39 }
 0x20e PF: > { %s18_s24 = sadd.s32 1, %s1027_s24  }
 0x20f   : > { %p15_p5 = scmp.ge.s32.totalorder %s18_s24, 6  }
 0x211   :  { %17 = sbr.rel (!%p15_p5) target bundleno = 1 (0x1), region = 94 }

// kernel: kan_conv_transformer.17
= control target key start
LH: loop header
LB: loop body
LE: loop exit
PB: predicated region body
PF: predicated region fallthrough
CT: control target
= control target key end

     0   :  { %s98_s0 = inlined_call_operand.vmem [shape: f32[16,128], index: 0, kind: input, shape index: {}]   ;;  %s99_s1 = inlined_call_operand.vmem [shape: f32[16,128], index: 1, kind: input, shape index: {}]   ;;  %s100_s2 = inlined_call_operand.vmem [shape: f32[1,128], index: 2, kind: input, shape index: {}]   ;;  %s101_s3 = inlined_call_operand.vmem [shape: f32[1,128], index: 3, kind: input, shape index: {}]   ;;  %s102_s4 = inlined_call_operand.vmem [shape: f32[16,128], index: 4, kind: output, shape index: {}]  }
   0x1   :  { %v17_v0 = vld [vmem:[%s98_s0] sm:$0xff]  ;;  %v18_v4 = vld [vmem:[%s98_s0 + $0x8] sm:$0xff] }
   0x2   :  { %v19_v1 = vld [vmem:[%s99_s1] sm:$0xff]  ;;  %v20_v5 = vld [vmem:[%s99_s1 + $0x8] sm:$0xff] }
   0x3   :  { %v47_v2 = vld [vmem:[%s100_s2] ss:$0 sm:$0xff] }
   0x4   :  { %v28_v3 = vmul.f32 %v47_v2, %v19_v1  ;;  %v48_v6 = vld [vmem:[%s101_s3] ss:$0 sm:$0xff]  ;;  %v29_v7 = vmul.f32 %v47_v2, %v20_v5 }
   0x6   :  { %v30_v8 = vadd.f32 %v28_v3, %v17_v0  ;;  %v31_v9 = vadd.f32 %v29_v7, %v18_v4 }
   0x8   :  { %v39_v10 = vadd.f32 %v48_v6, %v30_v8  ;;  %v40_v11 = vadd.f32 %v48_v6, %v31_v9 }
   0xa   :  { %41 = vst [vmem:[%s102_s4] sm:$0xff] %v39_v10  ;;  %42 = vst [vmem:[%s102_s4 + $0x8] sm:$0xff] %v40_v11 }

// kernel: kan_conv_transformer.18
= control target key start
LH: loop header
LB: loop body
LE: loop exit
PB: predicated region body
PF: predicated region fallthrough
CT: control target
= control target key end

     0   :  { %s1646_s30 = smov 0   ;;  %s1898_s0 = inlined_call_operand.vmem [shape: f32[128,16], index: 0, kind: input, shape index: {}]   ;;  %s1899_s1 = inlined_call_operand.vmem [shape: f32[1,16], index: 1, kind: input, shape index: {}]   ;;  %s1900_s2 = inlined_call_operand.vmem [shape: f32[1,16], index: 2, kind: input, shape index: {}]   ;;  %s1901_s3 = inlined_call_operand.vmem [shape: f32[16,512], index: 3, kind: input, shape index: {}]   ;;  %s1902_s4 = inlined_call_operand.vmem [shape: f32[1,512], index: 4, kind: input, shape index: {}]   ;;  %s1903_s5 = inlined_call_operand.vmem [shape: bf16[512,32], index: 5, kind: input, shape index: {}]   ;;  %s1904_s6 = inlined_call_operand.vmem [shape: bf16[16,32], index: 6, kind: input, shape index: {}]   ;;  %s1905_s7 = inlined_call_operand.vmem [shape: f32[128,32], index: 7, kind: output, shape index: {0}]   ;;  %s1906_s8 = inlined_call_operand.vmem [shape: f32[4,1,32], index: 8, kind: output, shape index: {1}]   ;;  %s1907_s9 = inlined_call_operand.vmem [shape: f32[4,1,32], index: 9, kind: output, shape index: {2}]  }
   0x1 LB: > { %s1652_s10 = sadd.s32 4294967295, %s1593_s30   ;;  %p1362_p0 = scmp.ge.s32.totalorder %s1593_s30, 1  ;;  %s1593_s30 = sphi %s1646_s30, %s20_s30  }
   0x2   : > { %p293_p1 = scmp.lt.s32.totalorder %s1593_s30, 5 }
   0x4   : > { %p294_p2 = pnand %p1362_p0, %p293_p1 }
   0x5   : > { %s1363_s11 = sshll.u32 (!%p294_p2), %s1652_s10, 2  ;;  %vm358_vm0 = vcmask (!%p294_p2), 130048   ;;  %v435_v28 = vld [vmem:[%s1901_s3 + $0x8] sm:$0xff] (!%p294_p2)  ;;  %v434_v30 = vld [vmem:[%s1901_s3] sm:$0xff] (!%p294_p2)  ;;  %v1595_v33 = vmov (!%p294_p2), 0.0   ;;  %v437_v34 = vld [vmem:[%s1901_s3 + $0x18] sm:$0xff] (!%p294_p2) }
   0x6   : > { %297 = sbr.rel (%p294_p2) target bundleno = 851 (0x353), region = 48  ;;  %p336_p3 = scmp.lt.s32.totalorder (!%p294_p2), %s1363_s11, 15  ;;  %v439_v29 = vld [vmem:[%s1901_s3 + $0x28] sm:$0xff] (!%p294_p2)  ;;  %v438_v32 = vld [vmem:[%s1901_s3 + $0x20] sm:$0xff] (!%p294_p2)  ;;  %530 = vmatprep.mubr.f32.mxu1 (!%p294_p2), %v1595_v33  ;;  %v441_v35 = vld [vmem:[%s1901_s3 + $0x38] sm:$0xff] (!%p294_p2)  ;;  %518 = vmatprep.mubr.f32.mxu0 (!%p294_p2), %v1595_v33  ;;  %vm1209_vm1 = vcmask (!%p294_p2), 261120  }
   0x7   : > { %v1495_v31 = vpack.c.bf16 (!%p294_p2), %v439_v29, %v435_v28  ;;  %v1497_v36 = vpack.c.bf16 (!%p294_p2), %v438_v32, %v434_v30  ;;  %v1499_v37 = vpack.c.bf16 (!%p294_p2), %v441_v35, %v437_v34  ;;  %v1514_v38 = vld [vmem:[%s1904_s6] sm:$0xff] (!%p294_p2)   ;;  %v436_v54 = vld [vmem:[%s1901_s3 + $0x10] sm:$0xff] (!%p294_p2)  ;;  %v1533_v28 = vld [vmem:[%s1903_s5 + $0x68] sm:$0xff] (!%p294_p2)   ;;  %p347_p4 = scmp.lt.s32.totalorder (!%p294_p2), %s1652_s10, 3  ;;  %vm1227_vm2 = vcmask (!%p294_p2), 253952  }
   0x8   : > { %v1367_v52 = vld [vmem:[%s1899_s1] ss:$0 sm:$0xff] (!%p294_p2)  ;;  %v440_v55 = vld [vmem:[%s1901_s3 + $0x30] sm:$0xff] (!%p294_p2)  ;;  %v1535_v30 = vld [vmem:[%s1903_s5 + $0x28] sm:$0xff] (!%p294_p2)  }
   0x9   : > { %1503 = vmatprep.subr.bf16.mxu1 (!%p294_p2), %v1495_v31  ;;  %1496 = vmatprep.subr.bf16.mxu0 (!%p294_p2), %v1495_v31  ;;  %v1368_v56 = vld [vmem:[%s1900_s2] ss:$0 sm:$0xff] (!%p294_p2)  ;;  %v1501_v59 = vpack.c.bf16 (!%p294_p2), %v440_v55, %v436_v54  ;;  %v1537_v32 = vld [vmem:[%s1903_s5 + $0x70] sm:$0xff] (!%p294_p2)   ;;  %v1540_v35 = vld [vmem:[%s1903_s5 + $0xa8] sm:$0xff] (!%p294_p2)  }
   0xa   : > { %1504 = vmatpush1.bf16.msra.mxu1 (!%p294_p2), %v1497_v36  ;;  %1498 = vmatpush1.bf16.msra.mxu0 (!%p294_p2), %v1497_v36  ;;  %v1534_v29 = vld [vmem:[%s1903_s5 + $0xe0] sm:$0xff] (!%p294_p2)   ;;  %v1539_v34 = vld [vmem:[%s1903_s5 + $0x30] sm:$0xff] (!%p294_p2)   ;;  %v1541_v36 = vld [vmem:[%s1903_s5 + $0x78] sm:$0xff] (!%p294_p2)  }
   0xb   : > { %1500 = vmatprep.subr.bf16.mxu1 (!%p294_p2), %v1499_v37  ;;  %1489 = vmatprep.subr.bf16.mxu0 (!%p294_p2), %v1514_v38  ;;  %v1536_v31 = vld [vmem:[%s1903_s5 + $0xa0] sm:$0xff] (!%p294_p2)   ;;  %v1542_v37 = vld [vmem:[%s1903_s5 + $0xf0] sm:$0xff] (!%p294_p2)  }
   0xd   : > { %s1909_s11 = smov (!%p336_p3, %s1363_s11), 15  ;;  %s1911_s10 = smov (!%p347_p4, %s1652_s10), 3 }
   0xe   : > { %s1364_s12 = sshll.u32 %s1909_s11, 3  ;;  %s349_s22 = scalar_lea.vmem %s1906_s8, %s1911_s10 }
   0xf   : > { %s339_s15 = scalar_lea.vmem %s1898_s0, %s1364_s12  ;;  %s345_s21 = scalar_lea.vmem %s1905_s7, %s1364_s12 }
  0x10   : > { %v356_v0 = vld [vmem:[%s339_s15 + $0x10] sm:$0xff]  ;;  %v357_v1 = vld [vmem:[%s339_s15 + $0x18] sm:$0xff]  ;;  %v354_v2 = vld [vmem:[%s339_s15] sm:$0xff]  ;;  %s352_s25 = scalar_lea.vmem %s1907_s9, %s1911_s10 }
  0x11   : > { %v365_v3 = vsel %vm358_vm0, %v356_v0, 0.0  ;;  %v359_v4 = vsel %vm358_vm0, %v354_v2, 0.0  ;;  %v355_v5 = vld [vmem:[%s339_s15 + $0x8] sm:$0xff]  ;;  %v368_v6 = vsel %vm358_vm0, %v357_v1, 0.0 }
  0x12   : > { %366 = vadd.xlane.f32.xlu0 %v365_v3  ;;  %360 = vadd.xlane.f32.xlu1 %v359_v4  ;;  %v362_v7 = vsel %vm358_vm0, %v355_v5, 0.0 }
  0x16   : > { %369 = vadd.xlane.f32.xlu0 %v368_v6  ;;  %363 = vadd.xlane.f32.xlu1 %v362_v7 }
  0x9f   : > { %v367_v8 = vpop.xlane.xlu0 %366  ;;  %v361_v9 = vpop.xlane.xlu1 %360 }
  0xa0   : > { %v374_v10 = vmul.f32 0.0625, %v367_v8  ;;  %v372_v11 = vmul.f32 0.0625, %v361_v9 }
  0xa2   : > { %v378_v12 = vsub.f32 %v356_v0, %v374_v10  ;;  %v1669_v13 = vsub.f32 %v354_v2, %v372_v11  ;;  %v1515_v10 = vld [vmem:[%s1903_s5 + $0x40] sm:$0xff]  }
  0xa3   : > { %v370_v14 = vpop.xlane.xlu0 %369  ;;  %v364_v15 = vpop.xlane.xlu1 %363  ;;  %v1516_v11 = vld [vmem:[%s1903_s5] sm:$0xff]  }
  0xa4   : > { %v375_v16 = vmul.f32 0.0625, %v370_v14  ;;  %v382_v17 = vmul.f32 %v378_v12, %v378_v12  ;;  %v373_v18 = vmul.f32 0.0625, %v364_v15  ;;  %v380_v19 = vmul.f32 %v1669_v13, %v1669_v13  ;;  %v1519_v14 = vld [vmem:[%s1903_s5 + $0x8] sm:$0xff]   ;;  %v1520_v15 = vld [vmem:[%s1903_s5 + $0x80] sm:$0xff]  }
  0xa6   : > { %v379_v20 = vsub.f32 %v357_v1, %v375_v16  ;;  %v390_v21 = vsel %vm358_vm0, %v382_v17, 0.0  ;;  %v1674_v22 = vsub.f32 %v355_v5, %v373_v18  ;;  %v384_v24 = vsel %vm358_vm0, %v380_v19, 0.0  ;;  %v1521_v16 = vld [vmem:[%s1903_s5 + $0x50] sm:$0xff]   ;;  %v1522_v17 = vld [vmem:[%s1903_s5 + $0xc8] sm:$0xff]  }
  0xa7   : > { %391 = vadd.xlane.f32.xlu0 %v390_v21  ;;  %v1523_v18 = vld [vmem:[%s1903_s5 + $0x10] sm:$0xff]   ;;  %v1524_v19 = vld [vmem:[%s1903_s5 + $0x88] sm:$0xff]  }
  0xa8   : > { %v383_v23 = vmul.f32 %v379_v20, %v379_v20  ;;  %v381_v25 = vmul.f32 %v1674_v22, %v1674_v22  ;;  %v1526_v21 = vld [vmem:[%s1903_s5 + $0xd0] sm:$0xff]  }
  0xaa   : > { %v393_v26 = vsel %vm358_vm0, %v383_v23, 0.0  ;;  %v387_v27 = vsel %vm358_vm0, %v381_v25, 0.0  ;;  %v1528_v23 = vld [vmem:[%s1903_s5 + $0x90] sm:$0xff]   ;;  %v1530_v25 = vld [vmem:[%s1903_s5 + $0xd8] sm:$0xff]  }
  0xab   : > { %394 = vadd.xlane.f32.xlu1 %v393_v26  ;;  %385 = vadd.xlane.f32.xlu0 %v384_v24  ;;  %v1529_v24 = vld [vmem:[%s1903_s5 + $0x60] sm:$0xff]  }
  0xac   : > { %v1531_v26 = vld [vmem:[%s1903_s5 + $0x20] sm:$0xff]  }
  0xaf   : > { %388 = vadd.xlane.f32.xlu1 %v387_v27  ;;  %v1532_v27 = vld [vmem:[%s1903_s5 + $0x98] sm:$0xff]  }
 0x134   : > { %v392_v39 = vpop.xlane.xlu0 %391 }
 0x135   : > { %v398_v40 = vmul.f32 0.0625, %v392_v39  ;;  %v1544_v39 = vld [vmem:[%s1903_s5 + $0xb0] sm:$0xff]  }
 0x137   : > { %v402_v41 = vadd.f32 1e-05, %v398_v40  ;;  %v1545_v40 = vld [vmem:[%s1903_s5 + $0xf8] sm:$0xff]  }
 0x138   : > { %v386_v42 = vpop.xlane.xlu0 %385  ;;  %v395_v43 = vpop.xlane.xlu1 %394 }
 0x139   : > { %1547 = vrsqrt.f32 %v402_v41  ;;  %v396_v44 = vmul.f32 0.0625, %v386_v42  ;;  %v399_v45 = vmul.f32 0.0625, %v395_v43  ;;  %v1546_v41 = vld [vmem:[%s1903_s5 + $0xb8] sm:$0xff]   ;;  %v634_v42 = vlaneseq }
 0x13b   : > { %v400_v46 = vadd.f32 1e-05, %v396_v44  ;;  %v403_v47 = vadd.f32 1e-05, %v399_v45  ;;  %v635_v43 = vshrl.u32 %v634_v42, 7 }
 0x13c   : > { %v389_v48 = vpop.xlane.xlu1 %388  ;;  %v632_v45 = vld [vmem:[%s1902_s4] sm:$0xf] }
 0x13d   : > { %1549 = vrsqrt.f32 %v400_v46  ;;  %v397_v49 = vmul.f32 0.0625, %v389_v48  ;;  %v636_v44 = vsub.s32 0, %v635_v43  ;;  %v640_v46 = vsub.s32 1, %v635_v43 }
 0x13e   : > { %1551 = vrsqrt.f32 %v403_v47 }
 0x13f   : > { %v401_v50 = vadd.f32 1e-05, %v397_v49  ;;  %v637_v47 = vrot.slane %v632_v45, %v636_v44  ;;  %v641_v48 = vrot.slane %v632_v45, %v640_v46 }
 0x141   : > { %1553 = vrsqrt.f32 %v401_v50 }
 0x143   : > { %v1548_v51 = vpop.eup %1547 }
 0x144   : > { %v410_v53 = vmul.f32 %v1548_v51, %v378_v12  ;;  %v1517_v12 = vld [vmem:[%s1903_s5 + $0x48] sm:$0xff]  }
 0x146   : > { %v421_v57 = vmul.f32 %v1367_v52, %v410_v53 }
 0x147   : > { %v1550_v58 = vpop.eup %1549 }
 0x148   : > { %v1552_v60 = vpop.eup %1551  ;;  %v432_v61 = vadd.f32 %v1368_v56, %v421_v57  ;;  %v408_v62 = vmul.f32 %v1550_v58, %v1669_v13  ;;  %v1518_v13 = vld [vmem:[%s1903_s5 + $0xc0] sm:$0xff]  }
 0x149   : > { %v411_v63 = vmul.f32 %v1552_v60, %v379_v20  ;;  %v1525_v20 = vld [vmem:[%s1903_s5 + $0x58] sm:$0xff]  }
 0x14a   : > { %1371 = vmatmul.mubr.msk.f32.vlgmr.msra.gmra.mrb[0].mxu1 %vm358_vm0, %v432_v61  ;;  %v419_v0 = vmul.f32 %v1367_v52, %v408_v62 }
 0x14b   : > { %v1554_v1 = vpop.eup %1553  ;;  %1502 = vmatpush1.bf16.msra.mxu1 %v1501_v59  ;;  %536 = vmatprep.mubr.f32.mxu1 %v1595_v33  ;;  %v422_v2 = vmul.f32 %v1367_v52, %v411_v63 }
 0x14c   : > { %v430_v3 = vadd.f32 %v1368_v56, %v419_v0  ;;  %v409_v4 = vmul.f32 %v1554_v1, %v1674_v22  ;;  %1433 = vmatprep.subr.bf16.mxu1 %v1515_v10  ;;  %v1527_v22 = vld [vmem:[%s1903_s5 + $0x18] sm:$0xff]   ;;  %v644_v0 = vsub.s32 2, %v635_v43 }
 0x14d   : > { %v433_v5 = vadd.f32 %v1368_v56, %v422_v2 }
 0x14e   : > { %1369 = vmatmul.mubr.msk.f32.vlgmr.msra.gmra.mrb[0].mxu0 %vm358_vm0, %v430_v3  ;;  %v420_v6 = vmul.f32 %v1367_v52, %v409_v4 }
 0x14f   : > { %1372 = vmatmul.mubr.msk.f32.gmra.mrb[2].mxu1 %vm358_vm0, %v433_v5  ;;  %524 = vmatprep.mubr.f32.mxu0 %v1595_v33  ;;  %v855_v9 = vpack.c.bf16 %v433_v5, %v432_v61 }
 0x150   : > { %607 = vmatprep.mubr.f32.mxu1 %v1595_v33  ;;  %v431_v7 = vadd.f32 %v1368_v56, %v420_v6  ;;  %1490 = vmatpush3.bf16.msra.mxu0 %v1514_v38  ;;  %v1543_v38 = vld [vmem:[%s1903_s5 + $0x38] sm:$0xff]  }
 0x151   : > { %1461 = vmatprep.subr.bf16.mxu0 %v1518_v13 }
 0x152   : > { %1370 = vmatmul.mubr.msk.f32.gmra.mrb[2].mxu0 %vm358_vm0, %v431_v7  ;;  %v854_v8 = vpack.c.bf16 %v431_v7, %v430_v3 }
 0x153   : > { %1373 = vmatmul.mubr.msk.f32.vlgmr.msra.gmra.mrb[4].mxu1 %vm358_vm0, %v430_v3  ;;  %v648_v3 = vsub.s32 3, %v635_v43 }
 0x154   : > { %1491 = vmatprep.mubr.msk.bf16.mxu0 %vm358_vm0, %v854_v8  ;;  %613 = vmatprep.mubr.f32.mxu1 %v1595_v33 }
 0x155   : > { %1434 = vmatpush3.bf16.msra.mxu1 %v1516_v11 }
 0x156   : > { %1492 = vmatmul.mubr.msk.bf16.vlgmr.msra.gmra.mrb[4].mxu0 %vm358_vm0, %v855_v9  ;;  %1435 = vmatprep.subr.bf16.mxu1 %v1517_v12 }
 0x157   : > { %1374 = vmatmul.mubr.msk.f32.gmra.mrb[6].mxu1 %vm358_vm0, %v431_v7  ;;  %1462 = vmatpush3.bf16.msra.mxu0 %v1520_v15 }
 0x158   : > { %619 = vmatprep.mubr.f32.mxu1 %v1595_v33  ;;  %1463 = vmatprep.subr.bf16.mxu0 %v1522_v17 }
 0x159   : > { %1436 = vmatpush3.bf16.msra.mxu1 %v1519_v14  ;;  %v1833_v14 = vrot.slane %v632_v45, %v644_v0 }
 0x15a   : > { %1437 = vmatprep.subr.bf16.mxu1 %v1521_v16  ;;  %v1835_v16 = vrot.slane %v632_v45, %v648_v3 }
 0x15b   : > { %1375 = vmatmul.mubr.msk.f32.gmra.mrb[8].mxu1 %vm358_vm0, %v432_v61  ;;  %1464 = vmatpush3.bf16.msra.mxu0 %v1524_v19 }
 0x15c   : > { %625 = vmatprep.mubr.f32.mxu1 %v1595_v33  ;;  %1465 = vmatprep.subr.bf16.mxu0 %v1526_v21  ;;  %v1538_v33 = vld [vmem:[%s1903_s5 + $0xe8] sm:$0xff]  }
 0x15d   : > { %1438 = vmatpush3.bf16.msra.mxu1 %v1523_v18 }
 0x15e   : > { %1439 = vmatprep.subr.bf16.mxu1 %v1525_v20 }
 0x15f   : > { %1376 = vmatmul.mubr.msk.f32.gmra.mrb[10].mxu1 %vm358_vm0, %v433_v5  ;;  %1466 = vmatpush3.bf16.msra.mxu0 %v1528_v23 }
 0x160   : > { %1467 = vmatprep.subr.bf16.mxu0 %v1530_v25 }
 0x161   : > { %1440 = vmatpush3.bf16.msra.mxu1 %v1527_v22 }
 0x162   : > { %1441 = vmatprep.subr.bf16.mxu1 %v1529_v24 }
 0x163   : > { %1468 = vmatpush3.bf16.msra.mxu0 %v1532_v27 }
 0x164   : > { %1469 = vmatprep.subr.bf16.mxu0 %v1534_v29 }
 0x165   : > { %1442 = vmatpush3.bf16.msra.mxu1 %v1531_v26 }
 0x166   : > { %1443 = vmatprep.subr.bf16.mxu1 %v1533_v28 }
 0x167   : > { %1470 = vmatpush3.bf16.msra.mxu0 %v1536_v31 }
 0x168   : > { %1471 = vmatprep.subr.bf16.mxu0 %v1538_v33 }
 0x169   : > { %1444 = vmatpush3.bf16.msra.mxu1 %v1535_v30 }
 0x16a   : > { %1445 = vmatprep.subr.bf16.mxu1 %v1537_v32 }
 0x16b   : > { %1472 = vmatpush3.bf16.msra.mxu0 %v1540_v35 }
 0x16c   : > { %1473 = vmatprep.subr.bf16.mxu0 %v1542_v37 }
 0x16d   : > { %1446 = vmatpush3.bf16.msra.mxu1 %v1539_v34 }
 0x16e   : > { %1447 = vmatprep.subr.bf16.mxu1 %v1541_v36 }
 0x16f   : > { %1474 = vmatpush3.bf16.msra.mxu0 %v1544_v39 }
 0x170   : > { %1475 = vmatprep.subr.bf16.mxu0 %v1545_v40 }
 0x171   : > { %1448 = vmatpush3.bf16.msra.mxu1 %v1543_v38 }
 0x173   : > { %1476 = vmatpush3.bf16.msra.mxu0 %v1546_v41 }
 0x21d   : > { %v532_v49 = vpop.f32.mrb[0].mxu1 }
 0x21e   : > { %v662_v50 = vsub.f32 %v532_v49, %v637_v47  ;;  %v534_v51 = vpop.f32.mrb[1].mxu1 }
 0x21f   : > { %v663_v52 = vsub.f32 %v534_v51, %v641_v48 }
 0x220   : > { %v678_v53 = vmul.f32 %v662_v50, %v662_v50 }
 0x221   : > { %v679_v54 = vmul.f32 %v663_v52, %v663_v52  ;;  %v520_v55 = vpop.f32.mrb[0].mxu0 }
 0x222   : > { %v726_v56 = vmul.f32 -0.5, %v678_v53  ;;  %v654_v57 = vsub.f32 %v520_v55, %v637_v47  ;;  %v538_v58 = vpop.f32.mrb[2].mxu1  ;;  %v522_v59 = vpop.f32.mrb[1].mxu0  ;;  %v1385_v17 = vadd.f32 -1.0, %v678_v53 }
 0x223   : > { %v727_v60 = vmul.f32 -0.5, %v679_v54  ;;  %v666_v61 = vsub.f32 %v538_v58, %v637_v47  ;;  %v655_v62 = vsub.f32 %v522_v59, %v641_v48  ;;  %v540_v63 = vpop.f32.mrb[3].mxu1  ;;  %v1386_v21 = vadd.f32 -1.0, %v679_v54 }
 0x224   : > { %v670_v1 = vmul.f32 %v654_v57, %v654_v57  ;;  %v667_v2 = vsub.f32 %v540_v63, %v641_v48  ;;  %v750_v6 = vmul.f32 1.442695, %v726_v56  ;;  %v710_v38 = vmul.f32 0.86732507, %v1385_v17 }
 0x225   : > { %v682_v4 = vmul.f32 %v666_v61, %v666_v61  ;;  %v526_v5 = vpop.f32.mrb[2].mxu0  ;;  %v671_v8 = vmul.f32 %v655_v62, %v655_v62  ;;  %v752_v12 = vmul.f32 1.442695, %v727_v60 }
 0x226   : > { %v718_v7 = vmul.f32 -0.5, %v670_v1  ;;  %v683_v9 = vmul.f32 %v667_v2, %v667_v2  ;;  %v609_v10 = vpop.f32.mrb[4].mxu1  ;;  %v528_v11 = vpop.f32.mrb[3].mxu0  ;;  %v658_v20 = vsub.f32 %v526_v5, %v637_v47  ;;  %1555 = vpow2.f32 %v750_v6 }
 0x227   : > { %v730_v13 = vmul.f32 -0.5, %v682_v4  ;;  %v611_v15 = vpop.f32.mrb[5].mxu1  ;;  %v719_v22 = vmul.f32 -0.5, %v671_v8  ;;  %1557 = vpow2.f32 %v752_v12  ;;  %v656_v26 = vsub.f32 %v609_v10, %v1833_v14 }
 0x228   : > { %v734_v18 = vmul.f32 1.442695, %v718_v7  ;;  %v731_v23 = vmul.f32 -0.5, %v683_v9  ;;  %v674_v25 = vmul.f32 %v658_v20, %v658_v20  ;;  %v659_v27 = vsub.f32 %v528_v11, %v641_v48 }
 0x229   : > { %v758_v19 = vmul.f32 1.442695, %v730_v13  ;;  %v1838_v28 = vpop.f32.mrb[4].mxu0  ;;  %v657_v31 = vsub.f32 %v611_v15, %v1835_v16  ;;  %v672_v35 = vmul.f32 %v656_v26, %v656_v26  ;;  %v736_v39 = vmul.f32 1.442695, %v719_v22 }
 0x22a   : > { %v615_v24 = vpop.f32.mrb[6].mxu1  ;;  %v760_v30 = vmul.f32 1.442695, %v731_v23  ;;  %v1842_v33 = vpop.f32.mrb[5].mxu0  ;;  %v722_v34 = vmul.f32 -0.5, %v674_v25  ;;  %v675_v36 = vmul.f32 %v659_v27, %v659_v27  ;;  %v1377_v43 = vadd.f32 -1.0, %v670_v1 }
 0x22b   : > { %v617_v29 = vpop.f32.mrb[7].mxu1  ;;  %1559 = vpow2.f32 %v758_v19  ;;  %v660_v32 = vsub.f32 %v615_v24, %v1833_v14  ;;  %v1844_v37 = vpop.f32.mrb[6].mxu0  ;;  %v1846_v40 = vmul.f32 %v657_v31, %v657_v31  ;;  %v720_v45 = vmul.f32 -0.5, %v672_v35 }
 0x22c   : > { %1561 = vpow2.f32 %v734_v18  ;;  %v1848_v41 = vpop.f32.mrb[7].mxu0  ;;  %v742_v44 = vmul.f32 1.442695, %v722_v34  ;;  %v711_v47 = vmul.f32 0.86732507, %v1386_v21  ;;  %v723_v48 = vmul.f32 -0.5, %v675_v36 }
 0x22d   : > { %1563 = vpow2.f32 %v760_v30  ;;  %v676_v46 = vmul.f32 %v660_v32, %v660_v32  ;;  %v721_v49 = vmul.f32 -0.5, %v1846_v40  ;;  %v661_v50 = vsub.f32 %v617_v29, %v1835_v16 }
 0x22e   : > { %v621_v42 = vpop.f32.mrb[8].mxu1  ;;  %v1389_v52 = vadd.f32 -1.0, %v682_v4  ;;  %v1378_v53 = vadd.f32 -1.0, %v671_v8  ;;  %1565 = vpow2.f32 %v742_v44  ;;  %v738_v54 = vmul.f32 1.442695, %v720_v45 }
 0x22f   : > { %v623_v51 = vpop.f32.mrb[9].mxu1  ;;  %1567 = vpow2.f32 %v736_v39  ;;  %v1390_v55 = vadd.f32 -1.0, %v683_v9  ;;  %v1381_v56 = vadd.f32 -1.0, %v674_v25  ;;  %v744_v57 = vmul.f32 1.442695, %v723_v48 }
 0x230   : > { %v702_v58 = vmul.f32 0.86732507, %v1377_v43  ;;  %v740_v59 = vmul.f32 1.442695, %v721_v49  ;;  %v724_v60 = vmul.f32 -0.5, %v676_v46  ;;  %v1556_v62 = vpop.eup %1555  ;;  %v677_v63 = vmul.f32 %v661_v50, %v661_v50 }
 0x231   : > { %1569 = vpow2.f32 %v744_v57  ;;  %v664_v0 = vsub.f32 %v621_v42, %v1833_v14  ;;  %v665_v1 = vsub.f32 %v623_v51, %v1835_v16  ;;  %v1558_v3 = vpop.eup %1557  ;;  %v714_v4 = vmul.f32 0.86732507, %v1389_v52 }
 0x232   : > { %v627_v61 = vpop.f32.mrb[10].mxu1  ;;  %v703_v5 = vmul.f32 0.86732507, %v1378_v53  ;;  %1571 = vpow2.f32 %v738_v54  ;;  %v746_v6 = vmul.f32 1.442695, %v724_v60  ;;  %v725_v10 = vmul.f32 -0.5, %v677_v63 }
 0x233   : > { %v629_v2 = vpop.f32.mrb[11].mxu1  ;;  %v715_v8 = vmul.f32 0.86732507, %v1390_v55  ;;  %v706_v9 = vmul.f32 0.86732507, %v1381_v56  ;;  %v680_v11 = vmul.f32 %v664_v0, %v664_v0  ;;  %v1379_v13 = vadd.f32 -1.0, %v672_v35 }
 0x234   : > { %1573 = vpow2.f32 %v746_v6  ;;  %v681_v15 = vmul.f32 %v665_v1, %v665_v1  ;;  %v668_v17 = vsub.f32 %v627_v61, %v1833_v14  ;;  %v1382_v19 = vadd.f32 -1.0, %v675_v36 }
 0x235   : > { %v1560_v7 = vpop.eup %1559  ;;  %1575 = vpow2.f32 %v740_v59  ;;  %v748_v20 = vmul.f32 1.442695, %v725_v10  ;;  %v728_v21 = vmul.f32 -0.5, %v680_v11  ;;  %v775_v26 = vmul.f32 %v1558_v3, %v711_v47 }
 0x236   : > { %v1562_v12 = vpop.eup %1561  ;;  %v1855_v22 = vmul.f32 %v1560_v7, %v714_v4  ;;  %v729_v24 = vmul.f32 -0.5, %v681_v15  ;;  %v684_v25 = vmul.f32 %v668_v17, %v668_v17  ;;  %v669_v29 = vsub.f32 %v629_v2, %v1835_v16 }
 0x237   : > { %v1564_v18 = vpop.eup %1563  ;;  %1577 = vpow2.f32 %v748_v20  ;;  %v754_v27 = vmul.f32 1.442695, %v728_v21  ;;  %v774_v31 = vmul.f32 %v1556_v62, %v710_v38  ;;  %v766_v32 = vmul.f32 %v1562_v12, %v702_v58 }
 0x238   : > { %v779_v23 = vmul.f32 %v1564_v18, %v715_v8  ;;  %v1566_v30 = vpop.eup %1565  ;;  %v1383_v34 = vadd.f32 -1.0, %v676_v46  ;;  %v732_v14 = vmul.f32 -0.5, %v684_v25  ;;  %v756_v39 = vmul.f32 1.442695, %v729_v24 }
 0x239   : > { %v1568_v35 = vpop.eup %1567  ;;  %v770_v36 = vmul.f32 %v1566_v30, %v706_v9  ;;  %v685_v42 = vmul.f32 %v669_v29, %v669_v29  ;;  %v707_v44 = vmul.f32 0.86732507, %v1382_v19  ;;  %1579 = vpow2.f32 %v754_v27 }
 0x23a   : > { %v787_v43 = vpack.c.bf16 %v779_v23, %v775_v26  ;;  %v762_v45 = vmul.f32 1.442695, %v732_v14  ;;  %v786_v48 = vpack.c.bf16 %v1855_v22, %v774_v31  ;;  %v1380_v50 = vadd.f32 -1.0, %v1846_v40 }
 0x23b   : > { %v1570_v47 = vpop.eup %1569  ;;  %v782_v49 = vpack.c.bf16 %v770_v36, %v766_v32  ;;  %v733_v16 = vmul.f32 -0.5, %v685_v42  ;;  %v767_v38 = vmul.f32 %v1568_v35, %v703_v5  ;;  %v1384_v46 = vadd.f32 -1.0, %v677_v63 }
 0x23c   : > { %v1572_v51 = vpop.eup %1571  ;;  %v771_v52 = vmul.f32 %v1570_v47, %v707_v44  ;;  %1581 = vpow2.f32 %v762_v45  ;;  %v704_v53 = vmul.f32 0.86732507, %v1379_v13  ;;  %v708_v54 = vmul.f32 0.86732507, %v1383_v34 }
 0x23d   : > { %1583 = vpow2.f32 %v756_v39  ;;  %v764_v55 = vmul.f32 1.442695, %v733_v16  ;;  %v705_v61 = vmul.f32 0.86732507, %v1380_v50  ;;  %v709_v62 = vmul.f32 0.86732507, %v1384_v46 }
 0x23e   : > { %v1574_v56 = vpop.eup %1573  ;;  %v783_v57 = vpack.c.bf16 %v771_v52, %v767_v38  ;;  %v768_v59 = vmul.f32 %v1572_v51, %v704_v53  ;;  %v1387_v0 = vadd.f32 -1.0, %v680_v11  ;;  %v1391_v1 = vadd.f32 -1.0, %v684_v25 }
 0x23f   : > { %v1576_v58 = vpop.eup %1575  ;;  %v772_v60 = vmul.f32 %v1574_v56, %v708_v54  ;;  %1585 = vpow2.f32 %v764_v55  ;;  %v1388_v5 = vadd.f32 -1.0, %v681_v15  ;;  %v1392_v6 = vadd.f32 -1.0, %v685_v42 }
 0x240   : > { %1143 = vmatprep.mubr.bf16.mxu1 %v783_v57  ;;  %v769_v63 = vmul.f32 %v1576_v58, %v705_v61  ;;  %v712_v8 = vmul.f32 0.86732507, %v1387_v0  ;;  %v716_v9 = vmul.f32 0.86732507, %v1391_v1 }
 0x241   : > { %v1578_v40 = vpop.eup %1577  ;;  %1144 = vmatmul.mubr.bf16.vlgmr.msra.gmra.mrb[12].mxu1 %v782_v49  ;;  %v784_v2 = vpack.c.bf16 %v772_v60, %v768_v59  ;;  %v713_v18 = vmul.f32 0.86732507, %v1388_v5  ;;  %v717_v11 = vmul.f32 0.86732507, %v1392_v6 }
 0x242   : > { %v773_v3 = vmul.f32 %v1578_v40, %v709_v62  ;;  %1151 = vmatprep.mubr.bf16.mxu1 %v787_v43 }
 0x243   : > { %v1580_v4 = vpop.eup %1579 }
 0x244   : > { %v785_v7 = vpack.c.bf16 %v773_v3, %v769_v63  ;;  %v776_v13 = vmul.f32 %v1580_v4, %v712_v8 }
 0x246   : > { %v1582_v10 = vpop.eup %1581  ;;  %1192 = vmatprep.mubr.bf16.mxu0 %v785_v7 }
 0x247   : > { %v1584_v12 = vpop.eup %1583  ;;  %v780_v17 = vmul.f32 %v1582_v10, %v716_v9  ;;  %1193 = vmatmul.mubr.bf16.vlgmr.msra.gmra.mrb[8].mxu0 %v784_v2 }
 0x248   : > { %v777_v21 = vmul.f32 %v1584_v12, %v713_v18 }
 0x249   : > { %v1586_v19 = vpop.eup %1585  ;;  %1152 = vmatmul.mubr.bf16.gmra.mrb[16].mxu1 %v786_v48  ;;  %v788_v20 = vpack.c.bf16 %v780_v17, %v776_v13 }
 0x24a   : > { %v781_v22 = vmul.f32 %v1586_v19, %v717_v11 }
 0x24c   : > { %v789_v23 = vpack.c.bf16 %v781_v22, %v777_v21 }
 0x24e   : > { %1200 = vmatprep.mubr.bf16.mxu0 %v789_v23 }
 0x24f   : > { %1201 = vmatmul.mubr.bf16.gmra.mrb[12].mxu0 %v788_v20 }
 0x314   : > { %v1449_v15 = vpop.f32.mrb[12].mxu1 }
 0x315   : > { %v1450_v24 = vpop.f32.mrb[13].mxu1 }
 0x316   : > { %v1451_v25 = vadd.f32 %v1450_v24, %v1449_v15  ;;  %v1452_v26 = vpop.f32.mrb[14].mxu1 }
 0x317   : > { %v1453_v27 = vpop.f32.mrb[15].mxu1 }
 0x318   : > { %v1146_v29 = vadd.f32 %v1451_v25, %v1842_v33  ;;  %v1454_v30 = vadd.f32 %v1453_v27, %v1452_v26 }
 0x31a   : > { %v1149_v31 = vadd.f32 %v1454_v30, %v1848_v41  ;;  %v1477_v32 = vpop.f32.mrb[8].mxu0 }
 0x31b   : > { %v1478_v34 = vpop.f32.mrb[9].mxu0 }
 0x31c   : > { %v1479_v14 = vadd.f32 %v1478_v34, %v1477_v32  ;;  %v1480_v35 = vpop.f32.mrb[10].mxu0  ;;  %v1455_v36 = vpop.f32.mrb[16].mxu1 }
 0x31d   : > { %v1481_v39 = vpop.f32.mrb[11].mxu0  ;;  %v1456_v42 = vpop.f32.mrb[17].mxu1 }
 0x31e   : > { %v1195_v43 = vadd.f32 %v1479_v14, %v1146_v29  ;;  %v1482_v44 = vadd.f32 %v1481_v39, %v1480_v35  ;;  %v1457_v45 = vadd.f32 %v1456_v42, %v1455_v36  ;;  %v1458_v33 = vpop.f32.mrb[18].mxu1 }
 0x31f   : > { %v1459_v48 = vpop.f32.mrb[19].mxu1 }
 0x320   : > { %1210 = vst.msk [vmem:[%s345_s21] sm:$0xff] %vm1209_vm1, %v1195_v43  ;;  %v1198_v41 = vadd.f32 %v1482_v44, %v1149_v31  ;;  %v1154_v47 = vadd.f32 %v1838_v28, %v1457_v45  ;;  %v1460_v49 = vadd.f32 %v1459_v48, %v1458_v33  ;;  %v1214_v50 = vsel %vm1209_vm1, %v1195_v43, 0.0 }
 0x322   : > { %1211 = vst.msk [vmem:[%s345_s21 + $0x8] sm:$0xff] %vm1209_vm1, %v1198_v41  ;;  %v1215_v16 = vsel %vm1209_vm1, %v1198_v41, 0.0  ;;  %v1157_v51 = vadd.f32 %v1844_v37, %v1460_v49  ;;  %v1483_v38 = vpop.f32.mrb[12].mxu0 }
 0x323   : > { %v1216_v52 = vadd.f32 %v1215_v16, %v1214_v50  ;;  %v1484_v46 = vpop.f32.mrb[13].mxu0 }
 0x324   : > { %v1485_v53 = vadd.f32 %v1484_v46, %v1483_v38  ;;  %v1486_v54 = vpop.f32.mrb[14].mxu0 }
 0x325   : > { %v1487_v55 = vpop.f32.mrb[15].mxu0 }
 0x326   : > { %v1203_v56 = vadd.f32 %v1485_v53, %v1154_v47  ;;  %v1488_v57 = vadd.f32 %v1487_v55, %v1486_v54 }
 0x328   : > { %1212 = vst.msk [vmem:[%s345_s21 + $0x10] sm:$0xff] %vm1209_vm1, %v1203_v56  ;;  %v1217_v28 = vsel %vm1209_vm1, %v1203_v56, 0.0  ;;  %v1206_v58 = vadd.f32 %v1488_v57, %v1157_v51 }
 0x329   : > { %v1218_v59 = vadd.f32 %v1217_v28, %v1216_v52 }
 0x32a   : > { %1213 = vst.msk [vmem:[%s345_s21 + $0x18] sm:$0xff] %vm1209_vm1, %v1206_v58  ;;  %v1219_v37 = vsel %vm1209_vm1, %v1206_v58, 0.0 }
 0x32b   : > { %v1220_v60 = vadd.f32 %v1219_v37, %v1218_v59 }
 0x32d   : > { %v1221_v61 = vrot.slane %v1220_v60, 4 }
 0x32f   : > { %v1222_v62 = vadd.f32 %v1221_v61, %v1220_v60 }
 0x331   : > { %v1223_v40 = vrot.slane %v1222_v62, 2 }
 0x333   : > { %v1224_v0 = vadd.f32 %v1223_v40, %v1222_v62 }
 0x335   : > { %v1225_v1 = vrot.slane %v1224_v0, 1 }
 0x337   : > { %v1226_v2 = vadd.f32 %v1225_v1, %v1224_v0 }
 0x339   : > { %1228 = vst.msk [vmem:[%s349_s22] sm:$0x1] %vm1227_vm2, %v1226_v2  ;;  %v1229_v63 = vmul.f32 0.03125, %v1226_v2 }
 0x33b   : > { %v1230_v3 = vsub.f32 %v1195_v43, %v1229_v63  ;;  %v1231_v4 = vsub.f32 %v1198_v41, %v1229_v63  ;;  %v1232_v5 = vsub.f32 %v1203_v56, %v1229_v63  ;;  %v1233_v6 = vsub.f32 %v1206_v58, %v1229_v63 }
 0x33d   : > { %v1234_v7 = vmul.f32 %v1230_v3, %v1230_v3  ;;  %v1235_v8 = vmul.f32 %v1231_v4, %v1231_v4  ;;  %v1236_v9 = vmul.f32 %v1232_v5, %v1232_v5  ;;  %v1237_v10 = vmul.f32 %v1233_v6, %v1233_v6 }
 0x33f   : > { %v1238_v12 = vsel %vm1209_vm1, %v1234_v7, 0.0  ;;  %v1239_v13 = vsel %vm1209_vm1, %v1235_v8, 0.0  ;;  %v1241_v18 = vsel %vm1209_vm1, %v1236_v9, 0.0  ;;  %v1243_v19 = vsel %vm1209_vm1, %v1237_v10, 0.0 }
 0x340   : > { %v1240_v17 = vadd.f32 %v1239_v13, %v1238_v12 }
 0x342   : > { %v1242_v11 = vadd.f32 %v1241_v18, %v1240_v17 }
 0x344   : > { %v1244_v20 = vadd.f32 %v1243_v19, %v1242_v11 }
 0x346   : > { %v1245_v21 = vrot.slane %v1244_v20, 4 }
 0x348   : > { %v1246_v22 = vadd.f32 %v1245_v21, %v1244_v20 }
 0x34a   : > { %v1247_v23 = vrot.slane %v1246_v22, 2 }
 0x34c   : > { %v1248_v15 = vadd.f32 %v1247_v23, %v1246_v22 }
 0x34e   : > { %v1249_v24 = vrot.slane %v1248_v15, 1 }
 0x350   : > { %v1250_v25 = vadd.f32 %v1249_v24, %v1248_v15 }
 0x352   : > { %1251 = vst.msk [vmem:[%s352_s25] sm:$0x1] %vm1227_vm2, %v1250_v25 }
 0x353 PF: > { %s20_s30 = sadd.s32 1, %s1593_s30  }
 0x354   : > { %p17_p5 = scmp.ge.s32.totalorder %s20_s30, 6  }
 0x356   :  { %19 = sbr.rel (!%p17_p5) target bundleno = 1 (0x1), region = 102 }

// kernel: kan_conv_transformer.19
= control target key start
LH: loop header
LB: loop body
LE: loop exit
PB: predicated region body
PF: predicated region fallthrough
CT: control target
= control target key end

     0   :  { %s747_s18 = smov 0   ;;  %s946_s0 = inlined_call_operand.vmem [shape: f32[2,8,8,32], index: 0, kind: input, shape index: {}]   ;;  %s947_s1 = inlined_call_operand.vmem [shape: f32[1,32], index: 1, kind: input, shape index: {}]   ;;  %s948_s2 = inlined_call_operand.vmem [shape: f32[1,32], index: 2, kind: input, shape index: {}]   ;;  %s949_s3 = inlined_call_operand.vmem [shape: f32[3,3,1,32], index: 3, kind: input, shape index: {}]   ;;  %s950_s4 = inlined_call_operand.vmem [shape: f32[1,32], index: 4, kind: input, shape index: {}]   ;;  %s951_s5 = inlined_call_operand.vmem [shape: f32[2,8,8,32], index: 5, kind: output, shape index: {}]  }
   0x1 LB: > { %s665_s19 = sadd.s32 4294967295, %s714_s18   ;;  %p669_p0 = scmp.ge.s32.totalorder %s714_s18, 1  ;;  %s714_s18 = sphi %s747_s18, %s15_s18  }
   0x2   : > { %p187_p1 = scmp.lt.s32.totalorder %s714_s18, 3 }
   0x4   : > { %p188_p2 = pnand %p669_p0, %p187_p1 }
   0x5   : > { %p215_p3 = scmp.lt.s32.totalorder (!%p188_p2), %s665_s19, 1  ;;  %p674_p4 = scmp.ne.s32.totalorder (!%p188_p2), %s665_s19, 0 }
   0x6   : > { %191 = sbr.rel (%p188_p2) target bundleno = 85 (0x55), region = 40 }
   0xd   : > { %s216_s20 = scalar_select %p215_p3, %s665_s19, 1 }
   0xe   : > { %228 = sbr.rel (%p674_p4) target bundleno = 25 (0x19), region = 44  ;;  %vm229_vm0 = vcmask (!%p674_p4), 261120   ;;  %vm231_vm1 = vcmask (!%p674_p4), 254976   ;;  %v716_v0 = vmov (!%p674_p4), 0.0  }
   0xf   : > { %s697_s21 = sshll.u32 %s216_s20, 6  ;;  %230 = vst.msk [vmem:[#allocation2] sm:$0xff] (!%p674_p4), %vm229_vm0, %v716_v0  ;;  %233 = vst.msk [vmem:[#allocation2 + $0x10] sm:$0xff] (!%p674_p4), %vm229_vm0, %v716_v0 }
  0x10   : > { %s758_s24 = scalar_lea.vmem %s946_s0, %s697_s21  ;;  %s763_s27 = scalar_lea.vmem %s951_s5, %s697_s21  ;;  %235 = vst.msk [vmem:[#allocation2 + $0x20] sm:$0xff] (!%p674_p4), %vm229_vm0, %v716_v0  ;;  %237 = vst.msk [vmem:[#allocation2 + $0x30] sm:$0xff] (!%p674_p4), %vm229_vm0, %v716_v0 }
  0x11   : > { %239 = vst.msk [vmem:[#allocation2 + $0x40] sm:$0xff] (!%p674_p4), %vm229_vm0, %v716_v0  ;;  %241 = vst.msk [vmem:[#allocation2 + $0x50] sm:$0xff] (!%p674_p4), %vm229_vm0, %v716_v0 }
  0x12   : > { %243 = vst.msk [vmem:[#allocation2 + $0x60] sm:$0xff] (!%p674_p4), %vm229_vm0, %v716_v0  ;;  %245 = vst.msk [vmem:[#allocation2 + $0x70] sm:$0xff] (!%p674_p4), %vm229_vm0, %v716_v0 }
  0x13   : > { %247 = vst.msk [vmem:[#allocation2 + $0x80] sm:$0xff] (!%p674_p4), %vm229_vm0, %v716_v0  ;;  %249 = vst.msk [vmem:[#allocation2 + $0x90] sm:$0xff] (!%p674_p4), %vm229_vm0, %v716_v0 }
  0x14   : > { %232 = vst.msk [vmem:[#allocation2 + $0x8] sm:$0x3] (!%p674_p4), %vm231_vm1, %v716_v0  ;;  %234 = vst.msk [vmem:[#allocation2 + $0x18] sm:$0x3] (!%p674_p4), %vm231_vm1, %v716_v0 }
  0x15   : > { %236 = vst.msk [vmem:[#allocation2 + $0x28] sm:$0x3] %vm231_vm1, %v716_v0  ;;  %238 = vst.msk [vmem:[#allocation2 + $0x38] sm:$0x3] %vm231_vm1, %v716_v0 }
  0x16   : > { %240 = vst.msk [vmem:[#allocation2 + $0x48] sm:$0x3] %vm231_vm1, %v716_v0  ;;  %242 = vst.msk [vmem:[#allocation2 + $0x58] sm:$0x3] %vm231_vm1, %v716_v0 }
  0x17   : > { %244 = vst.msk [vmem:[#allocation2 + $0x68] sm:$0x3] %vm231_vm1, %v716_v0  ;;  %246 = vst.msk [vmem:[#allocation2 + $0x78] sm:$0x3] %vm231_vm1, %v716_v0 }
  0x18   : > { %248 = vst.msk [vmem:[#allocation2 + $0x88] sm:$0x3] %vm231_vm1, %v716_v0  ;;  %250 = vst.msk [vmem:[#allocation2 + $0x98] sm:$0x3] %vm231_vm1, %v716_v0 }
  0x19 PF: > { %v251_v1 = vld [vmem:[%s758_s24] sm:$0xff]  ;;  %v252_v5 = vld [vmem:[%s758_s24 + $0x8] sm:$0xff]  ;;  %v253_v6 = vld [vmem:[%s758_s24 + $0x10] sm:$0xff]  ;;  %vm290_vm2 = vcmask 261120  }
  0x1a   : > { %v675_v2 = vld [vmem:[%s947_s1] ss:$0 sm:$0xff]  ;;  %v254_v7 = vld [vmem:[%s758_s24 + $0x18] sm:$0xff]  ;;  %v256_v12 = vld [vmem:[%s758_s24 + $0x28] sm:$0xff] }
  0x1b   : > { %v676_v3 = vld [vmem:[%s948_s2] ss:$0 sm:$0xff]  ;;  %v266_v4 = vmul.f32 %v675_v2, %v251_v1  ;;  %v267_v8 = vmul.f32 %v675_v2, %v252_v5  ;;  %v268_v9 = vmul.f32 %v675_v2, %v253_v6  ;;  %v269_v10 = vmul.f32 %v675_v2, %v254_v7  ;;  %v257_v13 = vld [vmem:[%s758_s24 + $0x30] sm:$0xff]  ;;  %v258_v18 = vld [vmem:[%s758_s24 + $0x38] sm:$0xff] }
  0x1c   : > { %v255_v11 = vld [vmem:[%s758_s24 + $0x20] sm:$0xff]  ;;  %v271_v16 = vmul.f32 %v675_v2, %v256_v12  ;;  %v272_v17 = vmul.f32 %v675_v2, %v257_v13  ;;  %v273_v24 = vmul.f32 %v675_v2, %v258_v18  ;;  %v847_v54 = vld [vmem:[%s949_s3 + $0x8] ss:$0 sm:$0xff] }
  0x1d   : > { %v281_v14 = vadd.f32 %v676_v3, %v266_v4  ;;  %v270_v15 = vmul.f32 %v675_v2, %v255_v11  ;;  %v299_v19 = vld [vmem:[#allocation2] sm:$0xff]  ;;  %v282_v21 = vadd.f32 %v676_v3, %v267_v8  ;;  %v283_v22 = vadd.f32 %v676_v3, %v268_v9 }
  0x1e   : > { %v792_v20 = vld [vmem:[%s949_s3] ss:$0 sm:$0xff]  ;;  %v284_v23 = vadd.f32 %v676_v3, %v269_v10  ;;  %v797_v26 = vld [vmem:[%s949_s3 + $0x1] ss:$0 sm:$0xff]  ;;  %v286_v29 = vadd.f32 %v676_v3, %v271_v16  ;;  %v287_v30 = vadd.f32 %v676_v3, %v272_v17  ;;  %v804_v32 = vld [vmem:[%s949_s3 + $0x2] ss:$0 sm:$0xff]  ;;  %v288_v33 = vadd.f32 %v676_v3, %v273_v24 }
  0x1f   : > { %v330_v25 = vld [vmem:[#allocation2 + $0x1] sm:$0xff]  ;;  %291 = vst.msk [vmem:[#allocation2 + $0x11] sm:$0xff] %vm290_vm2, %v281_v14  ;;  %v285_v28 = vadd.f32 %v676_v3, %v270_v15  ;;  %v314_v31 = vmul.f32 %v792_v20, %v299_v19  ;;  %292 = vst.msk [vmem:[#allocation2 + $0x21] sm:$0xff] %vm290_vm2, %v282_v21 }
  0x20   : > { %v362_v27 = vld [vmem:[#allocation2 + $0x2] sm:$0xff]  ;;  %293 = vst.msk [vmem:[#allocation2 + $0x31] sm:$0xff] %vm290_vm2, %v283_v22  ;;  %294 = vst.msk [vmem:[#allocation2 + $0x41] sm:$0xff] %vm290_vm2, %v284_v23  ;;  %v346_v34 = vmul.f32 %v797_v26, %v330_v25 }
  0x21   : > { %295 = vst.msk [vmem:[#allocation2 + $0x51] sm:$0xff] %vm290_vm2, %v285_v28  ;;  %296 = vst.msk [vmem:[#allocation2 + $0x61] sm:$0xff] %vm290_vm2, %v286_v29  ;;  %v378_v35 = vmul.f32 %v804_v32, %v362_v27  ;;  %v818_v37 = vld [vmem:[%s949_s3 + $0x3] ss:$0 sm:$0xff]  ;;  %v823_v39 = vld [vmem:[%s949_s3 + $0x4] ss:$0 sm:$0xff] }
  0x22   : > { %297 = vst.msk [vmem:[#allocation2 + $0x71] sm:$0xff] %vm290_vm2, %v287_v30  ;;  %298 = vst.msk [vmem:[#allocation2 + $0x81] sm:$0xff] %vm290_vm2, %v288_v33  ;;  %v354_v36 = vadd.f32 %v346_v34, %v314_v31  ;;  %v828_v42 = vld [vmem:[%s949_s3 + $0x5] ss:$0 sm:$0xff]  ;;  %v834_v46 = vld [vmem:[%s949_s3 + $0x6] ss:$0 sm:$0xff] }
  0x23   : > { %v840_v49 = vld [vmem:[%s949_s3 + $0x7] ss:$0 sm:$0xff]  ;;  %v872_v31 = vld [vmem:[%s950_s4] ss:$0 sm:$0xff] }
  0x24   : > { %v386_v38 = vadd.f32 %v378_v35, %v354_v36 }
  0x26   : > { %v394_v40 = vld [vmem:[#allocation2 + $0x10] sm:$0xff]  ;;  %v491_v45 = vld [vmem:[#allocation2 + $0x20] sm:$0xff] }
  0x27   : > { %v426_v41 = vld [vmem:[#allocation2 + $0x11] sm:$0xff]  ;;  %v410_v43 = vmul.f32 %v818_v37, %v394_v40  ;;  %v315_v47 = vmul.f32 %v792_v20, %v394_v40  ;;  %v523_v48 = vld [vmem:[#allocation2 + $0x21] sm:$0xff]  ;;  %v507_v56 = vmul.f32 %v834_v46, %v491_v45  ;;  %v316_v63 = vmul.f32 %v792_v20, %v491_v45 }
  0x28   : > { %v458_v44 = vld [vmem:[#allocation2 + $0x12] sm:$0xff]  ;;  %v347_v50 = vmul.f32 %v797_v26, %v426_v41  ;;  %v442_v52 = vmul.f32 %v823_v39, %v426_v41  ;;  %v555_v53 = vld [vmem:[#allocation2 + $0x22] sm:$0xff]  ;;  %v539_v60 = vmul.f32 %v840_v49, %v523_v48  ;;  %v348_v0 = vmul.f32 %v797_v26, %v523_v48 }
  0x29   : > { %v418_v51 = vadd.f32 %v410_v43, %v386_v38  ;;  %v474_v55 = vmul.f32 %v828_v42, %v458_v44  ;;  %v379_v58 = vmul.f32 %v804_v32, %v458_v44  ;;  %v492_v61 = vld [vmem:[#allocation2 + $0x30] sm:$0xff]  ;;  %v571_v1 = vmul.f32 %v847_v54, %v555_v53  ;;  %v493_v17 = vld [vmem:[#allocation2 + $0x40] sm:$0xff] }
  0x2a   : > { %v355_v57 = vadd.f32 %v347_v50, %v315_v47  ;;  %v524_v62 = vld [vmem:[#allocation2 + $0x31] sm:$0xff]  ;;  %v411_v3 = vmul.f32 %v818_v37, %v491_v45  ;;  %v443_v4 = vmul.f32 %v823_v39, %v523_v48  ;;  %v475_v6 = vmul.f32 %v828_v42, %v555_v53  ;;  %v525_v24 = vld [vmem:[#allocation2 + $0x41] sm:$0xff] }
  0x2b   : > { %v450_v59 = vadd.f32 %v442_v52, %v418_v51  ;;  %v556_v7 = vld [vmem:[#allocation2 + $0x32] sm:$0xff]  ;;  %v356_v8 = vadd.f32 %v348_v0, %v316_v63  ;;  %v380_v9 = vmul.f32 %v804_v32, %v555_v53  ;;  %v508_v11 = vmul.f32 %v834_v46, %v492_v61  ;;  %v557_v28 = vld [vmem:[#allocation2 + $0x42] sm:$0xff] }
  0x2c   : > { %v387_v2 = vadd.f32 %v379_v58, %v355_v57  ;;  %v540_v12 = vmul.f32 %v840_v49, %v524_v62  ;;  %v317_v13 = vmul.f32 %v792_v20, %v492_v61  ;;  %v412_v16 = vmul.f32 %v818_v37, %v492_v61  ;;  %v494_v43 = vld [vmem:[#allocation2 + $0x50] sm:$0xff] }
  0x2d   : > { %v482_v5 = vadd.f32 %v474_v55, %v450_v59  ;;  %v388_v15 = vadd.f32 %v380_v9, %v356_v8  ;;  %v349_v18 = vmul.f32 %v797_v26, %v524_v62  ;;  %v572_v21 = vmul.f32 %v847_v54, %v556_v7  ;;  %v526_v55 = vld [vmem:[#allocation2 + $0x51] sm:$0xff] }
  0x2e   : > { %v419_v10 = vadd.f32 %v411_v3, %v387_v2  ;;  %v444_v22 = vmul.f32 %v823_v39, %v524_v62  ;;  %v476_v23 = vmul.f32 %v828_v42, %v556_v7  ;;  %v381_v30 = vmul.f32 %v804_v32, %v556_v7  ;;  %v558_v63 = vld [vmem:[#allocation2 + $0x52] sm:$0xff] }
  0x2f   : > { %v515_v14 = vadd.f32 %v507_v56, %v482_v5  ;;  %v420_v27 = vadd.f32 %v412_v16, %v388_v15  ;;  %v357_v29 = vadd.f32 %v349_v18, %v317_v13  ;;  %v509_v34 = vmul.f32 %v834_v46, %v493_v17  ;;  %v527_v13 = vld [vmem:[#allocation2 + $0x61] sm:$0xff] }
  0x30   : > { %v451_v19 = vadd.f32 %v443_v4, %v419_v10  ;;  %v413_v35 = vmul.f32 %v818_v37, %v493_v17  ;;  %v318_v36 = vmul.f32 %v792_v20, %v493_v17  ;;  %v350_v44 = vmul.f32 %v797_v26, %v525_v24  ;;  %v495_v10 = vld [vmem:[#allocation2 + $0x60] sm:$0xff] }
  0x31   : > { %v547_v25 = vadd.f32 %v539_v60, %v515_v14  ;;  %v452_v40 = vadd.f32 %v444_v22, %v420_v27  ;;  %v389_v41 = vadd.f32 %v381_v30, %v357_v29  ;;  %v541_v47 = vmul.f32 %v840_v49, %v525_v24  ;;  %v559_v22 = vld [vmem:[#allocation2 + $0x62] sm:$0xff]  ;;  %v496_v30 = vld [vmem:[#allocation2 + $0x70] sm:$0xff] }
  0x32   : > { %v483_v33 = vadd.f32 %v475_v6, %v451_v19  ;;  %v445_v48 = vmul.f32 %v823_v39, %v525_v24  ;;  %v382_v50 = vmul.f32 %v804_v32, %v557_v28  ;;  %v358_v56 = vadd.f32 %v350_v44, %v318_v36 }
  0x33   : > { %v579_v38 = vadd.f32 %v571_v1, %v547_v25  ;;  %v484_v52 = vadd.f32 %v476_v23, %v452_v40  ;;  %v421_v53 = vadd.f32 %v413_v35, %v389_v41  ;;  %v573_v58 = vmul.f32 %v847_v54, %v557_v28  ;;  %v528_v41 = vld [vmem:[#allocation2 + $0x71] sm:$0xff] }
  0x34   : > { %v516_v45 = vadd.f32 %v508_v11, %v483_v33  ;;  %v477_v59 = vmul.f32 %v828_v42, %v557_v28  ;;  %v510_v60 = vmul.f32 %v834_v46, %v494_v43  ;;  %v390_v0 = vadd.f32 %v382_v50, %v358_v56  ;;  %v497_v56 = vld [vmem:[#allocation2 + $0x80] sm:$0xff] }
  0x35   : > { %v594_v51 = vadd.f32 %v872_v31, %v579_v38  ;;  %v517_v61 = vadd.f32 %v509_v34, %v484_v52  ;;  %v453_v62 = vadd.f32 %v445_v48, %v421_v53  ;;  %v414_v1 = vmul.f32 %v818_v37, %v494_v43  ;;  %v560_v53 = vld [vmem:[#allocation2 + $0x72] sm:$0xff] }
  0x36   : > { %v548_v57 = vadd.f32 %v540_v12, %v516_v45  ;;  %v542_v3 = vmul.f32 %v840_v49, %v526_v55  ;;  %v319_v4 = vmul.f32 %v792_v20, %v494_v43  ;;  %v351_v5 = vmul.f32 %v797_v26, %v526_v55 }
  0x37   : > { %602 = vst.msk [vmem:[%s763_s27] sm:$0xff] %vm290_vm2, %v594_v51  ;;  %v549_v6 = vadd.f32 %v541_v47, %v517_v61  ;;  %v485_v7 = vadd.f32 %v477_v59, %v453_v62  ;;  %v422_v8 = vadd.f32 %v414_v1, %v390_v0  ;;  %v446_v9 = vmul.f32 %v823_v39, %v526_v55 }
  0x38   : > { %v580_v2 = vadd.f32 %v572_v21, %v548_v57  ;;  %v574_v12 = vmul.f32 %v847_v54, %v558_v63  ;;  %v359_v14 = vadd.f32 %v351_v5, %v319_v4  ;;  %v383_v15 = vmul.f32 %v804_v32, %v558_v63 }
  0x39   : > { %v581_v16 = vadd.f32 %v573_v58, %v549_v6  ;;  %v518_v17 = vadd.f32 %v510_v60, %v485_v7  ;;  %v454_v18 = vadd.f32 %v446_v9, %v422_v8  ;;  %v478_v19 = vmul.f32 %v828_v42, %v558_v63  ;;  %v529_v6 = vld [vmem:[#allocation2 + $0x81] sm:$0xff] }
  0x3a   : > { %v595_v11 = vadd.f32 %v872_v31, %v580_v2  ;;  %v511_v21 = vmul.f32 %v834_v46, %v495_v10  ;;  %v391_v23 = vadd.f32 %v383_v15, %v359_v14  ;;  %v415_v24 = vmul.f32 %v818_v37, %v495_v10 }
  0x3b   : > { %v320_v25 = vmul.f32 %v792_v20, %v495_v10  ;;  %v596_v27 = vadd.f32 %v872_v31, %v581_v16  ;;  %v550_v28 = vadd.f32 %v542_v3, %v518_v17  ;;  %v486_v29 = vadd.f32 %v478_v19, %v454_v18  ;;  %v530_v17 = vld [vmem:[#allocation2 + $0x91] sm:$0xff] }
  0x3c   : > { %603 = vst.msk [vmem:[%s763_s27 + $0x8] sm:$0xff] %vm290_vm2, %v595_v11  ;;  %v352_v33 = vmul.f32 %v797_v26, %v527_v13  ;;  %v543_v34 = vmul.f32 %v840_v49, %v527_v13  ;;  %v423_v35 = vadd.f32 %v415_v24, %v391_v23  ;;  %v447_v36 = vmul.f32 %v823_v39, %v527_v13 }
  0x3d   : > { %604 = vst.msk [vmem:[%s763_s27 + $0x10] sm:$0xff] %vm290_vm2, %v596_v27  ;;  %v582_v38 = vadd.f32 %v574_v12, %v550_v28  ;;  %v519_v40 = vadd.f32 %v511_v21, %v486_v29  ;;  %v384_v44 = vmul.f32 %v804_v32, %v559_v22  ;;  %v575_v45 = vmul.f32 %v847_v54, %v559_v22  ;;  %v561_v12 = vld [vmem:[#allocation2 + $0x82] sm:$0xff] }
  0x3e   : > { %v360_v43 = vadd.f32 %v352_v33, %v320_v25  ;;  %v455_v47 = vadd.f32 %v447_v36, %v423_v35  ;;  %v479_v48 = vmul.f32 %v828_v42, %v559_v22  ;;  %v416_v50 = vmul.f32 %v818_v37, %v496_v30  ;;  %v562_v25 = vld [vmem:[#allocation2 + $0x92] sm:$0xff] }
  0x3f   : > { %v597_v51 = vadd.f32 %v872_v31, %v582_v38  ;;  %v551_v52 = vadd.f32 %v543_v34, %v519_v40  ;;  %v321_v57 = vmul.f32 %v792_v20, %v496_v30  ;;  %v512_v59 = vmul.f32 %v834_v46, %v496_v30 }
  0x40   : > { %v392_v55 = vadd.f32 %v384_v44, %v360_v43  ;;  %v487_v58 = vadd.f32 %v479_v48, %v455_v47  ;;  %v353_v60 = vmul.f32 %v797_v26, %v528_v41  ;;  %v544_v62 = vmul.f32 %v840_v49, %v528_v41 }
  0x41   : > { %605 = vst.msk [vmem:[%s763_s27 + $0x18] sm:$0xff] %vm290_vm2, %v597_v51  ;;  %v583_v61 = vadd.f32 %v575_v45, %v551_v52  ;;  %v448_v0 = vmul.f32 %v823_v39, %v528_v41  ;;  %v385_v3 = vmul.f32 %v804_v32, %v560_v53  ;;  %v417_v20 = vmul.f32 %v818_v37, %v497_v56  ;;  %v498_v32 = vld [vmem:[#allocation2 + $0x90] sm:$0xff] }
  0x42   : > { %v424_v63 = vadd.f32 %v416_v50, %v392_v55  ;;  %v520_v1 = vadd.f32 %v512_v59, %v487_v58  ;;  %v361_v2 = vadd.f32 %v353_v60, %v321_v57  ;;  %v480_v26 = vmul.f32 %v828_v42, %v560_v53 }
  0x43   : > { %v598_v4 = vadd.f32 %v872_v31, %v583_v61  ;;  %v576_v8 = vmul.f32 %v847_v54, %v560_v53  ;;  %v513_v11 = vmul.f32 %v834_v46, %v497_v56  ;;  %v449_v14 = vmul.f32 %v823_v39, %v529_v6 }
  0x44   : > { %v456_v5 = vadd.f32 %v448_v0, %v424_v63  ;;  %v552_v7 = vadd.f32 %v544_v62, %v520_v1  ;;  %v393_v9 = vadd.f32 %v385_v3, %v361_v2  ;;  %v545_v16 = vmul.f32 %v840_v49, %v529_v6 }
  0x45   : > { %606 = vst.msk [vmem:[%s763_s27 + $0x20] sm:$0xff] %vm290_vm2, %v598_v4  ;;  %v481_v21 = vmul.f32 %v828_v42, %v561_v12  ;;  %v514_v22 = vmul.f32 %v834_v46, %v498_v32  ;;  %v577_v24 = vmul.f32 %v847_v54, %v561_v12  ;;  %v546_v27 = vmul.f32 %v840_v49, %v530_v17 }
  0x46   : > { %v488_v10 = vadd.f32 %v480_v26, %v456_v5  ;;  %v584_v13 = vadd.f32 %v576_v8, %v552_v7  ;;  %v425_v37 = vadd.f32 %v417_v20, %v393_v9  ;;  %v578_v30 = vmul.f32 %v847_v54, %v562_v25 }
  0x48   : > { %v521_v15 = vadd.f32 %v513_v11, %v488_v10  ;;  %v599_v18 = vadd.f32 %v872_v31, %v584_v13  ;;  %v457_v19 = vadd.f32 %v449_v14, %v425_v37 }
  0x4a   : > { %v553_v23 = vadd.f32 %v545_v16, %v521_v15  ;;  %607 = vst.msk [vmem:[%s763_s27 + $0x28] sm:$0xff] %vm290_vm2, %v599_v18  ;;  %v489_v39 = vadd.f32 %v481_v21, %v457_v19 }
  0x4c   : > { %v585_v28 = vadd.f32 %v577_v24, %v553_v23  ;;  %v522_v29 = vadd.f32 %v514_v22, %v489_v39 }
  0x4e   : > { %v600_v33 = vadd.f32 %v872_v31, %v585_v28  ;;  %v554_v34 = vadd.f32 %v546_v27, %v522_v29 }
  0x50   : > { %608 = vst.msk [vmem:[%s763_s27 + $0x30] sm:$0xff] %vm290_vm2, %v600_v33  ;;  %v586_v42 = vadd.f32 %v578_v30, %v554_v34 }
  0x52   : > { %v601_v46 = vadd.f32 %v872_v31, %v586_v42 }
  0x54   : > { %609 = vst.msk [vmem:[%s763_s27 + $0x38] sm:$0xff] %vm290_vm2, %v601_v46 }
  0x55 PF: > { %s15_s18 = sadd.s32 1, %s714_s18  }
  0x56   : > { %p12_p5 = scmp.ge.s32.totalorder %s15_s18, 4  }
  0x58   :  { %14 = sbr.rel (!%p12_p5) target bundleno = 1 (0x1), region = 84 }

// kernel: kan_conv_transformer.20
= control target key start
LH: loop header
LB: loop body
LE: loop exit
PB: predicated region body
PF: predicated region fallthrough
CT: control target
= control target key end

     0   :  { %s1528_s24 = smov 0   ;;  %s1776_s0 = inlined_call_operand.vmem [shape: f32[128,32], index: 0, kind: input, shape index: {}]   ;;  %s1777_s1 = inlined_call_operand.vmem [shape: f32[32,512], index: 1, kind: input, shape index: {}]   ;;  %s1778_s2 = inlined_call_operand.vmem [shape: f32[1,512], index: 2, kind: input, shape index: {}]   ;;  %s1779_s3 = inlined_call_operand.vmem [shape: bf16[512,16], index: 3, kind: input, shape index: {}]   ;;  %s1780_s4 = inlined_call_operand.vmem [shape: bf16[32,16], index: 4, kind: input, shape index: {}]   ;;  %s1781_s5 = inlined_call_operand.vmem [shape: f32[128,16], index: 5, kind: output, shape index: {0}]   ;;  %s1782_s6 = inlined_call_operand.vmem [shape: f32[4,1,16], index: 6, kind: output, shape index: {1}]   ;;  %s1783_s7 = inlined_call_operand.vmem [shape: f32[4,1,16], index: 7, kind: output, shape index: {2}]  }
   0x1 LB: > { %s1534_s25 = sadd.s32 4294967295, %s1485_s24   ;;  %p1249_p0 = scmp.ge.s32.totalorder %s1485_s24, 1  ;;  %s1485_s24 = sphi %s1528_s24, %s18_s24  }
   0x2   : > { %p243_p1 = scmp.lt.s32.totalorder %s1485_s24, 5 }
   0x4   : > { %p244_p2 = pnand %p1249_p0, %p243_p1 }
   0x5   : > { %v305_v0 = vld [vmem:[%s1777_s1 + $0x8] sm:$0xff] (!%p244_p2)  ;;  %v304_v2 = vld [vmem:[%s1777_s1] sm:$0xff] (!%p244_p2)  ;;  %s1250_s9 = sshll.u32 (!%p244_p2), %s1534_s25, 2  ;;  %v1487_v7 = vmov (!%p244_p2), 0.0   ;;  %v307_v12 = vld [vmem:[%s1777_s1 + $0x18] sm:$0xff] (!%p244_p2)  ;;  %vm320_vm0 = vcmask (!%p244_p2), 261120  }
   0x6   : > { %247 = sbr.rel (%p244_p2) target bundleno = 537 (0x219), region = 40  ;;  %v309_v1 = vld [vmem:[%s1777_s1 + $0x28] sm:$0xff] (!%p244_p2)  ;;  %v308_v4 = vld [vmem:[%s1777_s1 + $0x20] sm:$0xff] (!%p244_p2)  ;;  %397 = vmatprep.mubr.f32.mxu0 (!%p244_p2), %v1487_v7  ;;  %409 = vmatprep.mubr.f32.mxu1 (!%p244_p2), %v1487_v7  ;;  %p282_p3 = scmp.lt.s32.totalorder (!%p244_p2), %s1250_s9, 15  ;;  %v311_v13 = vld [vmem:[%s1777_s1 + $0x38] sm:$0xff] (!%p244_p2)  ;;  %vm1096_vm1 = vcmask (!%p244_p2), 130048  }
   0x7   : > { %v1384_v3 = vpack.c.bf16 (!%p244_p2), %v309_v1, %v305_v0  ;;  %v313_v5 = vld [vmem:[%s1777_s1 + $0x48] sm:$0xff] (!%p244_p2)  ;;  %v1386_v8 = vpack.c.bf16 (!%p244_p2), %v308_v4, %v304_v2  ;;  %v312_v10 = vld [vmem:[%s1777_s1 + $0x40] sm:$0xff] (!%p244_p2)  ;;  %v306_v15 = vld [vmem:[%s1777_s1 + $0x10] sm:$0xff] (!%p244_p2)  ;;  %v1392_v18 = vpack.c.bf16 (!%p244_p2), %v311_v13, %v307_v12  ;;  %v513_v1 = vlaneseq (!%p244_p2)  ;;  %p293_p4 = scmp.lt.s32.totalorder (!%p244_p2), %s1534_s25, 3 }
   0x8   : > { %v317_v6 = vld [vmem:[%s1777_s1 + $0x68] sm:$0xff] (!%p244_p2)  ;;  %v316_v11 = vld [vmem:[%s1777_s1 + $0x60] sm:$0xff] (!%p244_p2)  ;;  %v310_v16 = vld [vmem:[%s1777_s1 + $0x30] sm:$0xff] (!%p244_p2)  ;;  %vm1114_vm2 = vcmask (!%p244_p2), 122880  }
   0x9   : > { %v1388_v9 = vpack.c.bf16 (!%p244_p2), %v317_v6, %v313_v5  ;;  %1385 = vmatprep.subr.bf16.mxu0 (!%p244_p2), %v1384_v3  ;;  %1400 = vmatprep.subr.bf16.mxu1 (!%p244_p2), %v1384_v3  ;;  %v1390_v14 = vpack.c.bf16 (!%p244_p2), %v316_v11, %v312_v10  ;;  %v315_v17 = vld [vmem:[%s1777_s1 + $0x58] sm:$0xff] (!%p244_p2)  ;;  %v1413_v20 = vld [vmem:[%s1780_s4] sm:$0xff] (!%p244_p2)   ;;  %v314_v22 = vld [vmem:[%s1777_s1 + $0x50] sm:$0xff] (!%p244_p2)  ;;  %v1394_v24 = vpack.c.bf16 (!%p244_p2), %v310_v16, %v306_v15  ;;  %v514_v2 = vshrl.u32 (!%p244_p2), %v513_v1, 7 }
   0xa   : > { %1387 = vmatpush1.bf16.msra.mxu0 (!%p244_p2), %v1386_v8  ;;  %1402 = vmatpush1.bf16.msra.mxu1 (!%p244_p2), %v1386_v8  ;;  %v319_v19 = vld [vmem:[%s1777_s1 + $0x78] sm:$0xff] (!%p244_p2)  ;;  %v318_v28 = vld [vmem:[%s1777_s1 + $0x70] sm:$0xff] (!%p244_p2)  ;;  %v1414_v30 = vld [vmem:[%s1779_s3 + $0x40] sm:$0xff] (!%p244_p2)  }
   0xb   : > { %1389 = vmatprep.subr.bf16.mxu0 (!%p244_p2), %v1388_v9  ;;  %1401 = vmatprep.subr.bf16.mxu1 (!%p244_p2), %v1388_v9  ;;  %v1396_v27 = vpack.c.bf16 (!%p244_p2), %v319_v19, %v315_v17  ;;  %v1398_v31 = vpack.c.bf16 (!%p244_p2), %v318_v28, %v314_v22  ;;  %v1415_v33 = vld [vmem:[%s1779_s3] sm:$0xff] (!%p244_p2)   ;;  %v1416_v34 = vld [vmem:[%s1780_s4 + $0x8] sm:$0xff] (!%p244_p2)   ;;  %v1419_v37 = vld [vmem:[%s1779_s3 + $0x50] sm:$0xff] (!%p244_p2)   ;;  %v515_v3 = vsub.s32 (!%p244_p2), 0, %v514_v2  ;;  %v519_v5 = vsub.s32 (!%p244_p2), 1, %v514_v2 }
   0xc   : > { %v1417_v35 = vld [vmem:[%s1779_s3 + $0x48] sm:$0xff] (!%p244_p2)   ;;  %v1420_v38 = vld [vmem:[%s1779_s3 + $0xc0] sm:$0xff] (!%p244_p2)   ;;  %v1421_v39 = vld [vmem:[%s1779_s3 + $0x10] sm:$0xff] (!%p244_p2)  }
   0xd   : > { %s1785_s9 = smov (!%p282_p3, %s1250_s9), 15  ;;  %v1418_v36 = vld [vmem:[%s1779_s3 + $0x8] sm:$0xff]   ;;  %v1422_v40 = vld [vmem:[%s1779_s3 + $0x80] sm:$0xff]   ;;  %v1423_v41 = vld [vmem:[%s1779_s3 + $0x58] sm:$0xff]   ;;  %s1787_s25 = smov (!%p293_p4, %s1534_s25), 3 }
   0xe   : > { %s1251_s10 = sshll.u32 %s1785_s9, 3  ;;  %1391 = vmatpush1.bf16.msra.mxu0 %v1390_v14  ;;  %1403 = vmatpush1.bf16.msra.mxu1 %v1390_v14  ;;  %v1424_v42 = vld [vmem:[%s1779_s3 + $0xc8] sm:$0xff]   ;;  %v1425_v43 = vld [vmem:[%s1779_s3 + $0x18] sm:$0xff]   ;;  %v1427_v45 = vld [vmem:[%s1779_s3 + $0x60] sm:$0xff]   ;;  %s295_s17 = scalar_lea.vmem %s1782_s6, %s1787_s25 }
   0xf   : > { %s285_s15 = scalar_lea.vmem %s1776_s0, %s1251_s10  ;;  %1393 = vmatprep.subr.bf16.mxu1 %v1392_v18  ;;  %1376 = vmatprep.subr.bf16.mxu0 %v1413_v20  ;;  %v1426_v44 = vld [vmem:[%s1779_s3 + $0x88] sm:$0xff]   ;;  %v1428_v46 = vld [vmem:[%s1779_s3 + $0xd0] sm:$0xff]   ;;  %v1429_v47 = vld [vmem:[%s1779_s3 + $0x20] sm:$0xff]   ;;  %v523_v18 = vsub.s32 2, %v514_v2  ;;  %s291_s16 = scalar_lea.vmem %s1781_s5, %s1251_s10 }
  0x10   : > { %v300_v21 = vld [vmem:[%s285_s15] sm:$0xff]  ;;  %v302_v23 = vld [vmem:[%s285_s15 + $0x10] sm:$0xff]  ;;  %v303_v25 = vld [vmem:[%s285_s15 + $0x18] sm:$0xff]  ;;  %s298_s20 = scalar_lea.vmem %s1783_s7, %s1787_s25 }
  0x11   : > { %v734_v26 = vpack.c.bf16 %v303_v25, %v302_v23  ;;  %v301_v29 = vld [vmem:[%s285_s15 + $0x8] sm:$0xff]  ;;  %1254 = vmatmul.mubr.msk.f32.vlgmr.msra.gmra.mrb[0].mxu0 %vm320_vm0, %v300_v21  ;;  %1256 = vmatmul.mubr.msk.f32.vlgmr.msra.gmra.mrb[0].mxu1 %vm320_vm0, %v302_v23  ;;  %v1430_v48 = vld [vmem:[%s1779_s3 + $0x90] sm:$0xff]   ;;  %v1432_v50 = vld [vmem:[%s1779_s3 + $0xd8] sm:$0xff]  }
  0x12   : > { %1395 = vmatpush1.bf16.msra.mxu1 %v1394_v24  ;;  %403 = vmatprep.mubr.f32.mxu0 %v1487_v7  ;;  %v733_v32 = vpack.c.bf16 %v301_v29, %v300_v21  ;;  %v1431_v49 = vld [vmem:[%s1779_s3 + $0x68] sm:$0xff]   ;;  %v1434_v52 = vld [vmem:[%s1779_s3 + $0x98] sm:$0xff]   ;;  %v1435_v53 = vld [vmem:[%s1779_s3 + $0x70] sm:$0xff]  }
  0x13   : > { %415 = vmatprep.mubr.f32.mxu1 %v1487_v7  ;;  %1397 = vmatprep.subr.bf16.mxu1 %v1396_v27  ;;  %v1433_v51 = vld [vmem:[%s1779_s3 + $0x28] sm:$0xff]   ;;  %v1436_v54 = vld [vmem:[%s1779_s3 + $0xe0] sm:$0xff]   ;;  %v1437_v55 = vld [vmem:[%s1779_s3 + $0x30] sm:$0xff]  }
  0x14   : > { %1377 = vmatpush3.bf16.msra.mxu0 %v1413_v20  ;;  %v1438_v56 = vld [vmem:[%s1779_s3 + $0xa0] sm:$0xff]   ;;  %v1439_v57 = vld [vmem:[%s1779_s3 + $0x78] sm:$0xff]   ;;  %v1440_v58 = vld [vmem:[%s1779_s3 + $0xe8] sm:$0xff]  }
  0x15   : > { %1255 = vmatmul.mubr.msk.f32.gmra.mrb[2].mxu0 %vm320_vm0, %v301_v29  ;;  %1257 = vmatmul.mubr.msk.f32.gmra.mrb[2].mxu1 %vm320_vm0, %v303_v25  ;;  %v1441_v59 = vld [vmem:[%s1779_s3 + $0x38] sm:$0xff]   ;;  %v1442_v60 = vld [vmem:[%s1779_s3 + $0xa8] sm:$0xff]   ;;  %v1443_v61 = vld [vmem:[%s1779_s3 + $0xf0] sm:$0xff]  }
  0x16   : > { %1399 = vmatpush1.bf16.msra.mxu1 %v1398_v31  ;;  %486 = vmatprep.mubr.f32.mxu1 %v1487_v7  ;;  %v1444_v62 = vld [vmem:[%s1779_s3 + $0xb0] sm:$0xff]   ;;  %v1445_v63 = vld [vmem:[%s1779_s3 + $0xf8] sm:$0xff]   ;;  %v511_v4 = vld [vmem:[%s1778_s2] sm:$0xf] }
  0x17   : > { %1320 = vmatprep.subr.bf16.mxu1 %v1414_v30  ;;  %1380 = vmatprep.mubr.msk.bf16.mxu0 %vm320_vm0, %v733_v32  ;;  %v1446_v0 = vld [vmem:[%s1779_s3 + $0xb8] sm:$0xff]   ;;  %v516_v6 = vrot.slane %v511_v4, %v515_v3  ;;  %v527_v30 = vsub.s32 3, %v514_v2 }
  0x18   : > { %1378 = vmatprep.subr.bf16.mxu0 %v1416_v34 }
  0x19   : > { %1258 = vmatmul.mubr.msk.f32.vlgmr.msra.gmra.mrb[4].mxu1 %vm320_vm0, %v300_v21  ;;  %1379 = vmatpush3.bf16.msra.mxu0 %v1416_v34 }
  0x1a   : > { %492 = vmatprep.mubr.f32.mxu1 %v1487_v7  ;;  %1321 = vmatpush3.bf16.msra.mxu1 %v1415_v33 }
  0x1b   : > { %1322 = vmatprep.subr.bf16.mxu1 %v1417_v35  ;;  %1348 = vmatprep.subr.bf16.mxu0 %v1420_v38 }
  0x1c   : > { %1381 = vmatmul.mubr.msk.bf16.vlgmr.msra.gmra.mrb[4].mxu0 %vm320_vm0, %v734_v26 }
  0x1d   : > { %1259 = vmatmul.mubr.msk.f32.gmra.mrb[6].mxu1 %vm320_vm0, %v301_v29  ;;  %1349 = vmatpush3.bf16.msra.mxu0 %v1422_v40  ;;  %v1718_v29 = vrot.slane %v511_v4, %v523_v18 }
  0x1e   : > { %498 = vmatprep.mubr.f32.mxu1 %v1487_v7  ;;  %1323 = vmatpush3.bf16.msra.mxu1 %v1418_v36 }
  0x1f   : > { %1324 = vmatprep.subr.bf16.mxu1 %v1419_v37  ;;  %1350 = vmatprep.subr.bf16.mxu0 %v1424_v42 }
  0x21   : > { %1260 = vmatmul.mubr.msk.f32.gmra.mrb[8].mxu1 %vm320_vm0, %v302_v23  ;;  %1351 = vmatpush3.bf16.msra.mxu0 %v1426_v44  ;;  %v1721_v44 = vrot.slane %v511_v4, %v527_v30 }
  0x22   : > { %504 = vmatprep.mubr.f32.mxu1 %v1487_v7  ;;  %1325 = vmatpush3.bf16.msra.mxu1 %v1421_v39  ;;  %v520_v7 = vrot.slane %v511_v4, %v519_v5 }
  0x23   : > { %1326 = vmatprep.subr.bf16.mxu1 %v1423_v41  ;;  %1352 = vmatprep.subr.bf16.mxu0 %v1428_v46 }
  0x25   : > { %1261 = vmatmul.mubr.msk.f32.gmra.mrb[10].mxu1 %vm320_vm0, %v303_v25  ;;  %1353 = vmatpush3.bf16.msra.mxu0 %v1430_v48 }
  0x26   : > { %1327 = vmatpush3.bf16.msra.mxu1 %v1425_v43  ;;  %1354 = vmatprep.subr.bf16.mxu0 %v1432_v50 }
  0x27   : > { %1328 = vmatprep.subr.bf16.mxu1 %v1427_v45 }
  0x29   : > { %1355 = vmatpush3.bf16.msra.mxu0 %v1434_v52 }
  0x2a   : > { %1329 = vmatpush3.bf16.msra.mxu1 %v1429_v47  ;;  %1356 = vmatprep.subr.bf16.mxu0 %v1436_v54 }
  0x2b   : > { %1330 = vmatprep.subr.bf16.mxu1 %v1431_v49 }
  0x2d   : > { %1357 = vmatpush3.bf16.msra.mxu0 %v1438_v56 }
  0x2e   : > { %1331 = vmatpush3.bf16.msra.mxu1 %v1433_v51  ;;  %1358 = vmatprep.subr.bf16.mxu0 %v1440_v58 }
  0x2f   : > { %1332 = vmatprep.subr.bf16.mxu1 %v1435_v53 }
  0x31   : > { %1359 = vmatpush3.bf16.msra.mxu0 %v1442_v60 }
  0x32   : > { %1333 = vmatpush3.bf16.msra.mxu1 %v1437_v55  ;;  %1360 = vmatprep.subr.bf16.mxu0 %v1443_v61 }
  0x33   : > { %1334 = vmatprep.subr.bf16.mxu1 %v1439_v57 }
  0x35   : > { %1361 = vmatpush3.bf16.msra.mxu0 %v1444_v62 }
  0x36   : > { %1335 = vmatpush3.bf16.msra.mxu1 %v1441_v59  ;;  %1362 = vmatprep.subr.bf16.mxu0 %v1445_v63 }
  0x39   : > { %1363 = vmatpush3.bf16.msra.mxu0 %v1446_v0 }
  0xe4   : > { %v399_v8 = vpop.f32.mrb[0].mxu0  ;;  %v411_v9 = vpop.f32.mrb[0].mxu1 }
  0xe5   : > { %v533_v10 = vsub.f32 %v399_v8, %v516_v6  ;;  %v541_v11 = vsub.f32 %v411_v9, %v516_v6  ;;  %v401_v12 = vpop.f32.mrb[1].mxu0  ;;  %v413_v13 = vpop.f32.mrb[1].mxu1 }
  0xe6   : > { %v534_v14 = vsub.f32 %v401_v12, %v520_v7  ;;  %v542_v15 = vsub.f32 %v413_v13, %v520_v7 }
  0xe7   : > { %v549_v16 = vmul.f32 %v533_v10, %v533_v10  ;;  %v557_v17 = vmul.f32 %v541_v11, %v541_v11 }
  0xe8   : > { %v550_v19 = vmul.f32 %v534_v14, %v534_v14  ;;  %v558_v20 = vmul.f32 %v542_v15, %v542_v15  ;;  %v405_v21 = vpop.f32.mrb[2].mxu0  ;;  %v417_v22 = vpop.f32.mrb[2].mxu1 }
  0xe9   : > { %v597_v23 = vmul.f32 -0.5, %v549_v16  ;;  %v605_v24 = vmul.f32 -0.5, %v557_v17  ;;  %v407_v25 = vpop.f32.mrb[3].mxu0  ;;  %v419_v26 = vpop.f32.mrb[3].mxu1  ;;  %v537_v28 = vsub.f32 %v405_v21, %v516_v6  ;;  %v545_v33 = vsub.f32 %v417_v22, %v516_v6 }
  0xea   : > { %v598_v27 = vmul.f32 -0.5, %v550_v19  ;;  %v606_v32 = vmul.f32 -0.5, %v558_v20  ;;  %v538_v39 = vsub.f32 %v407_v25, %v520_v7  ;;  %v546_v40 = vsub.f32 %v419_v26, %v520_v7 }
  0xeb   : > { %v613_v31 = vmul.f32 1.442695, %v597_v23  ;;  %v629_v34 = vmul.f32 1.442695, %v605_v24  ;;  %v553_v35 = vmul.f32 %v537_v28, %v537_v28  ;;  %v561_v38 = vmul.f32 %v545_v33, %v545_v33 }
  0xec   : > { %v488_v36 = vpop.f32.mrb[4].mxu1  ;;  %v615_v37 = vmul.f32 1.442695, %v598_v27  ;;  %v631_v45 = vmul.f32 1.442695, %v606_v32  ;;  %v554_v47 = vmul.f32 %v538_v39, %v538_v39  ;;  %v562_v50 = vmul.f32 %v546_v40, %v546_v40 }
  0xed   : > { %v490_v41 = vpop.f32.mrb[5].mxu1  ;;  %v601_v42 = vmul.f32 -0.5, %v553_v35  ;;  %v535_v43 = vsub.f32 %v488_v36, %v1718_v29  ;;  %1447 = vpow2.f32 %v613_v31  ;;  %v609_v46 = vmul.f32 -0.5, %v561_v38 }
  0xee   : > { %1449 = vpow2.f32 %v629_v34  ;;  %v1262_v53 = vadd.f32 -1.0, %v549_v16  ;;  %v602_v55 = vmul.f32 -0.5, %v554_v47  ;;  %v1270_v56 = vadd.f32 -1.0, %v557_v17 }
  0xef   : > { %v621_v49 = vmul.f32 1.442695, %v601_v42  ;;  %v1723_v51 = vmul.f32 %v535_v43, %v535_v43  ;;  %1451 = vpow2.f32 %v615_v37  ;;  %v637_v54 = vmul.f32 1.442695, %v609_v46 }
  0xf0   : > { %v494_v48 = vpop.f32.mrb[6].mxu1  ;;  %v610_v57 = vmul.f32 -0.5, %v562_v50  ;;  %v1263_v58 = vadd.f32 -1.0, %v550_v19  ;;  %v623_v59 = vmul.f32 1.442695, %v602_v55  ;;  %v1271_v62 = vadd.f32 -1.0, %v558_v20 }
  0xf1   : > { %v496_v52 = vpop.f32.mrb[7].mxu1  ;;  %1453 = vpow2.f32 %v621_v49  ;;  %v599_v60 = vmul.f32 -0.5, %v1723_v51  ;;  %v536_v0 = vsub.f32 %v490_v41, %v1721_v44  ;;  %v581_v1 = vmul.f32 0.86732507, %v1262_v53 }
  0xf2   : > { %1455 = vpow2.f32 %v637_v54  ;;  %v639_v63 = vmul.f32 1.442695, %v610_v57  ;;  %v539_v2 = vsub.f32 %v494_v48, %v1718_v29  ;;  %v540_v3 = vsub.f32 %v496_v52, %v1721_v44 }
  0xf3   : > { %1457 = vpow2.f32 %v631_v45  ;;  %v1266_v5 = vadd.f32 -1.0, %v553_v35  ;;  %v552_v6 = vmul.f32 %v536_v0, %v536_v0  ;;  %v617_v8 = vmul.f32 1.442695, %v599_v60 }
  0xf4   : > { %v500_v61 = vpop.f32.mrb[8].mxu1  ;;  %1459 = vpow2.f32 %v623_v59  ;;  %v555_v9 = vmul.f32 %v539_v2, %v539_v2  ;;  %v556_v10 = vmul.f32 %v540_v3, %v540_v3  ;;  %v589_v13 = vmul.f32 0.86732507, %v1270_v56 }
  0xf5   : > { %v502_v4 = vpop.f32.mrb[9].mxu1  ;;  %1461 = vpow2.f32 %v639_v63  ;;  %v543_v7 = vsub.f32 %v500_v61, %v1718_v29  ;;  %v1274_v14 = vadd.f32 -1.0, %v561_v38  ;;  %v1267_v15 = vadd.f32 -1.0, %v554_v47 }
  0xf6   : > { %v544_v11 = vsub.f32 %v502_v4, %v1721_v44  ;;  %v600_v16 = vmul.f32 -0.5, %v552_v6  ;;  %v582_v19 = vmul.f32 0.86732507, %v1263_v58  ;;  %v590_v20 = vmul.f32 0.86732507, %v1271_v62 }
  0xf7   : > { %v1448_v18 = vpop.eup %1447  ;;  %v603_v21 = vmul.f32 -0.5, %v555_v9  ;;  %v1731_v22 = vmul.f32 %v543_v7, %v543_v7  ;;  %v585_v24 = vmul.f32 0.86732507, %v1266_v5  ;;  %v604_v26 = vmul.f32 -0.5, %v556_v10 }
  0xf8   : > { %v506_v12 = vpop.f32.mrb[10].mxu1  ;;  %v1450_v23 = vpop.eup %1449  ;;  %v619_v25 = vmul.f32 1.442695, %v600_v16  ;;  %v1275_v28 = vadd.f32 -1.0, %v562_v50  ;;  %1463 = vpow2.f32 %v617_v8  ;;  %v1733_v31 = vmul.f32 %v544_v11, %v544_v11 }
  0xf9   : > { %v508_v17 = vpop.f32.mrb[11].mxu1  ;;  %v1452_v27 = vpop.eup %1451  ;;  %v625_v30 = vmul.f32 1.442695, %v603_v21  ;;  %v593_v33 = vmul.f32 0.86732507, %v1274_v14  ;;  %v645_v37 = vmul.f32 %v1448_v18, %v581_v1  ;;  %v607_v39 = vmul.f32 -0.5, %v1731_v22 }
  0xfa   : > { %v586_v34 = vmul.f32 0.86732507, %v1267_v15  ;;  %1465 = vpow2.f32 %v619_v25  ;;  %v627_v35 = vmul.f32 1.442695, %v604_v26  ;;  %v653_v41 = vmul.f32 %v1450_v23, %v589_v13 }
  0xfb   : > { %v1454_v32 = vpop.eup %1453  ;;  %1467 = vpow2.f32 %v625_v30  ;;  %v608_v43 = vmul.f32 -0.5, %v1733_v31  ;;  %v594_v47 = vmul.f32 0.86732507, %v1275_v28  ;;  %v1264_v48 = vadd.f32 -1.0, %v1723_v51 }
  0xfc   : > { %v1456_v36 = vpop.eup %1455  ;;  %v649_v38 = vmul.f32 %v1454_v32, %v585_v24  ;;  %1469 = vpow2.f32 %v627_v35  ;;  %v547_v49 = vsub.f32 %v506_v12, %v1718_v29  ;;  %v646_v52 = vmul.f32 %v1452_v27, %v582_v19 }
  0xfd   : > { %v1458_v40 = vpop.eup %1457  ;;  %v657_v42 = vmul.f32 %v1456_v36, %v593_v33  ;;  %v548_v54 = vsub.f32 %v508_v17, %v1721_v44  ;;  %v633_v58 = vmul.f32 1.442695, %v607_v39  ;;  %v1268_v60 = vadd.f32 -1.0, %v555_v9 }
  0xfe   : > { %v1460_v45 = vpop.eup %1459  ;;  %v661_v46 = vpack.c.bf16 %v649_v38, %v645_v37  ;;  %v654_v56 = vmul.f32 %v1458_v40, %v590_v20  ;;  %v563_v59 = vmul.f32 %v547_v49, %v547_v49  ;;  %v635_v61 = vmul.f32 1.442695, %v608_v43 }
  0xff   : > { %v1462_v50 = vpop.eup %1461  ;;  %v650_v53 = vmul.f32 %v1460_v45, %v586_v34  ;;  %v665_v55 = vpack.c.bf16 %v657_v42, %v653_v41  ;;  %v564_v62 = vmul.f32 %v548_v54, %v548_v54  ;;  %v1265_v0 = vadd.f32 -1.0, %v552_v6 }
 0x100   : > { %v658_v57 = vmul.f32 %v1462_v50, %v594_v47  ;;  %v1269_v1 = vadd.f32 -1.0, %v556_v10  ;;  %v611_v2 = vmul.f32 -0.5, %v563_v59  ;;  %1471 = vpow2.f32 %v633_v58 }
 0x101   : > { %v662_v63 = vpack.c.bf16 %v650_v53, %v646_v52  ;;  %v612_v3 = vmul.f32 -0.5, %v564_v62  ;;  %v583_v5 = vmul.f32 0.86732507, %v1264_v48  ;;  %v587_v7 = vmul.f32 0.86732507, %v1268_v60 }
 0x102   : > { %v666_v51 = vpack.c.bf16 %v658_v57, %v654_v56  ;;  %v1464_v29 = vpop.eup %1463  ;;  %v641_v4 = vmul.f32 1.442695, %v611_v2  ;;  %1473 = vpow2.f32 %v635_v61  ;;  %v584_v11 = vmul.f32 0.86732507, %v1265_v0 }
 0x103   : > { %1030 = vmatprep.mubr.bf16.mxu1 %v662_v63  ;;  %v643_v8 = vmul.f32 1.442695, %v612_v3  ;;  %v588_v12 = vmul.f32 0.86732507, %v1269_v1  ;;  %v647_v10 = vmul.f32 %v1464_v29, %v583_v5  ;;  %v1272_v18 = vadd.f32 -1.0, %v1731_v22 }
 0x104   : > { %1031 = vmatmul.mubr.bf16.vlgmr.msra.gmra.mrb[12].mxu1 %v661_v46  ;;  %v1466_v44 = vpop.eup %1465  ;;  %1475 = vpow2.f32 %v641_v4  ;;  %v1276_v19 = vadd.f32 -1.0, %v563_v59  ;;  %v1273_v20 = vadd.f32 -1.0, %v1733_v31  ;;  %v1277_v21 = vadd.f32 -1.0, %v564_v62  ;;  %v1382_v31 = vpop.f32.mrb[4].mxu0 }
 0x105   : > { %1038 = vmatprep.mubr.bf16.mxu1 %v666_v51  ;;  %v1468_v9 = vpop.eup %1467  ;;  %1477 = vpow2.f32 %v643_v8  ;;  %v648_v14 = vmul.f32 %v1466_v44, %v584_v11  ;;  %v591_v25 = vmul.f32 0.86732507, %v1272_v18  ;;  %v791_v38 = vpop.f32.mrb[5].mxu0 }
 0x106   : > { %v1470_v6 = vpop.eup %1469  ;;  %v651_v13 = vmul.f32 %v1468_v9, %v587_v7  ;;  %v595_v26 = vmul.f32 0.86732507, %v1276_v19  ;;  %v592_v28 = vmul.f32 0.86732507, %v1273_v20  ;;  %v596_v30 = vmul.f32 0.86732507, %v1277_v21 }
 0x107   : > { %v652_v15 = vmul.f32 %v1470_v6, %v588_v12  ;;  %v1383_v39 = vpop.f32.mrb[6].mxu0 }
 0x108   : > { %v663_v16 = vpack.c.bf16 %v651_v13, %v647_v10  ;;  %v794_v40 = vpop.f32.mrb[7].mxu0 }
 0x109   : > { %v664_v17 = vpack.c.bf16 %v652_v15, %v648_v14 }
 0x10a   : > { %v1472_v23 = vpop.eup %1471 }
 0x10b   : > { %1079 = vmatprep.mubr.bf16.mxu0 %v664_v17  ;;  %v655_v33 = vmul.f32 %v1472_v23, %v591_v25 }
 0x10c   : > { %1039 = vmatmul.mubr.bf16.gmra.mrb[16].mxu1 %v665_v55  ;;  %1080 = vmatmul.mubr.bf16.vlgmr.msra.gmra.mrb[8].mxu0 %v663_v16  ;;  %v1474_v24 = vpop.eup %1473 }
 0x10d   : > { %v656_v35 = vmul.f32 %v1474_v24, %v592_v28 }
 0x10e   : > { %v1476_v27 = vpop.eup %1475 }
 0x10f   : > { %v1478_v32 = vpop.eup %1477  ;;  %v659_v34 = vmul.f32 %v1476_v27, %v595_v26 }
 0x110   : > { %v660_v36 = vmul.f32 %v1478_v32, %v596_v30 }
 0x111   : > { %v667_v22 = vpack.c.bf16 %v659_v34, %v655_v33 }
 0x112   : > { %v668_v37 = vpack.c.bf16 %v660_v36, %v656_v35 }
 0x114   : > { %1087 = vmatprep.mubr.bf16.mxu0 %v668_v37 }
 0x115   : > { %1088 = vmatmul.mubr.bf16.gmra.mrb[12].mxu0 %v667_v22 }
 0x1d7   : > { %v1336_v41 = vpop.f32.mrb[12].mxu1 }
 0x1d8   : > { %v1337_v42 = vpop.f32.mrb[13].mxu1 }
 0x1d9   : > { %v1338_v43 = vadd.f32 %v1337_v42, %v1336_v41  ;;  %v1339_v45 = vpop.f32.mrb[14].mxu1 }
 0x1da   : > { %v1340_v46 = vpop.f32.mrb[15].mxu1 }
 0x1db   : > { %v1033_v47 = vadd.f32 %v1338_v43, %v791_v38  ;;  %v1341_v48 = vadd.f32 %v1340_v46, %v1339_v45 }
 0x1dd   : > { %v1036_v49 = vadd.f32 %v1341_v48, %v794_v40 }
 0x1df   : > { %v1342_v50 = vpop.f32.mrb[16].mxu1  ;;  %v1364_v52 = vpop.f32.mrb[8].mxu0 }
 0x1e0   : > { %v1343_v53 = vpop.f32.mrb[17].mxu1  ;;  %v1365_v55 = vpop.f32.mrb[9].mxu0 }
 0x1e1   : > { %v1344_v54 = vadd.f32 %v1343_v53, %v1342_v50  ;;  %v1345_v56 = vpop.f32.mrb[18].mxu1  ;;  %v1366_v57 = vadd.f32 %v1365_v55, %v1364_v52  ;;  %v1367_v58 = vpop.f32.mrb[10].mxu0 }
 0x1e2   : > { %v1346_v59 = vpop.f32.mrb[19].mxu1  ;;  %v1368_v62 = vpop.f32.mrb[11].mxu0 }
 0x1e3   : > { %v1041_v60 = vadd.f32 %v1382_v31, %v1344_v54  ;;  %v1347_v61 = vadd.f32 %v1346_v59, %v1345_v56  ;;  %v1082_v63 = vadd.f32 %v1366_v57, %v1033_v47  ;;  %v1369_v0 = vadd.f32 %v1368_v62, %v1367_v58 }
 0x1e5   : > { %v1044_v1 = vadd.f32 %v1383_v39, %v1347_v61  ;;  %1097 = vst.msk [vmem:[%s291_s16] sm:$0xff] %vm1096_vm1, %v1082_v63  ;;  %v1085_v2 = vadd.f32 %v1369_v0, %v1036_v49  ;;  %v1101_v51 = vsel %vm1096_vm1, %v1082_v63, 0.0 }
 0x1e7   : > { %1098 = vst.msk [vmem:[%s291_s16 + $0x8] sm:$0xff] %vm1096_vm1, %v1085_v2  ;;  %v1102_v3 = vsel %vm1096_vm1, %v1085_v2, 0.0 }
 0x1e8   : > { %v1103_v29 = vadd.f32 %v1102_v3, %v1101_v51  ;;  %v1370_v4 = vpop.f32.mrb[12].mxu0 }
 0x1e9   : > { %v1371_v44 = vpop.f32.mrb[13].mxu0 }
 0x1ea   : > { %v1372_v5 = vadd.f32 %v1371_v44, %v1370_v4  ;;  %v1373_v7 = vpop.f32.mrb[14].mxu0 }
 0x1eb   : > { %v1374_v8 = vpop.f32.mrb[15].mxu0 }
 0x1ec   : > { %v1090_v9 = vadd.f32 %v1372_v5, %v1041_v60  ;;  %v1375_v11 = vadd.f32 %v1374_v8, %v1373_v7 }
 0x1ee   : > { %1099 = vst.msk [vmem:[%s291_s16 + $0x10] sm:$0xff] %vm1096_vm1, %v1090_v9  ;;  %v1104_v12 = vsel %vm1096_vm1, %v1090_v9, 0.0  ;;  %v1093_v6 = vadd.f32 %v1375_v11, %v1044_v1 }
 0x1ef   : > { %v1105_v10 = vadd.f32 %v1104_v12, %v1103_v29 }
 0x1f0   : > { %1100 = vst.msk [vmem:[%s291_s16 + $0x18] sm:$0xff] %vm1096_vm1, %v1093_v6  ;;  %v1106_v13 = vsel %vm1096_vm1, %v1093_v6, 0.0 }
 0x1f1   : > { %v1107_v14 = vadd.f32 %v1106_v13, %v1105_v10 }
 0x1f3   : > { %v1108_v15 = vrot.slane %v1107_v14, 4 }
 0x1f5   : > { %v1109_v16 = vadd.f32 %v1108_v15, %v1107_v14 }
 0x1f7   : > { %v1110_v17 = vrot.slane %v1109_v16, 2 }
 0x1f9   : > { %v1111_v18 = vadd.f32 %v1110_v17, %v1109_v16 }
 0x1fb   : > { %v1112_v19 = vrot.slane %v1111_v18, 1 }
 0x1fd   : > { %v1113_v20 = vadd.f32 %v1112_v19, %v1111_v18 }
 0x1ff   : > { %1115 = vst.msk [vmem:[%s295_s17] sm:$0x1] %vm1114_vm2, %v1113_v20  ;;  %v1116_v21 = vmul.f32 0.03125, %v1113_v20 }
 0x201   : > { %v1117_v23 = vsub.f32 %v1082_v63, %v1116_v21  ;;  %v1118_v24 = vsub.f32 %v1085_v2, %v1116_v21  ;;  %v1119_v25 = vsub.f32 %v1090_v9, %v1116_v21  ;;  %v1120_v26 = vsub.f32 %v1093_v6, %v1116_v21 }
 0x203   : > { %v1121_v27 = vmul.f32 %v1117_v23, %v1117_v23  ;;  %v1122_v28 = vmul.f32 %v1118_v24, %v1118_v24  ;;  %v1123_v30 = vmul.f32 %v1119_v25, %v1119_v25  ;;  %v1124_v32 = vmul.f32 %v1120_v26, %v1120_v26 }
 0x205   : > { %v1125_v33 = vsel %vm1096_vm1, %v1121_v27, 0.0  ;;  %v1126_v34 = vsel %vm1096_vm1, %v1122_v28, 0.0  ;;  %v1128_v36 = vsel %vm1096_vm1, %v1123_v30, 0.0  ;;  %v1130_v37 = vsel %vm1096_vm1, %v1124_v32, 0.0 }
 0x206   : > { %v1127_v35 = vadd.f32 %v1126_v34, %v1125_v33 }
 0x208   : > { %v1129_v22 = vadd.f32 %v1128_v36, %v1127_v35 }
 0x20a   : > { %v1131_v31 = vadd.f32 %v1130_v37, %v1129_v22 }
 0x20c   : > { %v1132_v38 = vrot.slane %v1131_v31, 4 }
 0x20e   : > { %v1133_v39 = vadd.f32 %v1132_v38, %v1131_v31 }
 0x210   : > { %v1134_v40 = vrot.slane %v1133_v39, 2 }
 0x212   : > { %v1135_v41 = vadd.f32 %v1134_v40, %v1133_v39 }
 0x214   : > { %v1136_v42 = vrot.slane %v1135_v41, 1 }
 0x216   : > { %v1137_v43 = vadd.f32 %v1136_v42, %v1135_v41 }
 0x218   : > { %1138 = vst.msk [vmem:[%s298_s20] sm:$0x1] %vm1114_vm2, %v1137_v43 }
 0x219 PF: > { %s18_s24 = sadd.s32 1, %s1485_s24  }
 0x21a   : > { %p15_p5 = scmp.ge.s32.totalorder %s18_s24, 6  }
 0x21c   :  { %17 = sbr.rel (!%p15_p5) target bundleno = 1 (0x1), region = 94 }

// kernel: kan_conv_transformer.12
= control target key start
LH: loop header
LB: loop body
LE: loop exit
PB: predicated region body
PF: predicated region fallthrough
CT: control target
= control target key end

     0   :  { %s1040_s18 = smov 0   ;;  %s1363_s0 = inlined_call_operand.vmem [shape: f32[2,8,8,16], index: 0, kind: input, shape index: {}]   ;;  %s1364_s1 = inlined_call_operand.vmem [shape: f32[1,16], index: 1, kind: input, shape index: {}]   ;;  %s1365_s2 = inlined_call_operand.vmem [shape: f32[1,16], index: 2, kind: input, shape index: {}]   ;;  %s1366_s3 = inlined_call_operand.vmem [shape: bf16[144,16], index: 3, kind: input, shape index: {}]   ;;  %s1367_s4 = inlined_call_operand.vmem [shape: f32[1,16], index: 4, kind: input, shape index: {}]   ;;  %s1368_s5 = inlined_call_operand.vmem [shape: f32[2,8,8,16], index: 5, kind: output, shape index: {}]  }
   0x1 LB: > { %s919_s19 = sadd.s32 4294967295, %s999_s18   ;;  %p923_p0 = scmp.ge.s32.totalorder %s999_s18, 1  ;;  %s999_s18 = sphi %s1040_s18, %s15_s18  }
   0x2   : > { %p187_p1 = scmp.lt.s32.totalorder %s999_s18, 3 }
   0x4   : > { %p188_p2 = pnand %p923_p0, %p187_p1 }
   0x5   : > { %p215_p3 = scmp.lt.s32.totalorder (!%p188_p2), %s919_s19, 1  ;;  %p928_p4 = scmp.ne.s32.totalorder (!%p188_p2), %s919_s19, 0 }
   0x6   : > { %191 = sbr.rel (%p188_p2) target bundleno = 489 (0x1e9), region = 40 }
   0xd   : > { %s216_s20 = scalar_select %p215_p3, %s919_s19, 1 }
   0xe   : > { %229 = sbr.rel (%p928_p4) target bundleno = 25 (0x19), region = 44  ;;  %vm230_vm0 = vcmask (!%p928_p4), 130048   ;;  %vm232_vm1 = vcmask (!%p928_p4), 123904   ;;  %v1001_v0 = vmov (!%p928_p4), 0.0  }
   0xf   : > { %s947_s21 = sshll.u32 %s216_s20, 6  ;;  %231 = vst.msk [vmem:[#allocation2] sm:$0xff] (!%p928_p4), %vm230_vm0, %v1001_v0  ;;  %234 = vst.msk [vmem:[#allocation2 + $0x10] sm:$0xff] (!%p928_p4), %vm230_vm0, %v1001_v0 }
  0x10   : > { %s1051_s24 = scalar_lea.vmem %s1363_s0, %s947_s21  ;;  %s1056_s27 = scalar_lea.vmem %s1368_s5, %s947_s21  ;;  %236 = vst.msk [vmem:[#allocation2 + $0x20] sm:$0xff] (!%p928_p4), %vm230_vm0, %v1001_v0  ;;  %238 = vst.msk [vmem:[#allocation2 + $0x30] sm:$0xff] (!%p928_p4), %vm230_vm0, %v1001_v0 }
  0x11   : > { %240 = vst.msk [vmem:[#allocation2 + $0x40] sm:$0xff] (!%p928_p4), %vm230_vm0, %v1001_v0  ;;  %242 = vst.msk [vmem:[#allocation2 + $0x50] sm:$0xff] (!%p928_p4), %vm230_vm0, %v1001_v0 }
  0x12   : > { %244 = vst.msk [vmem:[#allocation2 + $0x60] sm:$0xff] (!%p928_p4), %vm230_vm0, %v1001_v0  ;;  %246 = vst.msk [vmem:[#allocation2 + $0x70] sm:$0xff] (!%p928_p4), %vm230_vm0, %v1001_v0 }
  0x13   : > { %248 = vst.msk [vmem:[#allocation2 + $0x80] sm:$0xff] (!%p928_p4), %vm230_vm0, %v1001_v0  ;;  %250 = vst.msk [vmem:[#allocation2 + $0x90] sm:$0xff] (!%p928_p4), %vm230_vm0, %v1001_v0 }
  0x14   : > { %233 = vst.msk [vmem:[#allocation2 + $0x8] sm:$0x3] (!%p928_p4), %vm232_vm1, %v1001_v0  ;;  %235 = vst.msk [vmem:[#allocation2 + $0x18] sm:$0x3] (!%p928_p4), %vm232_vm1, %v1001_v0 }
  0x15   : > { %237 = vst.msk [vmem:[#allocation2 + $0x28] sm:$0x3] %vm232_vm1, %v1001_v0  ;;  %239 = vst.msk [vmem:[#allocation2 + $0x38] sm:$0x3] %vm232_vm1, %v1001_v0 }
  0x16   : > { %241 = vst.msk [vmem:[#allocation2 + $0x48] sm:$0x3] %vm232_vm1, %v1001_v0  ;;  %243 = vst.msk [vmem:[#allocation2 + $0x58] sm:$0x3] %vm232_vm1, %v1001_v0 }
  0x17   : > { %245 = vst.msk [vmem:[#allocation2 + $0x68] sm:$0x3] %vm232_vm1, %v1001_v0  ;;  %247 = vst.msk [vmem:[#allocation2 + $0x78] sm:$0x3] %vm232_vm1, %v1001_v0 }
  0x18   : > { %249 = vst.msk [vmem:[#allocation2 + $0x88] sm:$0x3] %vm232_vm1, %v1001_v0  ;;  %251 = vst.msk [vmem:[#allocation2 + $0x98] sm:$0x3] %vm232_vm1, %v1001_v0 }
  0x19 PF: > { %v255_v2 = vld [vmem:[%s1051_s24 + $0x18] sm:$0xff]  ;;  %v929_v3 = vld [vmem:[%s1364_s1] ss:$0 sm:$0xff]  ;;  %s1002_s30 = smov 16   ;;  %vm291_vm2 = vcmask 130048   ;;  %v253_v10 = vld [vmem:[%s1051_s24 + $0x8] sm:$0xff] }
  0x1a   : > { %v270_v4 = vmul.f32 %v929_v3, %v255_v2  ;;  %v930_v5 = vld [vmem:[%s1365_s2] ss:$0 sm:$0xff]  ;;  %v257_v11 = vld [vmem:[%s1051_s24 + $0x28] sm:$0xff]  ;;  %v268_v14 = vmul.f32 %v929_v3, %v253_v10  ;;  %v254_v16 = vld [vmem:[%s1051_s24 + $0x10] sm:$0xff]  ;;  %s1003_s8 = smov 32   ;;  %v1004_v49 = vmov 0  }
  0x1b   : > { %v256_v7 = vld [vmem:[%s1051_s24 + $0x20] sm:$0xff]  ;;  %v272_v15 = vmul.f32 %v929_v3, %v257_v11  ;;  %v258_v17 = vld [vmem:[%s1051_s24 + $0x30] sm:$0xff]  ;;  %v259_v18 = vld [vmem:[%s1051_s24 + $0x38] sm:$0xff]  ;;  %v269_v20 = vmul.f32 %v929_v3, %v254_v16  ;;  %791 = vmatprep.subr.bf16.mxu0 %v1004_v49  ;;  %949 = vmatprep.subr.bf16.mxu1 %v1004_v49  ;;  %s1005_s11 = smov 48   ;;  %s1006_s16 = smov 64   ;;  %vm356_vm3 = vcmask 261248  }
  0x1c   : > { %v271_v8 = vmul.f32 %v929_v3, %v256_v7  ;;  %v252_v9 = vld [vmem:[%s1051_s24] sm:$0xff]  ;;  %v285_v12 = vadd.f32 %v930_v5, %v270_v4  ;;  %v273_v21 = vmul.f32 %v929_v3, %v258_v17  ;;  %v274_v22 = vmul.f32 %v929_v3, %v259_v18  ;;  %v985_v50 = vld [vmem:[%s1366_s3 + $0x8] sm:$0xff]   ;;  %v986_v51 = vld [vmem:[%s1366_s3 + $0x10] sm:$0xff]   ;;  %s1007_s22 = smov 80   ;;  %s1008_s28 = smov 96  }
  0x1d   : > { %v267_v13 = vmul.f32 %v929_v3, %v252_v9  ;;  %v300_v23 = vld [vmem:[#allocation2] sm:$0xff]  ;;  %v283_v25 = vadd.f32 %v930_v5, %v268_v14  ;;  %v287_v26 = vadd.f32 %v930_v5, %v272_v15  ;;  %v284_v27 = vadd.f32 %v930_v5, %v269_v20  ;;  %v987_v52 = vld [vmem:[%s1366_s3 + $0x18] sm:$0xff]   ;;  %v989_v56 = vld [vmem:[%s1366_s3 + $0x28] sm:$0xff]   ;;  %s1009_s10 = smov 112  }
  0x1e   : > { %v286_v19 = vadd.f32 %v930_v5, %v271_v8  ;;  %295 = vst.msk [vmem:[#allocation2 + $0x41] sm:$0xff] %vm291_vm2, %v285_v12  ;;  %308 = vst.msk [vmem:[#allocation3] sm:$0xff] %vm291_vm2, %v300_v23  ;;  %v288_v28 = vadd.f32 %v930_v5, %v273_v21  ;;  %v289_v29 = vadd.f32 %v930_v5, %v274_v22  ;;  %v984_v48 = vld [vmem:[%s1366_s3] sm:$0xff]   ;;  %v990_v57 = vld [vmem:[%s1366_s3 + $0x30] sm:$0xff]   ;;  %vm405_vm4 = vcmask 392448  }
  0x1f   : > { %v316_v1 = vld [vmem:[#allocation2 + $0x1] sm:$0xff]  ;;  %v282_v24 = vadd.f32 %v930_v5, %v267_v13  ;;  %293 = vst.msk [vmem:[#allocation2 + $0x21] sm:$0xff] %vm291_vm2, %v283_v25  ;;  %297 = vst.msk [vmem:[#allocation2 + $0x61] sm:$0xff] %vm291_vm2, %v287_v26  ;;  %792 = vmatpush1.bf16.msra.mxu0 %v984_v48  ;;  %958 = vmatpush1.bf16.msra.mxu1 %v984_v48  ;;  %v991_v58 = vld [vmem:[%s1366_s3 + $0x38] sm:$0xff]   ;;  %vm454_vm5 = vcmask 523648   ;;  %vm503_vm6 = vcmask 654848  }
  0x20   : > { %332 = vrot.lane.b32.xlu0 %v316_v1, %s1002_s30  ;;  %v365_v6 = vld [vmem:[#allocation2 + $0x2] sm:$0xff]  ;;  %296 = vst.msk [vmem:[#allocation2 + $0x51] sm:$0xff] %vm291_vm2, %v286_v19  ;;  %294 = vst.msk [vmem:[#allocation2 + $0x31] sm:$0xff] %vm291_vm2, %v284_v27  ;;  %793 = vmatprep.subr.bf16.mxu0 %v1004_v49  ;;  %v569_v7 = vld [vmem:[#allocation2 + $0x90] sm:$0xff]  ;;  %vm552_vm7 = vcmask 786048   ;;  %vm602_vm8 = vcmask 917248  }
  0x21   : > { %292 = vst.msk [vmem:[#allocation2 + $0x11] sm:$0xff] %vm291_vm2, %v282_v24  ;;  %298 = vst.msk [vmem:[#allocation2 + $0x71] sm:$0xff] %vm291_vm2, %v288_v28  ;;  %950 = vmatprep.subr.bf16.mxu1 %v1004_v49  ;;  %v988_v54 = vld [vmem:[%s1366_s3 + $0x20] sm:$0xff]   ;;  %v618_v9 = vld [vmem:[#allocation2 + $0x91] sm:$0xff]  ;;  %vm651_vm9 = vcmask 1048448  }
  0x22   : > { %299 = vst.msk [vmem:[#allocation2 + $0x81] sm:$0xff] %vm291_vm2, %v289_v29  ;;  %v992_v59 = vld [vmem:[%s1366_s3 + $0x40] sm:$0xff]  }
  0x23   : > { %794 = vmatpush1.bf16.msra.mxu0 %v985_v50  ;;  %959 = vmatpush1.bf16.msra.mxu1 %v985_v50 }
  0x24   : > { %381 = vrot.lane.b32.xlu0 %v365_v6, %s1003_s8  ;;  %795 = vmatprep.subr.bf16.mxu0 %v1004_v49  ;;  %v667_v6 = vld [vmem:[#allocation2 + $0x92] sm:$0xff] }
  0x25   : > { %v1093_v30 = vld [vmem:[#allocation2 + $0x41] sm:$0xff]  ;;  %951 = vmatprep.subr.bf16.mxu1 %v1004_v49  ;;  %675 = vst.msk [vmem:[#allocation3 + $0x78] sm:$0xff] %vm291_vm2, %v667_v6 }
  0x26   : > { %v1095_v31 = vld [vmem:[#allocation2 + $0x42] sm:$0xff]  ;;  %340 = vrot.lane.b32.xlu1 %v1093_v30, %s1002_s30 }
  0x27   : > { %v1097_v32 = vld [vmem:[#allocation2 + $0x40] sm:$0xff]  ;;  %v1101_v33 = vld [vmem:[#allocation2 + $0x52] sm:$0xff]  ;;  %670 = vst.msk [vmem:[#allocation3 + $0x28] sm:$0xff] %vm291_vm2, %v1095_v31  ;;  %796 = vmatpush1.bf16.msra.mxu0 %v986_v51  ;;  %960 = vmatpush1.bf16.msra.mxu1 %v986_v51 }
  0x28   : > { %v1103_v34 = vld [vmem:[#allocation2 + $0x50] sm:$0xff]  ;;  %312 = vst.msk [vmem:[#allocation3 + $0x40] sm:$0xff] %vm291_vm2, %v1097_v32  ;;  %v1111_v37 = vld [vmem:[#allocation2 + $0x20] sm:$0xff]  ;;  %671 = vst.msk [vmem:[#allocation3 + $0x38] sm:$0xff] %vm291_vm2, %v1101_v33  ;;  %797 = vmatprep.subr.bf16.mxu0 %v1004_v49  ;;  %952 = vmatprep.subr.bf16.mxu1 %v1004_v49 }
  0x29   : > { %v1109_v35 = vld [vmem:[#allocation2 + $0x51] sm:$0xff]  ;;  %313 = vst.msk [vmem:[#allocation3 + $0x50] sm:$0xff] %vm291_vm2, %v1103_v34  ;;  %v1118_v39 = vld [vmem:[#allocation2 + $0x60] sm:$0xff]  ;;  %310 = vst.msk [vmem:[#allocation3 + $0x20] sm:$0xff] %vm291_vm2, %v1111_v37 }
  0x2a   : > { %v317_v36 = vld [vmem:[#allocation2 + $0x11] sm:$0xff]  ;;  %v1122_v40 = vld [vmem:[#allocation2 + $0x22] sm:$0xff]  ;;  %314 = vst.msk [vmem:[#allocation3 + $0x60] sm:$0xff] %vm291_vm2, %v1118_v39  ;;  %342 = vrot.lane.b32.xlu1 %v1109_v35, %s1002_s30 }
  0x2b   : > { %334 = vrot.lane.b32.xlu0 %v317_v36, %s1002_s30  ;;  %v414_v38 = vld [vmem:[#allocation2 + $0x10] sm:$0xff]  ;;  %v1124_v41 = vld [vmem:[#allocation2 + $0x62] sm:$0xff]  ;;  %668 = vst.msk [vmem:[#allocation3 + $0x8] sm:$0xff] %vm291_vm2, %v1122_v40  ;;  %798 = vmatpush1.bf16.msra.mxu0 %v987_v52 }
  0x2c   : > { %309 = vst.msk [vmem:[#allocation3 + $0x10] sm:$0xff] %vm291_vm2, %v414_v38  ;;  %v1131_v42 = vld [vmem:[#allocation2 + $0x30] sm:$0xff]  ;;  %672 = vst.msk [vmem:[#allocation3 + $0x48] sm:$0xff] %vm291_vm2, %v1124_v41  ;;  %v1149_v47 = vld [vmem:[#allocation2 + $0x82] sm:$0xff]  ;;  %799 = vmatprep.subr.bf16.mxu0 %v1004_v49  ;;  %961 = vmatpush1.bf16.msra.mxu1 %v987_v52 }
  0x2d   : > { %v1133_v43 = vld [vmem:[#allocation2 + $0x70] sm:$0xff]  ;;  %311 = vst.msk [vmem:[#allocation3 + $0x30] sm:$0xff] %vm291_vm2, %v1131_v42  ;;  %674 = vst.msk [vmem:[#allocation3 + $0x68] sm:$0xff] %vm291_vm2, %v1149_v47  ;;  %v464_v53 = vld [vmem:[#allocation2 + $0x21] sm:$0xff]  ;;  %953 = vmatprep.subr.bf16.mxu1 %v1004_v49 }
  0x2e   : > { %v366_v44 = vld [vmem:[#allocation2 + $0x12] sm:$0xff]  ;;  %315 = vst.msk [vmem:[#allocation3 + $0x70] sm:$0xff] %vm291_vm2, %v1133_v43  ;;  %v468_v55 = vld [vmem:[#allocation2 + $0x61] sm:$0xff] }
  0x2f   : > { %v1139_v45 = vld [vmem:[#allocation2 + $0x32] sm:$0xff]  ;;  %389 = vrot.lane.b32.xlu0 %v1095_v31, %s1003_s8  ;;  %383 = vrot.lane.b32.xlu1 %v366_v44, %s1003_s8  ;;  %v421_v4 = vld [vmem:[#allocation2 + $0x80] sm:$0xff] }
  0x30   : > { %v1141_v46 = vld [vmem:[#allocation2 + $0x72] sm:$0xff]  ;;  %669 = vst.msk [vmem:[#allocation3 + $0x18] sm:$0xff] %vm291_vm2, %v1139_v45  ;;  %800 = vmatpush1.bf16.msra.mxu0 %v988_v54  ;;  %962 = vmatpush1.bf16.msra.mxu1 %v988_v54  ;;  %v470_v5 = vld [vmem:[#allocation2 + $0x81] sm:$0xff] }
  0x31   : > { %673 = vst.msk [vmem:[#allocation3 + $0x58] sm:$0xff] %vm291_vm2, %v1141_v46  ;;  %801 = vmatprep.subr.bf16.mxu0 %v1004_v49  ;;  %954 = vmatprep.subr.bf16.mxu1 %v1004_v49  ;;  %v612_v63 = vld [vmem:[#allocation2 + $0x31] sm:$0xff] }
  0x32   : > { %v677_v60 = vld [vmem:[#allocation3 + $0x8] sm:$0xff]  ;;  %v616_v3 = vld [vmem:[#allocation2 + $0x71] sm:$0xff] }
  0x33   : > { %430 = vrot.lane.b32.xlu0 %v414_v38, %s1005_s11  ;;  %391 = vrot.lane.b32.xlu1 %v1101_v33, %s1003_s8  ;;  %v685_v0 = vld [vmem:[#allocation3 + $0x48] sm:$0xff] }
  0x34   : > { %802 = vmatpush1.bf16.msra.mxu0 %v989_v56  ;;  %963 = vmatpush1.bf16.msra.mxu1 %v989_v56  ;;  %v681_v38 = vld [vmem:[#allocation3 + $0x28] sm:$0xff] }
  0x35   : > { %803 = vmatprep.subr.bf16.mxu0 %v1004_v49  ;;  %955 = vmatprep.subr.bf16.mxu1 %v1004_v49 }
  0x37   : > { %438 = vrot.lane.b32.xlu0 %v1103_v34, %s1005_s11  ;;  %432 = vrot.lane.b32.xlu1 %v1111_v37, %s1005_s11  ;;  %v679_v61 = vld [vmem:[#allocation3 + $0x18] sm:$0xff] }
  0x38   : > { %804 = vmatpush1.bf16.msra.mxu0 %v990_v57  ;;  %964 = vmatpush1.bf16.msra.mxu1 %v990_v57  ;;  %v693_v62 = vpack.c.bf16 %v679_v61, %v677_v60  ;;  %v687_v1 = vld [vmem:[#allocation3 + $0x58] sm:$0xff] }
  0x39   : > { %805 = vmatprep.subr.bf16.mxu0 %v1004_v49  ;;  %956 = vmatprep.subr.bf16.mxu1 %v1004_v49  ;;  %v697_v2 = vpack.c.bf16 %v687_v1, %v685_v0 }
  0x3a   : > { %941 = vmatprep.mubr.msk.bf16.mxu0 %vm291_vm2, %v693_v62 }
  0x3b   : > { %479 = vrot.lane.b32.xlu0 %v317_v36, %s1006_s16  ;;  %440 = vrot.lane.b32.xlu1 %v1118_v39, %s1005_s11 }
  0x3c   : > { %806 = vmatpush1.bf16.msra.mxu0 %v991_v58  ;;  %965 = vmatpush1.bf16.msra.mxu1 %v991_v58 }
  0x3d   : > { %807 = vmatprep.subr.bf16.mxu0 %v1004_v49  ;;  %957 = vmatprep.subr.bf16.mxu1 %v1004_v49 }
  0x3e   : > { %943 = vmatprep.mubr.msk.bf16.mxu1 %vm291_vm2, %v697_v2 }
  0x3f   : > { %487 = vrot.lane.b32.xlu0 %v1109_v35, %s1006_s16  ;;  %481 = vrot.lane.b32.xlu1 %v464_v53, %s1006_s16 }
  0x40   : > { %808 = vmatpush1.bf16.msra.mxu0 %v992_v59  ;;  %966 = vmatpush1.bf16.msra.mxu1 %v992_v59 }
  0x43   : > { %528 = vrot.lane.b32.xlu0 %v366_v44, %s1007_s22  ;;  %489 = vrot.lane.b32.xlu1 %v468_v55, %s1006_s16 }
  0x47   : > { %536 = vrot.lane.b32.xlu0 %v1101_v33, %s1007_s22  ;;  %530 = vrot.lane.b32.xlu1 %v1122_v40, %s1007_s22 }
  0x4b   : > { %578 = vrot.lane.b32.xlu0 %v1111_v37, %s1008_s28  ;;  %538 = vrot.lane.b32.xlu1 %v1124_v41, %s1007_s22 }
  0x4f   : > { %586 = vrot.lane.b32.xlu0 %v1118_v39, %s1008_s28  ;;  %580 = vrot.lane.b32.xlu1 %v1131_v42, %s1008_s28  ;;  %v683_v39 = vld [vmem:[#allocation3 + $0x38] sm:$0xff] }
  0x50   : > { %v695_v44 = vpack.c.bf16 %v683_v39, %v681_v38 }
  0x53   : > { %627 = vrot.lane.b32.xlu0 %v464_v53, %s1009_s10  ;;  %588 = vrot.lane.b32.xlu1 %v1133_v43, %s1008_s28 }
  0x57   : > { %635 = vrot.lane.b32.xlu0 %v468_v55, %s1009_s10  ;;  %629 = vrot.lane.b32.xlu1 %v612_v63, %s1009_s10 }
  0x5b   : > { %336 = vrot.lane.b32.xlu0 %v464_v53, %s1002_s30  ;;  %637 = vrot.lane.b32.xlu1 %v616_v3, %s1009_s10 }
  0x5f   : > { %344 = vrot.lane.b32.xlu0 %v468_v55, %s1002_s30  ;;  %338 = vrot.lane.b32.xlu1 %v612_v63, %s1002_s30 }
  0x63   : > { %385 = vrot.lane.b32.xlu0 %v1122_v40, %s1003_s8  ;;  %346 = vrot.lane.b32.xlu1 %v616_v3, %s1002_s30 }
  0x67   : > { %393 = vrot.lane.b32.xlu0 %v1124_v41, %s1003_s8  ;;  %387 = vrot.lane.b32.xlu1 %v1139_v45, %s1003_s8 }
  0x6b   : > { %434 = vrot.lane.b32.xlu0 %v1131_v42, %s1005_s11  ;;  %395 = vrot.lane.b32.xlu1 %v1141_v46, %s1003_s8 }
  0x6f   : > { %442 = vrot.lane.b32.xlu0 %v1133_v43, %s1005_s11  ;;  %436 = vrot.lane.b32.xlu1 %v1097_v32, %s1005_s11 }
  0x73   : > { %483 = vrot.lane.b32.xlu0 %v612_v63, %s1006_s16  ;;  %444 = vrot.lane.b32.xlu1 %v421_v4, %s1005_s11 }
  0x77   : > { %491 = vrot.lane.b32.xlu0 %v616_v3, %s1006_s16  ;;  %485 = vrot.lane.b32.xlu1 %v1093_v30, %s1006_s16 }
  0x7b   : > { %532 = vrot.lane.b32.xlu0 %v1139_v45, %s1007_s22  ;;  %493 = vrot.lane.b32.xlu1 %v470_v5, %s1006_s16 }
  0x7f   : > { %540 = vrot.lane.b32.xlu0 %v1141_v46, %s1007_s22  ;;  %534 = vrot.lane.b32.xlu1 %v1095_v31, %s1007_s22  ;;  %v689_v46 = vld [vmem:[#allocation3 + $0x68] sm:$0xff] }
  0x83   : > { %582 = vrot.lane.b32.xlu0 %v1097_v32, %s1008_s28  ;;  %542 = vrot.lane.b32.xlu1 %v1149_v47, %s1007_s22  ;;  %v691_v47 = vld [vmem:[#allocation3 + $0x78] sm:$0xff] }
  0x84   : > { %v699_v52 = vpack.c.bf16 %v691_v47, %v689_v46 }
  0x87   : > { %590 = vrot.lane.b32.xlu0 %v421_v4, %s1008_s28  ;;  %584 = vrot.lane.b32.xlu1 %v1103_v34, %s1008_s28 }
  0x8b   : > { %631 = vrot.lane.b32.xlu0 %v1093_v30, %s1009_s10  ;;  %592 = vrot.lane.b32.xlu1 %v569_v7, %s1008_s28 }
  0x8f   : > { %639 = vrot.lane.b32.xlu0 %v470_v5, %s1009_s10  ;;  %633 = vrot.lane.b32.xlu1 %v1109_v35, %s1009_s10 }
  0x92   : > { %v333_v8 = vpop.permute.xlu0 %332 }
  0x93   : > { %357 = vst.msk [vmem:[#allocation3] sm:$0xff] %vm356_vm3, %v333_v8  ;;  %641 = vrot.lane.b32.xlu1 %v618_v9, %s1009_s10 }
  0x96   : > { %v382_v10 = vpop.permute.xlu0 %381 }
  0x97   : > { %406 = vst.msk [vmem:[#allocation3] sm:$0xff] %vm405_vm4, %v382_v10 }
  0x98   : > { %v341_v11 = vpop.permute.xlu1 %340 }
  0x99   : > { %361 = vst.msk [vmem:[#allocation3 + $0x40] sm:$0xff] %vm356_vm3, %v341_v11 }
  0x9c   : > { %v343_v13 = vpop.permute.xlu1 %342 }
  0x9d   : > { %v335_v12 = vpop.permute.xlu0 %334  ;;  %362 = vst.msk [vmem:[#allocation3 + $0x50] sm:$0xff] %vm356_vm3, %v343_v13 }
  0x9e   : > { %358 = vst.msk [vmem:[#allocation3 + $0x10] sm:$0xff] %vm356_vm3, %v335_v12 }
  0xa1   : > { %v390_v14 = vpop.permute.xlu0 %389  ;;  %v384_v15 = vpop.permute.xlu1 %383 }
  0xa2   : > { %410 = vst.msk [vmem:[#allocation3 + $0x40] sm:$0xff] %vm405_vm4, %v390_v14  ;;  %407 = vst.msk [vmem:[#allocation3 + $0x10] sm:$0xff] %vm405_vm4, %v384_v15 }
  0xa5   : > { %v431_v16 = vpop.permute.xlu0 %430  ;;  %v392_v17 = vpop.permute.xlu1 %391 }
  0xa6   : > { %455 = vst.msk [vmem:[#allocation3] sm:$0xff] %vm454_vm5, %v431_v16 }
  0xa7   : > { %411 = vst.msk [vmem:[#allocation3 + $0x50] sm:$0xff] %vm405_vm4, %v392_v17 }
  0xa9   : > { %v439_v18 = vpop.permute.xlu0 %438  ;;  %v433_v19 = vpop.permute.xlu1 %432 }
  0xaa   : > { %459 = vst.msk [vmem:[#allocation3 + $0x40] sm:$0xff] %vm454_vm5, %v439_v18  ;;  %456 = vst.msk [vmem:[#allocation3 + $0x10] sm:$0xff] %vm454_vm5, %v433_v19  ;;  %v931_v19 = vld [vmem:[%s1367_s4] ss:$0 sm:$0xff] }
  0xad   : > { %v480_v20 = vpop.permute.xlu0 %479  ;;  %v441_v21 = vpop.permute.xlu1 %440 }
  0xae   : > { %504 = vst.msk [vmem:[#allocation3] sm:$0xff] %vm503_vm6, %v480_v20 }
  0xaf   : > { %460 = vst.msk [vmem:[#allocation3 + $0x50] sm:$0xff] %vm454_vm5, %v441_v21 }
  0xb1   : > { %v488_v22 = vpop.permute.xlu0 %487  ;;  %v482_v23 = vpop.permute.xlu1 %481 }
  0xb2   : > { %508 = vst.msk [vmem:[#allocation3 + $0x40] sm:$0xff] %vm503_vm6, %v488_v22  ;;  %505 = vst.msk [vmem:[#allocation3 + $0x10] sm:$0xff] %vm503_vm6, %v482_v23 }
  0xb5   : > { %v529_v24 = vpop.permute.xlu0 %528  ;;  %v490_v25 = vpop.permute.xlu1 %489 }
  0xb6   : > { %553 = vst.msk [vmem:[#allocation3] sm:$0xff] %vm552_vm7, %v529_v24 }
  0xb7   : > { %509 = vst.msk [vmem:[#allocation3 + $0x50] sm:$0xff] %vm503_vm6, %v490_v25 }
  0xb9   : > { %v537_v26 = vpop.permute.xlu0 %536  ;;  %v531_v27 = vpop.permute.xlu1 %530 }
  0xba   : > { %557 = vst.msk [vmem:[#allocation3 + $0x40] sm:$0xff] %vm552_vm7, %v537_v26  ;;  %554 = vst.msk [vmem:[#allocation3 + $0x10] sm:$0xff] %vm552_vm7, %v531_v27 }
  0xbd   : > { %v579_v28 = vpop.permute.xlu0 %578  ;;  %v539_v29 = vpop.permute.xlu1 %538 }
  0xbe   : > { %603 = vst.msk [vmem:[#allocation3] sm:$0xff] %vm602_vm8, %v579_v28 }
  0xbf   : > { %558 = vst.msk [vmem:[#allocation3 + $0x50] sm:$0xff] %vm552_vm7, %v539_v29 }
  0xc1   : > { %v587_v30 = vpop.permute.xlu0 %586  ;;  %v581_v31 = vpop.permute.xlu1 %580 }
  0xc2   : > { %607 = vst.msk [vmem:[#allocation3 + $0x40] sm:$0xff] %vm602_vm8, %v587_v30  ;;  %604 = vst.msk [vmem:[#allocation3 + $0x10] sm:$0xff] %vm602_vm8, %v581_v31 }
  0xc5   : > { %v628_v32 = vpop.permute.xlu0 %627  ;;  %v589_v33 = vpop.permute.xlu1 %588 }
  0xc6   : > { %652 = vst.msk [vmem:[#allocation3] sm:$0xff] %vm651_vm9, %v628_v32 }
  0xc7   : > { %608 = vst.msk [vmem:[#allocation3 + $0x50] sm:$0xff] %vm602_vm8, %v589_v33 }
  0xc9   : > { %v636_v34 = vpop.permute.xlu0 %635  ;;  %v630_v35 = vpop.permute.xlu1 %629 }
  0xca   : > { %656 = vst.msk [vmem:[#allocation3 + $0x40] sm:$0xff] %vm651_vm9, %v636_v34  ;;  %653 = vst.msk [vmem:[#allocation3 + $0x10] sm:$0xff] %vm651_vm9, %v630_v35 }
  0xcd   : > { %v337_v36 = vpop.permute.xlu0 %336  ;;  %v638_v37 = vpop.permute.xlu1 %637  ;;  %v676_v40 = vld [vmem:[#allocation3] sm:$0xff] }
  0xce   : > { %359 = vst.msk [vmem:[#allocation3 + $0x20] sm:$0xff] %vm356_vm3, %v337_v36 }
  0xcf   : > { %657 = vst.msk [vmem:[#allocation3 + $0x50] sm:$0xff] %vm651_vm9, %v638_v37 }
  0xd1   : > { %v345_v41 = vpop.permute.xlu0 %344  ;;  %v339_v42 = vpop.permute.xlu1 %338  ;;  %v678_v43 = vld [vmem:[#allocation3 + $0x10] sm:$0xff]  ;;  %v684_v48 = vld [vmem:[#allocation3 + $0x40] sm:$0xff] }
  0xd2   : > { %363 = vst.msk [vmem:[#allocation3 + $0x60] sm:$0xff] %vm356_vm3, %v345_v41  ;;  %360 = vst.msk [vmem:[#allocation3 + $0x30] sm:$0xff] %vm356_vm3, %v339_v42  ;;  %v692_v45 = vpack.c.bf16 %v678_v43, %v676_v40 }
  0xd4   : > { %824 = vmatmul.mubr.bf16.vlgmr.msra.gmra.mrb[0].mxu0 %v692_v45 }
  0xd5   : > { %v386_v49 = vpop.permute.xlu0 %385  ;;  %v347_v50 = vpop.permute.xlu1 %346  ;;  %942 = vmatprep.mubr.msk.bf16.mxu0 %vm291_vm2, %v695_v44 }
  0xd6   : > { %408 = vst.msk [vmem:[#allocation3 + $0x20] sm:$0xff] %vm405_vm4, %v386_v49  ;;  %v686_v51 = vld [vmem:[#allocation3 + $0x50] sm:$0xff] }
  0xd7   : > { %364 = vst.msk [vmem:[#allocation3 + $0x70] sm:$0xff] %vm356_vm3, %v347_v50  ;;  %v696_v53 = vpack.c.bf16 %v686_v51, %v684_v48 }
  0xd9   : > { %v394_v54 = vpop.permute.xlu0 %393  ;;  %840 = vmatmul.mubr.bf16.vlgmr.msra.gmra.mrb[0].mxu1 %v696_v53  ;;  %v388_v55 = vpop.permute.xlu1 %387 }
  0xda   : > { %412 = vst.msk [vmem:[#allocation3 + $0x60] sm:$0xff] %vm405_vm4, %v394_v54  ;;  %944 = vmatprep.mubr.msk.bf16.mxu1 %vm291_vm2, %v699_v52  ;;  %409 = vst.msk [vmem:[#allocation3 + $0x30] sm:$0xff] %vm405_vm4, %v388_v55 }
  0xdd   : > { %v435_v56 = vpop.permute.xlu0 %434  ;;  %v396_v57 = vpop.permute.xlu1 %395 }
  0xde   : > { %457 = vst.msk [vmem:[#allocation3 + $0x20] sm:$0xff] %vm454_vm5, %v435_v56 }
  0xdf   : > { %413 = vst.msk [vmem:[#allocation3 + $0x70] sm:$0xff] %vm405_vm4, %v396_v57 }
  0xe1   : > { %v443_v58 = vpop.permute.xlu0 %442  ;;  %v437_v59 = vpop.permute.xlu1 %436 }
  0xe2   : > { %461 = vst.msk [vmem:[#allocation3 + $0x60] sm:$0xff] %vm454_vm5, %v443_v58  ;;  %458 = vst.msk [vmem:[#allocation3 + $0x30] sm:$0xff] %vm454_vm5, %v437_v59 }
  0xe5   : > { %v484_v60 = vpop.permute.xlu0 %483  ;;  %v445_v61 = vpop.permute.xlu1 %444 }
  0xe6   : > { %506 = vst.msk [vmem:[#allocation3 + $0x20] sm:$0xff] %vm503_vm6, %v484_v60 }
  0xe7   : > { %462 = vst.msk [vmem:[#allocation3 + $0x70] sm:$0xff] %vm454_vm5, %v445_v61 }
  0xe9   : > { %v492_v62 = vpop.permute.xlu0 %491  ;;  %v486_v63 = vpop.permute.xlu1 %485 }
  0xea   : > { %510 = vst.msk [vmem:[#allocation3 + $0x60] sm:$0xff] %vm503_vm6, %v492_v62  ;;  %507 = vst.msk [vmem:[#allocation3 + $0x30] sm:$0xff] %vm503_vm6, %v486_v63 }
  0xed   : > { %v533_v0 = vpop.permute.xlu0 %532  ;;  %v494_v1 = vpop.permute.xlu1 %493 }
  0xee   : > { %555 = vst.msk [vmem:[#allocation3 + $0x20] sm:$0xff] %vm552_vm7, %v533_v0 }
  0xef   : > { %511 = vst.msk [vmem:[#allocation3 + $0x70] sm:$0xff] %vm503_vm6, %v494_v1 }
  0xf1   : > { %v541_v2 = vpop.permute.xlu0 %540  ;;  %v535_v3 = vpop.permute.xlu1 %534 }
  0xf2   : > { %559 = vst.msk [vmem:[#allocation3 + $0x60] sm:$0xff] %vm552_vm7, %v541_v2  ;;  %556 = vst.msk [vmem:[#allocation3 + $0x30] sm:$0xff] %vm552_vm7, %v535_v3 }
  0xf5   : > { %v583_v4 = vpop.permute.xlu0 %582  ;;  %v543_v5 = vpop.permute.xlu1 %542 }
  0xf6   : > { %605 = vst.msk [vmem:[#allocation3 + $0x20] sm:$0xff] %vm602_vm8, %v583_v4 }
  0xf7   : > { %560 = vst.msk [vmem:[#allocation3 + $0x70] sm:$0xff] %vm552_vm7, %v543_v5 }
  0xf9   : > { %v591_v6 = vpop.permute.xlu0 %590  ;;  %v585_v7 = vpop.permute.xlu1 %584 }
  0xfa   : > { %609 = vst.msk [vmem:[#allocation3 + $0x60] sm:$0xff] %vm602_vm8, %v591_v6  ;;  %606 = vst.msk [vmem:[#allocation3 + $0x30] sm:$0xff] %vm602_vm8, %v585_v7 }
  0xfd   : > { %v632_v8 = vpop.permute.xlu0 %631  ;;  %v593_v9 = vpop.permute.xlu1 %592 }
  0xfe   : > { %654 = vst.msk [vmem:[#allocation3 + $0x20] sm:$0xff] %vm651_vm9, %v632_v8 }
  0xff   : > { %610 = vst.msk [vmem:[#allocation3 + $0x70] sm:$0xff] %vm602_vm8, %v593_v9 }
 0x101   : > { %v640_v10 = vpop.permute.xlu0 %639  ;;  %v634_v11 = vpop.permute.xlu1 %633 }
 0x102   : > { %658 = vst.msk [vmem:[#allocation3 + $0x60] sm:$0xff] %vm651_vm9, %v640_v10  ;;  %655 = vst.msk [vmem:[#allocation3 + $0x30] sm:$0xff] %vm651_vm9, %v634_v11 }
 0x105   : > { %v642_v12 = vpop.permute.xlu1 %641  ;;  %v680_v13 = vld [vmem:[#allocation3 + $0x20] sm:$0xff] }
 0x106   : > { %659 = vst.msk [vmem:[#allocation3 + $0x70] sm:$0xff] %vm651_vm9, %v642_v12 }
 0x109   : > { %v682_v14 = vld [vmem:[#allocation3 + $0x30] sm:$0xff]  ;;  %v688_v16 = vld [vmem:[#allocation3 + $0x60] sm:$0xff] }
 0x10a   : > { %v694_v15 = vpack.c.bf16 %v682_v14, %v680_v13 }
 0x10c   : > { %832 = vmatmul.mubr.bf16.gmra.mrb[4].mxu0 %v694_v15 }
 0x10d   : > { %v690_v17 = vld [vmem:[#allocation3 + $0x70] sm:$0xff] }
 0x10e   : > { %v698_v18 = vpack.c.bf16 %v690_v17, %v688_v16 }
 0x110   : > { %848 = vmatmul.mubr.bf16.gmra.mrb[4].mxu1 %v698_v18 }
 0x1a7   : > { %v825_v20 = vpop.f32.mrb[0].mxu0 }
 0x1a8   : > { %v826_v21 = vadd.f32 %v931_v19, %v825_v20  ;;  %v827_v22 = vpop.f32.mrb[1].mxu0 }
 0x1a9   : > { %v828_v23 = vpop.f32.mrb[2].mxu0 }
 0x1aa   : > { %856 = vst.msk [vmem:[%s1056_s27] sm:$0xff] %vm291_vm2, %v826_v21  ;;  %v829_v24 = vadd.f32 %v931_v19, %v828_v23  ;;  %v830_v25 = vpop.f32.mrb[3].mxu0 }
 0x1ac   : > { %v841_v26 = vpop.f32.mrb[0].mxu1  ;;  %857 = vst.msk [vmem:[%s1056_s27 + $0x8] sm:$0xff] %vm291_vm2, %v829_v24 }
 0x1ad   : > { %v842_v27 = vadd.f32 %v931_v19, %v841_v26  ;;  %v843_v28 = vpop.f32.mrb[1].mxu1 }
 0x1ae   : > { %v844_v29 = vpop.f32.mrb[2].mxu1 }
 0x1af   : > { %860 = vst.msk [vmem:[%s1056_s27 + $0x20] sm:$0xff] %vm291_vm2, %v842_v27  ;;  %v845_v30 = vadd.f32 %v931_v19, %v844_v29  ;;  %v846_v31 = vpop.f32.mrb[3].mxu1 }
 0x1b1   : > { %861 = vst.msk [vmem:[%s1056_s27 + $0x28] sm:$0xff] %vm291_vm2, %v845_v30 }
 0x1df   : > { %v833_v32 = vpop.f32.mrb[4].mxu0 }
 0x1e0   : > { %v834_v33 = vadd.f32 %v931_v19, %v833_v32  ;;  %v835_v34 = vpop.f32.mrb[5].mxu0 }
 0x1e1   : > { %v836_v35 = vpop.f32.mrb[6].mxu0 }
 0x1e2   : > { %858 = vst.msk [vmem:[%s1056_s27 + $0x10] sm:$0xff] %vm291_vm2, %v834_v33  ;;  %v837_v36 = vadd.f32 %v931_v19, %v836_v35  ;;  %v838_v37 = vpop.f32.mrb[7].mxu0 }
 0x1e3   : > { %v849_v38 = vpop.f32.mrb[4].mxu1 }
 0x1e4   : > { %859 = vst.msk [vmem:[%s1056_s27 + $0x18] sm:$0xff] %vm291_vm2, %v837_v36  ;;  %v850_v39 = vadd.f32 %v931_v19, %v849_v38  ;;  %v851_v40 = vpop.f32.mrb[5].mxu1 }
 0x1e5   : > { %v852_v41 = vpop.f32.mrb[6].mxu1 }
 0x1e6   : > { %862 = vst.msk [vmem:[%s1056_s27 + $0x30] sm:$0xff] %vm291_vm2, %v850_v39  ;;  %v853_v42 = vadd.f32 %v931_v19, %v852_v41  ;;  %v854_v43 = vpop.f32.mrb[7].mxu1 }
 0x1e8   : > { %863 = vst.msk [vmem:[%s1056_s27 + $0x38] sm:$0xff] %vm291_vm2, %v853_v42 }
 0x1e9 PF: > { %s15_s18 = sadd.s32 1, %s999_s18  }
 0x1ea   : > { %p12_p5 = scmp.ge.s32.totalorder %s15_s18, 4  }
 0x1ec   :  { %14 = sbr.rel (!%p12_p5) target bundleno = 1 (0x1), region = 76 }

// kernel: kan_conv_transformer.22
= control target key start
LH: loop header
LB: loop body
LE: loop exit
PB: predicated region body
PF: predicated region fallthrough
CT: control target
= control target key end

     0   :  { %s1806_s21 = smov 0   ;;  %s2074_s0 = inlined_call_operand.vmem [shape: f32[128,16], index: 0, kind: input, shape index: {}]   ;;  %s2075_s1 = inlined_call_operand.vmem [shape: f32[128,16], index: 1, kind: input, shape index: {}]   ;;  %s2076_s2 = inlined_call_operand.vmem [shape: f32[16,256], index: 2, kind: input, shape index: {}]   ;;  %s2077_s3 = inlined_call_operand.vmem [shape: f32[1,256], index: 3, kind: input, shape index: {}]   ;;  %s2078_s4 = inlined_call_operand.vmem [shape: bf16[256,16], index: 4, kind: input, shape index: {}]   ;;  %s2079_s5 = inlined_call_operand.vmem [shape: bf16[16,16], index: 5, kind: input, shape index: {}]   ;;  %s2080_s6 = inlined_call_operand.vmem [shape: f32[16,256], index: 6, kind: input, shape index: {}]   ;;  %s2081_s7 = inlined_call_operand.vmem [shape: f32[1,256], index: 7, kind: input, shape index: {}]   ;;  %s2082_s8 = inlined_call_operand.vmem [shape: bf16[256,16], index: 8, kind: input, shape index: {}]   ;;  %s2083_s9 = inlined_call_operand.vmem [shape: bf16[16,16], index: 9, kind: input, shape index: {}]   ;;  %s2084_s10 = inlined_call_operand.vmem [shape: f32[128,16], index: 10, kind: output, shape index: {0}]   ;;  %s2085_s11 = inlined_call_operand.vmem [shape: f32[4,1,16], index: 11, kind: output, shape index: {1}]   ;;  %s2086_s12 = inlined_call_operand.vmem [shape: f32[4,1,16], index: 12, kind: output, shape index: {2}]  }
   0x1 LB: > { %s1812_s22 = sadd.s32 4294967295, %s1738_s21   ;;  %p1492_p0 = scmp.ge.s32.totalorder %s1738_s21, 1  ;;  %s1738_s21 = sphi %s1806_s21, %s23_s21  }
   0x2   : > { %p379_p1 = scmp.lt.s32.totalorder %s1738_s21, 5 }
   0x4   : > { %p380_p2 = pnand %p1492_p0, %p379_p1 }
   0x5   : > { %v462_v0 = vld [vmem:[%s2076_s2 + $0x8] sm:$0xff] (!%p380_p2)  ;;  %v464_v1 = vld [vmem:[%s2076_s2 + $0x18] sm:$0xff] (!%p380_p2)  ;;  %v461_v2 = vld [vmem:[%s2076_s2] sm:$0xff] (!%p380_p2)  ;;  %s1493_s29 = sshll.u32 (!%p380_p2), %s1812_s22, 2  ;;  %v1740_v5 = vmov (!%p380_p2), 0.0   ;;  %vm465_vm0 = vcmask (!%p380_p2), 130048   ;;  %v569_v59 = vlaneseq (!%p380_p2) }
   0x6   : > { %383 = sbr.rel (%p380_p2) target bundleno = 541 (0x21d), region = 60  ;;  %v1637_v3 = vpack.c.bf16 (!%p380_p2), %v464_v1, %v462_v0  ;;  %v463_v4 = vld [vmem:[%s2076_s2 + $0x10] sm:$0xff] (!%p380_p2)  ;;  %542 = vmatprep.mubr.f32.mxu0 (!%p380_p2), %v1740_v5  ;;  %p433_p3 = scmp.lt.s32.totalorder (!%p380_p2), %s1493_s29, 15  ;;  %v1666_v7 = vld [vmem:[%s2079_s5] sm:$0xff] (!%p380_p2)   ;;  %v894_v8 = vld [vmem:[%s2080_s6 + $0x8] sm:$0xff] (!%p380_p2)  ;;  %vm1345_vm1 = vcmask (!%p380_p2), 122880  }
   0x7   : > { %v1639_v6 = vpack.c.bf16 (!%p380_p2), %v463_v4, %v461_v2  ;;  %v896_v9 = vld [vmem:[%s2080_s6 + $0x18] sm:$0xff] (!%p380_p2)  ;;  %v893_v11 = vld [vmem:[%s2080_s6] sm:$0xff] (!%p380_p2)  ;;  %v895_v12 = vld [vmem:[%s2080_s6 + $0x10] sm:$0xff] (!%p380_p2)  ;;  %1625 = vmatprep.subr.bf16.mxu1 (!%p380_p2), %v1666_v7  ;;  %v570_v60 = vshrl.u32 (!%p380_p2), %v569_v59, 7  ;;  %p450_p4 = scmp.lt.s32.totalorder (!%p380_p2), %s1812_s22, 3 }
   0x8   : > { %1638 = vmatprep.subr.bf16.mxu0 (!%p380_p2), %v1637_v3  ;;  %v1641_v10 = vpack.c.bf16 (!%p380_p2), %v896_v9, %v894_v8  ;;  %v1667_v13 = vld [vmem:[%s2078_s4 + $0x40] sm:$0xff] (!%p380_p2)   ;;  %1626 = vmatpush3.bf16.msra.mxu1 (!%p380_p2), %v1666_v7  ;;  %v1643_v20 = vpack.c.bf16 (!%p380_p2), %v895_v12, %v893_v11  ;;  %v1669_v28 = vld [vmem:[%s2078_s4 + $0x48] sm:$0xff] (!%p380_p2)   ;;  %v1671_v30 = vld [vmem:[%s2078_s4 + $0x50] sm:$0xff] (!%p380_p2)  }
   0x9   : > { %1640 = vmatpush1.bf16.msra.mxu0 (!%p380_p2), %v1639_v6  ;;  %v1668_v14 = vld [vmem:[%s2078_s4] sm:$0xff] (!%p380_p2)   ;;  %v1670_v29 = vld [vmem:[%s2078_s4 + $0x8] sm:$0xff] (!%p380_p2)   ;;  %v1672_v31 = vld [vmem:[%s2078_s4 + $0x10] sm:$0xff] (!%p380_p2)   ;;  %v571_v61 = vsub.s32 (!%p380_p2), 0, %v570_v60  ;;  %v575_v63 = vsub.s32 (!%p380_p2), 1, %v570_v60 }
   0xa   : > { %1642 = vmatprep.subr.bf16.mxu1 (!%p380_p2), %v1641_v10  ;;  %1566 = vmatprep.subr.bf16.mxu0 (!%p380_p2), %v1667_v13  ;;  %v1673_v32 = vld [vmem:[%s2082_s8 + $0x40] sm:$0xff] (!%p380_p2)   ;;  %v1674_v33 = vld [vmem:[%s2078_s4 + $0x58] sm:$0xff] (!%p380_p2)   ;;  %v1677_v36 = vld [vmem:[%s2082_s8 + $0x48] sm:$0xff] (!%p380_p2)  }
   0xb   : > { %v1675_v34 = vld [vmem:[%s2082_s8] sm:$0xff] (!%p380_p2)   ;;  %v1676_v35 = vld [vmem:[%s2078_s4 + $0x18] sm:$0xff] (!%p380_p2)   ;;  %v1679_v38 = vld [vmem:[%s2082_s8 + $0x8] sm:$0xff] (!%p380_p2)  }
   0xc   : > { %v1678_v37 = vld [vmem:[%s2078_s4 + $0x60] sm:$0xff] (!%p380_p2)   ;;  %v1681_v40 = vld [vmem:[%s2082_s8 + $0x50] sm:$0xff] (!%p380_p2)   ;;  %v1682_v41 = vld [vmem:[%s2078_s4 + $0x68] sm:$0xff] (!%p380_p2)  }
   0xd   : > { %s2088_s29 = smov (!%p433_p3, %s1493_s29), 15  ;;  %v1680_v39 = vld [vmem:[%s2078_s4 + $0x20] sm:$0xff]   ;;  %v1683_v42 = vld [vmem:[%s2082_s8 + $0x10] sm:$0xff]   ;;  %v1684_v43 = vld [vmem:[%s2078_s4 + $0x28] sm:$0xff]   ;;  %s2090_s22 = smov (!%p450_p4, %s1812_s22), 3 }
   0xe   : > { %s1847_s28 = sshll.u32 %s2088_s29, 3  ;;  %v1685_v44 = vld [vmem:[%s2082_s8 + $0x58] sm:$0xff]   ;;  %v1686_v45 = vld [vmem:[%s2078_s4 + $0x70] sm:$0xff]   ;;  %v1689_v48 = vld [vmem:[%s2082_s8 + $0x60] sm:$0xff]   ;;  %s452_s15 = scalar_lea.vmem %s2085_s11, %s2090_s22 }
   0xf   : > { %s436_s16 = scalar_lea.vmem %s2074_s0, %s1847_s28  ;;  %s442_s19 = scalar_lea.vmem %s2075_s1, %s1847_s28  ;;  %v1687_v46 = vld [vmem:[%s2082_s8 + $0x18] sm:$0xff]   ;;  %v1688_v47 = vld [vmem:[%s2078_s4 + $0x30] sm:$0xff]   ;;  %v1691_v50 = vld [vmem:[%s2082_s8 + $0x20] sm:$0xff]  }
  0x10   : > { %v457_v15 = vld [vmem:[%s436_s16] sm:$0xff]  ;;  %v458_v16 = vld [vmem:[%s436_s16 + $0x8] sm:$0xff]  ;;  %v459_v17 = vld [vmem:[%s436_s16 + $0x10] sm:$0xff]  ;;  %s448_s13 = scalar_lea.vmem %s2084_s10, %s1847_s28  ;;  %s455_s18 = scalar_lea.vmem %s2086_s12, %s2090_s22 }
  0x11   : > { %1499 = vmatmul.mubr.msk.f32.vlgmr.msra.gmra.mrb[0].mxu0 %vm465_vm0, %v457_v15  ;;  %v679_v18 = vpack.c.bf16 %v458_v16, %v457_v15  ;;  %v460_v19 = vld [vmem:[%s436_s16 + $0x18] sm:$0xff]  ;;  %v1861_v21 = vld [vmem:[%s442_s19] sm:$0xff]  ;;  %v1863_v22 = vld [vmem:[%s442_s19 + $0x8] sm:$0xff] }
  0x12   : > { %548 = vmatprep.mubr.f32.mxu0 %v1740_v5  ;;  %v680_v23 = vpack.c.bf16 %v460_v19, %v459_v17  ;;  %v1259_v24 = vpack.c.bf16 %v1863_v22, %v1861_v21  ;;  %v1867_v25 = vld [vmem:[%s442_s19 + $0x10] sm:$0xff]  ;;  %v1869_v26 = vld [vmem:[%s442_s19 + $0x18] sm:$0xff]  ;;  %1567 = vmatpush3.bf16.msra.mxu0 %v1668_v14  ;;  %v1693_v52 = vld [vmem:[%s2082_s8 + $0x68] sm:$0xff]  }
  0x13   : > { %1627 = vmatprep.mubr.msk.bf16.mxu1 %vm465_vm0, %v679_v18  ;;  %v1260_v27 = vpack.c.bf16 %v1869_v26, %v1867_v25  ;;  %1568 = vmatprep.subr.bf16.mxu0 %v1669_v28  ;;  %v1690_v49 = vld [vmem:[%s2078_s4 + $0x78] sm:$0xff]   ;;  %v1694_v53 = vld [vmem:[%s2082_s8 + $0x28] sm:$0xff]   ;;  %v1696_v54 = vld [vmem:[%s2082_s8 + $0x70] sm:$0xff]  }
  0x14   : > { %1628 = vmatmul.mubr.msk.bf16.vlgmr.msra.gmra.mrb[0].mxu1 %vm465_vm0, %v680_v23  ;;  %v1692_v51 = vld [vmem:[%s2078_s4 + $0x38] sm:$0xff]   ;;  %v1697_v55 = vld [vmem:[%s2082_s8 + $0x30] sm:$0xff]   ;;  %v1979_v58 = vld [vmem:[%s2083_s9] sm:$0xff]  }
  0x15   : > { %1644 = vmatpush1.bf16.msra.mxu1 %v1643_v20  ;;  %1500 = vmatmul.mubr.msk.f32.gmra.mrb[2].mxu0 %vm465_vm0, %v458_v16  ;;  %v1698_v56 = vld [vmem:[%s2082_s8 + $0x78] sm:$0xff]   ;;  %v567_v62 = vld [vmem:[%s2077_s3] sm:$0x3] }
  0x16   : > { %554 = vmatprep.mubr.f32.mxu0 %v1740_v5  ;;  %973 = vmatprep.mubr.f32.mxu1 %v1740_v5  ;;  %v1699_v57 = vld [vmem:[%s2082_s8 + $0x38] sm:$0xff]   ;;  %v572_v0 = vrot.slane %v567_v62, %v571_v61  ;;  %v576_v1 = vrot.slane %v567_v62, %v575_v63  ;;  %v998_v15 = vld [vmem:[%s2081_s7] sm:$0x3] }
  0x17   : > { %1569 = vmatpush3.bf16.msra.mxu0 %v1670_v29  ;;  %1594 = vmatprep.subr.bf16.mxu1 %v1673_v32  ;;  %v1996_v28 = vrot.slane %v998_v15, %v571_v61 }
  0x18   : > { %1570 = vmatprep.subr.bf16.mxu0 %v1671_v30 }
  0x19   : > { %1501 = vmatmul.mubr.msk.f32.gmra.mrb[4].mxu0 %vm465_vm0, %v459_v17 }
  0x1a   : > { %560 = vmatprep.mubr.f32.mxu0 %v1740_v5 }
  0x1b   : > { %1571 = vmatpush3.bf16.msra.mxu0 %v1672_v31 }
  0x1c   : > { %1530 = vmatmul.mubr.msk.f32.vlgmr.msra.gmra.mrb[4].mxu1 %vm465_vm0, %v1861_v21  ;;  %1572 = vmatprep.subr.bf16.mxu0 %v1674_v33 }
  0x1d   : > { %1502 = vmatmul.mubr.msk.f32.gmra.mrb[6].mxu0 %vm465_vm0, %v460_v19  ;;  %979 = vmatprep.mubr.f32.mxu1 %v1740_v5 }
  0x1e   : > { %1595 = vmatpush3.bf16.msra.mxu1 %v1675_v34 }
  0x1f   : > { %1573 = vmatpush3.bf16.msra.mxu0 %v1676_v35  ;;  %1596 = vmatprep.subr.bf16.mxu1 %v1677_v36 }
  0x20   : > { %1531 = vmatmul.mubr.msk.f32.gmra.mrb[6].mxu1 %vm465_vm0, %v1863_v22  ;;  %1574 = vmatprep.subr.bf16.mxu0 %v1678_v37 }
  0x21   : > { %985 = vmatprep.mubr.f32.mxu1 %v1740_v5 }
  0x22   : > { %1597 = vmatpush3.bf16.msra.mxu1 %v1679_v38  ;;  %v1998_v38 = vrot.slane %v998_v15, %v575_v63 }
  0x23   : > { %1575 = vmatpush3.bf16.msra.mxu0 %v1680_v39  ;;  %1598 = vmatprep.subr.bf16.mxu1 %v1681_v40 }
  0x24   : > { %1532 = vmatmul.mubr.msk.f32.gmra.mrb[8].mxu1 %vm465_vm0, %v1867_v25  ;;  %1576 = vmatprep.subr.bf16.mxu0 %v1682_v41 }
  0x25   : > { %991 = vmatprep.mubr.f32.mxu1 %v1740_v5 }
  0x26   : > { %1599 = vmatpush3.bf16.msra.mxu1 %v1683_v42 }
  0x27   : > { %1577 = vmatpush3.bf16.msra.mxu0 %v1684_v43  ;;  %1600 = vmatprep.subr.bf16.mxu1 %v1685_v44 }
  0x28   : > { %1533 = vmatmul.mubr.msk.f32.gmra.mrb[10].mxu1 %vm465_vm0, %v1869_v26  ;;  %1578 = vmatprep.subr.bf16.mxu0 %v1686_v45 }
  0x2a   : > { %1601 = vmatpush3.bf16.msra.mxu1 %v1687_v46 }
  0x2b   : > { %1579 = vmatpush3.bf16.msra.mxu0 %v1688_v47  ;;  %1602 = vmatprep.subr.bf16.mxu1 %v1689_v48 }
  0x2c   : > { %1580 = vmatprep.subr.bf16.mxu0 %v1690_v49 }
  0x2e   : > { %1603 = vmatpush3.bf16.msra.mxu1 %v1691_v50 }
  0x2f   : > { %1581 = vmatpush3.bf16.msra.mxu0 %v1692_v51  ;;  %1604 = vmatprep.subr.bf16.mxu1 %v1693_v52 }
  0x30   : > { %1631 = vmatprep.subr.bf16.mxu0 %v1979_v58 }
  0x32   : > { %1605 = vmatpush3.bf16.msra.mxu1 %v1694_v53 }
  0x33   : > { %1606 = vmatprep.subr.bf16.mxu1 %v1696_v54 }
  0x36   : > { %1607 = vmatpush3.bf16.msra.mxu1 %v1697_v55 }
  0x37   : > { %1608 = vmatprep.subr.bf16.mxu1 %v1698_v56 }
  0x3a   : > { %1609 = vmatpush3.bf16.msra.mxu1 %v1699_v57 }
  0xe4   : > { %v544_v2 = vpop.f32.mrb[0].mxu0 }
  0xe5   : > { %v579_v3 = vsub.f32 %v544_v2, %v572_v0  ;;  %v546_v4 = vpop.f32.mrb[1].mxu0 }
  0xe6   : > { %v580_v5 = vsub.f32 %v546_v4, %v576_v1 }
  0xe7   : > { %v587_v6 = vmul.f32 %v579_v3, %v579_v3  ;;  %v1985_v7 = vpop.f32.mrb[0].mxu1 }
  0xe8   : > { %v550_v8 = vpop.f32.mrb[2].mxu0  ;;  %v1987_v9 = vpop.f32.mrb[1].mxu1  ;;  %v588_v11 = vmul.f32 %v580_v5, %v580_v5 }
  0xe9   : > { %v611_v10 = vmul.f32 -0.5, %v587_v6  ;;  %v581_v12 = vsub.f32 %v550_v8, %v572_v0  ;;  %v552_v13 = vpop.f32.mrb[3].mxu0  ;;  %v1989_v14 = vpop.f32.mrb[2].mxu1  ;;  %v1503_v54 = vadd.f32 -1.0, %v587_v6 }
  0xea   : > { %v582_v16 = vsub.f32 %v552_v13, %v576_v1  ;;  %v1994_v17 = vpop.f32.mrb[3].mxu1  ;;  %v612_v29 = vmul.f32 -0.5, %v588_v11 }
  0xeb   : > { %v619_v18 = vmul.f32 1.442695, %v611_v10  ;;  %v589_v19 = vmul.f32 %v581_v12, %v581_v12  ;;  %v603_v8 = vmul.f32 0.86732507, %v1503_v54  ;;  %v1504_v10 = vadd.f32 -1.0, %v588_v11 }
  0xec   : > { %v590_v20 = vmul.f32 %v582_v16, %v582_v16  ;;  %v556_v23 = vpop.f32.mrb[4].mxu0  ;;  %v621_v44 = vmul.f32 1.442695, %v612_v29 }
  0xed   : > { %v613_v30 = vmul.f32 -0.5, %v589_v19  ;;  %v583_v31 = vsub.f32 %v556_v23, %v572_v0  ;;  %v558_v32 = vpop.f32.mrb[5].mxu0  ;;  %1700 = vpow2.f32 %v619_v18  ;;  %v1505_v55 = vadd.f32 -1.0, %v589_v19 }
  0xee   : > { %v614_v33 = vmul.f32 -0.5, %v590_v20  ;;  %v584_v34 = vsub.f32 %v558_v32, %v576_v1  ;;  %v1506_v60 = vadd.f32 -1.0, %v590_v20 }
  0xef   : > { %v623_v35 = vmul.f32 1.442695, %v613_v30  ;;  %v591_v36 = vmul.f32 %v583_v31, %v583_v31  ;;  %v975_v37 = vpop.f32.mrb[4].mxu1  ;;  %v605_v12 = vmul.f32 0.86732507, %v1505_v55 }
  0xf0   : > { %v625_v39 = vmul.f32 1.442695, %v614_v33  ;;  %v2000_v40 = vmul.f32 %v584_v34, %v584_v34  ;;  %v1010_v41 = vsub.f32 %v975_v37, %v1996_v28  ;;  %v562_v42 = vpop.f32.mrb[6].mxu0  ;;  %v977_v43 = vpop.f32.mrb[5].mxu1  ;;  %v606_v15 = vmul.f32 0.86732507, %v1506_v60 }
  0xf1   : > { %1702 = vpow2.f32 %v623_v35  ;;  %v615_v45 = vmul.f32 -0.5, %v591_v36  ;;  %v585_v46 = vsub.f32 %v562_v42, %v572_v0  ;;  %v564_v47 = vpop.f32.mrb[7].mxu0  ;;  %v1011_v52 = vsub.f32 %v977_v43, %v1998_v38 }
  0xf2   : > { %1704 = vpow2.f32 %v625_v39  ;;  %v616_v48 = vmul.f32 -0.5, %v2000_v40  ;;  %v2004_v50 = vmul.f32 %v1010_v41, %v1010_v41  ;;  %v586_v61 = vsub.f32 %v564_v47, %v576_v1 }
  0xf3   : > { %v627_v49 = vmul.f32 1.442695, %v615_v45  ;;  %v593_v51 = vmul.f32 %v585_v46, %v585_v46  ;;  %v981_v53 = vpop.f32.mrb[6].mxu1  ;;  %1706 = vpow2.f32 %v621_v44  ;;  %v2007_v57 = vmul.f32 %v1011_v52, %v1011_v52 }
  0xf4   : > { %v983_v59 = vpop.f32.mrb[7].mxu1  ;;  %v629_v62 = vmul.f32 1.442695, %v616_v48  ;;  %v1042_v63 = vmul.f32 -0.5, %v2004_v50  ;;  %v594_v3 = vmul.f32 %v586_v61, %v586_v61  ;;  %v1012_v4 = vsub.f32 %v981_v53, %v1996_v28 }
  0xf5   : > { %v617_v56 = vmul.f32 -0.5, %v593_v51  ;;  %1708 = vpow2.f32 %v627_v49  ;;  %v1043_v2 = vmul.f32 -0.5, %v2007_v57  ;;  %v1013_v1 = vsub.f32 %v983_v59, %v1998_v38 }
  0xf6   : > { %v618_v16 = vmul.f32 -0.5, %v594_v3  ;;  %v1020_v18 = vmul.f32 %v1012_v4, %v1012_v4  ;;  %v1050_v20 = vmul.f32 1.442695, %v1042_v63  ;;  %v1507_v37 = vadd.f32 -1.0, %v591_v36 }
  0xf7   : > { %v631_v0 = vmul.f32 1.442695, %v617_v56  ;;  %v987_v5 = vpop.f32.mrb[8].mxu1  ;;  %v1701_v6 = vpop.eup %1700  ;;  %v1052_v11 = vmul.f32 1.442695, %v1043_v2  ;;  %v1021_v41 = vmul.f32 %v1013_v1, %v1013_v1  ;;  %v1509_v44 = vadd.f32 -1.0, %v593_v51 }
  0xf8   : > { %v989_v13 = vpop.f32.mrb[9].mxu1  ;;  %v1014_v23 = vsub.f32 %v987_v5, %v1996_v28  ;;  %v635_v32 = vmul.f32 %v1701_v6, %v603_v8  ;;  %v633_v34 = vmul.f32 1.442695, %v618_v16  ;;  %v1044_v39 = vmul.f32 -0.5, %v1020_v18 }
  0xf9   : > { %1710 = vpow2.f32 %v631_v0  ;;  %v1015_v29 = vsub.f32 %v989_v13, %v1998_v38  ;;  %v1045_v48 = vmul.f32 -0.5, %v1021_v41  ;;  %v604_v52 = vmul.f32 0.86732507, %v1504_v10 }
  0xfa   : > { %1712 = vpow2.f32 %v629_v62  ;;  %v2015_v42 = vmul.f32 %v1014_v23, %v1014_v23  ;;  %v1054_v47 = vmul.f32 1.442695, %v1044_v39  ;;  %v607_v36 = vmul.f32 0.86732507, %v1507_v37 }
  0xfb   : > { %v1703_v19 = vpop.eup %1702  ;;  %v993_v30 = vpop.f32.mrb[10].mxu1  ;;  %1714 = vpow2.f32 %v633_v34  ;;  %v2017_v45 = vmul.f32 %v1015_v29, %v1015_v29  ;;  %v1056_v55 = vmul.f32 1.442695, %v1045_v48  ;;  %v1508_v51 = vadd.f32 -1.0, %v2000_v40 }
  0xfc   : > { %v1705_v31 = vpop.eup %1704  ;;  %v637_v33 = vmul.f32 %v1703_v19, %v605_v12  ;;  %v995_v35 = vpop.f32.mrb[11].mxu1  ;;  %1716 = vpow2.f32 %v1050_v20  ;;  %v1046_v54 = vmul.f32 -0.5, %v2015_v42  ;;  %v609_v60 = vmul.f32 0.86732507, %v1509_v44 }
  0xfd   : > { %v1707_v46 = vpop.eup %1706  ;;  %v638_v53 = vmul.f32 %v1705_v31, %v606_v15  ;;  %1718 = vpow2.f32 %v1052_v11  ;;  %v1047_v56 = vmul.f32 -0.5, %v2017_v45  ;;  %v1016_v61 = vsub.f32 %v993_v30, %v1996_v28 }
  0xfe   : > { %v643_v43 = vpack.c.bf16 %v637_v33, %v635_v32  ;;  %1720 = vpow2.f32 %v1054_v47  ;;  %v636_v59 = vmul.f32 %v1707_v46, %v604_v52  ;;  %v1510_v0 = vadd.f32 -1.0, %v594_v3 }
  0xff   : > { %v1709_v49 = vpop.eup %1708  ;;  %1722 = vpow2.f32 %v1056_v55  ;;  %v1017_v2 = vsub.f32 %v995_v35, %v1998_v38  ;;  %v1058_v5 = vmul.f32 1.442695, %v1046_v54  ;;  %v1024_v6 = vmul.f32 %v1016_v61, %v1016_v61 }
 0x100   : > { %v639_v63 = vmul.f32 %v1709_v49, %v607_v36  ;;  %v644_v8 = vpack.c.bf16 %v638_v53, %v636_v59  ;;  %v1060_v12 = vmul.f32 1.442695, %v1047_v56  ;;  %v1534_v15 = vadd.f32 -1.0, %v2004_v50 }
 0x101   : > { %v1025_v13 = vmul.f32 %v1017_v2, %v1017_v2  ;;  %v1536_v16 = vadd.f32 -1.0, %v1020_v18  ;;  %v1048_v40 = vmul.f32 -0.5, %v1024_v6  ;;  %v608_v28 = vmul.f32 0.86732507, %v1508_v51 }
 0x102   : > { %872 = vmatprep.mubr.bf16.mxu0 %v644_v8  ;;  %v610_v19 = vmul.f32 0.86732507, %v1510_v0  ;;  %v1535_v38 = vadd.f32 -1.0, %v2007_v57  ;;  %v1537_v23 = vadd.f32 -1.0, %v1021_v41  ;;  %1724 = vpow2.f32 %v1058_v5 }
 0x103   : > { %v1711_v62 = vpop.eup %1710  ;;  %v1049_v20 = vmul.f32 -0.5, %v1025_v13  ;;  %873 = vmatmul.mubr.bf16.vlgmr.msra.gmra.mrb[8].mxu0 %v643_v43  ;;  %v1062_v29 = vmul.f32 1.442695, %v1048_v40  ;;  %1726 = vpow2.f32 %v1060_v12  ;;  %v1034_v33 = vmul.f32 0.86732507, %v1534_v15 }
 0x104   : > { %v641_v4 = vmul.f32 %v1711_v62, %v609_v60  ;;  %v1713_v10 = vpop.eup %1712  ;;  %1632 = vmatpush3.bf16.msra.mxu0 %v1979_v58  ;;  %v1036_v11 = vmul.f32 0.86732507, %v1536_v16  ;;  %v1035_v39 = vmul.f32 0.86732507, %v1535_v38  ;;  %v1037_v41 = vmul.f32 0.86732507, %v1537_v23 }
 0x105   : > { %v1715_v3 = vpop.eup %1714  ;;  %v640_v31 = vmul.f32 %v1713_v10, %v608_v28  ;;  %v1064_v50 = vmul.f32 1.442695, %v1049_v20  ;;  %1728 = vpow2.f32 %v1062_v29  ;;  %v1538_v47 = vadd.f32 -1.0, %v2015_v42 }
 0x106   : > { %v645_v1 = vpack.c.bf16 %v641_v4, %v639_v63  ;;  %v1717_v30 = vpop.eup %1716  ;;  %v642_v32 = vmul.f32 %v1715_v3, %v610_v19  ;;  %v1540_v48 = vadd.f32 -1.0, %v1024_v6  ;;  %v1539_v49 = vadd.f32 -1.0, %v2017_v45 }
 0x107   : > { %v1719_v18 = vpop.eup %1718  ;;  %1730 = vpow2.f32 %v1064_v50  ;;  %v1066_v37 = vmul.f32 %v1717_v30, %v1034_v33  ;;  %v1541_v52 = vadd.f32 -1.0, %v1025_v13  ;;  %v1038_v55 = vmul.f32 0.86732507, %v1538_v47 }
 0x108   : > { %v1721_v34 = vpop.eup %1720  ;;  %v646_v35 = vpack.c.bf16 %v642_v32, %v640_v31  ;;  %v1067_v44 = vmul.f32 %v1719_v18, %v1035_v39  ;;  %v1040_v56 = vmul.f32 0.86732507, %v1540_v48  ;;  %v1039_v51 = vmul.f32 0.86732507, %v1539_v49 }
 0x109   : > { %v1068_v57 = vmul.f32 %v1721_v34, %v1036_v11  ;;  %v1723_v43 = vpop.eup %1722  ;;  %v1041_v42 = vmul.f32 0.86732507, %v1541_v52 }
 0x10a   : > { %880 = vmatprep.mubr.bf16.mxu0 %v646_v35  ;;  %v1069_v46 = vmul.f32 %v1723_v43, %v1037_v41 }
 0x10b   : > { %v1074_v58 = vpack.c.bf16 %v1068_v57, %v1066_v37  ;;  %881 = vmatmul.mubr.bf16.gmra.mrb[12].mxu0 %v645_v1 }
 0x10c   : > { %v1075_v53 = vpack.c.bf16 %v1069_v46, %v1067_v44  ;;  %1633 = vmatprep.mubr.msk.bf16.mxu0 %vm465_vm0, %v1259_v24  ;;  %v1725_v54 = vpop.eup %1724 }
 0x10d   : > { %v1727_v36 = vpop.eup %1726  ;;  %v1070_v61 = vmul.f32 %v1725_v54, %v1038_v55 }
 0x10e   : > { %1238 = vmatprep.mubr.bf16.mxu1 %v1075_v53  ;;  %v1071_v45 = vmul.f32 %v1727_v36, %v1039_v51 }
 0x10f   : > { %1239 = vmatmul.mubr.bf16.vlgmr.msra.gmra.mrb[12].mxu1 %v1074_v58  ;;  %v1729_v59 = vpop.eup %1728 }
 0x110   : > { %v1072_v62 = vmul.f32 %v1729_v59, %v1040_v56 }
 0x111   : > { %v1731_v60 = vpop.eup %1730 }
 0x112   : > { %v1073_v63 = vmul.f32 %v1731_v60, %v1041_v42  ;;  %v1076_v21 = vpack.c.bf16 %v1072_v62, %v1070_v61 }
 0x113   : > { %1634 = vmatmul.mubr.msk.bf16.vlgmr.msra.gmra.mrb[16].mxu0 %vm465_vm0, %v1260_v27 }
 0x114   : > { %v1077_v22 = vpack.c.bf16 %v1073_v63, %v1071_v45 }
 0x116   : > { %1246 = vmatprep.mubr.bf16.mxu1 %v1077_v22 }
 0x117   : > { %1247 = vmatmul.mubr.bf16.gmra.mrb[16].mxu1 %v1076_v21 }
 0x1d6   : > { %v1582_v24 = vpop.f32.mrb[8].mxu0 }
 0x1d7   : > { %v1583_v0 = vpop.f32.mrb[9].mxu0 }
 0x1d8   : > { %v1584_v2 = vadd.f32 %v1583_v0, %v1582_v24  ;;  %v1585_v4 = vpop.f32.mrb[10].mxu0 }
 0x1d9   : > { %v1586_v5 = vpop.f32.mrb[11].mxu0 }
 0x1da   : > { %v875_v6 = vadd.f32 %v1584_v2, %v1987_v9  ;;  %v1587_v8 = vadd.f32 %v1586_v5, %v1585_v4 }
 0x1dc   : > { %v878_v10 = vadd.f32 %v1587_v8, %v1994_v17 }
 0x1de   : > { %v1588_v12 = vpop.f32.mrb[12].mxu0 }
 0x1df   : > { %v1589_v13 = vpop.f32.mrb[13].mxu0 }
 0x1e0   : > { %v1590_v25 = vadd.f32 %v1589_v13, %v1588_v12  ;;  %v1591_v26 = vpop.f32.mrb[14].mxu0 }
 0x1e1   : > { %v1592_v27 = vpop.f32.mrb[15].mxu0 }
 0x1e2   : > { %v883_v15 = vadd.f32 %v1985_v7, %v1590_v25  ;;  %v1593_v16 = vadd.f32 %v1592_v27, %v1591_v26  ;;  %v1610_v40 = vpop.f32.mrb[12].mxu1 }
 0x1e3   : > { %v1611_v1 = vpop.f32.mrb[13].mxu1 }
 0x1e4   : > { %v886_v28 = vadd.f32 %v1989_v14, %v1593_v16  ;;  %v1612_v19 = vadd.f32 %v1611_v1, %v1610_v40  ;;  %v1613_v20 = vpop.f32.mrb[14].mxu1 }
 0x1e5   : > { %v1614_v3 = vpop.f32.mrb[15].mxu1 }
 0x1e6   : > { %v1615_v9 = vadd.f32 %v1614_v3, %v1613_v20  ;;  %v1635_v38 = vpop.f32.mrb[16].mxu0  ;;  %v1255_v23 = vadd.f32 %v1612_v19, %v875_v6 }
 0x1e7   : > { %v1309_v17 = vpop.f32.mrb[17].mxu0 }
 0x1e8   : > { %v1324_v29 = vadd.f32 %v1309_v17, %v1255_v23  ;;  %v1636_v30 = vpop.f32.mrb[18].mxu0  ;;  %v1256_v31 = vadd.f32 %v1615_v9, %v878_v10 }
 0x1e9   : > { %v1312_v7 = vpop.f32.mrb[19].mxu0 }
 0x1ea   : > { %1328 = vst.msk [vmem:[%s448_s13] sm:$0xff] %vm465_vm0, %v1324_v29  ;;  %v1616_v32 = vpop.f32.mrb[16].mxu1  ;;  %v1325_v50 = vadd.f32 %v1312_v7, %v1256_v31  ;;  %v1332_v18 = vsel %vm465_vm0, %v1324_v29, 0.0 }
 0x1eb   : > { %v1617_v14 = vpop.f32.mrb[17].mxu1 }
 0x1ec   : > { %1329 = vst.msk [vmem:[%s448_s13 + $0x8] sm:$0xff] %vm465_vm0, %v1325_v50  ;;  %v1333_v33 = vsel %vm465_vm0, %v1325_v50, 0.0  ;;  %v1618_v11 = vadd.f32 %v1617_v14, %v1616_v32  ;;  %v1619_v34 = vpop.f32.mrb[18].mxu1 }
 0x1ed   : > { %v1334_v35 = vadd.f32 %v1333_v33, %v1332_v18  ;;  %v1620_v37 = vpop.f32.mrb[19].mxu1 }
 0x1ee   : > { %v1257_v39 = vadd.f32 %v1618_v11, %v883_v15  ;;  %v1621_v57 = vadd.f32 %v1620_v37, %v1619_v34 }
 0x1f0   : > { %v1326_v41 = vadd.f32 %v1635_v38, %v1257_v39  ;;  %v1258_v43 = vadd.f32 %v1621_v57, %v886_v28 }
 0x1f2   : > { %1330 = vst.msk [vmem:[%s448_s13 + $0x10] sm:$0xff] %vm465_vm0, %v1326_v41  ;;  %v1335_v44 = vsel %vm465_vm0, %v1326_v41, 0.0  ;;  %v1327_v58 = vadd.f32 %v1636_v30, %v1258_v43 }
 0x1f3   : > { %v1336_v46 = vadd.f32 %v1335_v44, %v1334_v35 }
 0x1f4   : > { %1331 = vst.msk [vmem:[%s448_s13 + $0x18] sm:$0xff] %vm465_vm0, %v1327_v58  ;;  %v1337_v47 = vsel %vm465_vm0, %v1327_v58, 0.0 }
 0x1f5   : > { %v1338_v48 = vadd.f32 %v1337_v47, %v1336_v46 }
 0x1f7   : > { %v1339_v49 = vrot.slane %v1338_v48, 4 }
 0x1f9   : > { %v1340_v52 = vadd.f32 %v1339_v49, %v1338_v48 }
 0x1fb   : > { %v1341_v53 = vrot.slane %v1340_v52, 2 }
 0x1fd   : > { %v1342_v54 = vadd.f32 %v1341_v53, %v1340_v52 }
 0x1ff   : > { %v1343_v36 = vrot.slane %v1342_v54, 1 }
 0x201   : > { %v1344_v55 = vadd.f32 %v1343_v36, %v1342_v54 }
 0x203   : > { %1346 = vst.msk [vmem:[%s452_s15] sm:$0x1] %vm1345_vm1, %v1344_v55  ;;  %v1347_v56 = vmul.f32 0.03125, %v1344_v55 }
 0x205   : > { %v1348_v59 = vsub.f32 %v1324_v29, %v1347_v56  ;;  %v1349_v51 = vsub.f32 %v1325_v50, %v1347_v56  ;;  %v1350_v42 = vsub.f32 %v1326_v41, %v1347_v56  ;;  %v1351_v60 = vsub.f32 %v1327_v58, %v1347_v56 }
 0x207   : > { %v1352_v61 = vmul.f32 %v1348_v59, %v1348_v59  ;;  %v1353_v62 = vmul.f32 %v1349_v51, %v1349_v51  ;;  %v1354_v45 = vmul.f32 %v1350_v42, %v1350_v42  ;;  %v1355_v63 = vmul.f32 %v1351_v60, %v1351_v60 }
 0x209   : > { %v1356_v21 = vsel %vm465_vm0, %v1352_v61, 0.0  ;;  %v1357_v22 = vsel %vm465_vm0, %v1353_v62, 0.0  ;;  %v1359_v0 = vsel %vm465_vm0, %v1354_v45, 0.0  ;;  %v1361_v4 = vsel %vm465_vm0, %v1355_v63, 0.0 }
 0x20a   : > { %v1358_v24 = vadd.f32 %v1357_v22, %v1356_v21 }
 0x20c   : > { %v1360_v2 = vadd.f32 %v1359_v0, %v1358_v24 }
 0x20e   : > { %v1362_v5 = vadd.f32 %v1361_v4, %v1360_v2 }
 0x210   : > { %v1363_v6 = vrot.slane %v1362_v5, 4 }
 0x212   : > { %v1364_v8 = vadd.f32 %v1363_v6, %v1362_v5 }
 0x214   : > { %v1365_v10 = vrot.slane %v1364_v8, 2 }
 0x216   : > { %v1366_v12 = vadd.f32 %v1365_v10, %v1364_v8 }
 0x218   : > { %v1367_v13 = vrot.slane %v1366_v12, 1 }
 0x21a   : > { %v1368_v25 = vadd.f32 %v1367_v13, %v1366_v12 }
 0x21c   : > { %1369 = vst.msk [vmem:[%s455_s18] sm:$0x1] %vm1345_vm1, %v1368_v25 }
 0x21d PF: > { %s23_s21 = sadd.s32 1, %s1738_s21  }
 0x21e   : > { %p20_p5 = scmp.ge.s32.totalorder %s23_s21, 6  }
 0x220   :  { %22 = sbr.rel (!%p20_p5) target bundleno = 1 (0x1), region = 117 }

// kernel: kan_conv_transformer.23
= control target key start
LH: loop header
LB: loop body
LE: loop exit
PB: predicated region body
PF: predicated region fallthrough
CT: control target
= control target key end

     0   :  { %10 = vsyncpa [#allocation5], 0  ;;  %s1591_s0 = inlined_call_operand.vmem [shape: f32[2,8,8,16], index: 0, kind: input, shape index: {}]   ;;  %s1592_s1 = inlined_call_operand.vmem [shape: f32[1,16], index: 1, kind: input, shape index: {}]   ;;  %s1593_s2 = inlined_call_operand.vmem [shape: f32[1,16], index: 2, kind: input, shape index: {}]   ;;  %s1594_s3 = inlined_call_operand.vmem [shape: bf16[144,16], index: 3, kind: input, shape index: {}]   ;;  %s1595_s4 = inlined_call_operand.vmem [shape: f32[1,16], index: 4, kind: input, shape index: {}]   ;;  %s1596_s5 = inlined_call_operand.hbm [shape: f32[2,8,8,16], index: 5, kind: output, shape index: {}]  }
   0x1   :  { %12 = vsyncpa [#allocation5 + $0x1], 0  ;;  %s1176_s18 = smov 0   ;;  %s1178_s19 = smov 0  }
   0x2   :  { %s1180_s20 = smov 0   ;;  %s1182_s21 = smov 0  }
   0x3 LB: > { %s1197_s22 = sadd.s32 4294967295, %s1132_s21   ;;  %s962_s23 = sadd.s32 4294967294, %s1132_s21   ;;  %s1132_s21 = sphi %s1182_s21, %s1602_s21   ;;  %s1128_s20 = sphi %s1180_s20, %s1601_s20   ;;  %s1124_s19 = sphi %s1178_s19, %s1600_s19   ;;  %s1120_s18 = sphi %s1176_s18, %s1599_s18  }
   0x4   : > { %s1201_s24 = sadd.s32 1, %s1132_s21   ;;  %s135_s25 = sadd.s32 1, %s1128_s20 }
   0x5   : > { %s132_s26 = ssub.s32 %s1132_s21, %s1201_s24  ;;  %p145_p0 = scmp.ne.s32.totalorder %s1128_s20, %s1124_s19 }
   0x6   : > { %p133_p1 = scmp.eq.s32.totalorder %s132_s26, 0  ;;  %p146_p2 = scmp.eq.s32.totalorder %s1197_s22, 1 }
   0x7   : > { %p151_p3 = scmp.ne.s32.totalorder %s1124_s19, %s1120_s18  ;;  %p152_p4 = scmp.eq.s32.totalorder %s962_s23, 1 }
   0x8   : > { %s1212_s27 = scalar_select %p133_p1, %s1128_s20, %s135_s25  }
   0x9   : > { %p1214_p5 = por %p146_p2, %p145_p0  ;;  %p1218_p6 = por %p152_p4, %p151_p3 }
   0xa   : > { %p965_p7 = scmp.ge.s32.totalorder %s1132_s21, 1  ;;  %p190_p8 = scmp.lt.s32.totalorder %s1132_s21, 3 }
   0xc   : > { %p191_p9 = pnand %p965_p7, %p190_p8 }
   0xd   : > { %s215_s30 = sand.u32 (!%p191_p9), 1, %s1124_s19   ;;  %p218_p10 = scmp.lt.s32.totalorder (!%p191_p9), %s1197_s22, 1 }
   0xe   : > { %194 = sbr.rel (%p191_p9) target bundleno = 514 (0x202), region = 40  ;;  %s966_s6 = sshll.u32 (!%p191_p9), %s215_s30, 6 }
   0xf   : > { %s1234_s12 = scalar_lea.vmem (!%p191_p9), [#allocation4], %s966_s6  ;;  %p969_p11 = scmp.ne.s32.totalorder (!%p191_p9), %s1197_s22, 0 }
  0x15   : > { %s219_s7 = scalar_select %p218_p10, %s1197_s22, 1 }
  0x16   : > { %227 = sbr.rel (%p969_p11) target bundleno = 33 (0x21), region = 44  ;;  %vm228_vm0 = vcmask (!%p969_p11), 130048   ;;  %vm230_vm1 = vcmask (!%p969_p11), 123904   ;;  %v1134_v0 = vmov (!%p969_p11), 0.0  }
  0x17   : > { %s991_s8 = sshll.u32 %s219_s7, 6  ;;  %229 = vst.msk [vmem:[#allocation2] sm:$0xff] (!%p969_p11), %vm228_vm0, %v1134_v0  ;;  %232 = vst.msk [vmem:[#allocation2 + $0x10] sm:$0xff] (!%p969_p11), %vm228_vm0, %v1134_v0 }
  0x18   : > { %s1232_s11 = scalar_lea.vmem %s1591_s0, %s991_s8  ;;  %234 = vst.msk [vmem:[#allocation2 + $0x20] sm:$0xff] (!%p969_p11), %vm228_vm0, %v1134_v0  ;;  %236 = vst.msk [vmem:[#allocation2 + $0x30] sm:$0xff] (!%p969_p11), %vm228_vm0, %v1134_v0 }
  0x19   : > { %238 = vst.msk [vmem:[#allocation2 + $0x40] sm:$0xff] (!%p969_p11), %vm228_vm0, %v1134_v0  ;;  %240 = vst.msk [vmem:[#allocation2 + $0x50] sm:$0xff] (!%p969_p11), %vm228_vm0, %v1134_v0 }
  0x1a   : > { %242 = vst.msk [vmem:[#allocation2 + $0x60] sm:$0xff] (!%p969_p11), %vm228_vm0, %v1134_v0  ;;  %244 = vst.msk [vmem:[#allocation2 + $0x70] sm:$0xff] (!%p969_p11), %vm228_vm0, %v1134_v0 }
  0x1b   : > { %246 = vst.msk [vmem:[#allocation2 + $0x80] sm:$0xff] (!%p969_p11), %vm228_vm0, %v1134_v0  ;;  %248 = vst.msk [vmem:[#allocation2 + $0x90] sm:$0xff] (!%p969_p11), %vm228_vm0, %v1134_v0 }
  0x1c   : > { %231 = vst.msk [vmem:[#allocation2 + $0x8] sm:$0x3] (!%p969_p11), %vm230_vm1, %v1134_v0  ;;  %233 = vst.msk [vmem:[#allocation2 + $0x18] sm:$0x3] (!%p969_p11), %vm230_vm1, %v1134_v0 }
  0x1d   : > { %235 = vst.msk [vmem:[#allocation2 + $0x28] sm:$0x3] %vm230_vm1, %v1134_v0  ;;  %237 = vst.msk [vmem:[#allocation2 + $0x38] sm:$0x3] %vm230_vm1, %v1134_v0 }
  0x1e   : > { %239 = vst.msk [vmem:[#allocation2 + $0x48] sm:$0x3] %vm230_vm1, %v1134_v0  ;;  %241 = vst.msk [vmem:[#allocation2 + $0x58] sm:$0x3] %vm230_vm1, %v1134_v0 }
  0x1f   : > { %243 = vst.msk [vmem:[#allocation2 + $0x68] sm:$0x3] %vm230_vm1, %v1134_v0  ;;  %245 = vst.msk [vmem:[#allocation2 + $0x78] sm:$0x3] %vm230_vm1, %v1134_v0 }
  0x20   : > { %247 = vst.msk [vmem:[#allocation2 + $0x88] sm:$0x3] %vm230_vm1, %v1134_v0  ;;  %249 = vst.msk [vmem:[#allocation2 + $0x98] sm:$0x3] %vm230_vm1, %v1134_v0 }
  0x21 PF: > { %v253_v2 = vld [vmem:[%s1232_s11 + $0x18] sm:$0xff]  ;;  %v970_v3 = vld [vmem:[%s1592_s1] ss:$0 sm:$0xff]  ;;  %s1135_s15 = smov 16   ;;  %vm289_vm2 = vcmask 130048   ;;  %v251_v10 = vld [vmem:[%s1232_s11 + $0x8] sm:$0xff] }
  0x22   : > { %v268_v4 = vmul.f32 %v970_v3, %v253_v2  ;;  %v971_v5 = vld [vmem:[%s1593_s2] ss:$0 sm:$0xff]  ;;  %v255_v11 = vld [vmem:[%s1232_s11 + $0x28] sm:$0xff]  ;;  %v266_v14 = vmul.f32 %v970_v3, %v251_v10  ;;  %v252_v16 = vld [vmem:[%s1232_s11 + $0x10] sm:$0xff]  ;;  %s1136_s23 = smov 32   ;;  %v1137_v49 = vmov 0  }
  0x23   : > { %v254_v7 = vld [vmem:[%s1232_s11 + $0x20] sm:$0xff]  ;;  %v270_v15 = vmul.f32 %v970_v3, %v255_v11  ;;  %v256_v17 = vld [vmem:[%s1232_s11 + $0x30] sm:$0xff]  ;;  %v257_v18 = vld [vmem:[%s1232_s11 + $0x38] sm:$0xff]  ;;  %v267_v20 = vmul.f32 %v970_v3, %v252_v16  ;;  %789 = vmatprep.subr.bf16.mxu0 %v1137_v49  ;;  %993 = vmatprep.subr.bf16.mxu1 %v1137_v49  ;;  %s1138_s6 = smov 48   ;;  %s1140_s25 = smov 80   ;;  %vm354_vm3 = vcmask 261248  }
  0x24   : > { %v269_v8 = vmul.f32 %v970_v3, %v254_v7  ;;  %v250_v9 = vld [vmem:[%s1232_s11] sm:$0xff]  ;;  %v283_v12 = vadd.f32 %v971_v5, %v268_v4  ;;  %v271_v21 = vmul.f32 %v970_v3, %v256_v17  ;;  %v272_v22 = vmul.f32 %v970_v3, %v257_v18  ;;  %v1062_v50 = vld [vmem:[%s1594_s3 + $0x8] sm:$0xff]   ;;  %v1063_v51 = vld [vmem:[%s1594_s3 + $0x10] sm:$0xff]   ;;  %s1139_s11 = smov 64   ;;  %s1141_s10 = smov 96  }
  0x25   : > { %v265_v13 = vmul.f32 %v970_v3, %v250_v9  ;;  %v298_v23 = vld [vmem:[#allocation2] sm:$0xff]  ;;  %v281_v25 = vadd.f32 %v971_v5, %v266_v14  ;;  %v285_v26 = vadd.f32 %v971_v5, %v270_v15  ;;  %v282_v27 = vadd.f32 %v971_v5, %v267_v20  ;;  %v1064_v52 = vld [vmem:[%s1594_s3 + $0x18] sm:$0xff]   ;;  %v1066_v56 = vld [vmem:[%s1594_s3 + $0x28] sm:$0xff]   ;;  %s1142_s26 = smov 112  }
  0x26   : > { %v284_v19 = vadd.f32 %v971_v5, %v269_v8  ;;  %293 = vst.msk [vmem:[#allocation2 + $0x41] sm:$0xff] %vm289_vm2, %v283_v12  ;;  %306 = vst.msk [vmem:[#allocation3] sm:$0xff] %vm289_vm2, %v298_v23  ;;  %v286_v28 = vadd.f32 %v971_v5, %v271_v21  ;;  %v287_v29 = vadd.f32 %v971_v5, %v272_v22  ;;  %v1061_v48 = vld [vmem:[%s1594_s3] sm:$0xff]   ;;  %v1067_v57 = vld [vmem:[%s1594_s3 + $0x30] sm:$0xff]   ;;  %vm403_vm4 = vcmask 392448  }
  0x27   : > { %v314_v1 = vld [vmem:[#allocation2 + $0x1] sm:$0xff]  ;;  %v280_v24 = vadd.f32 %v971_v5, %v265_v13  ;;  %291 = vst.msk [vmem:[#allocation2 + $0x21] sm:$0xff] %vm289_vm2, %v281_v25  ;;  %295 = vst.msk [vmem:[#allocation2 + $0x61] sm:$0xff] %vm289_vm2, %v285_v26  ;;  %790 = vmatpush1.bf16.msra.mxu0 %v1061_v48  ;;  %1002 = vmatpush1.bf16.msra.mxu1 %v1061_v48  ;;  %v1068_v58 = vld [vmem:[%s1594_s3 + $0x38] sm:$0xff]   ;;  %vm452_vm5 = vcmask 523648   ;;  %vm501_vm6 = vcmask 654848  }
  0x28   : > { %330 = vrot.lane.b32.xlu0 %v314_v1, %s1135_s15  ;;  %v363_v6 = vld [vmem:[#allocation2 + $0x2] sm:$0xff]  ;;  %294 = vst.msk [vmem:[#allocation2 + $0x51] sm:$0xff] %vm289_vm2, %v284_v19  ;;  %292 = vst.msk [vmem:[#allocation2 + $0x31] sm:$0xff] %vm289_vm2, %v282_v27  ;;  %791 = vmatprep.subr.bf16.mxu0 %v1137_v49  ;;  %v567_v7 = vld [vmem:[#allocation2 + $0x90] sm:$0xff]  ;;  %vm550_vm7 = vcmask 786048   ;;  %vm600_vm8 = vcmask 917248  }
  0x29   : > { %290 = vst.msk [vmem:[#allocation2 + $0x11] sm:$0xff] %vm289_vm2, %v280_v24  ;;  %296 = vst.msk [vmem:[#allocation2 + $0x71] sm:$0xff] %vm289_vm2, %v286_v28  ;;  %994 = vmatprep.subr.bf16.mxu1 %v1137_v49  ;;  %v1065_v54 = vld [vmem:[%s1594_s3 + $0x20] sm:$0xff]   ;;  %v616_v9 = vld [vmem:[#allocation2 + $0x91] sm:$0xff]  ;;  %vm649_vm9 = vcmask 1048448  }
  0x2a   : > { %297 = vst.msk [vmem:[#allocation2 + $0x81] sm:$0xff] %vm289_vm2, %v287_v29  ;;  %v1069_v59 = vld [vmem:[%s1594_s3 + $0x40] sm:$0xff]  }
  0x2b   : > { %792 = vmatpush1.bf16.msra.mxu0 %v1062_v50  ;;  %1003 = vmatpush1.bf16.msra.mxu1 %v1062_v50 }
  0x2c   : > { %379 = vrot.lane.b32.xlu0 %v363_v6, %s1136_s23  ;;  %793 = vmatprep.subr.bf16.mxu0 %v1137_v49  ;;  %v665_v6 = vld [vmem:[#allocation2 + $0x92] sm:$0xff] }
  0x2d   : > { %v1272_v30 = vld [vmem:[#allocation2 + $0x41] sm:$0xff]  ;;  %995 = vmatprep.subr.bf16.mxu1 %v1137_v49  ;;  %673 = vst.msk [vmem:[#allocation3 + $0x78] sm:$0xff] %vm289_vm2, %v665_v6 }
  0x2e   : > { %v1274_v31 = vld [vmem:[#allocation2 + $0x42] sm:$0xff]  ;;  %338 = vrot.lane.b32.xlu1 %v1272_v30, %s1135_s15 }
  0x2f   : > { %v1276_v32 = vld [vmem:[#allocation2 + $0x40] sm:$0xff]  ;;  %v1280_v33 = vld [vmem:[#allocation2 + $0x52] sm:$0xff]  ;;  %668 = vst.msk [vmem:[#allocation3 + $0x28] sm:$0xff] %vm289_vm2, %v1274_v31  ;;  %794 = vmatpush1.bf16.msra.mxu0 %v1063_v51  ;;  %1004 = vmatpush1.bf16.msra.mxu1 %v1063_v51 }
  0x30   : > { %v1282_v34 = vld [vmem:[#allocation2 + $0x50] sm:$0xff]  ;;  %310 = vst.msk [vmem:[#allocation3 + $0x40] sm:$0xff] %vm289_vm2, %v1276_v32  ;;  %v1290_v37 = vld [vmem:[#allocation2 + $0x20] sm:$0xff]  ;;  %669 = vst.msk [vmem:[#allocation3 + $0x38] sm:$0xff] %vm289_vm2, %v1280_v33  ;;  %795 = vmatprep.subr.bf16.mxu0 %v1137_v49  ;;  %996 = vmatprep.subr.bf16.mxu1 %v1137_v49 }
  0x31   : > { %v1288_v35 = vld [vmem:[#allocation2 + $0x51] sm:$0xff]  ;;  %311 = vst.msk [vmem:[#allocation3 + $0x50] sm:$0xff] %vm289_vm2, %v1282_v34  ;;  %v1297_v39 = vld [vmem:[#allocation2 + $0x60] sm:$0xff]  ;;  %308 = vst.msk [vmem:[#allocation3 + $0x20] sm:$0xff] %vm289_vm2, %v1290_v37 }
  0x32   : > { %v315_v36 = vld [vmem:[#allocation2 + $0x11] sm:$0xff]  ;;  %v1301_v40 = vld [vmem:[#allocation2 + $0x22] sm:$0xff]  ;;  %312 = vst.msk [vmem:[#allocation3 + $0x60] sm:$0xff] %vm289_vm2, %v1297_v39  ;;  %340 = vrot.lane.b32.xlu1 %v1288_v35, %s1135_s15 }
  0x33   : > { %332 = vrot.lane.b32.xlu0 %v315_v36, %s1135_s15  ;;  %v412_v38 = vld [vmem:[#allocation2 + $0x10] sm:$0xff]  ;;  %v1303_v41 = vld [vmem:[#allocation2 + $0x62] sm:$0xff]  ;;  %666 = vst.msk [vmem:[#allocation3 + $0x8] sm:$0xff] %vm289_vm2, %v1301_v40  ;;  %796 = vmatpush1.bf16.msra.mxu0 %v1064_v52 }
  0x34   : > { %307 = vst.msk [vmem:[#allocation3 + $0x10] sm:$0xff] %vm289_vm2, %v412_v38  ;;  %v1310_v42 = vld [vmem:[#allocation2 + $0x30] sm:$0xff]  ;;  %670 = vst.msk [vmem:[#allocation3 + $0x48] sm:$0xff] %vm289_vm2, %v1303_v41  ;;  %v1328_v47 = vld [vmem:[#allocation2 + $0x82] sm:$0xff]  ;;  %797 = vmatprep.subr.bf16.mxu0 %v1137_v49  ;;  %1005 = vmatpush1.bf16.msra.mxu1 %v1064_v52 }
  0x35   : > { %v1312_v43 = vld [vmem:[#allocation2 + $0x70] sm:$0xff]  ;;  %309 = vst.msk [vmem:[#allocation3 + $0x30] sm:$0xff] %vm289_vm2, %v1310_v42  ;;  %672 = vst.msk [vmem:[#allocation3 + $0x68] sm:$0xff] %vm289_vm2, %v1328_v47  ;;  %v462_v53 = vld [vmem:[#allocation2 + $0x21] sm:$0xff]  ;;  %997 = vmatprep.subr.bf16.mxu1 %v1137_v49 }
  0x36   : > { %v364_v44 = vld [vmem:[#allocation2 + $0x12] sm:$0xff]  ;;  %313 = vst.msk [vmem:[#allocation3 + $0x70] sm:$0xff] %vm289_vm2, %v1312_v43  ;;  %v466_v55 = vld [vmem:[#allocation2 + $0x61] sm:$0xff] }
  0x37   : > { %v1318_v45 = vld [vmem:[#allocation2 + $0x32] sm:$0xff]  ;;  %387 = vrot.lane.b32.xlu0 %v1274_v31, %s1136_s23  ;;  %381 = vrot.lane.b32.xlu1 %v364_v44, %s1136_s23  ;;  %v419_v4 = vld [vmem:[#allocation2 + $0x80] sm:$0xff] }
  0x38   : > { %v1320_v46 = vld [vmem:[#allocation2 + $0x72] sm:$0xff]  ;;  %667 = vst.msk [vmem:[#allocation3 + $0x18] sm:$0xff] %vm289_vm2, %v1318_v45  ;;  %798 = vmatpush1.bf16.msra.mxu0 %v1065_v54  ;;  %1006 = vmatpush1.bf16.msra.mxu1 %v1065_v54  ;;  %v468_v5 = vld [vmem:[#allocation2 + $0x81] sm:$0xff] }
  0x39   : > { %671 = vst.msk [vmem:[#allocation3 + $0x58] sm:$0xff] %vm289_vm2, %v1320_v46  ;;  %799 = vmatprep.subr.bf16.mxu0 %v1137_v49  ;;  %998 = vmatprep.subr.bf16.mxu1 %v1137_v49  ;;  %v610_v63 = vld [vmem:[#allocation2 + $0x31] sm:$0xff] }
  0x3a   : > { %v675_v60 = vld [vmem:[#allocation3 + $0x8] sm:$0xff]  ;;  %v614_v3 = vld [vmem:[#allocation2 + $0x71] sm:$0xff] }
  0x3b   : > { %428 = vrot.lane.b32.xlu0 %v412_v38, %s1138_s6  ;;  %389 = vrot.lane.b32.xlu1 %v1280_v33, %s1136_s23  ;;  %v683_v0 = vld [vmem:[#allocation3 + $0x48] sm:$0xff] }
  0x3c   : > { %800 = vmatpush1.bf16.msra.mxu0 %v1066_v56  ;;  %1007 = vmatpush1.bf16.msra.mxu1 %v1066_v56  ;;  %v679_v38 = vld [vmem:[#allocation3 + $0x28] sm:$0xff] }
  0x3d   : > { %801 = vmatprep.subr.bf16.mxu0 %v1137_v49  ;;  %999 = vmatprep.subr.bf16.mxu1 %v1137_v49 }
  0x3f   : > { %436 = vrot.lane.b32.xlu0 %v1282_v34, %s1138_s6  ;;  %430 = vrot.lane.b32.xlu1 %v1290_v37, %s1138_s6  ;;  %v677_v61 = vld [vmem:[#allocation3 + $0x18] sm:$0xff] }
  0x40   : > { %802 = vmatpush1.bf16.msra.mxu0 %v1067_v57  ;;  %1008 = vmatpush1.bf16.msra.mxu1 %v1067_v57  ;;  %v691_v62 = vpack.c.bf16 %v677_v61, %v675_v60  ;;  %v685_v1 = vld [vmem:[#allocation3 + $0x58] sm:$0xff] }
  0x41   : > { %803 = vmatprep.subr.bf16.mxu0 %v1137_v49  ;;  %1000 = vmatprep.subr.bf16.mxu1 %v1137_v49  ;;  %v695_v2 = vpack.c.bf16 %v685_v1, %v683_v0 }
  0x42   : > { %982 = vmatprep.mubr.msk.bf16.mxu0 %vm289_vm2, %v691_v62 }
  0x43   : > { %477 = vrot.lane.b32.xlu0 %v315_v36, %s1139_s11  ;;  %438 = vrot.lane.b32.xlu1 %v1297_v39, %s1138_s6 }
  0x44   : > { %804 = vmatpush1.bf16.msra.mxu0 %v1068_v58  ;;  %1009 = vmatpush1.bf16.msra.mxu1 %v1068_v58 }
  0x45   : > { %805 = vmatprep.subr.bf16.mxu0 %v1137_v49  ;;  %1001 = vmatprep.subr.bf16.mxu1 %v1137_v49 }
  0x46   : > { %984 = vmatprep.mubr.msk.bf16.mxu1 %vm289_vm2, %v695_v2 }
  0x47   : > { %485 = vrot.lane.b32.xlu0 %v1288_v35, %s1139_s11  ;;  %479 = vrot.lane.b32.xlu1 %v462_v53, %s1139_s11 }
  0x48   : > { %806 = vmatpush1.bf16.msra.mxu0 %v1069_v59  ;;  %1010 = vmatpush1.bf16.msra.mxu1 %v1069_v59 }
  0x4b   : > { %526 = vrot.lane.b32.xlu0 %v364_v44, %s1140_s25  ;;  %487 = vrot.lane.b32.xlu1 %v466_v55, %s1139_s11 }
  0x4f   : > { %534 = vrot.lane.b32.xlu0 %v1280_v33, %s1140_s25  ;;  %528 = vrot.lane.b32.xlu1 %v1301_v40, %s1140_s25 }
  0x53   : > { %576 = vrot.lane.b32.xlu0 %v1290_v37, %s1141_s10  ;;  %536 = vrot.lane.b32.xlu1 %v1303_v41, %s1140_s25 }
  0x57   : > { %584 = vrot.lane.b32.xlu0 %v1297_v39, %s1141_s10  ;;  %578 = vrot.lane.b32.xlu1 %v1310_v42, %s1141_s10  ;;  %v681_v39 = vld [vmem:[#allocation3 + $0x38] sm:$0xff] }
  0x58   : > { %v693_v44 = vpack.c.bf16 %v681_v39, %v679_v38 }
  0x5b   : > { %625 = vrot.lane.b32.xlu0 %v462_v53, %s1142_s26  ;;  %586 = vrot.lane.b32.xlu1 %v1312_v43, %s1141_s10 }
  0x5f   : > { %633 = vrot.lane.b32.xlu0 %v466_v55, %s1142_s26  ;;  %627 = vrot.lane.b32.xlu1 %v610_v63, %s1142_s26 }
  0x63   : > { %334 = vrot.lane.b32.xlu0 %v462_v53, %s1135_s15  ;;  %635 = vrot.lane.b32.xlu1 %v614_v3, %s1142_s26 }
  0x67   : > { %342 = vrot.lane.b32.xlu0 %v466_v55, %s1135_s15  ;;  %336 = vrot.lane.b32.xlu1 %v610_v63, %s1135_s15 }
  0x6b   : > { %383 = vrot.lane.b32.xlu0 %v1301_v40, %s1136_s23  ;;  %344 = vrot.lane.b32.xlu1 %v614_v3, %s1135_s15 }
  0x6f   : > { %391 = vrot.lane.b32.xlu0 %v1303_v41, %s1136_s23  ;;  %385 = vrot.lane.b32.xlu1 %v1318_v45, %s1136_s23 }
  0x73   : > { %432 = vrot.lane.b32.xlu0 %v1310_v42, %s1138_s6  ;;  %393 = vrot.lane.b32.xlu1 %v1320_v46, %s1136_s23 }
  0x77   : > { %440 = vrot.lane.b32.xlu0 %v1312_v43, %s1138_s6  ;;  %434 = vrot.lane.b32.xlu1 %v1276_v32, %s1138_s6 }
  0x7b   : > { %481 = vrot.lane.b32.xlu0 %v610_v63, %s1139_s11  ;;  %442 = vrot.lane.b32.xlu1 %v419_v4, %s1138_s6  ;;  %s992_s6 = sshll.u32 %s1197_s22, 10  ;;  %s1550_s22 = scalar_lea.sflag [#allocation5], %s215_s30 }
  0x7c   : > { %s1540_s8 = scalar_lea.hbm %s1596_s5, %s992_s6 }
  0x7f   : > { %489 = vrot.lane.b32.xlu0 %v614_v3, %s1139_s11  ;;  %483 = vrot.lane.b32.xlu1 %v1272_v30, %s1139_s11 }
  0x83   : > { %530 = vrot.lane.b32.xlu0 %v1318_v45, %s1140_s25  ;;  %491 = vrot.lane.b32.xlu1 %v468_v5, %s1139_s11  ;;  %s900_s11 = sshll.u32 %s1234_s12, 4  ;;  %s1542_s11 = int_to_ptr.vmem [resolvable:$true] %s900_s11 }
  0x84   : > { %s1070_s9 = scalar_lea.vmem %s1542_s11, 1024 }
  0x85   : > { %p1071_p12 = scmp.ne.s32.totalorder %s1542_s11, %s1070_s9 }
  0x87   : > { %538 = vrot.lane.b32.xlu0 %v1320_v46, %s1140_s25  ;;  %532 = vrot.lane.b32.xlu1 %v1274_v31, %s1140_s25  ;;  %v687_v46 = vld [vmem:[#allocation3 + $0x68] sm:$0xff]  ;;  %p1072_p13 = pnand %p1071_p12, %p1214_p5 }
  0x89   : > { %p1073_p0 = pneg %p1072_p13 }
  0x8b   : > { %580 = vrot.lane.b32.xlu0 %v1276_v32, %s1141_s10  ;;  %540 = vrot.lane.b32.xlu1 %v1328_v47, %s1140_s25  ;;  %v689_v47 = vld [vmem:[#allocation3 + $0x78] sm:$0xff] }
  0x8c   : > { %v697_v52 = vpack.c.bf16 %v689_v47, %v687_v46 }
  0x8f   : > { %588 = vrot.lane.b32.xlu0 %v419_v4, %s1141_s10  ;;  %582 = vrot.lane.b32.xlu1 %v1282_v34, %s1141_s10 }
  0x93   : > { %629 = vrot.lane.b32.xlu0 %v1272_v30, %s1142_s26  ;;  %590 = vrot.lane.b32.xlu1 %v567_v7, %s1141_s10  ;;  %s1143_s10 = smov [#allocation4]  }
  0x94   : > { %s1074_s13 = sshll.u32 %s1143_s10, 4  ;;  %s1075_s13 = int_to_ptr.vmem [resolvable:$false] %s1074_s13 }
  0x95   : > { %s1076_s14 = scalar_lea.vmem %s1075_s13, 2048  ;;  %p1077_p1 = scmp.lt.s32.totalorder %s1542_s11, %s1075_s13 }
  0x96   : > { %p1078_p2 = scmp.lt.s32.totalorder %s1076_s14, %s1070_s9 }
  0x97   : > { %637 = vrot.lane.b32.xlu0 %v468_v5, %s1142_s26  ;;  %631 = vrot.lane.b32.xlu1 %v1288_v35, %s1142_s26 }
  0x98   : > { %p1079_p3 = por %p1078_p2, %p1077_p1 }
  0x9a   : > { %v331_v8 = vpop.permute.xlu0 %330  ;;  %p1080_p4 = pnand %p1079_p3, %p1073_p0 }
  0x9b   : > { %355 = vst.msk [vmem:[#allocation3] sm:$0xff] %vm354_vm3, %v331_v8  ;;  %639 = vrot.lane.b32.xlu1 %v616_v9, %s1142_s26 }
  0x9e   : > { %v380_v10 = vpop.permute.xlu0 %379 }
  0x9f   : > { %404 = vst.msk [vmem:[#allocation3] sm:$0xff] %vm403_vm4, %v380_v10 }
  0xa0   : > { %v339_v11 = vpop.permute.xlu1 %338 }
  0xa1   : > { %359 = vst.msk [vmem:[#allocation3 + $0x40] sm:$0xff] %vm354_vm3, %v339_v11 }
  0xa4   : > { %v341_v13 = vpop.permute.xlu1 %340 }
  0xa5   : > { %v333_v12 = vpop.permute.xlu0 %332  ;;  %360 = vst.msk [vmem:[#allocation3 + $0x50] sm:$0xff] %vm354_vm3, %v341_v13 }
  0xa6   : > { %356 = vst.msk [vmem:[#allocation3 + $0x10] sm:$0xff] %vm354_vm3, %v333_v12 }
  0xa9   : > { %v388_v14 = vpop.permute.xlu0 %387  ;;  %v382_v15 = vpop.permute.xlu1 %381 }
  0xaa   : > { %408 = vst.msk [vmem:[#allocation3 + $0x40] sm:$0xff] %vm403_vm4, %v388_v14  ;;  %405 = vst.msk [vmem:[#allocation3 + $0x10] sm:$0xff] %vm403_vm4, %v382_v15 }
  0xad   : > { %v429_v16 = vpop.permute.xlu0 %428  ;;  %v390_v17 = vpop.permute.xlu1 %389 }
  0xae   : > { %453 = vst.msk [vmem:[#allocation3] sm:$0xff] %vm452_vm5, %v429_v16 }
  0xaf   : > { %409 = vst.msk [vmem:[#allocation3 + $0x50] sm:$0xff] %vm403_vm4, %v390_v17 }
  0xb1   : > { %v437_v18 = vpop.permute.xlu0 %436  ;;  %v431_v19 = vpop.permute.xlu1 %430 }
  0xb2   : > { %457 = vst.msk [vmem:[#allocation3 + $0x40] sm:$0xff] %vm452_vm5, %v437_v18  ;;  %454 = vst.msk [vmem:[#allocation3 + $0x10] sm:$0xff] %vm452_vm5, %v431_v19  ;;  %v972_v19 = vld [vmem:[%s1595_s4] ss:$0 sm:$0xff] }
  0xb5   : > { %v478_v20 = vpop.permute.xlu0 %477  ;;  %v439_v21 = vpop.permute.xlu1 %438 }
  0xb6   : > { %502 = vst.msk [vmem:[#allocation3] sm:$0xff] %vm501_vm6, %v478_v20 }
  0xb7   : > { %458 = vst.msk [vmem:[#allocation3 + $0x50] sm:$0xff] %vm452_vm5, %v439_v21 }
  0xb9   : > { %v486_v22 = vpop.permute.xlu0 %485  ;;  %v480_v23 = vpop.permute.xlu1 %479 }
  0xba   : > { %506 = vst.msk [vmem:[#allocation3 + $0x40] sm:$0xff] %vm501_vm6, %v486_v22  ;;  %503 = vst.msk [vmem:[#allocation3 + $0x10] sm:$0xff] %vm501_vm6, %v480_v23 }
  0xbd   : > { %v527_v24 = vpop.permute.xlu0 %526  ;;  %v488_v25 = vpop.permute.xlu1 %487 }
  0xbe   : > { %551 = vst.msk [vmem:[#allocation3] sm:$0xff] %vm550_vm7, %v527_v24 }
  0xbf   : > { %507 = vst.msk [vmem:[#allocation3 + $0x50] sm:$0xff] %vm501_vm6, %v488_v25 }
  0xc1   : > { %v535_v26 = vpop.permute.xlu0 %534  ;;  %v529_v27 = vpop.permute.xlu1 %528 }
  0xc2   : > { %555 = vst.msk [vmem:[#allocation3 + $0x40] sm:$0xff] %vm550_vm7, %v535_v26  ;;  %552 = vst.msk [vmem:[#allocation3 + $0x10] sm:$0xff] %vm550_vm7, %v529_v27 }
  0xc5   : > { %v577_v28 = vpop.permute.xlu0 %576  ;;  %v537_v29 = vpop.permute.xlu1 %536 }
  0xc6   : > { %601 = vst.msk [vmem:[#allocation3] sm:$0xff] %vm600_vm8, %v577_v28 }
  0xc7   : > { %556 = vst.msk [vmem:[#allocation3 + $0x50] sm:$0xff] %vm550_vm7, %v537_v29 }
  0xc9   : > { %v585_v30 = vpop.permute.xlu0 %584  ;;  %v579_v31 = vpop.permute.xlu1 %578 }
  0xca   : > { %605 = vst.msk [vmem:[#allocation3 + $0x40] sm:$0xff] %vm600_vm8, %v585_v30  ;;  %602 = vst.msk [vmem:[#allocation3 + $0x10] sm:$0xff] %vm600_vm8, %v579_v31 }
  0xcd   : > { %v626_v32 = vpop.permute.xlu0 %625  ;;  %v587_v33 = vpop.permute.xlu1 %586 }
  0xce   : > { %650 = vst.msk [vmem:[#allocation3] sm:$0xff] %vm649_vm9, %v626_v32 }
  0xcf   : > { %606 = vst.msk [vmem:[#allocation3 + $0x50] sm:$0xff] %vm600_vm8, %v587_v33 }
  0xd1   : > { %v634_v34 = vpop.permute.xlu0 %633  ;;  %v628_v35 = vpop.permute.xlu1 %627 }
  0xd2   : > { %654 = vst.msk [vmem:[#allocation3 + $0x40] sm:$0xff] %vm649_vm9, %v634_v34  ;;  %651 = vst.msk [vmem:[#allocation3 + $0x10] sm:$0xff] %vm649_vm9, %v628_v35 }
  0xd5   : > { %v335_v36 = vpop.permute.xlu0 %334  ;;  %v636_v37 = vpop.permute.xlu1 %635  ;;  %v674_v40 = vld [vmem:[#allocation3] sm:$0xff] }
  0xd6   : > { %357 = vst.msk [vmem:[#allocation3 + $0x20] sm:$0xff] %vm354_vm3, %v335_v36 }
  0xd7   : > { %655 = vst.msk [vmem:[#allocation3 + $0x50] sm:$0xff] %vm649_vm9, %v636_v37 }
  0xd9   : > { %v343_v41 = vpop.permute.xlu0 %342  ;;  %v337_v42 = vpop.permute.xlu1 %336  ;;  %v676_v43 = vld [vmem:[#allocation3 + $0x10] sm:$0xff]  ;;  %v682_v48 = vld [vmem:[#allocation3 + $0x40] sm:$0xff] }
  0xda   : > { %361 = vst.msk [vmem:[#allocation3 + $0x60] sm:$0xff] %vm354_vm3, %v343_v41  ;;  %358 = vst.msk [vmem:[#allocation3 + $0x30] sm:$0xff] %vm354_vm3, %v337_v42  ;;  %v690_v45 = vpack.c.bf16 %v676_v43, %v674_v40 }
  0xdc   : > { %822 = vmatmul.mubr.bf16.vlgmr.msra.gmra.mrb[0].mxu0 %v690_v45 }
  0xdd   : > { %v384_v49 = vpop.permute.xlu0 %383  ;;  %v345_v50 = vpop.permute.xlu1 %344  ;;  %983 = vmatprep.mubr.msk.bf16.mxu0 %vm289_vm2, %v693_v44 }
  0xde   : > { %406 = vst.msk [vmem:[#allocation3 + $0x20] sm:$0xff] %vm403_vm4, %v384_v49  ;;  %v684_v51 = vld [vmem:[#allocation3 + $0x50] sm:$0xff] }
  0xdf   : > { %362 = vst.msk [vmem:[#allocation3 + $0x70] sm:$0xff] %vm354_vm3, %v345_v50  ;;  %v694_v53 = vpack.c.bf16 %v684_v51, %v682_v48 }
  0xe1   : > { %v392_v54 = vpop.permute.xlu0 %391  ;;  %838 = vmatmul.mubr.bf16.vlgmr.msra.gmra.mrb[0].mxu1 %v694_v53  ;;  %v386_v55 = vpop.permute.xlu1 %385 }
  0xe2   : > { %410 = vst.msk [vmem:[#allocation3 + $0x60] sm:$0xff] %vm403_vm4, %v392_v54  ;;  %985 = vmatprep.mubr.msk.bf16.mxu1 %vm289_vm2, %v697_v52  ;;  %407 = vst.msk [vmem:[#allocation3 + $0x30] sm:$0xff] %vm403_vm4, %v386_v55 }
  0xe5   : > { %v433_v56 = vpop.permute.xlu0 %432  ;;  %v394_v57 = vpop.permute.xlu1 %393 }
  0xe6   : > { %455 = vst.msk [vmem:[#allocation3 + $0x20] sm:$0xff] %vm452_vm5, %v433_v56 }
  0xe7   : > { %411 = vst.msk [vmem:[#allocation3 + $0x70] sm:$0xff] %vm403_vm4, %v394_v57 }
  0xe9   : > { %v441_v58 = vpop.permute.xlu0 %440  ;;  %v435_v59 = vpop.permute.xlu1 %434 }
  0xea   : > { %459 = vst.msk [vmem:[#allocation3 + $0x60] sm:$0xff] %vm452_vm5, %v441_v58  ;;  %456 = vst.msk [vmem:[#allocation3 + $0x30] sm:$0xff] %vm452_vm5, %v435_v59 }
  0xed   : > { %v482_v60 = vpop.permute.xlu0 %481  ;;  %v443_v61 = vpop.permute.xlu1 %442 }
  0xee   : > { %504 = vst.msk [vmem:[#allocation3 + $0x20] sm:$0xff] %vm501_vm6, %v482_v60 }
  0xef   : > { %460 = vst.msk [vmem:[#allocation3 + $0x70] sm:$0xff] %vm452_vm5, %v443_v61 }
  0xf1   : > { %v490_v62 = vpop.permute.xlu0 %489  ;;  %v484_v63 = vpop.permute.xlu1 %483 }
  0xf2   : > { %508 = vst.msk [vmem:[#allocation3 + $0x60] sm:$0xff] %vm501_vm6, %v490_v62  ;;  %505 = vst.msk [vmem:[#allocation3 + $0x30] sm:$0xff] %vm501_vm6, %v484_v63 }
  0xf5   : > { %v531_v0 = vpop.permute.xlu0 %530  ;;  %v492_v1 = vpop.permute.xlu1 %491 }
  0xf6   : > { %553 = vst.msk [vmem:[#allocation3 + $0x20] sm:$0xff] %vm550_vm7, %v531_v0 }
  0xf7   : > { %509 = vst.msk [vmem:[#allocation3 + $0x70] sm:$0xff] %vm501_vm6, %v492_v1 }
  0xf9   : > { %v539_v2 = vpop.permute.xlu0 %538  ;;  %v533_v3 = vpop.permute.xlu1 %532 }
  0xfa   : > { %557 = vst.msk [vmem:[#allocation3 + $0x60] sm:$0xff] %vm550_vm7, %v539_v2  ;;  %554 = vst.msk [vmem:[#allocation3 + $0x30] sm:$0xff] %vm550_vm7, %v533_v3 }
  0xfd   : > { %v581_v4 = vpop.permute.xlu0 %580  ;;  %v541_v5 = vpop.permute.xlu1 %540 }
  0xfe   : > { %603 = vst.msk [vmem:[#allocation3 + $0x20] sm:$0xff] %vm600_vm8, %v581_v4 }
  0xff   : > { %558 = vst.msk [vmem:[#allocation3 + $0x70] sm:$0xff] %vm550_vm7, %v541_v5 }
 0x101   : > { %v589_v6 = vpop.permute.xlu0 %588  ;;  %v583_v7 = vpop.permute.xlu1 %582 }
 0x102   : > { %607 = vst.msk [vmem:[#allocation3 + $0x60] sm:$0xff] %vm600_vm8, %v589_v6  ;;  %604 = vst.msk [vmem:[#allocation3 + $0x30] sm:$0xff] %vm600_vm8, %v583_v7 }
 0x105   : > { %v630_v8 = vpop.permute.xlu0 %629  ;;  %v591_v9 = vpop.permute.xlu1 %590 }
 0x106   : > { %652 = vst.msk [vmem:[#allocation3 + $0x20] sm:$0xff] %vm649_vm9, %v630_v8 }
 0x107   : > { %608 = vst.msk [vmem:[#allocation3 + $0x70] sm:$0xff] %vm600_vm8, %v591_v9 }
 0x109   : > { %v638_v10 = vpop.permute.xlu0 %637  ;;  %v632_v11 = vpop.permute.xlu1 %631 }
 0x10a   : > { %656 = vst.msk [vmem:[#allocation3 + $0x60] sm:$0xff] %vm649_vm9, %v638_v10  ;;  %653 = vst.msk [vmem:[#allocation3 + $0x30] sm:$0xff] %vm649_vm9, %v632_v11 }
 0x10d   : > { %v640_v12 = vpop.permute.xlu1 %639  ;;  %v678_v13 = vld [vmem:[#allocation3 + $0x20] sm:$0xff] }
 0x10e   : > { %657 = vst.msk [vmem:[#allocation3 + $0x70] sm:$0xff] %vm649_vm9, %v640_v12 }
 0x111   : > { %v680_v14 = vld [vmem:[#allocation3 + $0x30] sm:$0xff]  ;;  %v686_v16 = vld [vmem:[#allocation3 + $0x60] sm:$0xff] }
 0x112   : > { %v692_v15 = vpack.c.bf16 %v680_v14, %v678_v13 }
 0x114   : > { %830 = vmatmul.mubr.bf16.gmra.mrb[4].mxu0 %v692_v15 }
 0x115   : > { %v688_v17 = vld [vmem:[#allocation3 + $0x70] sm:$0xff] }
 0x116   : > { %v696_v18 = vpack.c.bf16 %v688_v17, %v686_v16 }
 0x118   : > { %846 = vmatmul.mubr.bf16.gmra.mrb[4].mxu1 %v696_v18 }
 0x1af   : > { %v823_v20 = vpop.f32.mrb[0].mxu0 }
 0x1b0   : > { %v824_v21 = vadd.f32 %v972_v19, %v823_v20  ;;  %v825_v22 = vpop.f32.mrb[1].mxu0 }
 0x1b1   : > { %v826_v23 = vpop.f32.mrb[2].mxu0 }
 0x1b2   : > { %vm854_vm10 = vcmp.ge.f32.partialorder %v824_v21, 0.0  ;;  %v862_v24 = vmul.f32 0.2, %v824_v21  ;;  %v827_v25 = vadd.f32 %v972_v19, %v826_v23  ;;  %v828_v26 = vpop.f32.mrb[3].mxu0 }
 0x1b4   : > { %v839_v27 = vpop.f32.mrb[0].mxu1  ;;  %v870_v28 = vsel %vm854_vm10, %v824_v21, %v862_v24  ;;  %vm855_vm11 = vcmp.ge.f32.partialorder %v827_v25, 0.0  ;;  %v863_v29 = vmul.f32 0.2, %v827_v25 }
 0x1b5   : > { %v840_v30 = vadd.f32 %v972_v19, %v839_v27  ;;  %v841_v31 = vpop.f32.mrb[1].mxu1  ;;  %878 = vst.msk [vmem:[%s1234_s12] sm:$0xff] %vm289_vm2, %v870_v28 }
 0x1b6   : > { %v842_v32 = vpop.f32.mrb[2].mxu1  ;;  %v871_v33 = vsel %vm855_vm11, %v827_v25, %v863_v29 }
 0x1b7   : > { %vm858_vm12 = vcmp.ge.f32.partialorder %v840_v30, 0.0  ;;  %v866_v34 = vmul.f32 0.2, %v840_v30  ;;  %v843_v35 = vadd.f32 %v972_v19, %v842_v32  ;;  %v844_v36 = vpop.f32.mrb[3].mxu1  ;;  %879 = vst.msk [vmem:[%s1234_s12 + $0x8] sm:$0xff] %vm289_vm2, %v871_v33 }
 0x1b9   : > { %v874_v37 = vsel %vm858_vm12, %v840_v30, %v866_v34  ;;  %vm859_vm13 = vcmp.ge.f32.partialorder %v843_v35, 0.0  ;;  %v867_v38 = vmul.f32 0.2, %v843_v35 }
 0x1ba   : > { %882 = vst.msk [vmem:[%s1234_s12 + $0x20] sm:$0xff] %vm289_vm2, %v874_v37 }
 0x1bb   : > { %v875_v39 = vsel %vm859_vm13, %v843_v35, %v867_v38 }
 0x1bc   : > { %883 = vst.msk [vmem:[%s1234_s12 + $0x28] sm:$0xff] %vm289_vm2, %v875_v39 }
 0x1e7   : > { %v831_v40 = vpop.f32.mrb[4].mxu0 }
 0x1e8   : > { %v832_v41 = vadd.f32 %v972_v19, %v831_v40  ;;  %v833_v42 = vpop.f32.mrb[5].mxu0 }
 0x1e9   : > { %v834_v43 = vpop.f32.mrb[6].mxu0 }
 0x1ea   : > { %vm856_vm14 = vcmp.ge.f32.partialorder %v832_v41, 0.0  ;;  %v864_v44 = vmul.f32 0.2, %v832_v41  ;;  %v835_v45 = vadd.f32 %v972_v19, %v834_v43  ;;  %v836_v46 = vpop.f32.mrb[7].mxu0 }
 0x1eb   : > { %v847_v47 = vpop.f32.mrb[4].mxu1 }
 0x1ec   : > { %v872_v48 = vsel %vm856_vm14, %v832_v41, %v864_v44  ;;  %vm857_vm15 = vcmp.ge.f32.partialorder %v835_v45, 0.0  ;;  %v865_v49 = vmul.f32 0.2, %v835_v45  ;;  %v848_v50 = vadd.f32 %v972_v19, %v847_v47  ;;  %v849_v51 = vpop.f32.mrb[5].mxu1 }
 0x1ed   : > { %880 = vst.msk [vmem:[%s1234_s12 + $0x10] sm:$0xff] %vm289_vm2, %v872_v48  ;;  %v850_v52 = vpop.f32.mrb[6].mxu1 }
 0x1ee   : > { %v873_v53 = vsel %vm857_vm15, %v835_v45, %v865_v49  ;;  %vm860_vm0 = vcmp.ge.f32.partialorder %v848_v50, 0.0  ;;  %v868_v54 = vmul.f32 0.2, %v848_v50  ;;  %v851_v55 = vadd.f32 %v972_v19, %v850_v52  ;;  %v852_v56 = vpop.f32.mrb[7].mxu1 }
 0x1ef   : > { %881 = vst.msk [vmem:[%s1234_s12 + $0x18] sm:$0xff] %vm289_vm2, %v873_v53 }
 0x1f0   : > { %v876_v57 = vsel %vm860_vm0, %v848_v50, %v868_v54  ;;  %vm861_vm1 = vcmp.ge.f32.partialorder %v851_v55, 0.0  ;;  %v869_v58 = vmul.f32 0.2, %v851_v55 }
 0x1f1   : > { %884 = vst.msk [vmem:[%s1234_s12 + $0x30] sm:$0xff] %vm289_vm2, %v876_v57 }
 0x1f2   : > { %v877_v59 = vsel %vm861_vm1, %v851_v55, %v869_v58 }
 0x1f3   : > { %885 = vst.msk [vmem:[%s1234_s12 + $0x38] sm:$0xff] %vm289_vm2, %v877_v59 }
 0x1f4   : > { %1083 = shalt.err (!%p1080_p4)
}
 0x1f5   : > { %s1084_s30 = scalar_lea.hbm %s1540_s8, 1024  ;;  %s1088_s17 = scalar_lea.hbm %s1596_s5, 2048 }
 0x1f6   : > { %p1085_p7 = scmp.ne.s32.totalorder %s1540_s8, %s1084_s30  ;;  %p1089_p10 = scmp.lt.u32.totalorder %s1540_s8, %s1596_s5 }
 0x1f7   : > { %p1090_p11 = scmp.lt.u32.totalorder %s1088_s17, %s1084_s30  ;;  %p1092_p13 = scmp.lt.u32.totalorder %s1084_s30, %s1540_s8 }
 0x1f8   : > { %p1086_p8 = pnand %p1085_p7, %p1214_p5 }
 0x1f9   : > { %p1091_p12 = por %p1090_p11, %p1089_p10 }
 0x1fa   : > { %p1087_p9 = pneg %p1086_p8 }
 0x1fb   : > { %p1093_p0 = por %p1092_p13, %p1091_p12 }
 0x1fd   : > { %p1094_p1 = pnand %p1093_p0, %p1087_p9 }
 0x1ff   : > { %1097 = shalt.err (!%p1094_p1)
}
 0x200   : > { %s1144_s23 = smov 128   ;;  %s1145_s6 = smov 8  }
 0x201   : > { %1011 = dma.vmem_to_hbm [thread:$0]  (%p1214_p5), %s1542_s11, 1024, %s1540_s8, %s1550_s22, %s1144_s23, %s1144_s23, %s1145_s6  }
 0x202 PF: > { %p1017_p2 = scmp.ge.s32.totalorder %s1132_s21, 2  ;;  %s915_s25 = sand.u32 1, %s1120_s18  }
 0x203   : > { %s916_s7 = scalar_lea.sflag [#allocation5], %s915_s25 }
 0x204   : > { %p1014_p3 = pnand %p1017_p2, %p1218_p6 }
 0x206   : > { %1115 = dma.done.wait (!%p1014_p3), %s916_s7, 1024  }
 0x207   : > { %1117 = vsyncadd (!%p1014_p3), %s916_s7, 4294966272  ;;  %p15_p4 = scmp.ge.s32.totalorder %s1201_s24, 4   ;;  %s1599_s18 = smov %s1124_s19 }
 0x208   : > { %s1600_s19 = smov %s1128_s20  ;;  %s1601_s20 = smov %s1212_s27 }
 0x209   : > { %s1602_s21 = smov %s1201_s24  ;;  %17 = sbr.rel (!%p15_p4) target bundleno = 3 (0x3), region = 81 }
 0x210   :  { %921 = vsyncpa [#allocation5], 1 }
 0x211   :  { %923 = vsyncpa [#allocation5 + $0x1], 1 }

</bundles_post_ra>
